<compile_context>
chip_gen: v5e
topology: v5e:2x2
jax: 0.10.0
libtpu: 0.0.40
codegen_flags: <defaults>
</compile_context>

<pallas_src>
import jax
import jax.numpy as jnp
from jax.experimental import pallas as pl
from jax.experimental.pallas import tpu as pltpu

_HI = jax.lax.Precision.HIGHEST


def make_attention1d_kernel(batch_tile: int, heads: int, dim_head: int, has_mask: bool):
    hidden = heads * dim_head

    def kernel(x_ref, wqkvT_ref, wout_ref, bout_ref, *rest):
        # x_ref:     (Bt, C, N)       NCW input block (channels on sublanes, seq on lanes)
        # wqkvT_ref: (C, 3*hidden)    lane-dense QKV weight, q columns pre-scaled by dh**-0.5
        # wout_ref:  (C, hidden)      output-projection weight (lane-dense, K=hidden)
        # bout_ref:  (C, 1)           output-projection bias
        # mask_ref:  (N, N)           additive mask (only in the masked variant)
        # o_ref:     (Bt, C, N)       NCW output block
        # qkv_sc:    VMEM (3*hidden, N) scratch;  out_sc: VMEM (hidden, N) scratch
        if has_mask:
            mask_ref, o_ref, qkv_sc, out_sc = rest
        else:
            mask_ref = None
            o_ref, qkv_sc, out_sc = rest

        @pl.loop(0, batch_tile)
        def _(b):
            xb = x_ref[b]                                                    # (C, N)
            # 1x1 conv == matmul over channels; contract dim 0 of both operands
            # (transposed-LHS MXU feed, no relayout of the lane-dense weight).
            qkv_sc[...] = jax.lax.dot_general(
                wqkvT_ref[...], xb, (((0,), (0,)), ((), ())),
                preferred_element_type=jnp.float32, precision=_HI)           # (3*hidden, N)

            # Per-head attention; q/k/v are static sublane slices of the scratch, loaded JIT.
            for h in range(heads):
                lo = h * dim_head
                qT = qkv_sc[lo:lo + dim_head, :]                             # (dh, N)
                kT = qkv_sc[hidden + lo:hidden + lo + dim_head, :]           # (dh, N)
                vT = qkv_sc[2 * hidden + lo:2 * hidden + lo + dim_head, :]   # (dh, N)

                # sim[i, j] = sum_d q[d, i] * k[d, j]  (q scale folded into the weight)
                sim = jax.lax.dot_general(
                    qT, kT, (((0,), (0,)), ((), ())),
                    preferred_element_type=jnp.float32, precision=_HI)       # (N, N)

                m = jnp.max(sim, axis=-1, keepdims=True)
                e = jnp.exp(sim - m)
                s = jnp.sum(e, axis=-1, keepdims=True)
                attn = e / s                                                 # exact softmax
                if has_mask:
                    attn = attn + mask_ref[...]       # added AFTER softmax (module quirk)

                # outT[d, i] = sum_j v[d, j] * attn[i, j]
                outT = jax.lax.dot_general(
                    vT, attn, (((1,), (1,)), ((), ())),
                    preferred_element_type=jnp.float32, precision=_HI)       # (dh, N)
                out_sc[lo:lo + dim_head, :] = outT

            # Fused output projection: one K=hidden matmul per sequence.
            y = jnp.dot(wout_ref[...], out_sc[...],
                        preferred_element_type=jnp.float32, precision=_HI)   # (C, N)
            o_ref[b] = y + bout_ref[...]                                     # lane-dense store

    return kernel


def attention1d_pallas(x_ncw, wqkv, wout, bout, heads=4, dim_head=32,
                       attn_mask=None, batch_tile=None):
    """x_ncw: (B, dim, N) float32 — same NCW layout as the PyTorch module."""
    B, C, N = x_ncw.shape
    hidden = heads * dim_head
    assert wqkv.shape == (3 * hidden, C)
    assert wout.shape == (C, hidden)
    assert N % 128 == 0 and C % 8 == 0

    if batch_tile is None:
        # Keep the grid length a multiple of 2 when possible (v7x has 2 TensorCores).
        batch_tile = B // 2 if (B % 2 == 0 and B >= 2) else 1
    if B % batch_tile != 0:
        batch_tile = 1

    scale = dim_head ** (-0.5)
    # Fold the q scale into the weight rows, THEN transpose to the lane-dense (C, 3*hidden).
    wqkv_t = (wqkv.at[:hidden].multiply(scale)).T                  # (C, 3*hidden)
    bout2d = bout.reshape(C, 1)

    has_mask = attn_mask is not None
    kernel = make_attention1d_kernel(batch_tile, heads, dim_head, has_mask)

    in_specs = [
        pl.BlockSpec((batch_tile, C, N), lambda i: (i, 0, 0)),     # x (NCW, lane-dense)
        pl.BlockSpec((C, 3 * hidden), lambda i: (0, 0)),           # Wqkv^T (q cols pre-scaled)
        pl.BlockSpec((C, hidden), lambda i: (0, 0)),               # Wout (C, hidden)
        pl.BlockSpec((C, 1), lambda i: (0, 0)),                    # bout
    ]
    operands = [x_ncw, wqkv_t, wout, bout2d]
    if has_mask:
        in_specs.append(pl.BlockSpec((N, N), lambda i: (0, 0)))    # additive mask
        operands.append(attn_mask.astype(jnp.float32))

    flops = B * (2 * C * 3 * hidden * N                            # QKV projection
                 + heads * (2 * dim_head * N * N) * 2              # sim + PV
                 + 2 * C * hidden * N)                             # output projection
    transcendentals = B * heads * N * N                            # exp
    bytes_accessed = 4 * (2 * B * C * N + C * 3 * hidden + C * hidden + C
                          + (N * N if has_mask else 0))

    return pl.pallas_call(
        kernel,
        out_shape=jax.ShapeDtypeStruct((B, C, N), jnp.float32),
        grid_spec=pltpu.PrefetchScalarGridSpec(
            num_scalar_prefetch=0,
            grid=(B // batch_tile,),
            in_specs=in_specs,
            out_specs=pl.BlockSpec((batch_tile, C, N), lambda i: (i, 0, 0)),
            scratch_shapes=[pltpu.VMEM((3 * hidden, N), jnp.float32),   # staged QKV
                            pltpu.VMEM((hidden, N), jnp.float32)],      # per-head outputs
        ),
        compiler_params=pltpu.CompilerParams(dimension_semantics=("parallel",)),
        cost_estimate=pl.CostEstimate(flops=flops, transcendentals=transcendentals,
                                      bytes_accessed=bytes_accessed),
    )(*operands)


# ----------------------- pure-JAX reference (mirrors the torch module) -----------------------
def attention1d_reference(x, wqkv, wout, bout, heads, dim_head, attn_mask=None):
    B, C, N = x.shape
    hidden = heads * dim_head
    scale = dim_head ** (-0.5)

    qkv = jnp.einsum("oc,bcn->bon", wqkv, x, precision=_HI)       # Conv1d(dim, 3*hidden, 1, bias=False)
    q, k, v = jnp.split(qkv, 3, axis=1)
    q = q.reshape(B, heads, dim_head, N) * scale                  # 'b (h c) n -> b h c n'
    k = k.reshape(B, heads, dim_head, N)
    v = v.reshape(B, heads, dim_head, N)
    sim = jnp.einsum("bhdi,bhdj->bhij", q, k, precision=_HI)
    attn = jax.nn.softmax(sim, axis=-1)
    if attn_mask is not None:
        attn = attn + attn_mask                                   # added AFTER softmax, as in the module
    out = jnp.einsum("bhij,bhdj->bhid", attn, v, precision=_HI)   # (B, h, N, dh)
    out = jnp.transpose(out, (0, 1, 3, 2)).reshape(B, hidden, N)  # 'b h n d -> b (h d) n'
    return jnp.einsum("ch,bhn->bcn", wout, out, precision=_HI) + bout[None, :, None]


if __name__ == "__main__":
    B = 4
    dim = 32
    N = 128                       # seq length (128 -> lane-dense loads/stores)
    heads = 4                     # Attention1D defaults
    dim_head = 32
    hidden = heads * dim_head

    key = jax.random.PRNGKey(0)
    k0, k1, k2, k3 = jax.random.split(key, 4)
    x = jax.random.normal(k0, (B, dim, N), jnp.float32)
    wqkv = 0.2 * jax.random.normal(k1, (3 * hidden, dim), jnp.float32)
    wout = 0.2 * jax.random.normal(k2, (dim, hidden), jnp.float32)
    bout = 0.1 * jax.random.normal(k3, (dim,), jnp.float32)

    ATOL = RTOL = 2e-3

    # --- path 1: attn_mask=None -> full output is checkable ------------------------------------
    y = attention1d_pallas(x, wqkv, wout, bout, heads, dim_head, attn_mask=None)
    y = jax.block_until_ready(y)
    y_ref = attention1d_reference(x, wqkv, wout, bout, heads, dim_head, None)
    err_nomask = float(jnp.max(jnp.abs(y - y_ref)))
    ok_nomask = bool(jnp.allclose(y, y_ref, atol=ATOL, rtol=RTOL))

    # --- path 2: causal mask added AFTER softmax (module quirk) --------------------------------
    # Only the last sequence position stays finite; verify that position against the reference.
    idx = jnp.arange(N)
    causal = jnp.where(idx[None, :] > idx[:, None], -jnp.inf, 0.0).astype(jnp.float32)
    ym = attention1d_pallas(x, wqkv, wout, bout, heads, dim_head, attn_mask=causal)
    ym = jax.block_until_ready(ym)
    ym_ref = attention1d_reference(x, wqkv, wout, bout, heads, dim_head, causal)
    err_mask = float(jnp.max(jnp.abs(ym[:, :, -1] - ym_ref[:, :, -1])))
    ok_mask = bool(jnp.allclose(ym[:, :, -1], ym_ref[:, :, -1], atol=ATOL, rtol=RTOL))
    ok_mask = ok_mask and bool(jnp.all(jnp.isfinite(ym[:, :, -1])))

    if ok_nomask and ok_mask:
        print("KERNEL_OK")
    else:
        raise SystemExit(
            f"mismatch vs reference (no-mask max err={err_nomask:.3e}, "
            f"masked last-pos max err={err_mask:.3e})")
</pallas_src>

<mosaic_0001>
module attributes {stable_mosaic.version = 11 : i64} {
  func.func @kernel(%arg0: i32, %arg1: memref<2x32x128xf32, #tpu.memory_space<vmem>>, %arg2: memref<32x384xf32, #tpu.memory_space<vmem>>, %arg3: memref<32x128xf32, #tpu.memory_space<vmem>>, %arg4: memref<32x1xf32, #tpu.memory_space<vmem>>, %arg5: memref<2x32x128xf32, #tpu.memory_space<vmem>>, %arg6: memref<384x128xf32, #tpu.memory_space<vmem>>, %arg7: memref<128x128xf32, #tpu.memory_space<vmem>>) attributes {dimension_semantics = [#tpu.dimension_semantics<parallel>], iteration_bounds = array<i64: 2>, scalar_prefetch = 0 : i64, scratch_operands = 2 : i64, tpu.core_type = #tpu.core_type<tc>, window_params = [{transform_indices = @transform_0, window_bounds = array<i64: 2, 32, 128>}, {pipeline_mode = #tpu.pipeline_mode<synchronous>, transform_indices = @transform_1, window_bounds = array<i64: 32, 384>}, {pipeline_mode = #tpu.pipeline_mode<synchronous>, transform_indices = @transform_2, window_bounds = array<i64: 32, 128>}, {pipeline_mode = #tpu.pipeline_mode<synchronous>, transform_indices = @transform_3, window_bounds = array<i64: 32, 1>}, {transform_indices = @transform_4, window_bounds = array<i64: 2, 32, 128>}]} {
    %c0_i32 = arith.constant 0 : i32
    %c2_i32 = arith.constant 2 : i32
    %0 = arith.addi %c0_i32, %c2_i32 : i32
    %c1_i32 = arith.constant 1 : i32
    scf.for %arg8 = %c0_i32 to %0 step %c1_i32  : i32 {
      %c1_i32_1 = arith.constant 1 : i32
      %1 = arith.muli %arg8, %c1_i32_1 : i32
      %c0_i32_2 = arith.constant 0 : i32
      %2 = arith.addi %c0_i32_2, %1 : i32
      %3 = arith.index_cast %2 : i32 to index
      %c0 = arith.constant 0 : index
      %c0_3 = arith.constant 0 : index
      %4 = vector.load %arg1[%3, %c0, %c0_3] : memref<2x32x128xf32, #tpu.memory_space<vmem>>, vector<1x32x128xf32>
      %5 = vector.shape_cast %4 : vector<1x32x128xf32> to vector<32x128xf32>
      %c0_4 = arith.constant 0 : index
      %c0_5 = arith.constant 0 : index
      %6 = vector.load %arg2[%c0_4, %c0_5] : memref<32x384xf32, #tpu.memory_space<vmem>>, vector<32x384xf32>
      %cst = arith.constant dense<0.000000e+00> : vector<384x128xf32>
      %7 = tpu.matmul %6, %5, %cst {dimension_numbers = #tpu.dot_dimension_numbers<[0], [0], [1], [1], [0, 1, 1, 1], [], []>, precision = #tpu.contract_precision<fp32>} : vector<32x384xf32>, vector<32x128xf32>, vector<384x128xf32> -> vector<384x128xf32>
      %c0_6 = arith.constant 0 : index
      %c0_7 = arith.constant 0 : index
      %8 = vector.load %arg6[%c0_6, %c0_7] : memref<384x128xf32, #tpu.memory_space<vmem>>, vector<384x128xf32>
      tpu.vector_store %arg6[%c0_6, %c0_7], %7 {strides = array<i32>} : memref<384x128xf32, #tpu.memory_space<vmem>>, vector<384x128xf32>,
      %c0_8 = arith.constant 0 : index
      %c0_9 = arith.constant 0 : index
      %9 = vector.load %arg6[%c0_8, %c0_9] : memref<384x128xf32, #tpu.memory_space<vmem>>, vector<32x128xf32>
      %c128 = arith.constant 128 : index
      %c0_10 = arith.constant 0 : index
      %10 = vector.load %arg6[%c128, %c0_10] : memref<384x128xf32, #tpu.memory_space<vmem>>, vector<32x128xf32>
      %c256 = arith.constant 256 : index
      %c0_11 = arith.constant 0 : index
      %11 = vector.load %arg6[%c256, %c0_11] : memref<384x128xf32, #tpu.memory_space<vmem>>, vector<32x128xf32>
      %cst_12 = arith.constant dense<0.000000e+00> : vector<128x128xf32>
      %12 = tpu.matmul %9, %10, %cst_12 {dimension_numbers = #tpu.dot_dimension_numbers<[0], [0], [1], [1], [0, 1, 1, 1], [], []>, precision = #tpu.contract_precision<fp32>} : vector<32x128xf32>, vector<32x128xf32>, vector<128x128xf32> -> vector<128x128xf32>
      %cst_13 = arith.constant dense<0xFF800000> : vector<128xf32>
      %13 = vector.multi_reduction <maximumf>, %12, %cst_13 [1] : vector<128x128xf32> to vector<128xf32>
      %14 = vector.shape_cast %13 : vector<128xf32> to vector<128x1xf32>
      %15 = vector.broadcast %14 : vector<128x1xf32> to vector<128x128xf32>
      %16 = arith.subf %12, %15 : vector<128x128xf32>
      %17 = math.exp %16 : vector<128x128xf32>
      %cst_14 = arith.constant dense<0.000000e+00> : vector<128xf32>
      %18 = vector.multi_reduction <add>, %17, %cst_14 [1] : vector<128x128xf32> to vector<128xf32>
      %19 = vector.shape_cast %18 : vector<128xf32> to vector<128x1xf32>
      %20 = vector.broadcast %19 : vector<128x1xf32> to vector<128x128xf32>
      %21 = arith.divf %17, %20 : vector<128x128xf32>
      %cst_15 = arith.constant dense<0.000000e+00> : vector<32x128xf32>
      %22 = tpu.matmul %11, %21, %cst_15 {dimension_numbers = #tpu.dot_dimension_numbers<[1], [1], [0], [0], [0, 0, 1, 0], [], []>, precision = #tpu.contract_precision<fp32>} : vector<32x128xf32>, vector<128x128xf32>, vector<32x128xf32> -> vector<32x128xf32>
      %c0_16 = arith.constant 0 : index
      %c0_17 = arith.constant 0 : index
      %23 = vector.load %arg7[%c0_16, %c0_17] : memref<128x128xf32, #tpu.memory_space<vmem>>, vector<32x128xf32>
      tpu.vector_store %arg7[%c0_16, %c0_17], %22 {strides = array<i32>} : memref<128x128xf32, #tpu.memory_space<vmem>>, vector<32x128xf32>,
      %c32 = arith.constant 32 : index
      %c0_18 = arith.constant 0 : index
      %24 = vector.load %arg6[%c32, %c0_18] : memref<384x128xf32, #tpu.memory_space<vmem>>, vector<32x128xf32>
      %c160 = arith.constant 160 : index
      %c0_19 = arith.constant 0 : index
      %25 = vector.load %arg6[%c160, %c0_19] : memref<384x128xf32, #tpu.memory_space<vmem>>, vector<32x128xf32>
      %c288 = arith.constant 288 : index
      %c0_20 = arith.constant 0 : index
      %26 = vector.load %arg6[%c288, %c0_20] : memref<384x128xf32, #tpu.memory_space<vmem>>, vector<32x128xf32>
      %cst_21 = arith.constant dense<0.000000e+00> : vector<128x128xf32>
      %27 = tpu.matmul %24, %25, %cst_21 {dimension_numbers = #tpu.dot_dimension_numbers<[0], [0], [1], [1], [0, 1, 1, 1], [], []>, precision = #tpu.contract_precision<fp32>} : vector<32x128xf32>, vector<32x128xf32>, vector<128x128xf32> -> vector<128x128xf32>
      %cst_22 = arith.constant dense<0xFF800000> : vector<128xf32>
      %28 = vector.multi_reduction <maximumf>, %27, %cst_22 [1] : vector<128x128xf32> to vector<128xf32>
      %29 = vector.shape_cast %28 : vector<128xf32> to vector<128x1xf32>
      %30 = vector.broadcast %29 : vector<128x1xf32> to vector<128x128xf32>
      %31 = arith.subf %27, %30 : vector<128x128xf32>
      %32 = math.exp %31 : vector<128x128xf32>
      %cst_23 = arith.constant dense<0.000000e+00> : vector<128xf32>
      %33 = vector.multi_reduction <add>, %32, %cst_23 [1] : vector<128x128xf32> to vector<128xf32>
      %34 = vector.shape_cast %33 : vector<128xf32> to vector<128x1xf32>
      %35 = vector.broadcast %34 : vector<128x1xf32> to vector<128x128xf32>
      %36 = arith.divf %32, %35 : vector<128x128xf32>
      %cst_24 = arith.constant dense<0.000000e+00> : vector<32x128xf32>
      %37 = tpu.matmul %26, %36, %cst_24 {dimension_numbers = #tpu.dot_dimension_numbers<[1], [1], [0], [0], [0, 0, 1, 0], [], []>, precision = #tpu.contract_precision<fp32>} : vector<32x128xf32>, vector<128x128xf32>, vector<32x128xf32> -> vector<32x128xf32>
      %c32_25 = arith.constant 32 : index
      %c0_26 = arith.constant 0 : index
      %38 = vector.load %arg7[%c32_25, %c0_26] : memref<128x128xf32, #tpu.memory_space<vmem>>, vector<32x128xf32>
      tpu.vector_store %arg7[%c32_25, %c0_26], %37 {strides = array<i32>} : memref<128x128xf32, #tpu.memory_space<vmem>>, vector<32x128xf32>,
      %c64 = arith.constant 64 : index
      %c0_27 = arith.constant 0 : index
      %39 = vector.load %arg6[%c64, %c0_27] : memref<384x128xf32, #tpu.memory_space<vmem>>, vector<32x128xf32>
      %c192 = arith.constant 192 : index
      %c0_28 = arith.constant 0 : index
      %40 = vector.load %arg6[%c192, %c0_28] : memref<384x128xf32, #tpu.memory_space<vmem>>, vector<32x128xf32>
      %c320 = arith.constant 320 : index
      %c0_29 = arith.constant 0 : index
      %41 = vector.load %arg6[%c320, %c0_29] : memref<384x128xf32, #tpu.memory_space<vmem>>, vector<32x128xf32>
      %cst_30 = arith.constant dense<0.000000e+00> : vector<128x128xf32>
      %42 = tpu.matmul %39, %40, %cst_30 {dimension_numbers = #tpu.dot_dimension_numbers<[0], [0], [1], [1], [0, 1, 1, 1], [], []>, precision = #tpu.contract_precision<fp32>} : vector<32x128xf32>, vector<32x128xf32>, vector<128x128xf32> -> vector<128x128xf32>
      %cst_31 = arith.constant dense<0xFF800000> : vector<128xf32>
      %43 = vector.multi_reduction <maximumf>, %42, %cst_31 [1] : vector<128x128xf32> to vector<128xf32>
      %44 = vector.shape_cast %43 : vector<128xf32> to vector<128x1xf32>
      %45 = vector.broadcast %44 : vector<128x1xf32> to vector<128x128xf32>
      %46 = arith.subf %42, %45 : vector<128x128xf32>
      %47 = math.exp %46 : vector<128x128xf32>
      %cst_32 = arith.constant dense<0.000000e+00> : vector<128xf32>
      %48 = vector.multi_reduction <add>, %47, %cst_32 [1] : vector<128x128xf32> to vector<128xf32>
      %49 = vector.shape_cast %48 : vector<128xf32> to vector<128x1xf32>
      %50 = vector.broadcast %49 : vector<128x1xf32> to vector<128x128xf32>
      %51 = arith.divf %47, %50 : vector<128x128xf32>
      %cst_33 = arith.constant dense<0.000000e+00> : vector<32x128xf32>
      %52 = tpu.matmul %41, %51, %cst_33 {dimension_numbers = #tpu.dot_dimension_numbers<[1], [1], [0], [0], [0, 0, 1, 0], [], []>, precision = #tpu.contract_precision<fp32>} : vector<32x128xf32>, vector<128x128xf32>, vector<32x128xf32> -> vector<32x128xf32>
      %c64_34 = arith.constant 64 : index
      %c0_35 = arith.constant 0 : index
      %53 = vector.load %arg7[%c64_34, %c0_35] : memref<128x128xf32, #tpu.memory_space<vmem>>, vector<32x128xf32>
      tpu.vector_store %arg7[%c64_34, %c0_35], %52 {strides = array<i32>} : memref<128x128xf32, #tpu.memory_space<vmem>>, vector<32x128xf32>,
      %c96 = arith.constant 96 : index
      %c0_36 = arith.constant 0 : index
      %54 = vector.load %arg6[%c96, %c0_36] : memref<384x128xf32, #tpu.memory_space<vmem>>, vector<32x128xf32>
      %c224 = arith.constant 224 : index
      %c0_37 = arith.constant 0 : index
      %55 = vector.load %arg6[%c224, %c0_37] : memref<384x128xf32, #tpu.memory_space<vmem>>, vector<32x128xf32>
      %c352 = arith.constant 352 : index
      %c0_38 = arith.constant 0 : index
      %56 = vector.load %arg6[%c352, %c0_38] : memref<384x128xf32, #tpu.memory_space<vmem>>, vector<32x128xf32>
      %cst_39 = arith.constant dense<0.000000e+00> : vector<128x128xf32>
      %57 = tpu.matmul %54, %55, %cst_39 {dimension_numbers = #tpu.dot_dimension_numbers<[0], [0], [1], [1], [0, 1, 1, 1], [], []>, precision = #tpu.contract_precision<fp32>} : vector<32x128xf32>, vector<32x128xf32>, vector<128x128xf32> -> vector<128x128xf32>
      %cst_40 = arith.constant dense<0xFF800000> : vector<128xf32>
      %58 = vector.multi_reduction <maximumf>, %57, %cst_40 [1] : vector<128x128xf32> to vector<128xf32>
      %59 = vector.shape_cast %58 : vector<128xf32> to vector<128x1xf32>
      %60 = vector.broadcast %59 : vector<128x1xf32> to vector<128x128xf32>
      %61 = arith.subf %57, %60 : vector<128x128xf32>
      %62 = math.exp %61 : vector<128x128xf32>
      %cst_41 = arith.constant dense<0.000000e+00> : vector<128xf32>
      %63 = vector.multi_reduction <add>, %62, %cst_41 [1] : vector<128x128xf32> to vector<128xf32>
      %64 = vector.shape_cast %63 : vector<128xf32> to vector<128x1xf32>
      %65 = vector.broadcast %64 : vector<128x1xf32> to vector<128x128xf32>
      %66 = arith.divf %62, %65 : vector<128x128xf32>
      %cst_42 = arith.constant dense<0.000000e+00> : vector<32x128xf32>
      %67 = tpu.matmul %56, %66, %cst_42 {dimension_numbers = #tpu.dot_dimension_numbers<[1], [1], [0], [0], [0, 0, 1, 0], [], []>, precision = #tpu.contract_precision<fp32>} : vector<32x128xf32>, vector<128x128xf32>, vector<32x128xf32> -> vector<32x128xf32>
      %c96_43 = arith.constant 96 : index
      %c0_44 = arith.constant 0 : index
      %68 = vector.load %arg7[%c96_43, %c0_44] : memref<128x128xf32, #tpu.memory_space<vmem>>, vector<32x128xf32>
      tpu.vector_store %arg7[%c96_43, %c0_44], %67 {strides = array<i32>} : memref<128x128xf32, #tpu.memory_space<vmem>>, vector<32x128xf32>,
      %c0_45 = arith.constant 0 : index
      %c0_46 = arith.constant 0 : index
      %69 = vector.load %arg3[%c0_45, %c0_46] : memref<32x128xf32, #tpu.memory_space<vmem>>, vector<32x128xf32>
      %c0_47 = arith.constant 0 : index
      %c0_48 = arith.constant 0 : index
      %70 = vector.load %arg7[%c0_47, %c0_48] : memref<128x128xf32, #tpu.memory_space<vmem>>, vector<128x128xf32>
      %cst_49 = arith.constant dense<0.000000e+00> : vector<32x128xf32>
      %71 = tpu.matmul %69, %70, %cst_49 {dimension_numbers = #tpu.dot_dimension_numbers<[1], [0], [0], [1], [0, 0, 1, 1], [], []>, precision = #tpu.contract_precision<fp32>} : vector<32x128xf32>, vector<128x128xf32>, vector<32x128xf32> -> vector<32x128xf32>
      %c0_50 = arith.constant 0 : index
      %c0_51 = arith.constant 0 : index
      %72 = vector.load %arg4[%c0_50, %c0_51] : memref<32x1xf32, #tpu.memory_space<vmem>>, vector<32x1xf32>
      %73 = vector.broadcast %72 : vector<32x1xf32> to vector<32x128xf32>
      %74 = arith.addf %71, %73 : vector<32x128xf32>
      %75 = arith.index_cast %2 : i32 to index
      %c0_52 = arith.constant 0 : index
      %c0_53 = arith.constant 0 : index
      %76 = vector.load %arg5[%75, %c0_52, %c0_53] : memref<2x32x128xf32, #tpu.memory_space<vmem>>, vector<1x32x128xf32>
      %77 = vector.shape_cast %76 : vector<1x32x128xf32> to vector<32x128xf32>
      %78 = vector.shape_cast %74 : vector<32x128xf32> to vector<1x32x128xf32>
      tpu.vector_store %arg5[%75, %c0_52, %c0_53], %78 {strides = array<i32>} : memref<2x32x128xf32, #tpu.memory_space<vmem>>, vector<1x32x128xf32>,
    }
    %c2_i32_0 = arith.constant 2 : i32
    return
  }
  func.func @transform_0(%arg0: i32) -> (i32, i32, i32) {
    %c0_i32 = arith.constant 0 : i32
    %c0_i32_0 = arith.constant 0 : i32
    %c0_i32_1 = arith.constant 0 : i32
    return %arg0, %c0_i32, %c0_i32_0 : i32, i32, i32
  }
  func.func @transform_1(%arg0: i32) -> (i32, i32) {
    %c0_i32 = arith.constant 0 : i32
    %c0_i32_0 = arith.constant 0 : i32
    %c0_i32_1 = arith.constant 0 : i32
    return %c0_i32, %c0_i32_0 : i32, i32
  }
  func.func @transform_2(%arg0: i32) -> (i32, i32) {
    %c0_i32 = arith.constant 0 : i32
    %c0_i32_0 = arith.constant 0 : i32
    %c0_i32_1 = arith.constant 0 : i32
    return %c0_i32, %c0_i32_0 : i32, i32
  }
  func.func @transform_3(%arg0: i32) -> (i32, i32) {
    %c0_i32 = arith.constant 0 : i32
    %c0_i32_0 = arith.constant 0 : i32
    %c0_i32_1 = arith.constant 0 : i32
    return %c0_i32, %c0_i32_0 : i32, i32
  }
  func.func @transform_4(%arg0: i32) -> (i32, i32, i32) {
    %c0_i32 = arith.constant 0 : i32
    %c0_i32_0 = arith.constant 0 : i32
    %c0_i32_1 = arith.constant 0 : i32
    return %arg0, %c0_i32, %c0_i32_0 : i32, i32, i32
  }
}

</mosaic_0001>

<bundles_post_ra>
// kernel: tpu_custom_call.1
= control target key start
LH: loop header
LB: loop body
LE: loop exit
PB: predicated region body
PF: predicated region fallthrough
CT: control target
= control target key end

     0   :  { %9 = vsyncpa [#allocation5], 0  ;;  %s15812_s0 = inlined_call_operand.hbm [shape: f32[4,32,128], index: 0, kind: input, shape index: {}]   ;;  %s15813_s1 = inlined_call_operand.hbm [shape: f32[32,384], index: 1, kind: input, shape index: {}]   ;;  %s15814_s2 = inlined_call_operand.vmem [shape: f32[32,128], index: 2, kind: input, shape index: {}]   ;;  %s15815_s3 = inlined_call_operand.vmem [shape: f32[32,1], index: 3, kind: input, shape index: {}]   ;;  %s15816_s4 = inlined_call_operand.hbm [shape: f32[4,32,128], index: 4, kind: output, shape index: {}]  }
   0x1   :  { %11 = vsyncpa [#allocation5 + $0x1], 0 }
   0x2   :  { %12 = vsyncpa [#allocation8], 0 }
   0x3   :  { %13 = vsyncpa [#allocation6], 0 }
   0x4   :  { %15 = vsyncpa [#allocation6 + $0x1], 0  ;;  %s9448_s15 = smov 0   ;;  %s9450_s16 = smov 0  }
   0x5   :  { %s9452_s17 = smov 0   ;;  %s9454_s18 = smov 0  }
   0x6 LB: > { %s9469_s19 = sadd.s32 4294967295, %s9409_s18   ;;  %s8913_s20 = sadd.s32 4294967294, %s9409_s18   ;;  %s9409_s18 = sphi %s9454_s18, %s16836_s18   ;;  %s9405_s17 = sphi %s9452_s17, %s16835_s17   ;;  %s9401_s16 = sphi %s9450_s16, %s16834_s16   ;;  %s9397_s15 = sphi %s9448_s15, %s16833_s15  }
   0x7   : > { %p41_p0 = scmp.ne.s32.totalorder %s9401_s16, %s9397_s15  ;;  %p42_p1 = scmp.eq.s32.totalorder %s9469_s19, 0 }
   0x8   : > { %p128_p2 = scmp.eq.s32.totalorder %s9469_s19, 1  ;;  %p134_p3 = scmp.eq.s32.totalorder %s8913_s20, 1 }
   0x9   : > { %p9478_p4 = por %p42_p1, %p41_p0  ;;  %p8914_p5 = scmp.ge.s32.totalorder %s9409_s18, 1 }
   0xa   : > { %p9483_p6 = por %p134_p3, %p41_p0  ;;  %p141_p7 = scmp.lt.s32.totalorder %s9409_s18, 3 }
   0xb   : > { %s152_s25 = sshll.u32 %s15813_s1, 4  ;;  %s9415_s27 = smov [#allocation7]   ;;  %s153_s25 = int_to_ptr.hbm [resolvable:$true] %s152_s25 }
   0xc   : > { %p9491_p8 = pnand %p8914_p5, %p141_p7  ;;  %s154_s28 = sshll.u32 %s9415_s27, 4  ;;  %s155_s28 = int_to_ptr.vmem [resolvable:$true] %s154_s28 }
   0xd   : > { %s9501_s29 = sadd.s32 1, %s9409_s18   ;;  %s9416_s30 = smov 384  }
   0xe   : > { %p8952_p9 = pneg %p9491_p8  ;;  %s9417_s5 = smov 24  }
   0xf   : > { %s25_s6 = ssub.s32 %s9409_s18, %s9501_s29  ;;  %s28_s7 = sadd.s32 1, %s9405_s17 }
  0x10   : > { %p8953_p10 = pnand %p8952_p9, %p42_p1  ;;  %p26_p12 = scmp.eq.s32.totalorder %s25_s6, 0 }
  0x11   : > { %p35_p13 = scmp.ne.s32.totalorder %s9405_s17, %s9401_s16  ;;  %p36_p0 = scmp.eq.s32.totalorder %s9409_s18, 0 }
  0x12   : > { %8955 = dma.hbm_to_vmem [thread:$0]  (!%p8953_p10), %s153_s25, 1536, %s155_s28, [#allocation8], %s9416_s30, %s9416_s30, %s9417_s5  }
  0x13   : > { %p8965_p3 = scmp.lt.s32.totalorder %s9409_s18, 2  ;;  %p37_p5 = por %p36_p0, %p35_p13 }
  0x14   : > { %s9511_s8 = scalar_select %p26_p12, %s9405_s17, %s28_s7  }
  0x15   : > { %p9515_p7 = por %p128_p2, %p35_p13  ;;  %s174_s10 = sand.u32 1, %s9405_s17  }
  0x16   : > { %s8933_s11 = sshll.u32 %s9409_s18, 6  ;;  %s8917_s12 = sshll.u32 %s174_s10, 6 }
  0x17   : > { %s184_s20 = scalar_lea.hbm %s15812_s0, %s8933_s11  ;;  %s178_s24 = scalar_lea.vmem [#allocation4], %s8917_s12 }
  0x18   : > { %s185_s23 = sshll.u32 %s184_s20, 4  ;;  %s187_s25 = sshll.u32 %s178_s24, 4  ;;  %s186_s23 = int_to_ptr.hbm [resolvable:$true] %s185_s23  ;;  %s188_s25 = int_to_ptr.vmem [resolvable:$true] %s187_s25 }
  0x19   : > { %p9526_p9 = pnand %p8965_p3, %p37_p5  ;;  %s175_s28 = scalar_lea.sflag [#allocation5], %s174_s10 }
  0x1a   : > { %s9305_s30 = sshra.s32 %s186_s23, 4  ;;  %s9312_s11 = scalar_lea.hbm %s15812_s0, 128  ;;  %s9306_s30 = int_to_ptr.hbm [resolvable:$true] %s9305_s30 }
  0x1b   : > { %s9307_s5 = scalar_lea.hbm %s9306_s30, 64  ;;  %p9309_p10 = pneg %p9526_p9 }
  0x1c   : > { %p9308_p2 = scmp.ne.s32.totalorder %s9306_s30, %s9307_s5  ;;  %p9313_p0 = scmp.lt.s32.totalorder %s9306_s30, %s15812_s0 }
  0x1d   : > { %p9314_p3 = scmp.lt.s32.totalorder %s9312_s11, %s9307_s5 }
  0x1e   : > { %p9310_p12 = pnand %p9309_p10, %p9308_p2 }
  0x1f   : > { %p9315_p5 = por %p9314_p3, %p9313_p0 }
  0x20   : > { %p9311_p13 = pneg %p9310_p12 }
  0x22   : > { %p9316_p11 = pnand %p9315_p5, %p9311_p13 }
  0x24   : > { %9319 = shalt.err (!%p9316_p11)
}
  0x25   : > { %s9418_s10 = smov 128   ;;  %s9419_s14 = smov 8  }
  0x26   : > { %8959 = dma.hbm_to_vmem [thread:$0]  (!%p9526_p9), %s186_s23, 1024, %s188_s25, %s175_s28, %s9418_s10, %s9418_s10, %s9419_s14  }
  0x27   : > { %199 = sbr.rel (%p9491_p8) target bundleno = 4664 (0x1238), region = 36  ;;  %s9543_s20 = sand.u32 (!%p9491_p8), 1, %s9401_s16  }
  0x28   : > { %s8922_s24 = sshll.u32 (!%p9491_p8), %s9543_s20, 6  ;;  %s202_s30 = scalar_lea.sflag (!%p9491_p8), [#allocation5], %s9543_s20 }
  0x29   : > { %s9547_s5 = scalar_lea.vmem (!%p9491_p8), [#allocation4], %s8922_s24 }
  0x2c   : > { %9384 = dma.done.wait (%p9478_p4), %s202_s30, 1024  }
  0x2d   : > { %9386 = vsyncadd (%p9478_p4), %s202_s30, 4294966272 }
  0x2e   : > { %9388 = dma.done.wait (%p42_p1), [#allocation8], 1536  }
  0x2f   : > { %9390 = vsyncadd (%p42_p1), [#allocation8], 4294965760  ;;  %s9557_s26 = scalar_lea.vmem [#allocation9], %s8922_s24  ;;  %s9559_s23 = smov 0  }
  0x30 LB: >> { %v252_v0 = vld [vmem:[#allocation7 + $0x10] sm:$0xff]  ;;  %v250_v1 = vld [vmem:[#allocation7] sm:$0xff]  ;;  %v251_v2 = vld [vmem:[#allocation7 + $0x8] sm:$0xff]  ;;  %s8925_s21 = sshll.u32 %s9413_s23, 5  ;;  %vm358_vm0 = vcmask 261120   ;;  %s243_s23 = sadd.s32 1, %s9413_s23   ;;  %s9413_s23 = sphi %s9559_s23, %s243_s23  }
  0x31   : >> { %326 = vxpose.xlu2.b32.start [1/4] (short) %v252_v0, 128  ;;  %262 = vxpose.xlu0.b32.start [1/4] (short) %v250_v1, 128  ;;  %v255_v3 = vld [vmem:[#allocation7 + $0x28] sm:$0xff]  ;;  %v253_v4 = vld [vmem:[#allocation7 + $0x18] sm:$0xff]  ;;  %v254_v5 = vld [vmem:[#allocation7 + $0x20] sm:$0xff]  ;;  %s245_s25 = scalar_lea.vmem %s9547_s5, %s8925_s21 [#allocation4]  ;;  %s15769_s11 = scalar_lea.vmem %s9557_s26, %s8925_s21 [#allocation9] }
  0x32   : >> { %294 = vxpose.xlu1.b32.start [1/4] (short) %v251_v2, 128  ;;  %v258_v6 = vld [vmem:[#allocation7 + $0x40] sm:$0xff]  ;;  %v256_v7 = vld [vmem:[#allocation7 + $0x30] sm:$0xff]  ;;  %v257_v8 = vld [vmem:[#allocation7 + $0x38] sm:$0xff]  ;;  %p240_p1 = scmp.ge.s32.totalorder %s243_s23, 2  }
  0x33   : >> { %v261_v9 = vld [vmem:[#allocation7 + $0x58] sm:$0xff]  ;;  %v259_v10 = vld [vmem:[#allocation7 + $0x48] sm:$0xff]  ;;  %v260_v11 = vld [vmem:[#allocation7 + $0x50] sm:$0xff]  ;;  %s8935_s21 = sshll.u32 (%p240_p1), %s9469_s19, 6  ;;  %s8818_s14 = sshll.u32 (%p240_p1), %s9557_s26, 4  ;;  %s8819_s14 = int_to_ptr.vmem [resolvable:$true] %s8818_s14 }
  0x34   : >> { %v249_v12 = vld [vmem:[%s245_s25 + $0x18] sm:$0xff]  ;;  %v248_v14 = vld [vmem:[%s245_s25 + $0x10] sm:$0xff]  ;;  %v247_v17 = vld [vmem:[%s245_s25 + $0x8] sm:$0xff]  ;;  %s8817_s10 = scalar_lea.hbm (%p240_p1), %s15816_s4, %s8935_s21  ;;  %s8805_s30 = scalar_lea.sflag (%p240_p1), [#allocation6], %s9543_s20 }
  0x35   : >> { %v515_v13 = vand.u32 4294901760, %v249_v12  ;;  %v517_v16 = vand.u32 4294901760, %v248_v14  ;;  %v519_v20 = vand.u32 4294901760, %v247_v17  ;;  %v246_v21 = vld [vmem:[%s245_s25] sm:$0xff]  ;;  %s8820_s24 = sshll.u32 (%p240_p1), %s8817_s10, 4  ;;  %s9355_s19 = scalar_lea.hbm (%p240_p1), %s15816_s4, 128  ;;  %s8821_s24 = int_to_ptr.hbm [resolvable:$true] %s8820_s24 }
  0x36   : >> { %v521_v25 = vand.u32 4294901760, %v246_v21  ;;  %s9349_s25 = sshra.s32 (%p240_p1), %s8821_s24, 4  ;;  %s9350_s25 = int_to_ptr.hbm [resolvable:$true] %s9349_s25 }
  0x37   : >> { %v921_v15 = vsub.f32 %v249_v12, %v515_v13  ;;  %516 = vmatpush.msra.mxu0 %v515_v13  ;;  %8936 = vmatpush.msra.mxu2 %v515_v13  ;;  %v927_v19 = vsub.f32 %v248_v14, %v517_v16  ;;  %v933_v24 = vsub.f32 %v247_v17, %v519_v20  ;;  %s9351_s27 = scalar_lea.hbm (%p240_p1), %s9350_s25, 64  ;;  %p9356_p9 = scmp.lt.s32.totalorder (%p240_p1), %s9350_s25, %s15816_s4 }
  0x38   : >> { %v939_v29 = vsub.f32 %v246_v21, %v521_v25  ;;  %p9352_p4 = scmp.ne.s32.totalorder (%p240_p1), %s9350_s25, %s9351_s27  ;;  %p9357_p2 = scmp.lt.s32.totalorder (%p240_p1), %s9355_s19, %s9351_s27 }
  0x39   : >> { %327 = vxpose.xlu2.b32.cont [2/4] (short) %v255_v3, 128  ;;  %263 = vxpose.xlu0.b32.cont [2/4] (short) %v253_v4, 128  ;;  %v922_v18 = vand.u32 4294901760, %v921_v15  ;;  %v928_v23 = vand.u32 4294901760, %v927_v19  ;;  %v934_v28 = vand.u32 4294901760, %v933_v24 }
  0x3a   : >> { %295 = vxpose.xlu1.b32.cont [2/4] (short) %v254_v5, 128  ;;  %518 = vmatpush.msra.mxu0 %v517_v16  ;;  %v940_v32 = vand.u32 4294901760, %v939_v29  ;;  %p9353_p8 = pnand (%p240_p1), %p9352_p4, %p9515_p7  ;;  %p9358_p10 = por (%p240_p1), %p9357_p2, %p9356_p9 }
  0x3b   : >> { %8937 = vmatpush.msra.mxu2 %v517_v16  ;;  %v923_v22 = vsub.f32 %v921_v15, %v922_v18  ;;  %v929_v27 = vsub.f32 %v927_v19, %v928_v23  ;;  %v935_v31 = vsub.f32 %v933_v24, %v934_v28 }
  0x3c   : >> { %520 = vmatpush.msra.mxu0 %v519_v20  ;;  %v941_v34 = vsub.f32 %v939_v29, %v940_v32  ;;  %p9354_p11 = pneg (%p240_p1), %p9353_p8 }
  0x3d   : >> { %8938 = vmatpush.msra.mxu2 %v519_v20  ;;  %v924_v26 = vand.u32 4294901760, %v923_v22  ;;  %v930_v30 = vand.u32 4294901760, %v929_v27  ;;  %v936_v33 = vand.u32 4294901760, %v935_v31 }
  0x3e   : >> { %522 = vmatpush.msra.mxu0 %v521_v25  ;;  %v942_v35 = vand.u32 4294901760, %v941_v34  ;;  %p9359_p12 = pnand (%p240_p1), %p9358_p10, %p9354_p11 }
  0x3f   : >> { %8939 = vmatpush.msra.mxu2 %v521_v25  ;;  %925 = vmatpush.msra.mxu1 %v924_v26 }
  0x40   : >> { %1726 = vmatpush.msrb.mxu0 %v922_v18  ;;  %8940 = vmatpush.msra.mxu3 %v924_v26 }
  0x41   : >> { %328 = vxpose.xlu2.b32.cont [3/4] (short) %v258_v6, 128  ;;  %264 = vxpose.xlu0.b32.cont [3/4] (short) %v256_v7, 128 }
  0x42   : >> { %296 = vxpose.xlu1.b32.cont [3/4] (short) %v257_v8, 128  ;;  %1151 = vmatpush.msrb.mxu2 %v921_v15 }
  0x43   : >> { %1730 = vmatpush.msrb.mxu0 %v928_v23  ;;  %931 = vmatpush.msra.mxu1 %v930_v30 }
  0x44   : >> { %1154 = vmatpush.msrb.mxu2 %v927_v19  ;;  %8941 = vmatpush.msra.mxu3 %v930_v30 }
  0x45   : >> { %1734 = vmatpush.msrb.mxu0 %v934_v28  ;;  %937 = vmatpush.msra.mxu1 %v936_v33 }
  0x46   : >> { %1157 = vmatpush.msrb.mxu2 %v933_v24  ;;  %8942 = vmatpush.msra.mxu3 %v936_v33 }
  0x47   : >> { %1738 = vmatpush.msrb.mxu0 %v940_v32  ;;  %943 = vmatpush.msra.mxu1 %v942_v35 }
  0x48   : >> { %1160 = vmatpush.msrb.mxu2 %v939_v29  ;;  %8943 = vmatpush.msra.mxu3 %v942_v35 }
  0x49   : >> { %329 = vxpose.xlu2.b32.end [4/4] (short) %v261_v9, 128  ;;  %265 = vxpose.xlu0.b32.end [4/4] (short) %v259_v10, 128 }
  0x4a   : >> { %297 = vxpose.xlu1.b32.end [4/4] (short) %v260_v11, 128  ;;  %1415 = vmatpush.msrb.mxu3 %v515_v13 }
  0x4b   : >> { %1945 = vmatpush.msrb.mxu1 %v515_v13 }
  0x4c   : >> { %1417 = vmatpush.msrb.mxu3 %v517_v16 }
  0x4d   : >> { %1947 = vmatpush.msrb.mxu1 %v517_v16 }
  0x4e   : >> { %1419 = vmatpush.msrb.mxu3 %v519_v20 }
  0x4f   : >> { %1949 = vmatpush.msrb.mxu1 %v519_v20 }
  0x50   : >> { %1421 = vmatpush.msrb.mxu3 %v521_v25 }
  0x51   : >> { %1951 = vmatpush.msrb.mxu1 %v521_v25 }
  0xca   : >> { %v9568_v36 = vpop.trf.xlu2 }
  0xd2   : >> { %v9570_v37 = vpop.trf.xlu2 }
  0xd5   : >> { %v278_v38 = vpop.trf.xlu0 }
  0xd6   : >> { %v360_v39 = vsel %vm358_vm0, %v278_v38, 0 }
  0xd7   : >> { %v9573_v40 = vand.u32 4294901760, %v360_v39 }
  0xd9   : >> { %16012 = vst [vmem:[#allocation13_spill] sm:$0xff] %v9573_v40  ;;  %v9576_v41 = vsub.f32 %v360_v39, %v9573_v40  ;;  %945 = vmatmul.f32.vlgmr.msra.gmra.mxu1 %v9573_v40 }
  0xda   : >> { %v9579_v42 = vpop.trf.xlu2 }
  0xdb   : >> { %v525_v43 = vand.u32 4294901760, %v9576_v41 }
  0xdd   : >> { %v279_v44 = vpop.trf.xlu0  ;;  %v526_v45 = vsub.f32 %v9576_v41, %v525_v43 }
  0xde   : >> { %v363_v46 = vsel %vm358_vm0, %v279_v44, 0 }
  0xdf   : >> { %v9586_v47 = vand.u32 4294901760, %v363_v46  ;;  %v527_v48 = vand.u32 4294901760, %v526_v45 }
  0xe1   : >> { %16013 = vst [vmem:[#allocation14_spill] sm:$0xff] %v9586_v47  ;;  %v9589_v49 = vsub.f32 %v363_v46, %v9586_v47  ;;  %528 = vmatmul.f32.vlgmr.msra.gmra.mxu0 %v527_v48  ;;  %949 = vmatmul.f32.gmra.mxu1 %v9586_v47 }
  0xe2   : >> { %v9592_v50 = vpop.trf.xlu2 }
  0xe3   : >> { %v15832_v51 = vand.u32 4294901760, %v9589_v49 }
  0xe5   : >> { %v280_v52 = vpop.trf.xlu0  ;;  %v534_v53 = vsub.f32 %v9589_v49, %v15832_v51 }
  0xe6   : >> { %v366_v54 = vsel %vm358_vm0, %v280_v52, 0 }
  0xe7   : >> { %v9599_v55 = vand.u32 4294901760, %v366_v54  ;;  %v535_v56 = vand.u32 4294901760, %v534_v53 }
  0xe9   : >> { %16014 = vst [vmem:[#allocation15_spill] sm:$0xff] %v9599_v55  ;;  %v9602_v57 = vsub.f32 %v366_v54, %v9599_v55  ;;  %536 = vmatmul.f32.gmra.mxu0 %v535_v56  ;;  %953 = vmatmul.f32.gmra.mxu1 %v9599_v55 }
  0xea   : >> { %v9605_v58 = vpop.trf.xlu2 }
  0xeb   : >> { %v15829_v59 = vand.u32 4294901760, %v9602_v57 }
  0xed   : >> { %v281_v60 = vpop.trf.xlu0  ;;  %v542_v61 = vsub.f32 %v9602_v57, %v15829_v59 }
  0xee   : >> { %v369_v62 = vsel %vm358_vm0, %v281_v60, 0 }
  0xef   : >> { %v9612_v63 = vand.u32 4294901760, %v369_v62  ;;  %v543_v0 = vand.u32 4294901760, %v542_v61 }
  0xf1   : >> { %16015 = vst [vmem:[#allocation16_spill] sm:$0xff] %v9612_v63  ;;  %v9615_v1 = vsub.f32 %v369_v62, %v9612_v63  ;;  %544 = vmatmul.f32.gmra.mxu0 %v543_v0  ;;  %957 = vmatmul.f32.gmra.mxu1 %v9612_v63 }
  0xf2   : >> { %v9618_v2 = vpop.trf.xlu2 }
  0xf3   : >> { %v15828_v3 = vand.u32 4294901760, %v9615_v1 }
  0xf5   : >> { %v282_v4 = vpop.trf.xlu0  ;;  %v550_v5 = vsub.f32 %v9615_v1, %v15828_v3 }
  0xf6   : >> { %v372_v6 = vsel %vm358_vm0, %v282_v4, 0 }
  0xf7   : >> { %v9625_v7 = vand.u32 4294901760, %v372_v6  ;;  %v551_v8 = vand.u32 4294901760, %v550_v5 }
  0xf9   : >> { %16016 = vst [vmem:[#allocation17_spill] sm:$0xff] %v9625_v7  ;;  %v9628_v9 = vsub.f32 %v372_v6, %v9625_v7  ;;  %552 = vmatmul.f32.gmra.mxu0 %v551_v8  ;;  %961 = vmatmul.f32.gmra.mxu1 %v9625_v7 }
  0xfa   : >> { %v9631_v10 = vpop.trf.xlu2 }
  0xfb   : >> { %v15827_v11 = vand.u32 4294901760, %v9628_v9 }
  0xfd   : >> { %v283_v12 = vpop.trf.xlu0  ;;  %v558_v13 = vsub.f32 %v9628_v9, %v15827_v11 }
  0xfe   : >> { %v375_v14 = vsel %vm358_vm0, %v283_v12, 0 }
  0xff   : >> { %v9638_v15 = vand.u32 4294901760, %v375_v14  ;;  %v559_v16 = vand.u32 4294901760, %v558_v13 }
 0x101   : >> { %16017 = vst [vmem:[#allocation18_spill] sm:$0xff] %v9638_v15  ;;  %v9641_v17 = vsub.f32 %v375_v14, %v9638_v15  ;;  %560 = vmatmul.f32.gmra.mxu0 %v559_v16  ;;  %965 = vmatmul.f32.gmra.mxu1 %v9638_v15 }
 0x102   : >> { %v9644_v18 = vpop.trf.xlu2 }
 0x103   : >> { %v15825_v19 = vand.u32 4294901760, %v9641_v17 }
 0x105   : >> { %v284_v20 = vpop.trf.xlu0  ;;  %v566_v21 = vsub.f32 %v9641_v17, %v15825_v19 }
 0x106   : >> { %v378_v22 = vsel %vm358_vm0, %v284_v20, 0 }
 0x107   : >> { %v9651_v23 = vand.u32 4294901760, %v378_v22  ;;  %v567_v24 = vand.u32 4294901760, %v566_v21 }
 0x109   : >> { %16018 = vst [vmem:[#allocation19_spill] sm:$0xff] %v9651_v23  ;;  %v9654_v25 = vsub.f32 %v378_v22, %v9651_v23  ;;  %568 = vmatmul.f32.gmra.mxu0 %v567_v24  ;;  %969 = vmatmul.f32.gmra.mxu1 %v9651_v23 }
 0x10a   : >> { %v9657_v26 = vpop.trf.xlu2 }
 0x10b   : >> { %v15823_v27 = vand.u32 4294901760, %v9654_v25 }
 0x10d   : >> { %v285_v28 = vpop.trf.xlu0  ;;  %v574_v29 = vsub.f32 %v9654_v25, %v15823_v27 }
 0x10e   : >> { %v381_v30 = vsel %vm358_vm0, %v285_v28, 0 }
 0x10f   : >> { %v9664_v31 = vand.u32 4294901760, %v381_v30  ;;  %v575_v32 = vand.u32 4294901760, %v574_v29 }
 0x111   : >> { %16019 = vst [vmem:[#allocation20_spill] sm:$0xff] %v9664_v31  ;;  %v9667_v33 = vsub.f32 %v381_v30, %v9664_v31  ;;  %576 = vmatmul.f32.gmra.mxu0 %v575_v32  ;;  %973 = vmatmul.f32.gmra.mxu1 %v9664_v31 }
 0x112   : >> { %v9670_v34 = vpop.trf.xlu2 }
 0x113   : >> { %v15822_v35 = vand.u32 4294901760, %v9667_v33 }
 0x115   : >> { %v286_v38 = vpop.trf.xlu0  ;;  %v582_v39 = vsub.f32 %v9667_v33, %v15822_v35 }
 0x116   : >> { %v384_v44 = vsel %vm358_vm0, %v286_v38, 0  ;;  %v310_v38 = vpop.trf.xlu1 }
 0x117   : >> { %v9677_v45 = vand.u32 4294901760, %v384_v44  ;;  %v583_v46 = vand.u32 4294901760, %v582_v39  ;;  %v408_v11 = vsel %vm358_vm0, %v310_v38, 0 }
 0x118   : >> { %v9789_v59 = vand.u32 4294901760, %v408_v11 }
 0x119   : >> { %16020 = vst [vmem:[#allocation21_spill] sm:$0xff] %v9677_v45  ;;  %v9680_v48 = vsub.f32 %v384_v44, %v9677_v45  ;;  %584 = vmatmul.f32.gmra.mxu0 %v583_v46  ;;  %977 = vmatmul.f32.gmra.mxu1 %v9677_v45 }
 0x11a   : >> { %v9683_v52 = vpop.trf.xlu2  ;;  %16033 = vst [vmem:[#allocation34_spill] sm:$0xff] %v9789_v59  ;;  %v9796_v38 = vsub.f32 %v408_v11, %v9789_v59 }
 0x11b   : >> { %v15821_v53 = vand.u32 4294901760, %v9680_v48 }
 0x11d   : >> { %v287_v54 = vpop.trf.xlu0  ;;  %v590_v56 = vsub.f32 %v9680_v48, %v15821_v53 }
 0x11e   : >> { %v387_v60 = vsel %vm358_vm0, %v287_v54, 0 }
 0x11f   : >> { %v9690_v61 = vand.u32 4294901760, %v387_v60  ;;  %v591_v62 = vand.u32 4294901760, %v590_v56 }
 0x121   : >> { %16021 = vst [vmem:[#allocation22_spill] sm:$0xff] %v9690_v61  ;;  %v9693_v0 = vsub.f32 %v387_v60, %v9690_v61  ;;  %592 = vmatmul.f32.gmra.mxu0 %v591_v62  ;;  %981 = vmatmul.f32.gmra.mxu1 %v9690_v61 }
 0x122   : >> { %v9696_v4 = vpop.trf.xlu2 }
 0x123   : >> { %v15820_v5 = vand.u32 4294901760, %v9693_v0 }
 0x125   : >> { %v288_v6 = vpop.trf.xlu0  ;;  %v598_v8 = vsub.f32 %v9693_v0, %v15820_v5 }
 0x126   : >> { %v390_v12 = vsel %vm358_vm0, %v288_v6, 0 }
 0x127   : >> { %v9703_v13 = vand.u32 4294901760, %v390_v12  ;;  %v599_v14 = vand.u32 4294901760, %v598_v8  ;;  %v311_v8 = vpop.trf.xlu1 }
 0x129   : >> { %16022 = vst [vmem:[#allocation23_spill] sm:$0xff] %v9703_v13  ;;  %v9706_v16 = vsub.f32 %v390_v12, %v9703_v13  ;;  %600 = vmatmul.f32.gmra.mxu0 %v599_v14  ;;  %985 = vmatmul.f32.gmra.mxu1 %v9703_v13 }
 0x12a   : >> { %v9709_v20 = vpop.trf.xlu2 }
 0x12b   : >> { %v15818_v21 = vand.u32 4294901760, %v9706_v16 }
 0x12d   : >> { %v289_v22 = vpop.trf.xlu0  ;;  %v606_v24 = vsub.f32 %v9706_v16, %v15818_v21 }
 0x12e   : >> { %v393_v28 = vsel %vm358_vm0, %v289_v22, 0 }
 0x12f   : >> { %v9716_v29 = vand.u32 4294901760, %v393_v28  ;;  %v607_v30 = vand.u32 4294901760, %v606_v24  ;;  %v312_v21 = vpop.trf.xlu1 }
 0x131   : >> { %16023 = vst [vmem:[#allocation24_spill] sm:$0xff] %v9716_v29  ;;  %v9719_v32 = vsub.f32 %v393_v28, %v9716_v29  ;;  %608 = vmatmul.f32.gmra.mxu0 %v607_v30  ;;  %989 = vmatmul.f32.gmra.mxu1 %v9716_v29 }
 0x132   : >> { %v9722_v39 = vpop.trf.xlu2 }
 0x133   : >> { %16024 = vst [vmem:[#allocation25_spill] sm:$0xff] %v9722_v39  ;;  %v15817_v44 = vand.u32 4294901760, %v9719_v32 }
 0x135   : >> { %v290_v46 = vpop.trf.xlu0  ;;  %v614_v54 = vsub.f32 %v9719_v32, %v15817_v44 }
 0x136   : >> { %v396_v56 = vsel %vm358_vm0, %v290_v46, 0 }
 0x137   : >> { %v9729_v60 = vand.u32 4294901760, %v396_v56  ;;  %v615_v62 = vand.u32 4294901760, %v614_v54 }
 0x139   : >> { %16025 = vst [vmem:[#allocation26_spill] sm:$0xff] %v9729_v60  ;;  %v9732_v6 = vsub.f32 %v396_v56, %v9729_v60  ;;  %616 = vmatmul.f32.gmra.mxu0 %v615_v62  ;;  %993 = vmatmul.f32.gmra.mxu1 %v9729_v60 }
 0x13a   : >> { %v356_v12 = vpop.trf.xlu2 }
 0x13b   : >> { %v498_v14 = vsel %vm358_vm0, %v356_v12, 0  ;;  %v15819_v22 = vand.u32 4294901760, %v9732_v6 }
 0x13c   : >> { %v9737_v24 = vand.u32 4294901760, %v498_v14 }
 0x13d   : >> { %v291_v28 = vpop.trf.xlu0  ;;  %v622_v30 = vsub.f32 %v9732_v6, %v15819_v22 }
 0x13e   : >> { %16026 = vst [vmem:[#allocation27_spill] sm:$0xff] %v9737_v24  ;;  %v9743_v46 = vsub.f32 %v498_v14, %v9737_v24  ;;  %v399_v54 = vsel %vm358_vm0, %v291_v28, 0  ;;  %1129 = vmatmul.f32.vlgmr.msra.gmra.mxu3 %v9737_v24 }
 0x13f   : >> { %v9747_v56 = vand.u32 4294901760, %v399_v54  ;;  %v623_v62 = vand.u32 4294901760, %v622_v30 }
 0x140   : >> { %16027 = vst [vmem:[#allocation28_spill] sm:$0xff] %v9743_v46  ;;  %v15824_v12 = vand.u32 4294901760, %v9743_v46 }
 0x141   : >> { %16028 = vst [vmem:[#allocation29_spill] sm:$0xff] %v9747_v56  ;;  %v9751_v44 = vsub.f32 %v399_v54, %v9747_v56  ;;  %624 = vmatmul.f32.gmra.mxu0 %v623_v62  ;;  %997 = vmatmul.f32.gmra.mxu1 %v9747_v56 }
 0x142   : >> { %v357_v22 = vpop.trf.xlu2  ;;  %v894_v14 = vsub.f32 %v9743_v46, %v15824_v12 }
 0x143   : >> { %v501_v28 = vsel %vm358_vm0, %v357_v22, 0  ;;  %v15826_v5 = vand.u32 4294901760, %v9751_v44 }
 0x144   : >> { %v9759_v53 = vand.u32 4294901760, %v501_v28  ;;  %v895_v30 = vand.u32 4294901760, %v894_v14 }
 0x145   : >> { %v292_v35 = vpop.trf.xlu0  ;;  %v630_v54 = vsub.f32 %v9751_v44, %v15826_v5  ;;  %v313_v5 = vpop.trf.xlu1 }
 0x146   : >> { %16029 = vst [vmem:[#allocation30_spill] sm:$0xff] %v9759_v53  ;;  %v9765_v62 = vsub.f32 %v501_v28, %v9759_v53  ;;  %v402_v27 = vsel %vm358_vm0, %v292_v35, 0  ;;  %896 = vmatmul.f32.vlgmr.msra.gmra.mxu2 %v895_v30  ;;  %1133 = vmatmul.f32.gmra.mxu3 %v9759_v53 }
 0x147   : >> { %v9769_v12 = vand.u32 4294901760, %v402_v27  ;;  %v631_v22 = vand.u32 4294901760, %v630_v54 }
 0x148   : >> { %16030 = vst [vmem:[#allocation31_spill] sm:$0xff] %v9765_v62  ;;  %v15830_v19 = vand.u32 4294901760, %v9765_v62 }
 0x149   : >> { %16031 = vst [vmem:[#allocation32_spill] sm:$0xff] %v9769_v12  ;;  %v9773_v14 = vsub.f32 %v402_v27, %v9769_v12  ;;  %632 = vmatmul.f32.gmra.mxu0 %v631_v22  ;;  %1001 = vmatmul.f32.gmra.mxu1 %v9769_v12 }
 0x14a   : >> { %v902_v28 = vsub.f32 %v9765_v62, %v15830_v19 }
 0x14b   : >> { %v15831_v35 = vand.u32 4294901760, %v9773_v14 }
 0x14c   : >> { %v903_v30 = vand.u32 4294901760, %v902_v28 }
 0x14d   : >> { %v293_v3 = vpop.trf.xlu0  ;;  %v638_v54 = vsub.f32 %v9773_v14, %v15831_v35  ;;  %v411_v35 = vsel %vm358_vm0, %v311_v8, 0 }
 0x14e   : >> { %v405_v27 = vsel %vm358_vm0, %v293_v3, 0  ;;  %904 = vmatmul.f32.gmra.mxu2 %v903_v30  ;;  %1425 = vmatmul.f32.vlgmr.msrb.gmra.mxu3 %v525_v43  ;;  %v314_v30 = vpop.trf.xlu1 }
 0x14f   : >> { %v9787_v22 = vand.u32 4294901760, %v405_v27  ;;  %v639_v19 = vand.u32 4294901760, %v638_v54  ;;  %v9808_v54 = vand.u32 4294901760, %v411_v35 }
 0x151   : >> { %16032 = vst [vmem:[#allocation33_spill] sm:$0xff] %v9787_v22  ;;  %v9792_v28 = vsub.f32 %v405_v27, %v9787_v22  ;;  %640 = vmatmul.f32.gmra.mxu0 %v639_v19  ;;  %1005 = vmatmul.f32.gmra.mxu1 %v9787_v22  ;;  %v16034_v19 = vand.u32 4294901760, %v9589_v49  ;;  %v15840_v27 = vand.u32 4294901760, %v9796_v38  ;;  %v9813_v8 = vsub.f32 %v411_v35, %v9808_v54 }
 0x152   : >> { %16035 = vst [vmem:[#allocation35_spill] sm:$0xff] %v9808_v54 }
 0x153   : >> { %v15833_v3 = vand.u32 4294901760, %v9792_v28 }
 0x155   : >> { %v646_v43 = vsub.f32 %v9792_v28, %v15833_v3  ;;  %v654_v3 = vsub.f32 %v9796_v38, %v15840_v27 }
 0x156   : >> { %v9803_v51 = vpop.f32.mrf.mxu1  ;;  %1163 = vmatmul.f32.vlgmr.msrb.gmra.mxu2 %v9576_v41  ;;  %1431 = vmatmul.f32.gmra.mxu3 %v16034_v19  ;;  %v414_v41 = vsel %vm358_vm0, %v312_v21, 0  ;;  %v315_v53 = vpop.trf.xlu1 }
 0x157   : >> { %v647_v11 = vand.u32 4294901760, %v646_v43  ;;  %v16036_v43 = vand.u32 4294901760, %v9602_v57  ;;  %v655_v35 = vand.u32 4294901760, %v654_v3  ;;  %v16038_v3 = vand.u32 4294901760, %v9615_v1 }
 0x159   : >> { %648 = vmatmul.f32.gmra.mxu0 %v647_v11  ;;  %1009 = vmatmul.f32.gmra.mxu1 %v9789_v59  ;;  %v9826_v11 = vand.u32 4294901760, %v414_v41  ;;  %v15847_v59 = vand.u32 4294901760, %v9813_v8 }
 0x15b   : >> { %16037 = vst [vmem:[#allocation36_spill] sm:$0xff] %v9826_v11  ;;  %v9831_v21 = vsub.f32 %v414_v41, %v9826_v11  ;;  %v662_v27 = vsub.f32 %v9813_v8, %v15847_v59 }
 0x15d   : >> { %v15852_v41 = vand.u32 4294901760, %v9831_v21 }
 0x15e   : >> { %v9819_v24 = vpop.f32.mrf.mxu0  ;;  %v9821_v19 = vpop.f32.mrf.mxu1  ;;  %1168 = vmatmul.f32.gmra.mxu2 %v9589_v49  ;;  %1437 = vmatmul.f32.gmra.mxu3 %v16036_v43  ;;  %v417_v49 = vsel %vm358_vm0, %v313_v5, 0 }
 0x15f   : >> { %v316_v22 = vpop.trf.xlu1  ;;  %v670_v59 = vsub.f32 %v9831_v21, %v15852_v41 }
 0x161   : >> { %656 = vmatmul.f32.gmra.mxu0 %v655_v35  ;;  %1013 = vmatmul.f32.gmra.mxu1 %v9808_v54  ;;  %v9844_v35 = vand.u32 4294901760, %v417_v49  ;;  %v663_v54 = vand.u32 4294901760, %v662_v27  ;;  %v16040_v27 = vand.u32 4294901760, %v9628_v9 }
 0x163   : >> { %16039 = vst [vmem:[#allocation37_spill] sm:$0xff] %v9844_v35  ;;  %v9849_v5 = vsub.f32 %v417_v49, %v9844_v35 }
 0x165   : >> { %v15859_v49 = vand.u32 4294901760, %v9849_v5 }
 0x166   : >> { %v9837_v62 = vpop.f32.mrf.mxu0  ;;  %v9839_v43 = vpop.f32.mrf.mxu1  ;;  %1173 = vmatmul.f32.gmra.mxu2 %v9602_v57  ;;  %1443 = vmatmul.f32.gmra.mxu3 %v16038_v3  ;;  %v420_v57 = vsel %vm358_vm0, %v314_v30, 0 }
 0x167   : >> { %v317_v41 = vpop.trf.xlu1  ;;  %v678_v12 = vsub.f32 %v9849_v5, %v15859_v49 }
 0x169   : >> { %664 = vmatmul.f32.gmra.mxu0 %v663_v54  ;;  %1017 = vmatmul.f32.gmra.mxu1 %v9826_v11  ;;  %v9862_v54 = vand.u32 4294901760, %v420_v57  ;;  %v671_v11 = vand.u32 4294901760, %v670_v59  ;;  %v16042_v59 = vand.u32 4294901760, %v9641_v17 }
 0x16b   : >> { %16041 = vst [vmem:[#allocation38_spill] sm:$0xff] %v9862_v54  ;;  %v9867_v30 = vsub.f32 %v420_v57, %v9862_v54 }
 0x16d   : >> { %v15866_v57 = vand.u32 4294901760, %v9867_v30 }
 0x16e   : >> { %v9855_v46 = vpop.f32.mrf.mxu0  ;;  %v9857_v3 = vpop.f32.mrf.mxu1  ;;  %1178 = vmatmul.f32.gmra.mxu2 %v9615_v1  ;;  %1449 = vmatmul.f32.gmra.mxu3 %v16040_v27  ;;  %v423_v1 = vsel %vm358_vm0, %v315_v53, 0 }
 0x16f   : >> { %v686_v53 = vsub.f32 %v9867_v30, %v15866_v57  ;;  %v318_v60 = vpop.trf.xlu1 }
 0x171   : >> { %672 = vmatmul.f32.gmra.mxu0 %v671_v11  ;;  %1021 = vmatmul.f32.gmra.mxu1 %v9844_v35  ;;  %v9880_v11 = vand.u32 4294901760, %v423_v1  ;;  %v679_v35 = vand.u32 4294901760, %v678_v12  ;;  %v16044_v12 = vand.u32 4294901760, %v9654_v25 }
 0x173   : >> { %16043 = vst [vmem:[#allocation39_spill] sm:$0xff] %v9880_v11  ;;  %v9885_v49 = vsub.f32 %v423_v1, %v9880_v11  ;;  %v687_v1 = vand.u32 4294901760, %v686_v53  ;;  %v16046_v53 = vand.u32 4294901760, %v9667_v33 }
 0x176   : >> { %v9873_v56 = vpop.f32.mrf.mxu0  ;;  %v9875_v27 = vpop.f32.mrf.mxu1  ;;  %1183 = vmatmul.f32.gmra.mxu2 %v9628_v9  ;;  %1455 = vmatmul.f32.gmra.mxu3 %v16042_v59  ;;  %v426_v9 = vsel %vm358_vm0, %v316_v22, 0 }
 0x177   : >> { %v319_v13 = vpop.trf.xlu1 }
 0x179   : >> { %680 = vmatmul.f32.gmra.mxu0 %v679_v35  ;;  %1025 = vmatmul.f32.gmra.mxu1 %v9862_v54  ;;  %v9898_v35 = vand.u32 4294901760, %v426_v9  ;;  %v15873_v54 = vand.u32 4294901760, %v9885_v49 }
 0x17b   : >> { %16045 = vst [vmem:[#allocation40_spill] sm:$0xff] %v9898_v35  ;;  %v9903_v57 = vsub.f32 %v426_v9, %v9898_v35  ;;  %v694_v22 = vsub.f32 %v9885_v49, %v15873_v54 }
 0x17d   : >> { %v695_v9 = vand.u32 4294901760, %v694_v22  ;;  %v16048_v22 = vand.u32 4294901760, %v9680_v48 }
 0x17e   : >> { %v9891_v29 = vpop.f32.mrf.mxu0  ;;  %v9893_v59 = vpop.f32.mrf.mxu1  ;;  %1188 = vmatmul.f32.gmra.mxu2 %v9641_v17  ;;  %1461 = vmatmul.f32.gmra.mxu3 %v16044_v12  ;;  %v429_v17 = vsel %vm358_vm0, %v317_v41, 0 }
 0x17f   : >> { %v320_v31 = vpop.trf.xlu1 }
 0x181   : >> { %688 = vmatmul.f32.gmra.mxu0 %v687_v1  ;;  %1029 = vmatmul.f32.gmra.mxu1 %v9880_v11  ;;  %v9916_v1 = vand.u32 4294901760, %v429_v17  ;;  %v15880_v11 = vand.u32 4294901760, %v9903_v57 }
 0x183   : >> { %16047 = vst [vmem:[#allocation41_spill] sm:$0xff] %v9916_v1  ;;  %v9921_v41 = vsub.f32 %v429_v17, %v9916_v1  ;;  %v702_v54 = vsub.f32 %v9903_v57, %v15880_v11 }
 0x185   : >> { %v15885_v17 = vand.u32 4294901760, %v9921_v41 }
 0x186   : >> { %v9909_v61 = vpop.f32.mrf.mxu0  ;;  %v9911_v12 = vpop.f32.mrf.mxu1  ;;  %1193 = vmatmul.f32.gmra.mxu2 %v9654_v25  ;;  %1467 = vmatmul.f32.gmra.mxu3 %v16046_v53  ;;  %v432_v25 = vsel %vm358_vm0, %v318_v60, 0 }
 0x187   : >> { %v710_v11 = vsub.f32 %v9921_v41, %v15885_v17  ;;  %v321_v17 = vpop.trf.xlu1 }
 0x189   : >> { %696 = vmatmul.f32.gmra.mxu0 %v695_v9  ;;  %1033 = vmatmul.f32.gmra.mxu1 %v9898_v35  ;;  %v9934_v9 = vand.u32 4294901760, %v432_v25  ;;  %v703_v35 = vand.u32 4294901760, %v702_v54  ;;  %v16050_v54 = vand.u32 4294901760, %v9693_v0 }
 0x18b   : >> { %16049 = vst [vmem:[#allocation42_spill] sm:$0xff] %v9934_v9  ;;  %v9939_v60 = vsub.f32 %v432_v25, %v9934_v9 }
 0x18d   : >> { %v15892_v25 = vand.u32 4294901760, %v9939_v60 }
 0x18e   : >> { %v9927_v45 = vpop.f32.mrf.mxu0  ;;  %v9929_v53 = vpop.f32.mrf.mxu1  ;;  %1198 = vmatmul.f32.gmra.mxu2 %v9667_v33  ;;  %1473 = vmatmul.f32.gmra.mxu3 %v16048_v22  ;;  %v435_v33 = vsel %vm358_vm0, %v319_v13, 0 }
 0x18f   : >> { %v718_v15 = vsub.f32 %v9939_v60, %v15892_v25  ;;  %v322_v63 = vpop.trf.xlu1 }
 0x191   : >> { %704 = vmatmul.f32.gmra.mxu0 %v703_v35  ;;  %1037 = vmatmul.f32.gmra.mxu1 %v9916_v1  ;;  %v9952_v35 = vand.u32 4294901760, %v435_v33  ;;  %v711_v1 = vand.u32 4294901760, %v710_v11  ;;  %v16052_v11 = vand.u32 4294901760, %v9706_v16 }
 0x193   : >> { %16051 = vst [vmem:[#allocation43_spill] sm:$0xff] %v9952_v35  ;;  %v9957_v13 = vsub.f32 %v435_v33, %v9952_v35 }
 0x195   : >> { %v15899_v33 = vand.u32 4294901760, %v9957_v13 }
 0x196   : >> { %v9945_v23 = vpop.f32.mrf.mxu0  ;;  %v9947_v22 = vpop.f32.mrf.mxu1  ;;  %1203 = vmatmul.f32.gmra.mxu2 %v9680_v48  ;;  %1479 = vmatmul.f32.gmra.mxu3 %v16050_v54  ;;  %v438_v48 = vsel %vm358_vm0, %v320_v31, 0 }
 0x197   : >> { %v726_v31 = vsub.f32 %v9957_v13, %v15899_v33  ;;  %v323_v47 = vpop.trf.xlu1 }
 0x199   : >> { %712 = vmatmul.f32.gmra.mxu0 %v711_v1  ;;  %1041 = vmatmul.f32.gmra.mxu1 %v9934_v9  ;;  %v9970_v1 = vand.u32 4294901760, %v438_v48  ;;  %v719_v9 = vand.u32 4294901760, %v718_v15  ;;  %v16054_v15 = vand.u32 4294901760, %v9719_v32 }
 0x19b   : >> { %16053 = vst [vmem:[#allocation44_spill] sm:$0xff] %v9970_v1  ;;  %v9975_v25 = vsub.f32 %v438_v48, %v9970_v1  ;;  %v727_v48 = vand.u32 4294901760, %v726_v31  ;;  %v16057_v31 = vand.u32 4294901760, %v9732_v6 }
 0x19e   : >> { %v9963_v7 = vpop.f32.mrf.mxu0  ;;  %v9965_v54 = vpop.f32.mrf.mxu1  ;;  %1208 = vmatmul.f32.gmra.mxu2 %v9693_v0  ;;  %1485 = vmatmul.f32.gmra.mxu3 %v16052_v11  ;;  %v441_v0 = vsel %vm358_vm0, %v321_v17, 0 }
 0x1a1   : >> { %720 = vmatmul.f32.gmra.mxu0 %v719_v9  ;;  %1045 = vmatmul.f32.gmra.mxu1 %v9952_v35  ;;  %v9988_v9 = vand.u32 4294901760, %v441_v0  ;;  %v15906_v35 = vand.u32 4294901760, %v9975_v25 }
 0x1a3   : >> { %16055 = vst [vmem:[#allocation45_spill] sm:$0xff] %v9988_v9  ;;  %v9993_v33 = vsub.f32 %v441_v0, %v9988_v9  ;;  %v734_v17 = vsub.f32 %v9975_v25, %v15906_v35 }
 0x1a5   : >> { %v735_v0 = vand.u32 4294901760, %v734_v17  ;;  %v16062_v17 = vand.u32 4294901760, %v9751_v44 }
 0x1a6   : >> { %v9981_v55 = vpop.f32.mrf.mxu0  ;;  %v9983_v11 = vpop.f32.mrf.mxu1  ;;  %1213 = vmatmul.f32.gmra.mxu2 %v9706_v16  ;;  %1491 = vmatmul.f32.gmra.mxu3 %v16054_v15  ;;  %v444_v16 = vsel %vm358_vm0, %v322_v63, 0 }
 0x1a9   : >> { %728 = vmatmul.f32.gmra.mxu0 %v727_v48  ;;  %1049 = vmatmul.f32.gmra.mxu1 %v9970_v1  ;;  %v10006_v48 = vand.u32 4294901760, %v444_v16  ;;  %v15909_v1 = vand.u32 4294901760, %v9993_v33 }
 0x1ab   : >> { %16058 = vst [vmem:[#allocation47_spill] sm:$0xff] %v10006_v48  ;;  %v10011_v63 = vsub.f32 %v444_v16, %v10006_v48  ;;  %v742_v35 = vsub.f32 %v9993_v33, %v15909_v1  ;;  %v324_v16 = vpop.trf.xlu1 }
 0x1ad   : >> { %16059 = vst [vmem:[#allocation48_spill] sm:$0xff] %v10011_v63 }
 0x1ae   : >> { %v9999_v40 = vpop.f32.mrf.mxu0  ;;  %v10001_v15 = vpop.f32.mrf.mxu1  ;;  %1218 = vmatmul.f32.gmra.mxu2 %v9719_v32  ;;  %1497 = vmatmul.f32.gmra.mxu3 %v16057_v31  ;;  %v447_v32 = vsel %vm358_vm0, %v323_v47, 0 }
 0x1af   : >> { %16056 = vst [vmem:[#allocation46_spill] sm:$0xff] %v10001_v15  ;;  %v15912_v15 = vand.u32 4294901760, %v10011_v63 }
 0x1b1   : >> { %736 = vmatmul.f32.gmra.mxu0 %v735_v0  ;;  %1053 = vmatmul.f32.gmra.mxu1 %v9988_v9  ;;  %v10024_v0 = vand.u32 4294901760, %v447_v32  ;;  %v743_v9 = vand.u32 4294901760, %v742_v35  ;;  %v750_v1 = vsub.f32 %v10011_v63, %v15912_v15  ;;  %v16066_v35 = vand.u32 4294901760, %v9773_v14 }
 0x1b3   : >> { %16063 = vst [vmem:[#allocation51_spill] sm:$0xff] %v10024_v0  ;;  %v10029_v47 = vsub.f32 %v447_v32, %v10024_v0 }
 0x1b5   : >> { %v15917_v32 = vand.u32 4294901760, %v10029_v47 }
 0x1b6   : >> { %v10017_v39 = vpop.f32.mrf.mxu0  ;;  %v10019_v31 = vpop.f32.mrf.mxu1  ;;  %1223 = vmatmul.f32.gmra.mxu2 %v9732_v6  ;;  %1503 = vmatmul.f32.gmra.mxu3 %v16062_v17  ;;  %v450_v6 = vsel %vm358_vm0, %v324_v16, 0 }
 0x1b7   : >> { %16060 = vst [vmem:[#allocation49_spill] sm:$0xff] %v10017_v39  ;;  %v325_v39 = vpop.trf.xlu1 }
 0x1b8   : >> { %16061 = vst [vmem:[#allocation50_spill] sm:$0xff] %v10019_v31 }
 0x1b9   : >> { %744 = vmatmul.f32.gmra.mxu0 %v743_v9  ;;  %1057 = vmatmul.f32.gmra.mxu1 %v10006_v48  ;;  %v10042_v9 = vand.u32 4294901760, %v450_v6  ;;  %v751_v48 = vand.u32 4294901760, %v750_v1  ;;  %v16070_v1 = vand.u32 4294901760, %v9792_v28 }
 0x1bb   : >> { %16067 = vst [vmem:[#allocation54_spill] sm:$0xff] %v10042_v9  ;;  %v10047_v16 = vsub.f32 %v450_v6, %v10042_v9 }
 0x1bd   : >> { %v15918_v6 = vand.u32 4294901760, %v10047_v16 }
 0x1be   : >> { %v10035_v31 = vpop.f32.mrf.mxu0  ;;  %v10037_v17 = vpop.f32.mrf.mxu1  ;;  %1228 = vmatmul.f32.gmra.mxu2 %v9751_v44  ;;  %1509 = vmatmul.f32.gmra.mxu3 %v16066_v35  ;;  %v758_v44 = vsub.f32 %v10029_v47, %v15917_v32 }
 0x1bf   : >> { %16064 = vst [vmem:[#allocation52_spill] sm:$0xff] %v10035_v31 }
 0x1c0   : >> { %16065 = vst [vmem:[#allocation53_spill] sm:$0xff] %v10037_v17  ;;  %v453_v17 = vsel %vm358_vm0, %v325_v39, 0 }
 0x1c1   : >> { %752 = vmatmul.f32.gmra.mxu0 %v751_v48  ;;  %1061 = vmatmul.f32.gmra.mxu1 %v10024_v0  ;;  %v1130_v15 = vpop.f32.mrf.mxu3  ;;  %v10060_v48 = vand.u32 4294901760, %v453_v17  ;;  %v759_v0 = vand.u32 4294901760, %v758_v44 }
 0x1c3   : >> { %16071 = vst [vmem:[#allocation57_spill] sm:$0xff] %v10060_v48 }
 0x1c6   : >> { %v10053_v35 = vpop.f32.mrf.mxu0  ;;  %v10055_v31 = vpop.f32.mrf.mxu1  ;;  %1233 = vmatmul.f32.gmra.mxu2 %v9773_v14  ;;  %1515 = vmatmul.f32.gmra.mxu3 %v16070_v1  ;;  %v766_v14 = vsub.f32 %v10047_v16, %v15918_v6  ;;  %v456_v1 = vsel %vm358_vm0, %v9568_v36, 0 }
 0x1c7   : >> { %16068 = vst [vmem:[#allocation55_spill] sm:$0xff] %v10053_v35  ;;  %v10067_v35 = vsub.f32 %v453_v17, %v10060_v48 }
 0x1c8   : >> { %16069 = vst [vmem:[#allocation56_spill] sm:$0xff] %v10055_v31 }
 0x1c9   : >> { %760 = vmatmul.f32.gmra.mxu0 %v759_v0  ;;  %v897_v63 = vpop.f32.mrf.mxu2  ;;  %1065 = vmatmul.f32.gmra.mxu1 %v10042_v9  ;;  %v1134_v32 = vpop.f32.mrf.mxu3  ;;  %v16074_v0 = vand.u32 4294901760, %v9796_v38  ;;  %v15921_v17 = vand.u32 4294901760, %v10067_v35 }
 0x1ca   : >> { %v10064_v39 = vadd.f32 %v1130_v15, %v897_v63  ;;  %v10081_v15 = vand.u32 4294901760, %v456_v1  ;;  %v767_v63 = vand.u32 4294901760, %v766_v14 }
 0x1cc   : >> { %16072 = vst [vmem:[#allocation58_spill] sm:$0xff] %v10064_v39  ;;  %v10088_v9 = vsub.f32 %v456_v1, %v10081_v15 }
 0x1cd   : >> { %16075 = vst [vmem:[#allocation60_spill] sm:$0xff] %v10081_v15 }
 0x1ce   : >> { %v10074_v44 = vpop.f32.mrf.mxu0  ;;  %v10076_v31 = vpop.f32.mrf.mxu1  ;;  %1238 = vmatmul.f32.gmra.mxu2 %v9792_v28  ;;  %1521 = vmatmul.f32.gmra.mxu3 %v16074_v0  ;;  %v774_v28 = vsub.f32 %v10067_v35, %v15921_v17  ;;  %v459_v0 = vsel %vm358_vm0, %v9570_v37, 0  ;;  %v15924_v1 = vand.u32 4294901760, %v10088_v9  ;;  %v947_v17 = vadd.f32 %v9803_v51, %v9819_v24 }
 0x1cf   : >> { %16073 = vst [vmem:[#allocation59_spill] sm:$0xff] %v10076_v31  ;;  %v16081_v24 = vand.u32 4294901760, %v9831_v21 }
 0x1d1   : >> { %768 = vmatmul.f32.gmra.mxu0 %v767_v63  ;;  %v905_v39 = vpop.f32.mrf.mxu2  ;;  %1069 = vmatmul.f32.gmra.mxu1 %v10060_v48  ;;  %v1426_v6 = vpop.f32.mrf.mxu3  ;;  %v16079_v63 = vand.u32 4294901760, %v9813_v8 }
 0x1d2   : >> { %v10085_v36 = vadd.f32 %v1134_v32, %v905_v39  ;;  %v10102_v32 = vand.u32 4294901760, %v459_v0  ;;  %v775_v39 = vand.u32 4294901760, %v774_v28  ;;  %v462_v28 = vsel %vm358_vm0, %v9579_v42, 0 }
 0x1d4   : >> { %16076 = vst [vmem:[#allocation61_spill] sm:$0xff] %v10085_v36 }
 0x1d5   : >> { %16080 = vst [vmem:[#allocation64_spill] sm:$0xff] %v10102_v32 }
 0x1d6   : >> { %v10095_v14 = vpop.f32.mrf.mxu0  ;;  %v10097_v31 = vpop.f32.mrf.mxu1  ;;  %1243 = vmatmul.f32.gmra.mxu2 %v9796_v38  ;;  %1527 = vmatmul.f32.gmra.mxu3 %v16079_v63  ;;  %v782_v38 = vsub.f32 %v10088_v9, %v15924_v1 }
 0x1d7   : >> { %16077 = vst [vmem:[#allocation62_spill] sm:$0xff] %v10095_v14 }
 0x1d8   : >> { %16078 = vst [vmem:[#allocation63_spill] sm:$0xff] %v10097_v31  ;;  %v10109_v31 = vsub.f32 %v459_v0, %v10102_v32  ;;  %v783_v0 = vand.u32 4294901760, %v782_v38  ;;  %v465_v38 = vsel %vm358_vm0, %v9592_v50, 0 }
 0x1d9   : >> { %776 = vmatmul.f32.gmra.mxu0 %v775_v39  ;;  %1073 = vmatmul.f32.gmra.mxu1 %v10081_v15  ;;  %v1164_v37 = vpop.f32.mrf.mxu2  ;;  %v1432_v36 = vpop.f32.mrf.mxu3 }
 0x1da   : >> { %v1165_v48 = vadd.f32 %v1164_v37, %v947_v17  ;;  %v10125_v17 = vand.u32 4294901760, %v462_v28  ;;  %v15927_v39 = vand.u32 4294901760, %v10109_v31  ;;  %v951_v37 = vadd.f32 %v9821_v19, %v9837_v62 }
 0x1db   : >> { %v16083_v19 = vand.u32 4294901760, %v9849_v5 }
 0x1dc   : >> { %v10116_v63 = vadd.f32 %v1426_v6, %v1165_v48  ;;  %16082 = vst [vmem:[#allocation65_spill] sm:$0xff] %v10125_v17  ;;  %v10132_v1 = vsub.f32 %v462_v28, %v10125_v17  ;;  %v10148_v28 = vand.u32 4294901760, %v465_v38 }
 0x1de   : >> { %v10118_v14 = vpop.f32.mrf.mxu0  ;;  %v10120_v51 = vpop.f32.mrf.mxu1  ;;  %1248 = vmatmul.f32.gmra.mxu2 %v9813_v8  ;;  %1533 = vmatmul.f32.gmra.mxu3 %v16081_v24  ;;  %v790_v8 = vsub.f32 %v10109_v31, %v15927_v39  ;;  %16084 = vst [vmem:[#allocation66_spill] sm:$0xff] %v10148_v28  ;;  %v10155_v39 = vsub.f32 %v465_v38, %v10148_v28 }
 0x1e1   : >> { %784 = vmatmul.f32.gmra.mxu0 %v783_v0  ;;  %1077 = vmatmul.f32.gmra.mxu1 %v10102_v32  ;;  %v1169_v42 = vpop.f32.mrf.mxu2  ;;  %v1438_v48 = vpop.f32.mrf.mxu3  ;;  %v791_v0 = vand.u32 4294901760, %v790_v8  ;;  %v468_v8 = vsel %vm358_vm0, %v9605_v58, 0 }
 0x1e2   : >> { %v1170_v6 = vadd.f32 %v1169_v42, %v951_v37  ;;  %v15930_v37 = vand.u32 4294901760, %v10132_v1  ;;  %v955_v42 = vadd.f32 %v9839_v43, %v9855_v46  ;;  %v16085_v43 = vand.u32 4294901760, %v9867_v30 }
 0x1e3   : >> { %v10171_v38 = vand.u32 4294901760, %v468_v8 }
 0x1e4   : >> { %v10139_v24 = vadd.f32 %v1432_v36, %v1170_v6 }
 0x1e5   : >> { %16086 = vst [vmem:[#allocation67_spill] sm:$0xff] %v10171_v38 }
 0x1e6   : >> { %v10141_v15 = vpop.f32.mrf.mxu0  ;;  %v10143_v62 = vpop.f32.mrf.mxu1  ;;  %1253 = vmatmul.f32.gmra.mxu2 %v9831_v21  ;;  %1539 = vmatmul.f32.gmra.mxu3 %v16083_v19  ;;  %v798_v21 = vsub.f32 %v10132_v1, %v15930_v37  ;;  %v10178_v37 = vsub.f32 %v468_v8, %v10171_v38 }
 0x1e9   : >> { %792 = vmatmul.f32.gmra.mxu0 %v791_v0  ;;  %1081 = vmatmul.f32.gmra.mxu1 %v10125_v17  ;;  %v1174_v50 = vpop.f32.mrf.mxu2  ;;  %v1444_v36 = vpop.f32.mrf.mxu3  ;;  %v799_v0 = vand.u32 4294901760, %v798_v21  ;;  %v471_v21 = vsel %vm358_vm0, %v9618_v2, 0 }
 0x1ea   : >> { %v1175_v6 = vadd.f32 %v1174_v50, %v955_v42  ;;  %v15933_v42 = vand.u32 4294901760, %v10155_v39  ;;  %v959_v50 = vadd.f32 %v9857_v3, %v9873_v56  ;;  %v16087_v3 = vand.u32 4294901760, %v9885_v49 }
 0x1eb   : >> { %v10194_v8 = vand.u32 4294901760, %v471_v21 }
 0x1ec   : >> { %v10162_v19 = vadd.f32 %v1438_v48, %v1175_v6 }
 0x1ed   : >> { %16088 = vst [vmem:[#allocation68_spill] sm:$0xff] %v10194_v8 }
 0x1ee   : >> { %v10164_v32 = vpop.f32.mrf.mxu0  ;;  %v10166_v46 = vpop.f32.mrf.mxu1  ;;  %1258 = vmatmul.f32.gmra.mxu2 %v9849_v5  ;;  %1545 = vmatmul.f32.gmra.mxu3 %v16085_v43  ;;  %v806_v5 = vsub.f32 %v10155_v39, %v15933_v42  ;;  %v10201_v42 = vsub.f32 %v471_v21, %v10194_v8 }
 0x1f0   : >> { %v15939_v21 = vand.u32 4294901760, %v10201_v42 }
 0x1f1   : >> { %800 = vmatmul.f32.gmra.mxu0 %v799_v0  ;;  %1085 = vmatmul.f32.gmra.mxu1 %v10148_v28  ;;  %v1179_v58 = vpop.f32.mrf.mxu2  ;;  %v1450_v48 = vpop.f32.mrf.mxu3  ;;  %v807_v0 = vand.u32 4294901760, %v806_v5  ;;  %v474_v5 = vsel %vm358_vm0, %v9631_v10, 0 }
 0x1f2   : >> { %v1180_v6 = vadd.f32 %v1179_v58, %v959_v50  ;;  %v15936_v50 = vand.u32 4294901760, %v10178_v37  ;;  %v963_v58 = vadd.f32 %v9875_v27, %v9891_v29  ;;  %v16089_v27 = vand.u32 4294901760, %v9903_v57 }
 0x1f4   : >> { %v10185_v43 = vadd.f32 %v1444_v36, %v1180_v6 }
 0x1f6   : >> { %v10187_v17 = vpop.f32.mrf.mxu0  ;;  %v10189_v56 = vpop.f32.mrf.mxu1  ;;  %1263 = vmatmul.f32.gmra.mxu2 %v9867_v30  ;;  %1551 = vmatmul.f32.gmra.mxu3 %v16087_v3  ;;  %v814_v30 = vsub.f32 %v10178_v37, %v15936_v50 }
 0x1f9   : >> { %808 = vmatmul.f32.gmra.mxu0 %v807_v0  ;;  %1089 = vmatmul.f32.gmra.mxu1 %v10171_v38  ;;  %v1184_v2 = vpop.f32.mrf.mxu2  ;;  %v1456_v36 = vpop.f32.mrf.mxu3  ;;  %v10218_v0 = vand.u32 4294901760, %v474_v5 }
 0x1fa   : >> { %v1185_v6 = vadd.f32 %v1184_v2, %v963_v58  ;;  %v815_v58 = vand.u32 4294901760, %v814_v30  ;;  %v967_v2 = vadd.f32 %v9893_v59, %v9909_v61  ;;  %v16091_v59 = vand.u32 4294901760, %v9921_v41 }
 0x1fb   : >> { %16090 = vst [vmem:[#allocation69_spill] sm:$0xff] %v10218_v0  ;;  %v10224_v50 = vsub.f32 %v474_v5, %v10218_v0 }
 0x1fc   : >> { %v10208_v3 = vadd.f32 %v1450_v48, %v1185_v6 }
 0x1fd   : >> { %v15942_v5 = vand.u32 4294901760, %v10224_v50 }
 0x1fe   : >> { %v10210_v28 = vpop.f32.mrf.mxu0  ;;  %v10212_v29 = vpop.f32.mrf.mxu1  ;;  %1268 = vmatmul.f32.gmra.mxu2 %v9885_v49  ;;  %1557 = vmatmul.f32.gmra.mxu3 %v16089_v27  ;;  %v822_v49 = vsub.f32 %v10201_v42, %v15939_v21  ;;  %v477_v27 = vsel %vm358_vm0, %v9644_v18, 0 }
 0x201   : >> { %816 = vmatmul.f32.gmra.mxu0 %v815_v58  ;;  %1093 = vmatmul.f32.gmra.mxu1 %v10194_v8  ;;  %v1189_v10 = vpop.f32.mrf.mxu2  ;;  %v1462_v48 = vpop.f32.mrf.mxu3  ;;  %v10241_v58 = vand.u32 4294901760, %v477_v27 }
 0x202   : >> { %v1190_v6 = vadd.f32 %v1189_v10, %v967_v2  ;;  %v823_v2 = vand.u32 4294901760, %v822_v49  ;;  %v971_v10 = vadd.f32 %v9911_v12, %v9927_v45  ;;  %v16092_v12 = vand.u32 4294901760, %v9939_v60 }
 0x203   : >> { %v10247_v21 = vsub.f32 %v477_v27, %v10241_v58 }
 0x204   : >> { %v10231_v30 = vadd.f32 %v1456_v36, %v1190_v6 }
 0x205   : >> { %v15945_v27 = vand.u32 4294901760, %v10247_v21 }
 0x206   : >> { %v10233_v38 = vpop.f32.mrf.mxu0  ;;  %v10235_v61 = vpop.f32.mrf.mxu1  ;;  %1273 = vmatmul.f32.gmra.mxu2 %v9903_v57  ;;  %1563 = vmatmul.f32.gmra.mxu3 %v16091_v59  ;;  %v830_v57 = vsub.f32 %v10224_v50, %v15942_v5  ;;  %v480_v59 = vsel %vm358_vm0, %v9657_v26, 0 }
 0x209   : >> { %824 = vmatmul.f32.gmra.mxu0 %v823_v2  ;;  %1097 = vmatmul.f32.gmra.mxu1 %v10218_v0  ;;  %v1194_v18 = vpop.f32.mrf.mxu2  ;;  %v1468_v36 = vpop.f32.mrf.mxu3  ;;  %v10264_v2 = vand.u32 4294901760, %v480_v59 }
 0x20a   : >> { %v1195_v6 = vadd.f32 %v1194_v18, %v971_v10  ;;  %v831_v10 = vand.u32 4294901760, %v830_v57  ;;  %v975_v18 = vadd.f32 %v9929_v53, %v9945_v23  ;;  %v16094_v53 = vand.u32 4294901760, %v9957_v13 }
 0x20b   : >> { %v10270_v5 = vsub.f32 %v480_v59, %v10264_v2 }
 0x20c   : >> { %v10254_v49 = vadd.f32 %v1462_v48, %v1195_v6 }
 0x20d   : >> { %v15946_v59 = vand.u32 4294901760, %v10270_v5 }
 0x20e   : >> { %v10256_v8 = vpop.f32.mrf.mxu0  ;;  %v10258_v45 = vpop.f32.mrf.mxu1  ;;  %1278 = vmatmul.f32.gmra.mxu2 %v9921_v41  ;;  %1569 = vmatmul.f32.gmra.mxu3 %v16092_v12  ;;  %v838_v41 = vsub.f32 %v10247_v21, %v15945_v27  ;;  %v483_v12 = vsel %vm358_vm0, %v9670_v34, 0 }
 0x211   : >> { %832 = vmatmul.f32.gmra.mxu0 %v831_v10  ;;  %1101 = vmatmul.f32.gmra.mxu1 %v10241_v58  ;;  %v1199_v26 = vpop.f32.mrf.mxu2  ;;  %v1474_v48 = vpop.f32.mrf.mxu3  ;;  %v10287_v10 = vand.u32 4294901760, %v483_v12 }
 0x212   : >> { %v1200_v6 = vadd.f32 %v1199_v26, %v975_v18  ;;  %v839_v18 = vand.u32 4294901760, %v838_v41  ;;  %v979_v26 = vadd.f32 %v9947_v22, %v9963_v7  ;;  %v16097_v22 = vand.u32 4294901760, %v9975_v25 }
 0x213   : >> { %v10293_v27 = vsub.f32 %v483_v12, %v10287_v10 }
 0x214   : >> { %v10277_v57 = vadd.f32 %v1468_v36, %v1200_v6 }
 0x215   : >> { %v15947_v12 = vand.u32 4294901760, %v10293_v27 }
 0x216   : >> { %v10279_v0 = vpop.f32.mrf.mxu0  ;;  %v10281_v23 = vpop.f32.mrf.mxu1  ;;  %1283 = vmatmul.f32.gmra.mxu2 %v9939_v60  ;;  %1575 = vmatmul.f32.gmra.mxu3 %v16094_v53  ;;  %v846_v60 = vsub.f32 %v10270_v5, %v15946_v59  ;;  %v486_v53 = vsel %vm358_vm0, %v9683_v52, 0 }
 0x217   : >> { %16093 = vst [vmem:[#allocation70_spill] sm:$0xff] %v10281_v23 }
 0x219   : >> { %840 = vmatmul.f32.gmra.mxu0 %v839_v18  ;;  %1105 = vmatmul.f32.gmra.mxu1 %v10264_v2  ;;  %v1204_v34 = vpop.f32.mrf.mxu2  ;;  %v1480_v36 = vpop.f32.mrf.mxu3  ;;  %v10310_v18 = vand.u32 4294901760, %v486_v53 }
 0x21a   : >> { %v1205_v6 = vadd.f32 %v1204_v34, %v979_v26  ;;  %v847_v26 = vand.u32 4294901760, %v846_v60  ;;  %v983_v34 = vadd.f32 %v9965_v54, %v9981_v55  ;;  %v16101_v54 = vand.u32 4294901760, %v9993_v33 }
 0x21b   : >> { %16098 = vst [vmem:[#allocation73_spill] sm:$0xff] %v10310_v18  ;;  %v10316_v59 = vsub.f32 %v486_v53, %v10310_v18 }
 0x21c   : >> { %v10300_v41 = vadd.f32 %v1474_v48, %v1205_v6 }
 0x21d   : >> { %v15948_v53 = vand.u32 4294901760, %v10316_v59 }
 0x21e   : >> { %v10302_v23 = vpop.f32.mrf.mxu0  ;;  %v10304_v7 = vpop.f32.mrf.mxu1  ;;  %1288 = vmatmul.f32.gmra.mxu2 %v9957_v13  ;;  %1581 = vmatmul.f32.gmra.mxu3 %v16097_v22  ;;  %v854_v13 = vsub.f32 %v10293_v27, %v15947_v12  ;;  %v489_v22 = vsel %vm358_vm0, %v9696_v4, 0 }
 0x21f   : >> { %16095 = vst [vmem:[#allocation71_spill] sm:$0xff] %v10302_v23  ;;  %v16108_v23 = vld [vmem:[#allocation46_spill] sm:$0xff] }
 0x220   : >> { %16096 = vst [vmem:[#allocation72_spill] sm:$0xff] %v10304_v7 }
 0x221   : >> { %848 = vmatmul.f32.gmra.mxu0 %v847_v26  ;;  %1109 = vmatmul.f32.gmra.mxu1 %v10287_v10  ;;  %v1209_v52 = vpop.f32.mrf.mxu2  ;;  %v1486_v48 = vpop.f32.mrf.mxu3  ;;  %v10333_v26 = vand.u32 4294901760, %v489_v22 }
 0x222   : >> { %v1210_v6 = vadd.f32 %v1209_v52, %v983_v34  ;;  %v855_v34 = vand.u32 4294901760, %v854_v13  ;;  %v987_v52 = vadd.f32 %v9983_v11, %v9999_v40  ;;  %v16105_v11 = vld [vmem:[#allocation48_spill] sm:$0xff] }
 0x223   : >> { %16102 = vst [vmem:[#allocation76_spill] sm:$0xff] %v10333_v26  ;;  %v10339_v12 = vsub.f32 %v489_v22, %v10333_v26 }
 0x224   : >> { %v10323_v60 = vadd.f32 %v1480_v36, %v1210_v6 }
 0x225   : >> { %v15951_v22 = vand.u32 4294901760, %v10339_v12 }
 0x226   : >> { %v10325_v7 = vpop.f32.mrf.mxu0  ;;  %v10327_v55 = vpop.f32.mrf.mxu1  ;;  %1293 = vmatmul.f32.gmra.mxu2 %v9975_v25  ;;  %1587 = vmatmul.f32.gmra.mxu3 %v16101_v54  ;;  %v862_v25 = vsub.f32 %v10316_v59, %v15948_v53  ;;  %v492_v54 = vsel %vm358_vm0, %v9709_v20, 0  ;;  %v16107_v53 = vld [vmem:[#allocation49_spill] sm:$0xff] }
 0x227   : >> { %16099 = vst [vmem:[#allocation74_spill] sm:$0xff] %v10325_v7 }
 0x228   : >> { %16100 = vst [vmem:[#allocation75_spill] sm:$0xff] %v10327_v55  ;;  %v991_v55 = vadd.f32 %v16108_v23, %v16107_v53 }
 0x229   : >> { %856 = vmatmul.f32.gmra.mxu0 %v855_v34  ;;  %1113 = vmatmul.f32.gmra.mxu1 %v10310_v18  ;;  %v1214_v4 = vpop.f32.mrf.mxu2  ;;  %v1492_v36 = vpop.f32.mrf.mxu3  ;;  %v16106_v34 = vand.u32 4294901760, %v16105_v11 }
 0x22a   : >> { %v1215_v6 = vadd.f32 %v1214_v4, %v987_v52  ;;  %v10356_v52 = vand.u32 4294901760, %v492_v54  ;;  %v863_v4 = vand.u32 4294901760, %v862_v25 }
 0x22c   : >> { %v10346_v13 = vadd.f32 %v1486_v48, %v1215_v6 }
 0x22e   : >> { %v10348_v7 = vpop.f32.mrf.mxu0  ;;  %v10350_v40 = vpop.f32.mrf.mxu1  ;;  %1298 = vmatmul.f32.gmra.mxu2 %v9993_v33  ;;  %1593 = vmatmul.f32.gmra.mxu3 %v16106_v34  ;;  %v870_v33 = vsub.f32 %v10339_v12, %v15951_v22  ;;  %v16109_v34 = vld [vmem:[#allocation25_spill] sm:$0xff]  ;;  %v16115_v22 = vld [vmem:[#allocation50_spill] sm:$0xff] }
 0x22f   : >> { %16103 = vst [vmem:[#allocation77_spill] sm:$0xff] %v10348_v7  ;;  %v10362_v7 = vsub.f32 %v492_v54, %v10356_v52 }
 0x230   : >> { %16104 = vst [vmem:[#allocation78_spill] sm:$0xff] %v10350_v40  ;;  %v495_v40 = vsel %vm358_vm0, %v16109_v34, 0 }
 0x231   : >> { %864 = vmatmul.f32.gmra.mxu0 %v863_v4  ;;  %1117 = vmatmul.f32.gmra.mxu1 %v10333_v26  ;;  %v1219_v20 = vpop.f32.mrf.mxu2  ;;  %v1498_v48 = vpop.f32.mrf.mxu3  ;;  %v15954_v53 = vand.u32 4294901760, %v10362_v7  ;;  %v10379_v54 = vand.u32 4294901760, %v495_v40  ;;  %v871_v4 = vand.u32 4294901760, %v870_v33 }
 0x232   : >> { %v1220_v6 = vadd.f32 %v1219_v20, %v991_v55  ;;  %v16112_v55 = vand.u32 4294901760, %v10029_v47  ;;  %v16114_v20 = vld [vmem:[#allocation52_spill] sm:$0xff] }
 0x233   : >> { %16113 = vst [vmem:[#allocation46_spill] sm:$0xff] %v10379_v54  ;;  %v995_v26 = vadd.f32 %v16115_v22, %v16114_v20  ;;  %v16118_v22 = vand.u32 4294901760, %v10047_v16  ;;  %v16120_v20 = vld [vmem:[#allocation53_spill] sm:$0xff] }
 0x234   : >> { %v10369_v25 = vadd.f32 %v1492_v36, %v1220_v6 }
 0x236   : >> { %v10371_v18 = vpop.f32.mrf.mxu0  ;;  %v10373_v23 = vpop.f32.mrf.mxu1  ;;  %1303 = vmatmul.f32.gmra.mxu2 %v16105_v11  ;;  %1599 = vmatmul.f32.gmra.mxu3 %v16112_v55  ;;  %v878_v11 = vsub.f32 %v10362_v7, %v15954_v53 }
 0x237   : >> { %16110 = vst [vmem:[#allocation48_spill] sm:$0xff] %v10371_v18 }
 0x238   : >> { %16111 = vst [vmem:[#allocation49_spill] sm:$0xff] %v10373_v23  ;;  %v10385_v23 = vsub.f32 %v495_v40, %v10379_v54  ;;  %v16119_v40 = vld [vmem:[#allocation55_spill] sm:$0xff] }
 0x239   : >> { %872 = vmatmul.f32.gmra.mxu0 %v871_v4  ;;  %1121 = vmatmul.f32.gmra.mxu1 %v10356_v52  ;;  %v1224_v36 = vpop.f32.mrf.mxu2  ;;  %v1504_v6 = vpop.f32.mrf.mxu3  ;;  %v879_v4 = vand.u32 4294901760, %v878_v11  ;;  %v16123_v11 = vand.u32 4294901760, %v10067_v35 }
 0x23a   : >> { %v1225_v34 = vadd.f32 %v1224_v36, %v995_v26  ;;  %v15957_v26 = vand.u32 4294901760, %v10385_v23  ;;  %v999_v36 = vadd.f32 %v16120_v20, %v16119_v40  ;;  %v16124_v40 = vld [vmem:[#allocation56_spill] sm:$0xff] }
 0x23b   : >> { %v1003_v20 = vadd.f32 %v16124_v40, %v10074_v44 }
 0x23c   : >> { %v10390_v55 = vadd.f32 %v1498_v48, %v1225_v34 }
 0x23e   : >> { %v10392_v18 = vpop.f32.mrf.mxu0  ;;  %v10394_v33 = vpop.f32.mrf.mxu1  ;;  %1308 = vmatmul.f32.gmra.mxu2 %v10029_v47  ;;  %1605 = vmatmul.f32.gmra.mxu3 %v16118_v22 }
 0x23f   : >> { %16116 = vst [vmem:[#allocation25_spill] sm:$0xff] %v10392_v18 }
 0x240   : >> { %16117 = vst [vmem:[#allocation52_spill] sm:$0xff] %v10394_v33  ;;  %v886_v33 = vsub.f32 %v10385_v23, %v15957_v26 }
 0x241   : >> { %880 = vmatmul.f32.gmra.mxu0 %v879_v4  ;;  %1125 = vmatmul.f32.gmra.mxu1 %v10379_v54  ;;  %v1229_v48 = vpop.f32.mrf.mxu2  ;;  %v1510_v34 = vpop.f32.mrf.mxu3  ;;  %v16125_v54 = vld [vmem:[#allocation13_spill] sm:$0xff] }
 0x242   : >> { %v1230_v53 = vadd.f32 %v1229_v48, %v999_v36  ;;  %v887_v4 = vand.u32 4294901760, %v886_v33  ;;  %v16129_v33 = vld [vmem:[#allocation62_spill] sm:$0xff] }
 0x244   : >> { %v10406_v47 = vadd.f32 %v1504_v6, %v1230_v53 }
 0x246   : >> { %v10408_v18 = vpop.f32.mrf.mxu0  ;;  %v10410_v22 = vpop.f32.mrf.mxu1  ;;  %1313 = vmatmul.f32.gmra.mxu2 %v10047_v16  ;;  %1611 = vmatmul.f32.gmra.mxu3 %v16123_v11  ;;  %v16128_v16 = vand.u32 4294901760, %v10088_v9  ;;  %v16130_v11 = vld [vmem:[#allocation59_spill] sm:$0xff] }
 0x247   : >> { %16121 = vst [vmem:[#allocation50_spill] sm:$0xff] %v10408_v18  ;;  %v1007_v44 = vadd.f32 %v16130_v11, %v16129_v33 }
 0x248   : >> { %16122 = vst [vmem:[#allocation55_spill] sm:$0xff] %v10410_v22  ;;  %v16131_v22 = vld [vmem:[#allocation14_spill] sm:$0xff] }
 0x249   : >> { %888 = vmatmul.f32.gmra.mxu0 %v887_v4  ;;  %v1234_v36 = vpop.f32.mrf.mxu2  ;;  %v1516_v48 = vpop.f32.mrf.mxu3  ;;  %1953 = vmatmul.f32.vlgmr.msrb.gmra.mxu1 %v16125_v54 }
 0x24a   : >> { %v1235_v53 = vadd.f32 %v1234_v36, %v1003_v20 }
 0x24c   : >> { %v10418_v6 = vadd.f32 %v1510_v34, %v1235_v53 }
 0x24e   : >> { %v10420_v26 = vpop.f32.mrf.mxu0  ;;  %v10422_v18 = vpop.f32.mrf.mxu1  ;;  %1318 = vmatmul.f32.gmra.mxu2 %v10067_v35  ;;  %1617 = vmatmul.f32.gmra.mxu3 %v16128_v16  ;;  %v16134_v35 = vand.u32 4294901760, %v10109_v31  ;;  %v16135_v16 = vld [vmem:[#allocation63_spill] sm:$0xff] }
 0x24f   : >> { %16126 = vst [vmem:[#allocation53_spill] sm:$0xff] %v10420_v26  ;;  %v1011_v33 = vadd.f32 %v16135_v16, %v10118_v14  ;;  %v1015_v14 = vadd.f32 %v10120_v51, %v10141_v15  ;;  %v1019_v15 = vadd.f32 %v10143_v62, %v10164_v32  ;;  %v1023_v32 = vadd.f32 %v10166_v46, %v10187_v17  ;;  %v16229_v26 = vld [vmem:[#allocation57_spill] sm:$0xff] }
 0x250   : >> { %16127 = vst [vmem:[#allocation56_spill] sm:$0xff] %v10422_v18  ;;  %v1027_v17 = vadd.f32 %v10189_v56, %v10210_v28  ;;  %v1031_v28 = vadd.f32 %v10212_v29, %v10233_v38  ;;  %v1035_v38 = vadd.f32 %v10235_v61, %v10256_v8  ;;  %v1039_v8 = vadd.f32 %v10258_v45, %v10279_v0  ;;  %v16168_v0 = vld [vmem:[#allocation23_spill] sm:$0xff] }
 0x251   : >> { %v1239_v4 = vpop.f32.mrf.mxu2  ;;  %v1522_v40 = vpop.f32.mrf.mxu3  ;;  %1740 = vmatmul.f32.vlgmr.msrb.gmra.mxu0 %v16125_v54  ;;  %1957 = vmatmul.f32.gmra.mxu1 %v16131_v22  ;;  %v16136_v54 = vld [vmem:[#allocation15_spill] sm:$0xff] }
 0x252   : >> { %v1240_v34 = vadd.f32 %v1239_v4, %v1007_v44 }
 0x254   : >> { %v10431_v20 = vadd.f32 %v1516_v48, %v1240_v34 }
 0x256   : >> { %v10433_v36 = vpop.f32.mrf.mxu0  ;;  %v10435_v53 = vpop.f32.mrf.mxu1  ;;  %1323 = vmatmul.f32.gmra.mxu2 %v10088_v9  ;;  %1623 = vmatmul.f32.gmra.mxu3 %v16134_v35  ;;  %v16139_v9 = vand.u32 4294901760, %v10132_v1 }
 0x257   : >> { %16132 = vst [vmem:[#allocation13_spill] sm:$0xff] %v10433_v36  ;;  %v16222_v36 = vld [vmem:[#allocation51_spill] sm:$0xff] }
 0x258   : >> { %16133 = vst [vmem:[#allocation62_spill] sm:$0xff] %v10435_v53 }
 0x259   : >> { %v1244_v11 = vpop.f32.mrf.mxu2  ;;  %v1528_v18 = vpop.f32.mrf.mxu3  ;;  %1744 = vmatmul.f32.gmra.mxu0 %v16131_v22  ;;  %1961 = vmatmul.f32.gmra.mxu1 %v16136_v54  ;;  %v16140_v22 = vld [vmem:[#allocation16_spill] sm:$0xff] }
 0x25a   : >> { %v1245_v48 = vadd.f32 %v1244_v11, %v1011_v33 }
 0x25c   : >> { %v10444_v44 = vadd.f32 %v1522_v40, %v1245_v48 }
 0x25e   : >> { %v10446_v4 = vpop.f32.mrf.mxu0  ;;  %v10448_v34 = vpop.f32.mrf.mxu1  ;;  %1328 = vmatmul.f32.gmra.mxu2 %v10109_v31  ;;  %1629 = vmatmul.f32.gmra.mxu3 %v16139_v9  ;;  %v16143_v31 = vand.u32 4294901760, %v10155_v39 }
 0x25f   : >> { %16137 = vst [vmem:[#allocation59_spill] sm:$0xff] %v10446_v4 }
 0x260   : >> { %16138 = vst [vmem:[#allocation14_spill] sm:$0xff] %v10448_v34 }
 0x261   : >> { %v1249_v35 = vpop.f32.mrf.mxu2  ;;  %v1534_v16 = vpop.f32.mrf.mxu3  ;;  %1748 = vmatmul.f32.gmra.mxu0 %v16136_v54  ;;  %1965 = vmatmul.f32.gmra.mxu1 %v16140_v22  ;;  %v16144_v54 = vld [vmem:[#allocation17_spill] sm:$0xff] }
 0x262   : >> { %v1250_v40 = vadd.f32 %v1249_v35, %v1015_v14 }
 0x264   : >> { %v10457_v33 = vadd.f32 %v1528_v18, %v1250_v40 }
 0x266   : >> { %v10459_v11 = vpop.f32.mrf.mxu0  ;;  %v10461_v48 = vpop.f32.mrf.mxu1  ;;  %1333 = vmatmul.f32.gmra.mxu2 %v10132_v1  ;;  %1635 = vmatmul.f32.gmra.mxu3 %v16143_v31  ;;  %v16147_v1 = vand.u32 4294901760, %v10178_v37 }
 0x267   : >> { %16141 = vst [vmem:[#allocation63_spill] sm:$0xff] %v10459_v11 }
 0x268   : >> { %16142 = vst [vmem:[#allocation15_spill] sm:$0xff] %v10461_v48 }
 0x269   : >> { %v1254_v51 = vpop.f32.mrf.mxu2  ;;  %1752 = vmatmul.f32.gmra.mxu0 %v16140_v22  ;;  %1969 = vmatmul.f32.gmra.mxu1 %v16144_v54  ;;  %v1540_v18 = vpop.f32.mrf.mxu3  ;;  %v16148_v22 = vld [vmem:[#allocation18_spill] sm:$0xff] }
 0x26a   : >> { %v1255_v9 = vadd.f32 %v1254_v51, %v1019_v15 }
 0x26c   : >> { %v10470_v14 = vadd.f32 %v1534_v16, %v1255_v9 }
 0x26e   : >> { %v10472_v35 = vpop.f32.mrf.mxu0  ;;  %v10474_v40 = vpop.f32.mrf.mxu1  ;;  %1338 = vmatmul.f32.gmra.mxu2 %v10155_v39  ;;  %1641 = vmatmul.f32.gmra.mxu3 %v16147_v1  ;;  %v16151_v39 = vand.u32 4294901760, %v10201_v42 }
 0x26f   : >> { %16145 = vst [vmem:[#allocation16_spill] sm:$0xff] %v10472_v35 }
 0x270   : >> { %16146 = vst [vmem:[#allocation17_spill] sm:$0xff] %v10474_v40 }
 0x271   : >> { %v1259_v62 = vpop.f32.mrf.mxu2  ;;  %1756 = vmatmul.f32.gmra.mxu0 %v16144_v54  ;;  %1973 = vmatmul.f32.gmra.mxu1 %v16148_v22  ;;  %v1546_v15 = vpop.f32.mrf.mxu3  ;;  %v16152_v54 = vld [vmem:[#allocation19_spill] sm:$0xff] }
 0x272   : >> { %v1260_v31 = vadd.f32 %v1259_v62, %v1023_v32 }
 0x274   : >> { %v10483_v16 = vadd.f32 %v1540_v18, %v1260_v31 }
 0x276   : >> { %v10485_v51 = vpop.f32.mrf.mxu0  ;;  %v10487_v9 = vpop.f32.mrf.mxu1  ;;  %1343 = vmatmul.f32.gmra.mxu2 %v10178_v37  ;;  %1647 = vmatmul.f32.gmra.mxu3 %v16151_v39  ;;  %v16155_v37 = vand.u32 4294901760, %v10224_v50 }
 0x277   : >> { %16149 = vst [vmem:[#allocation18_spill] sm:$0xff] %v10485_v51 }
 0x278   : >> { %16150 = vst [vmem:[#allocation79_spill] sm:$0xff] %v10487_v9 }
 0x279   : >> { %v1264_v46 = vpop.f32.mrf.mxu2  ;;  %1760 = vmatmul.f32.gmra.mxu0 %v16148_v22  ;;  %1977 = vmatmul.f32.gmra.mxu1 %v16152_v54  ;;  %v1552_v31 = vpop.f32.mrf.mxu3  ;;  %v16156_v22 = vld [vmem:[#allocation20_spill] sm:$0xff] }
 0x27a   : >> { %v1265_v18 = vadd.f32 %v1264_v46, %v1027_v17 }
 0x27c   : >> { %v10496_v1 = vadd.f32 %v1546_v15, %v1265_v18 }
 0x27e   : >> { %v10498_v32 = vpop.f32.mrf.mxu0  ;;  %v10500_v62 = vpop.f32.mrf.mxu1  ;;  %1348 = vmatmul.f32.gmra.mxu2 %v10201_v42  ;;  %1653 = vmatmul.f32.gmra.mxu3 %v16155_v37  ;;  %v16159_v42 = vand.u32 4294901760, %v10247_v21 }
 0x27f   : >> { %16153 = vst [vmem:[#allocation19_spill] sm:$0xff] %v10498_v32 }
 0x280   : >> { %16154 = vst [vmem:[#allocation80_spill] sm:$0xff] %v10500_v62 }
 0x281   : >> { %v1269_v56 = vpop.f32.mrf.mxu2  ;;  %1764 = vmatmul.f32.gmra.mxu0 %v16152_v54  ;;  %1981 = vmatmul.f32.gmra.mxu1 %v16156_v22  ;;  %v1558_v29 = vpop.f32.mrf.mxu3  ;;  %v16160_v54 = vld [vmem:[#allocation21_spill] sm:$0xff] }
 0x282   : >> { %v1270_v15 = vadd.f32 %v1269_v56, %v1031_v28 }
 0x284   : >> { %v10509_v39 = vadd.f32 %v1552_v31, %v1270_v15 }
 0x286   : >> { %v10511_v17 = vpop.f32.mrf.mxu0  ;;  %v10513_v46 = vpop.f32.mrf.mxu1  ;;  %1353 = vmatmul.f32.gmra.mxu2 %v10224_v50  ;;  %1659 = vmatmul.f32.gmra.mxu3 %v16159_v42  ;;  %v16163_v50 = vand.u32 4294901760, %v10270_v5 }
 0x287   : >> { %16157 = vst [vmem:[#allocation20_spill] sm:$0xff] %v10511_v17 }
 0x288   : >> { %16158 = vst [vmem:[#allocation81_spill] sm:$0xff] %v10513_v46 }
 0x289   : >> { %v1274_v18 = vpop.f32.mrf.mxu2  ;;  %1768 = vmatmul.f32.gmra.mxu0 %v16156_v22  ;;  %1985 = vmatmul.f32.gmra.mxu1 %v16160_v54  ;;  %v16164_v22 = vld [vmem:[#allocation22_spill] sm:$0xff]  ;;  %v1564_v42 = vpop.f32.mrf.mxu3 }
 0x28a   : >> { %v1275_v37 = vadd.f32 %v1274_v18, %v1035_v38 }
 0x28c   : >> { %v10522_v31 = vadd.f32 %v1558_v29, %v1275_v37  ;;  %v16171_v37 = vand.u32 4294901760, %v10316_v59 }
 0x28e   : >> { %v10524_v28 = vpop.f32.mrf.mxu0  ;;  %v10526_v56 = vpop.f32.mrf.mxu1  ;;  %1358 = vmatmul.f32.gmra.mxu2 %v10247_v21  ;;  %1665 = vmatmul.f32.gmra.mxu3 %v16163_v50  ;;  %v16167_v21 = vand.u32 4294901760, %v10293_v27  ;;  %v16172_v50 = vld [vmem:[#allocation24_spill] sm:$0xff] }
 0x28f   : >> { %16161 = vst [vmem:[#allocation21_spill] sm:$0xff] %v10524_v28 }
 0x290   : >> { %16162 = vst [vmem:[#allocation82_spill] sm:$0xff] %v10526_v56  ;;  %v16266_v56 = vld [vmem:[#allocation76_spill] sm:$0xff] }
 0x291   : >> { %v1279_v61 = vpop.f32.mrf.mxu2  ;;  %1772 = vmatmul.f32.gmra.mxu0 %v16160_v54  ;;  %1989 = vmatmul.f32.gmra.mxu1 %v16164_v22 }
 0x292   : >> { %v1280_v15 = vadd.f32 %v1279_v61, %v1039_v8  ;;  %v16175_v61 = vand.u32 4294901760, %v10339_v12 }
 0x294   : >> { %v10535_v38 = vadd.f32 %v1564_v42, %v1280_v15  ;;  %v16179_v42 = vand.u32 4294901760, %v10362_v7 }
 0x296   : >> { %v10537_v29 = vpop.f32.mrf.mxu0  ;;  %v10539_v18 = vpop.f32.mrf.mxu1  ;;  %1363 = vmatmul.f32.gmra.mxu2 %v10270_v5  ;;  %1671 = vmatmul.f32.gmra.mxu3 %v16167_v21  ;;  %v16180_v21 = vld [vmem:[#allocation29_spill] sm:$0xff] }
 0x297   : >> { %16165 = vst [vmem:[#allocation22_spill] sm:$0xff] %v10537_v29 }
 0x298   : >> { %16166 = vst [vmem:[#allocation83_spill] sm:$0xff] %v10539_v18 }
 0x299   : >> { %1776 = vmatmul.f32.gmra.mxu0 %v16164_v22  ;;  %1993 = vmatmul.f32.gmra.mxu1 %v16168_v0  ;;  %v16176_v22 = vld [vmem:[#allocation26_spill] sm:$0xff] }
 0x29e   : >> { %v10546_v45 = vpop.f32.mrf.mxu0  ;;  %v10548_v54 = vpop.f32.mrf.mxu1  ;;  %1368 = vmatmul.f32.gmra.mxu2 %v10293_v27  ;;  %1677 = vmatmul.f32.gmra.mxu3 %v16171_v37  ;;  %v16183_v37 = vand.u32 4294901760, %v10385_v23 }
 0x29f   : >> { %16169 = vst [vmem:[#allocation23_spill] sm:$0xff] %v10546_v45 }
 0x2a0   : >> { %16170 = vst [vmem:[#allocation84_spill] sm:$0xff] %v10548_v54 }
 0x2a1   : >> { %1780 = vmatmul.f32.gmra.mxu0 %v16168_v0  ;;  %1997 = vmatmul.f32.gmra.mxu1 %v16172_v50 }
 0x2a6   : >> { %v10555_v5 = vpop.f32.mrf.mxu0  ;;  %v10557_v8 = vpop.f32.mrf.mxu1  ;;  %1373 = vmatmul.f32.gmra.mxu2 %v10316_v59  ;;  %1683 = vmatmul.f32.gmra.mxu3 %v16175_v61 }
 0x2a7   : >> { %16173 = vst [vmem:[#allocation24_spill] sm:$0xff] %v10555_v5  ;;  %v16226_v5 = vld [vmem:[#allocation54_spill] sm:$0xff] }
 0x2a8   : >> { %16174 = vst [vmem:[#allocation85_spill] sm:$0xff] %v10557_v8 }
 0x2a9   : >> { %1784 = vmatmul.f32.gmra.mxu0 %v16172_v50  ;;  %2001 = vmatmul.f32.gmra.mxu1 %v16176_v22  ;;  %v16184_v50 = vld [vmem:[#allocation32_spill] sm:$0xff] }
 0x2ae   : >> { %v10564_v27 = vpop.f32.mrf.mxu0  ;;  %v10566_v15 = vpop.f32.mrf.mxu1  ;;  %1378 = vmatmul.f32.gmra.mxu2 %v10339_v12  ;;  %1689 = vmatmul.f32.gmra.mxu3 %v16179_v42 }
 0x2af   : >> { %16177 = vst [vmem:[#allocation26_spill] sm:$0xff] %v10564_v27 }
 0x2b0   : >> { %16178 = vst [vmem:[#allocation86_spill] sm:$0xff] %v10566_v15 }
 0x2b1   : >> { %1788 = vmatmul.f32.gmra.mxu0 %v16176_v22  ;;  %2005 = vmatmul.f32.gmra.mxu1 %v16180_v21  ;;  %v16187_v22 = vld [vmem:[#allocation28_spill] sm:$0xff] }
 0x2b2   : >> { %v16188_v42 = vand.u32 4294901760, %v16187_v22 }
 0x2b6   : >> { %v10573_v59 = vpop.f32.mrf.mxu0  ;;  %v10575_v0 = vpop.f32.mrf.mxu1  ;;  %1383 = vmatmul.f32.gmra.mxu2 %v10362_v7  ;;  %1695 = vmatmul.f32.gmra.mxu3 %v16183_v37 }
 0x2b7   : >> { %16181 = vst [vmem:[#allocation29_spill] sm:$0xff] %v10573_v59 }
 0x2b8   : >> { %16182 = vst [vmem:[#allocation87_spill] sm:$0xff] %v10575_v0  ;;  %v16189_v0 = vld [vmem:[#allocation33_spill] sm:$0xff] }
 0x2b9   : >> { %1792 = vmatmul.f32.gmra.mxu0 %v16180_v21  ;;  %2009 = vmatmul.f32.gmra.mxu1 %v16184_v50  ;;  %v16191_v21 = vld [vmem:[#allocation31_spill] sm:$0xff] }
 0x2ba   : >> { %v16192_v37 = vand.u32 4294901760, %v16191_v21 }
 0x2be   : >> { %v10582_v12 = vpop.f32.mrf.mxu0  ;;  %v10584_v61 = vpop.f32.mrf.mxu1  ;;  %1388 = vmatmul.f32.gmra.mxu2 %v10385_v23  ;;  %1701 = vmatmul.f32.gmra.mxu3 %v16188_v42 }
 0x2bf   : >> { %16185 = vst [vmem:[#allocation32_spill] sm:$0xff] %v10582_v12  ;;  %v16194_v12 = vld [vmem:[#allocation35_spill] sm:$0xff] }
 0x2c0   : >> { %16186 = vst [vmem:[#allocation88_spill] sm:$0xff] %v10584_v61  ;;  %v16193_v61 = vld [vmem:[#allocation34_spill] sm:$0xff] }
 0x2c1   : >> { %1796 = vmatmul.f32.gmra.mxu0 %v16184_v50  ;;  %2013 = vmatmul.f32.gmra.mxu1 %v16189_v0 }
 0x2c6   : >> { %v10591_v7 = vpop.f32.mrf.mxu0  ;;  %1393 = vmatmul.f32.gmra.mxu2 %v16187_v22  ;;  %1707 = vmatmul.f32.gmra.mxu3 %v16192_v37  ;;  %v1954_v15 = vpop.f32.mrf.mxu1 }
 0x2c7   : >> { %16190 = vst [vmem:[#allocation28_spill] sm:$0xff] %v10591_v7 }
 0x2c9   : >> { %1800 = vmatmul.f32.gmra.mxu0 %v16189_v0  ;;  %2017 = vmatmul.f32.gmra.mxu1 %v16193_v61  ;;  %v16195_v0 = vld [vmem:[#allocation36_spill] sm:$0xff] }
 0x2ce   : >> { %1398 = vmatmul.f32.gmra.mxu2 %v16191_v21  ;;  %v1741_v23 = vpop.f32.mrf.mxu0  ;;  %v1958_v42 = vpop.f32.mrf.mxu1 }
 0x2cf   : >> { %v1742_v50 = vadd.f32 %v1741_v23, %v10116_v63 }
 0x2d1   : >> { %1804 = vmatmul.f32.gmra.mxu0 %v16193_v61  ;;  %2021 = vmatmul.f32.gmra.mxu1 %v16194_v12  ;;  %v1955_v7 = vadd.f32 %v1954_v15, %v1742_v50  ;;  %v16196_v61 = vld [vmem:[#allocation37_spill] sm:$0xff] }
 0x2d3   : >> { %2205 = vxpose.xlu0.b32.start [1/4] (short) %v1955_v7, 128 }
 0x2d6   : >> { %v1745_v22 = vpop.f32.mrf.mxu0  ;;  %v1962_v59 = vpop.f32.mrf.mxu1 }
 0x2d7   : >> { %v1746_v37 = vadd.f32 %v1745_v22, %v10139_v24  ;;  %v16199_v22 = vld [vmem:[#allocation39_spill] sm:$0xff] }
 0x2d9   : >> { %v1959_v8 = vadd.f32 %v1958_v42, %v1746_v37  ;;  %1808 = vmatmul.f32.gmra.mxu0 %v16194_v12  ;;  %2025 = vmatmul.f32.gmra.mxu1 %v16195_v0  ;;  %v16197_v12 = vld [vmem:[#allocation38_spill] sm:$0xff] }
 0x2db   : >> { %2206 = vxpose.xlu0.b32.cont [2/4] (short) %v1959_v8, 128 }
 0x2de   : >> { %v1749_v21 = vpop.f32.mrf.mxu0  ;;  %v1966_v27 = vpop.f32.mrf.mxu1 }
 0x2df   : >> { %v1750_v63 = vadd.f32 %v1749_v21, %v10162_v19  ;;  %v16201_v21 = vld [vmem:[#allocation40_spill] sm:$0xff] }
 0x2e1   : >> { %v1963_v23 = vadd.f32 %v1962_v59, %v1750_v63  ;;  %1812 = vmatmul.f32.gmra.mxu0 %v16195_v0  ;;  %2029 = vmatmul.f32.gmra.mxu1 %v16196_v61 }
 0x2e3   : >> { %2207 = vxpose.xlu0.b32.cont [3/4] (short) %v1963_v23, 128 }
 0x2e6   : >> { %v1753_v15 = vpop.f32.mrf.mxu0  ;;  %v1970_v7 = vpop.f32.mrf.mxu1 }
 0x2e7   : >> { %v1754_v24 = vadd.f32 %v1753_v15, %v10185_v43  ;;  %v16203_v15 = vld [vmem:[#allocation41_spill] sm:$0xff] }
 0x2e9   : >> { %v1967_v42 = vadd.f32 %v1966_v27, %v1754_v24  ;;  %1816 = vmatmul.f32.gmra.mxu0 %v16196_v61  ;;  %2033 = vmatmul.f32.gmra.mxu1 %v16197_v12 }
 0x2eb   : >> { %2208 = vxpose.xlu0.b32.end [4/4] (short) %v1967_v42, 128 }
 0x2ee   : >> { %v1757_v8 = vpop.f32.mrf.mxu0  ;;  %v1974_v50 = vpop.f32.mrf.mxu1 }
 0x2ef   : >> { %v1758_v19 = vadd.f32 %v1757_v8, %v10208_v3 }
 0x2f1   : >> { %v10612_v59 = vadd.f32 %v1970_v7, %v1758_v19  ;;  %1820 = vmatmul.f32.gmra.mxu0 %v16197_v12  ;;  %2037 = vmatmul.f32.gmra.mxu1 %v16199_v22  ;;  %v16205_v12 = vld [vmem:[#allocation42_spill] sm:$0xff]  ;;  %v10632_v19 = vpop.f32.mrf.mxu3 }
 0x2f2   : >> { %16206 = vst [vmem:[#allocation36_spill] sm:$0xff] %v10632_v19 }
 0x2f3   : >> { %16198 = vst [vmem:[#allocation33_spill] sm:$0xff] %v10612_v59 }
 0x2f6   : >> { %v1761_v37 = vpop.f32.mrf.mxu0  ;;  %v1978_v0 = vpop.f32.mrf.mxu1 }
 0x2f7   : >> { %v1762_v43 = vadd.f32 %v1761_v37, %v10231_v30  ;;  %v16208_v37 = vld [vmem:[#allocation43_spill] sm:$0xff] }
 0x2f9   : >> { %v10617_v27 = vadd.f32 %v1974_v50, %v1762_v43  ;;  %1824 = vmatmul.f32.gmra.mxu0 %v16199_v22  ;;  %2041 = vmatmul.f32.gmra.mxu1 %v16201_v21  ;;  %v10638_v43 = vpop.f32.mrf.mxu2 }
 0x2fa   : >> { %16209 = vst [vmem:[#allocation38_spill] sm:$0xff] %v10638_v43 }
 0x2fb   : >> { %16200 = vst [vmem:[#allocation31_spill] sm:$0xff] %v10617_v27 }
 0x2fe   : >> { %v1765_v63 = vpop.f32.mrf.mxu0  ;;  %v1982_v23 = vpop.f32.mrf.mxu1 }
 0x2ff   : >> { %v1766_v3 = vadd.f32 %v1765_v63, %v10254_v49 }
 0x301   : >> { %v10622_v61 = vadd.f32 %v1978_v0, %v1766_v3  ;;  %1828 = vmatmul.f32.gmra.mxu0 %v16201_v21  ;;  %2045 = vmatmul.f32.gmra.mxu1 %v16203_v15 }
 0x303   : >> { %16202 = vst [vmem:[#allocation34_spill] sm:$0xff] %v10622_v61 }
 0x306   : >> { %v1769_v7 = vpop.f32.mrf.mxu0  ;;  %v1986_v24 = vpop.f32.mrf.mxu1 }
 0x307   : >> { %v1770_v30 = vadd.f32 %v1769_v7, %v10277_v57 }
 0x309   : >> { %v10627_v42 = vadd.f32 %v1982_v23, %v1770_v30  ;;  %1832 = vmatmul.f32.gmra.mxu0 %v16203_v15  ;;  %2049 = vmatmul.f32.gmra.mxu1 %v16205_v12  ;;  %v16211_v23 = vld [vmem:[#allocation44_spill] sm:$0xff] }
 0x30b   : >> { %16204 = vst [vmem:[#allocation35_spill] sm:$0xff] %v10627_v42 }
 0x30e   : >> { %v1773_v8 = vpop.f32.mrf.mxu0  ;;  %v1990_v50 = vpop.f32.mrf.mxu1 }
 0x30f   : >> { %v1774_v49 = vadd.f32 %v1773_v8, %v10300_v41  ;;  %v10645_v41 = vpop.f32.mrf.mxu3 }
 0x310   : >> { %16212 = vst [vmem:[#allocation40_spill] sm:$0xff] %v10645_v41 }
 0x311   : >> { %v10634_v22 = vadd.f32 %v1986_v24, %v1774_v49  ;;  %1836 = vmatmul.f32.gmra.mxu0 %v16205_v12  ;;  %2053 = vmatmul.f32.gmra.mxu1 %v16208_v37  ;;  %v10648_v24 = vpop.f32.mrf.mxu2  ;;  %v16215_v12 = vld [vmem:[#allocation45_spill] sm:$0xff] }
 0x312   : >> { %16213 = vst [vmem:[#allocation41_spill] sm:$0xff] %v10648_v24 }
 0x313   : >> { %16207 = vst [vmem:[#allocation37_spill] sm:$0xff] %v10634_v22 }
 0x316   : >> { %v1777_v0 = vpop.f32.mrf.mxu0  ;;  %v1994_v57 = vpop.f32.mrf.mxu1 }
 0x317   : >> { %v1778_v21 = vadd.f32 %v1777_v0, %v10323_v60  ;;  %v10654_v60 = vpop.f32.mrf.mxu3  ;;  %v16218_v0 = vld [vmem:[#allocation47_spill] sm:$0xff] }
 0x318   : >> { %16216 = vst [vmem:[#allocation43_spill] sm:$0xff] %v10654_v60 }
 0x319   : >> { %v10641_v63 = vadd.f32 %v1990_v50, %v1778_v21  ;;  %1840 = vmatmul.f32.gmra.mxu0 %v16208_v37  ;;  %2057 = vmatmul.f32.gmra.mxu1 %v16211_v23 }
 0x31b   : >> { %16210 = vst [vmem:[#allocation39_spill] sm:$0xff] %v10641_v63 }
 0x31e   : >> { %v1781_v3 = vpop.f32.mrf.mxu0  ;;  %v1998_v15 = vpop.f32.mrf.mxu1 }
 0x31f   : >> { %v1782_v7 = vadd.f32 %v1781_v3, %v10346_v13  ;;  %v10661_v13 = vpop.f32.mrf.mxu2  ;;  %v10663_v3 = vpop.f32.mrf.mxu3 }
 0x320   : >> { %16219 = vst [vmem:[#allocation45_spill] sm:$0xff] %v10661_v13 }
 0x321   : >> { %v10650_v30 = vadd.f32 %v1994_v57, %v1782_v7  ;;  %1844 = vmatmul.f32.gmra.mxu0 %v16211_v23  ;;  %2061 = vmatmul.f32.gmra.mxu1 %v16215_v12  ;;  %16220 = vst [vmem:[#allocation47_spill] sm:$0xff] %v10663_v3 }
 0x323   : >> { %16214 = vst [vmem:[#allocation42_spill] sm:$0xff] %v10650_v30 }
 0x326   : >> { %v1785_v8 = vpop.f32.mrf.mxu0  ;;  %v2002_v50 = vpop.f32.mrf.mxu1 }
 0x327   : >> { %v1786_v49 = vadd.f32 %v1785_v8, %v10369_v25  ;;  %v10670_v25 = vpop.f32.mrf.mxu2 }
 0x328   : >> { %16223 = vst [vmem:[#allocation51_spill] sm:$0xff] %v10670_v25 }
 0x329   : >> { %v10657_v37 = vadd.f32 %v1998_v15, %v1786_v49  ;;  %1848 = vmatmul.f32.gmra.mxu0 %v16215_v12  ;;  %2065 = vmatmul.f32.gmra.mxu1 %v16218_v0  ;;  %v10673_v49 = vpop.f32.mrf.mxu3 }
 0x32a   : >> { %16224 = vst [vmem:[#allocation90_spill] sm:$0xff] %v10673_v49  ;;  %v16232_v49 = vld [vmem:[#allocation60_spill] sm:$0xff] }
 0x32b   : >> { %16217 = vst [vmem:[#allocation44_spill] sm:$0xff] %v10657_v37 }
 0x32e   : >> { %v1789_v57 = vpop.f32.mrf.mxu0  ;;  %v2006_v21 = vpop.f32.mrf.mxu1 }
 0x32f   : >> { %v1790_v23 = vadd.f32 %v1789_v57, %v10390_v55  ;;  %v10680_v57 = vpop.f32.mrf.mxu2 }
 0x330   : >> { %16227 = vst [vmem:[#allocation54_spill] sm:$0xff] %v10680_v57 }
 0x331   : >> { %v10666_v7 = vadd.f32 %v2002_v50, %v1790_v23  ;;  %1852 = vmatmul.f32.gmra.mxu0 %v16218_v0  ;;  %2069 = vmatmul.f32.gmra.mxu1 %v16222_v36 }
 0x333   : >> { %16221 = vst [vmem:[#allocation89_spill] sm:$0xff] %v10666_v7 }
 0x336   : >> { %v1793_v15 = vpop.f32.mrf.mxu0  ;;  %v2010_v12 = vpop.f32.mrf.mxu1 }
 0x337   : >> { %v1794_v8 = vadd.f32 %v1793_v15, %v10406_v47  ;;  %v10686_v47 = vpop.f32.mrf.mxu3 }
 0x338   : >> { %16230 = vst [vmem:[#allocation57_spill] sm:$0xff] %v10686_v47 }
 0x339   : >> { %v10675_v54 = vadd.f32 %v2006_v21, %v1794_v8  ;;  %1856 = vmatmul.f32.gmra.mxu0 %v16222_v36  ;;  %2073 = vmatmul.f32.gmra.mxu1 %v16226_v5 }
 0x33b   : >> { %16225 = vst [vmem:[#allocation91_spill] sm:$0xff] %v10675_v54 }
 0x33e   : >> { %v1797_v55 = vpop.f32.mrf.mxu0  ;;  %v2014_v50 = vpop.f32.mrf.mxu1 }
 0x33f   : >> { %v1798_v0 = vadd.f32 %v1797_v55, %v10418_v6  ;;  %v10693_v6 = vpop.f32.mrf.mxu2 }
 0x340   : >> { %16233 = vst [vmem:[#allocation60_spill] sm:$0xff] %v10693_v6 }
 0x341   : >> { %v10682_v23 = vadd.f32 %v2010_v12, %v1798_v0  ;;  %1860 = vmatmul.f32.gmra.mxu0 %v16226_v5  ;;  %2077 = vmatmul.f32.gmra.mxu1 %v16229_v26  ;;  %v10695_v12 = vpop.f32.mrf.mxu3  ;;  %v16235_v0 = vld [vmem:[#allocation64_spill] sm:$0xff] }
 0x342   : >> { %16234 = vst [vmem:[#allocation94_spill] sm:$0xff] %v10695_v12 }
 0x343   : >> { %16228 = vst [vmem:[#allocation92_spill] sm:$0xff] %v10682_v23 }
 0x346   : >> { %v1801_v21 = vpop.f32.mrf.mxu0  ;;  %v2018_v15 = vpop.f32.mrf.mxu1 }
 0x347   : >> { %v1802_v36 = vadd.f32 %v1801_v21, %v10431_v20  ;;  %v10699_v47 = vpop.f32.mrf.mxu2 }
 0x348   : >> { %16236 = vst [vmem:[#allocation64_spill] sm:$0xff] %v10699_v47  ;;  %v16240_v47 = vld [vmem:[#allocation66_spill] sm:$0xff] }
 0x349   : >> { %v10689_v8 = vadd.f32 %v2014_v50, %v1802_v36  ;;  %1864 = vmatmul.f32.gmra.mxu0 %v16229_v26  ;;  %2081 = vmatmul.f32.gmra.mxu1 %v16232_v49  ;;  %v10701_v50 = vpop.f32.mrf.mxu3  ;;  %v16238_v26 = vld [vmem:[#allocation65_spill] sm:$0xff] }
 0x34a   : >> { %16237 = vst [vmem:[#allocation95_spill] sm:$0xff] %v10701_v50 }
 0x34b   : >> { %16231 = vst [vmem:[#allocation93_spill] sm:$0xff] %v10689_v8 }
 0x34e   : >> { %v1805_v55 = vpop.f32.mrf.mxu0  ;;  %v2022_v5 = vpop.f32.mrf.mxu1 }
 0x34f   : >> { %v10705_v21 = vpop.f32.mrf.mxu2  ;;  %v1806_v50 = vadd.f32 %v1805_v55, %v10444_v44 }
 0x350   : >> { %16239 = vst [vmem:[#allocation65_spill] sm:$0xff] %v10705_v21 }
 0x351   : >> { %1868 = vmatmul.f32.gmra.mxu0 %v16232_v49  ;;  %2085 = vmatmul.f32.gmra.mxu1 %v16235_v0  ;;  %v10711_v45 = vpop.f32.mrf.mxu3  ;;  %v2019_v23 = vadd.f32 %v2018_v15, %v1806_v50 }
 0x352   : >> { %16241 = vst [vmem:[#allocation66_spill] sm:$0xff] %v10711_v45 }
 0x353   : >> { %v10726_v44 = vand.u32 4294901760, %v2019_v23 }
 0x356   : >> { %v1809_v57 = vpop.f32.mrf.mxu0  ;;  %v2026_v20 = vpop.f32.mrf.mxu1 }
 0x357   : >> { %v1810_v6 = vadd.f32 %v1809_v57, %v10457_v33 }
 0x359   : >> { %1872 = vmatmul.f32.gmra.mxu0 %v16235_v0  ;;  %2089 = vmatmul.f32.gmra.mxu1 %v16238_v26  ;;  %v2023_v0 = vadd.f32 %v2022_v5, %v1810_v6  ;;  %v10730_v15 = vpop.f32.mrf.mxu3 }
 0x35b   : >> { %v10719_v33 = vand.u32 4294901760, %v2023_v0 }
 0x35e   : >> { %v1813_v36 = vpop.f32.mrf.mxu0  ;;  %v2030_v49 = vpop.f32.mrf.mxu1 }
 0x35f   : >> { %v1814_v12 = vadd.f32 %v1813_v36, %v10470_v14  ;;  %v10717_v14 = vpop.f32.mrf.mxu2 }
 0x360   : >> { %16242 = vst [vmem:[#allocation96_spill] sm:$0xff] %v10717_v14 }
 0x361   : >> { %v2027_v18 = vadd.f32 %v2026_v20, %v1814_v12  ;;  %1876 = vmatmul.f32.gmra.mxu0 %v16238_v26  ;;  %2093 = vmatmul.f32.gmra.mxu1 %v16240_v47  ;;  %v16243_v12 = vld [vmem:[#allocation67_spill] sm:$0xff]  ;;  %v10764_v7 = vpop.f32.mrf.mxu3 }
 0x362   : >> { %16244 = vst [vmem:[#allocation67_spill] sm:$0xff] %v10730_v15 }
 0x363   : >> { %v10714_v8 = vand.u32 4294901760, %v2027_v18  ;;  %16249 = vst [vmem:[#allocation98_spill] sm:$0xff] %v10764_v7 }
 0x365   : >> { %v10724_v20 = vsub.f32 %v2027_v18, %v10714_v8  ;;  %v10741_v18 = vsub.f32 %v2019_v23, %v10726_v44 }
 0x366   : >> { %v1817_v21 = vpop.f32.mrf.mxu0  ;;  %v2034_v6 = vpop.f32.mrf.mxu1 }
 0x367   : >> { %v1818_v54 = vadd.f32 %v1817_v21, %v10483_v16  ;;  %v10733_v16 = vsub.f32 %v2023_v0, %v10719_v33 }
 0x369   : >> { %v2031_v57 = vadd.f32 %v2030_v49, %v1818_v54  ;;  %1880 = vmatmul.f32.gmra.mxu0 %v16240_v47  ;;  %2097 = vmatmul.f32.gmra.mxu1 %v16243_v12  ;;  %v15958_v54 = vand.u32 4294901760, %v10724_v20  ;;  %v16246_v49 = vld [vmem:[#allocation68_spill] sm:$0xff] }
 0x36b   : >> { %v10728_v55 = vand.u32 4294901760, %v2031_v57  ;;  %v2455_v23 = vsub.f32 %v10724_v20, %v15958_v54 }
 0x36d   : >> { %v10736_v5 = vsub.f32 %v2031_v57, %v10728_v55  ;;  %2298 = vmatpush.msra.mxu2 %v10728_v55  ;;  %v10755_v57 = vpop.f32.mrf.mxu2 }
 0x36e   : >> { %v1821_v47 = vpop.f32.mrf.mxu0  ;;  %16247 = vst [vmem:[#allocation68_spill] sm:$0xff] %v10755_v57  ;;  %v2038_v21 = vpop.f32.mrf.mxu1 }
 0x36f   : >> { %v1822_v50 = vadd.f32 %v1821_v47, %v10496_v1  ;;  %2300 = vmatpush.msra.mxu2 %v10714_v8  ;;  %v2448_v26 = vand.u32 4294901760, %v10736_v5  ;;  %v15959_v1 = vand.u32 4294901760, %v10741_v18 }
 0x371   : >> { %v10747_v36 = vadd.f32 %v2034_v6, %v1822_v50  ;;  %1884 = vmatmul.f32.gmra.mxu0 %v16243_v12  ;;  %2101 = vmatmul.f32.gmra.mxu1 %v16246_v49  ;;  %v2449_v0 = vsub.f32 %v10736_v5, %v2448_v26  ;;  %v16248_v12 = vand.u32 4294901760, %v10733_v16  ;;  %v2456_v50 = vand.u32 4294901760, %v2455_v23  ;;  %v16251_v23 = vld [vmem:[#allocation69_spill] sm:$0xff] }
 0x372   : >> { %2302 = vmatpush.msra.mxu2 %v10719_v33  ;;  %v2467_v19 = vsub.f32 %v10741_v18, %v15959_v1 }
 0x373   : >> { %16245 = vst [vmem:[#allocation97_spill] sm:$0xff] %v10747_v36  ;;  %v2450_v47 = vand.u32 4294901760, %v2449_v0  ;;  %v2461_v6 = vsub.f32 %v10733_v16, %v16248_v12 }
 0x374   : >> { %2304 = vmatpush.msra.mxu2 %v10726_v44 }
 0x375   : >> { %2451 = vmatpush.msra.mxu3 %v2450_v47  ;;  %v2462_v12 = vand.u32 4294901760, %v2461_v6  ;;  %v2468_v47 = vand.u32 4294901760, %v2467_v19 }
 0x376   : >> { %2549 = vmatpush.msrb.mxu2 %v10736_v5  ;;  %v1825_v54 = vpop.f32.mrf.mxu0 }
 0x377   : >> { %v1826_v0 = vadd.f32 %v1825_v54, %v10509_v39  ;;  %2457 = vmatpush.msra.mxu3 %v2456_v50  ;;  %v2221_v41 = vpop.trf.xlu0  ;;  %v10783_v54 = vpop.f32.mrf.mxu2 }
 0x378   : >> { %2552 = vmatpush.msrb.mxu2 %v10724_v20  ;;  %v2238_v60 = vsel %vm358_vm0, %v2221_v41, 0  ;;  %16252 = vst [vmem:[#allocation69_spill] sm:$0xff] %v10783_v54  ;;  %v10792_v50 = vpop.f32.mrf.mxu3 }
 0x379   : >> { %v10772_v43 = vadd.f32 %v2038_v21, %v1826_v0  ;;  %v10774_v5 = vand.u32 4294901760, %v2238_v60  ;;  %1888 = vmatmul.f32.gmra.mxu0 %v16246_v49  ;;  %2105 = vmatmul.f32.gmra.mxu1 %v16251_v23  ;;  %v2042_v21 = vpop.f32.mrf.mxu1  ;;  %16253 = vst [vmem:[#allocation100_spill] sm:$0xff] %v10792_v50 }
 0x37a   : >> { %2555 = vmatpush.msrb.mxu2 %v10733_v16  ;;  %2463 = vmatpush.msra.mxu3 %v2462_v12 }
 0x37b   : >> { %16250 = vst [vmem:[#allocation99_spill] sm:$0xff] %v10772_v43  ;;  %v10780_v39 = vsub.f32 %v2238_v60, %v10774_v5 }
 0x37c   : >> { %2558 = vmatpush.msrb.mxu2 %v10741_v18  ;;  %2469 = vmatpush.msra.mxu3 %v2468_v47 }
 0x37d   : >> { %v15960_v41 = vand.u32 4294901760, %v10780_v39  ;;  %2471 = vmatmul.f32.vlgmr.msra.gmra.mxu3 %v10774_v5 }
 0x37e   : >> { %2653 = vmatpush.msrb.mxu3 %v10728_v55  ;;  %v1829_v49 = vpop.f32.mrf.mxu0 }
 0x37f   : >> { %v2308_v19 = vsub.f32 %v10780_v39, %v15960_v41  ;;  %v1830_v60 = vadd.f32 %v1829_v49, %v10522_v31  ;;  %v2222_v6 = vpop.trf.xlu0  ;;  %v10809_v49 = vpop.f32.mrf.mxu2 }
 0x380   : >> { %2655 = vmatpush.msrb.mxu3 %v10714_v8  ;;  %v2241_v0 = vsel %vm358_vm0, %v2222_v6, 0  ;;  %16255 = vst [vmem:[#allocation102_spill] sm:$0xff] %v10809_v49 }
 0x381   : >> { %v2309_v12 = vand.u32 4294901760, %v2308_v19  ;;  %v10796_v47 = vadd.f32 %v2042_v21, %v1830_v60  ;;  %v10798_v1 = vand.u32 4294901760, %v2241_v0  ;;  %1892 = vmatmul.f32.gmra.mxu0 %v16251_v23  ;;  %2109 = vmatmul.f32.gmra.mxu1 %v10241_v58  ;;  %v16256_v23 = vand.u32 4294901760, %v10724_v20 }
 0x382   : >> { %2657 = vmatpush.msrb.mxu3 %v10719_v33 }
 0x383   : >> { %16254 = vst [vmem:[#allocation101_spill] sm:$0xff] %v10796_v47  ;;  %v10804_v31 = vsub.f32 %v2241_v0, %v10798_v1  ;;  %2310 = vmatmul.f32.vlgmr.msra.gmra.mxu2 %v2309_v12  ;;  %v16257_v0 = vand.u32 4294901760, %v10733_v16 }
 0x384   : >> { %2659 = vmatpush.msrb.mxu3 %v10726_v44  ;;  %2772 = vmatpush.msra.mxu2 %v2448_v26 }
 0x385   : >> { %v15962_v21 = vand.u32 4294901760, %v10804_v31  ;;  %2475 = vmatmul.f32.gmra.mxu3 %v10798_v1 }
 0x386   : >> { %2863 = vmatpush.msra.mxu3 %v10728_v55  ;;  %2776 = vmatpush.msra.mxu2 %v16256_v23  ;;  %v1833_v19 = vpop.f32.mrf.mxu0  ;;  %v2046_v55 = vpop.f32.mrf.mxu1  ;;  %v16260_v23 = vand.u32 4294901760, %v10741_v18 }
 0x387   : >> { %v1834_v60 = vadd.f32 %v1833_v19, %v10535_v38  ;;  %v2223_v6 = vpop.trf.xlu0  ;;  %v2316_v26 = vsub.f32 %v10804_v31, %v15962_v21 }
 0x388   : >> { %2865 = vmatpush.msra.mxu3 %v10714_v8  ;;  %2780 = vmatpush.msra.mxu2 %v16257_v0  ;;  %v2244_v12 = vsel %vm358_vm0, %v2223_v6, 0  ;;  %v10828_v8 = vpop.f32.mrf.mxu3 }
 0x389   : >> { %v10822_v41 = vadd.f32 %v2046_v55, %v1834_v60  ;;  %v10825_v20 = vand.u32 4294901760, %v2244_v12  ;;  %1896 = vmatmul.f32.gmra.mxu0 %v10241_v58  ;;  %v2317_v38 = vand.u32 4294901760, %v2316_v26  ;;  %16259 = vst [vmem:[#allocation104_spill] sm:$0xff] %v10828_v8  ;;  %2113 = vmatmul.f32.gmra.mxu1 %v10264_v2  ;;  %v10842_v60 = vpop.f32.mrf.mxu2 }
 0x38a   : >> { %2867 = vmatpush.msra.mxu3 %v10719_v33  ;;  %2784 = vmatpush.msra.mxu2 %v16260_v23  ;;  %16261 = vst [vmem:[#allocation105_spill] sm:$0xff] %v10842_v60 }
 0x38b   : >> { %16258 = vst [vmem:[#allocation103_spill] sm:$0xff] %v10822_v41  ;;  %v10834_v16 = vsub.f32 %v2244_v12, %v10825_v20  ;;  %2318 = vmatmul.f32.gmra.mxu2 %v2317_v38 }
 0x38c   : >> { %2869 = vmatpush.msra.mxu3 %v10726_v44 }
 0x38d   : >> { %v15961_v33 = vand.u32 4294901760, %v10834_v16  ;;  %2479 = vmatmul.f32.gmra.mxu3 %v10825_v20 }
 0x38f   : >> { %v2224_v19 = vpop.trf.xlu0  ;;  %v2324_v58 = vsub.f32 %v10834_v16, %v15961_v33 }
 0x390   : >> { %v2247_v18 = vsel %vm358_vm0, %v2224_v19, 0  ;;  %v10852_v55 = vpop.f32.mrf.mxu3 }
 0x391   : >> { %v10845_v6 = vand.u32 4294901760, %v2247_v18  ;;  %1900 = vmatmul.f32.gmra.mxu0 %v10264_v2  ;;  %v2325_v26 = vand.u32 4294901760, %v2324_v58  ;;  %2117 = vmatmul.f32.gmra.mxu1 %v10287_v10  ;;  %16262 = vst [vmem:[#allocation106_spill] sm:$0xff] %v10852_v55  ;;  %v10863_v58 = vpop.f32.mrf.mxu2 }
 0x392   : >> { %16263 = vst [vmem:[#allocation107_spill] sm:$0xff] %v10863_v58 }
 0x393   : >> { %v10850_v44 = vsub.f32 %v2247_v18, %v10845_v6  ;;  %2326 = vmatmul.f32.gmra.mxu2 %v2325_v26  ;;  %v16264_v18 = vld [vmem:[#allocation73_spill] sm:$0xff] }
 0x395   : >> { %v15963_v0 = vand.u32 4294901760, %v10850_v44  ;;  %2483 = vmatmul.f32.gmra.mxu3 %v10845_v6 }
 0x397   : >> { %v2225_v12 = vpop.trf.xlu0  ;;  %v2332_v38 = vsub.f32 %v10850_v44, %v15963_v0 }
 0x398   : >> { %v2250_v2 = vsel %vm358_vm0, %v2225_v12, 0  ;;  %v10870_v21 = vpop.f32.mrf.mxu3 }
 0x399   : >> { %v10860_v23 = vand.u32 4294901760, %v2250_v2  ;;  %1904 = vmatmul.f32.gmra.mxu0 %v10287_v10  ;;  %v2333_v19 = vand.u32 4294901760, %v2332_v38  ;;  %2121 = vmatmul.f32.gmra.mxu1 %v16264_v18  ;;  %16265 = vst [vmem:[#allocation73_spill] sm:$0xff] %v10870_v21  ;;  %v10884_v21 = vpop.f32.mrf.mxu2 }
 0x39a   : >> { %16267 = vst [vmem:[#allocation76_spill] sm:$0xff] %v10884_v21 }
 0x39b   : >> { %v10867_v26 = vsub.f32 %v2250_v2, %v10860_v23  ;;  %2334 = vmatmul.f32.gmra.mxu2 %v2333_v19 }
 0x39d   : >> { %v15964_v33 = vand.u32 4294901760, %v10867_v26  ;;  %2487 = vmatmul.f32.gmra.mxu3 %v10860_v23 }
 0x39f   : >> { %v2226_v12 = vpop.trf.xlu0  ;;  %v2340_v10 = vsub.f32 %v10867_v26, %v15964_v33 }
 0x3a0   : >> { %v2253_v38 = vsel %vm358_vm0, %v2226_v12, 0  ;;  %v10891_v24 = vpop.f32.mrf.mxu3 }
 0x3a1   : >> { %v10877_v0 = vand.u32 4294901760, %v2253_v38  ;;  %1908 = vmatmul.f32.gmra.mxu0 %v16264_v18  ;;  %v2341_v2 = vand.u32 4294901760, %v2340_v10  ;;  %2125 = vmatmul.f32.gmra.mxu1 %v16266_v56  ;;  %16268 = vst [vmem:[#allocation108_spill] sm:$0xff] %v10891_v24  ;;  %v10902_v13 = vpop.f32.mrf.mxu2 }
 0x3a2   : >> { %16269 = vst [vmem:[#allocation109_spill] sm:$0xff] %v10902_v13 }
 0x3a3   : >> { %v10882_v19 = vsub.f32 %v2253_v38, %v10877_v0  ;;  %2342 = vmatmul.f32.gmra.mxu2 %v2341_v2 }
 0x3a5   : >> { %v15965_v29 = vand.u32 4294901760, %v10882_v19  ;;  %2491 = vmatmul.f32.gmra.mxu3 %v10877_v0 }
 0x3a7   : >> { %v2227_v33 = vpop.trf.xlu0  ;;  %v2348_v12 = vsub.f32 %v10882_v19, %v15965_v29 }
 0x3a8   : >> { %v2256_v18 = vsel %vm358_vm0, %v2227_v33, 0  ;;  %v10912_v24 = vpop.f32.mrf.mxu3 }
 0x3a9   : >> { %v10894_v10 = vand.u32 4294901760, %v2256_v18  ;;  %1912 = vmatmul.f32.gmra.mxu0 %v16266_v56  ;;  %v2349_v38 = vand.u32 4294901760, %v2348_v12  ;;  %2129 = vmatmul.f32.gmra.mxu1 %v10356_v52  ;;  %16270 = vst [vmem:[#allocation110_spill] sm:$0xff] %v10912_v24  ;;  %v10923_v25 = vpop.f32.mrf.mxu2  ;;  %v16273_v24 = vld [vmem:[#allocation27_spill] sm:$0xff] }
 0x3ab   : >> { %v10899_v2 = vsub.f32 %v2256_v18, %v10894_v10  ;;  %2350 = vmatmul.f32.gmra.mxu2 %v2349_v38  ;;  %v16271_v38 = vld [vmem:[#allocation46_spill] sm:$0xff] }
 0x3ac   : >> { %16272 = vst [vmem:[#allocation46_spill] sm:$0xff] %v10923_v25 }
 0x3ad   : >> { %v15966_v3 = vand.u32 4294901760, %v10899_v2  ;;  %2495 = vmatmul.f32.gmra.mxu3 %v10894_v10 }
 0x3af   : >> { %v2228_v29 = vpop.trf.xlu0  ;;  %v2356_v33 = vsub.f32 %v10899_v2, %v15966_v3 }
 0x3b0   : >> { %v2259_v56 = vsel %vm358_vm0, %v2228_v29, 0  ;;  %v10933_v46 = vpop.f32.mrf.mxu3 }
 0x3b1   : >> { %v10909_v12 = vand.u32 4294901760, %v2259_v56  ;;  %1916 = vmatmul.f32.gmra.mxu0 %v10356_v52  ;;  %v2357_v18 = vand.u32 4294901760, %v2356_v33  ;;  %2133 = vmatmul.f32.gmra.mxu1 %v16271_v38  ;;  %16274 = vst [vmem:[#allocation27_spill] sm:$0xff] %v10933_v46  ;;  %v10944_v25 = vpop.f32.mrf.mxu2 }
 0x3b2   : >> { %16275 = vst [vmem:[#allocation111_spill] sm:$0xff] %v10944_v25 }
 0x3b3   : >> { %v10916_v13 = vsub.f32 %v2259_v56, %v10909_v12  ;;  %2358 = vmatmul.f32.gmra.mxu2 %v2357_v18 }
 0x3b5   : >> { %v15967_v21 = vand.u32 4294901760, %v10916_v13  ;;  %2499 = vmatmul.f32.gmra.mxu3 %v10909_v12 }
 0x3b7   : >> { %v2229_v3 = vpop.trf.xlu0  ;;  %v2364_v29 = vsub.f32 %v10916_v13, %v15967_v21 }
 0x3b8   : >> { %v2262_v52 = vsel %vm358_vm0, %v2229_v3, 0  ;;  %v10951_v58 = vpop.f32.mrf.mxu3 }
 0x3b9   : >> { %v10926_v33 = vand.u32 4294901760, %v2262_v52  ;;  %1920 = vmatmul.f32.gmra.mxu0 %v16271_v38  ;;  %v2365_v56 = vand.u32 4294901760, %v2364_v29  ;;  %2137 = vmatmul.f32.gmra.mxu1 %v16273_v24  ;;  %v10964_v25 = vpop.f32.mrf.mxu2 }
 0x3ba   : >> { %16278 = vst [vmem:[#allocation112_spill] sm:$0xff] %v10964_v25 }
 0x3bb   : >> { %v10931_v18 = vsub.f32 %v2262_v52, %v10926_v33  ;;  %2366 = vmatmul.f32.gmra.mxu2 %v2365_v56  ;;  %v16276_v56 = vld [vmem:[#allocation30_spill] sm:$0xff] }
 0x3bc   : >> { %16277 = vst [vmem:[#allocation30_spill] sm:$0xff] %v10951_v58 }
 0x3bd   : >> { %v15968_v28 = vand.u32 4294901760, %v10931_v18  ;;  %2503 = vmatmul.f32.gmra.mxu3 %v10926_v33 }
 0x3bf   : >> { %v2230_v21 = vpop.trf.xlu0  ;;  %v2372_v3 = vsub.f32 %v10931_v18, %v15968_v28 }
 0x3c0   : >> { %v2265_v38 = vsel %vm358_vm0, %v2230_v21, 0 }
 0x3c1   : >> { %v10941_v29 = vand.u32 4294901760, %v2265_v38  ;;  %1924 = vmatmul.f32.gmra.mxu0 %v16273_v24  ;;  %v2373_v52 = vand.u32 4294901760, %v2372_v3  ;;  %2141 = vmatmul.f32.gmra.mxu1 %v16276_v56  ;;  %v10980_v17 = vpop.f32.mrf.mxu2 }
 0x3c2   : >> { %16280 = vst [vmem:[#allocation114_spill] sm:$0xff] %v10980_v17 }
 0x3c3   : >> { %v10948_v46 = vsub.f32 %v2265_v38, %v10941_v29  ;;  %2374 = vmatmul.f32.gmra.mxu2 %v2373_v52 }
 0x3c5   : >> { %v15969_v55 = vand.u32 4294901760, %v10948_v46  ;;  %2507 = vmatmul.f32.gmra.mxu3 %v10941_v29 }
 0x3c7   : >> { %v2231_v21 = vpop.trf.xlu0  ;;  %v2380_v24 = vsub.f32 %v10948_v46, %v15969_v55  ;;  %v10971_v55 = vpop.f32.mrf.mxu3 }
 0x3c8   : >> { %v2268_v3 = vsel %vm358_vm0, %v2231_v21, 0  ;;  %16279 = vst [vmem:[#allocation113_spill] sm:$0xff] %v10971_v55 }
 0x3c9   : >> { %v10958_v28 = vand.u32 4294901760, %v2268_v3  ;;  %1928 = vmatmul.f32.gmra.mxu0 %v16276_v56  ;;  %v2381_v38 = vand.u32 4294901760, %v2380_v24  ;;  %v10999_v9 = vpop.f32.mrf.mxu2 }
 0x3ca   : >> { %16282 = vst [vmem:[#allocation116_spill] sm:$0xff] %v10999_v9 }
 0x3cb   : >> { %v10962_v52 = vsub.f32 %v2268_v3, %v10958_v28  ;;  %2382 = vmatmul.f32.gmra.mxu2 %v2381_v38 }
 0x3cd   : >> { %v15970_v58 = vand.u32 4294901760, %v10962_v52  ;;  %2511 = vmatmul.f32.gmra.mxu3 %v10958_v28 }
 0x3cf   : >> { %v2232_v62 = vpop.trf.xlu0  ;;  %v2388_v21 = vsub.f32 %v10962_v52, %v15970_v58  ;;  %v10989_v60 = vpop.f32.mrf.mxu3 }
 0x3d0   : >> { %v2271_v56 = vsel %vm358_vm0, %v2232_v62, 0  ;;  %16281 = vst [vmem:[#allocation115_spill] sm:$0xff] %v10989_v60 }
 0x3d1   : >> { %v10974_v24 = vand.u32 4294901760, %v2271_v56  ;;  %v2389_v3 = vand.u32 4294901760, %v2388_v21  ;;  %v11017_v30 = vpop.f32.mrf.mxu2 }
 0x3d2   : >> { %16284 = vst [vmem:[#allocation118_spill] sm:$0xff] %v11017_v30 }
 0x3d3   : >> { %v10977_v38 = vsub.f32 %v2271_v56, %v10974_v24  ;;  %2390 = vmatmul.f32.gmra.mxu2 %v2389_v3 }
 0x3d5   : >> { %v15971_v25 = vand.u32 4294901760, %v10977_v38  ;;  %2515 = vmatmul.f32.gmra.mxu3 %v10974_v24 }
 0x3d7   : >> { %v2233_v8 = vpop.trf.xlu0  ;;  %v2396_v58 = vsub.f32 %v10977_v38, %v15971_v25 }
 0x3d8   : >> { %v2274_v62 = vsel %vm358_vm0, %v2233_v8, 0 }
 0x3d9   : >> { %v10987_v55 = vand.u32 4294901760, %v2274_v62  ;;  %v2397_v21 = vand.u32 4294901760, %v2396_v58 }
 0x3db   : >> { %v10992_v56 = vsub.f32 %v2274_v62, %v10987_v55  ;;  %2398 = vmatmul.f32.gmra.mxu2 %v2397_v21  ;;  %v11007_v21 = vpop.f32.mrf.mxu3 }
 0x3dc   : >> { %16283 = vst [vmem:[#allocation117_spill] sm:$0xff] %v11007_v21 }
 0x3dd   : >> { %v15972_v3 = vand.u32 4294901760, %v10992_v56  ;;  %2519 = vmatmul.f32.gmra.mxu3 %v10987_v55 }
 0x3df   : >> { %v2234_v17 = vpop.trf.xlu0  ;;  %v2404_v25 = vsub.f32 %v10992_v56, %v15972_v3 }
 0x3e0   : >> { %v2277_v8 = vsel %vm358_vm0, %v2234_v17, 0 }
 0x3e1   : >> { %v11002_v58 = vand.u32 4294901760, %v2277_v8  ;;  %v2405_v60 = vand.u32 4294901760, %v2404_v25 }
 0x3e3   : >> { %v11005_v62 = vsub.f32 %v2277_v8, %v11002_v58  ;;  %2406 = vmatmul.f32.gmra.mxu2 %v2405_v60  ;;  %v11023_v21 = vpop.f32.mrf.mxu3 }
 0x3e4   : >> { %16285 = vst [vmem:[#allocation119_spill] sm:$0xff] %v11023_v21 }
 0x3e5   : >> { %v15973_v32 = vand.u32 4294901760, %v11005_v62  ;;  %2523 = vmatmul.f32.gmra.mxu3 %v11002_v58 }
 0x3e7   : >> { %v2235_v37 = vpop.trf.xlu0  ;;  %v2412_v3 = vsub.f32 %v11005_v62, %v15973_v32 }
 0x3e8   : >> { %v2280_v17 = vsel %vm358_vm0, %v2235_v37, 0 }
 0x3e9   : >> { %v11015_v9 = vand.u32 4294901760, %v2280_v17  ;;  %v2413_v25 = vand.u32 4294901760, %v2412_v3 }
 0x3eb   : >> { %v11020_v60 = vsub.f32 %v2280_v17, %v11015_v9  ;;  %2414 = vmatmul.f32.gmra.mxu2 %v2413_v25  ;;  %v11035_v25 = vpop.f32.mrf.mxu2 }
 0x3ec   : >> { %16286 = vst [vmem:[#allocation120_spill] sm:$0xff] %v11035_v25 }
 0x3ed   : >> { %v15974_v8 = vand.u32 4294901760, %v11020_v60  ;;  %2527 = vmatmul.f32.gmra.mxu3 %v11015_v9 }
 0x3ef   : >> { %v2236_v63 = vpop.trf.xlu0  ;;  %v2420_v37 = vsub.f32 %v11020_v60, %v15974_v8  ;;  %v11042_v8 = vpop.f32.mrf.mxu3 }
 0x3f0   : >> { %v2283_v32 = vsel %vm358_vm0, %v2236_v63, 0  ;;  %16287 = vst [vmem:[#allocation121_spill] sm:$0xff] %v11042_v8 }
 0x3f1   : >> { %v11030_v3 = vand.u32 4294901760, %v2283_v32  ;;  %v2421_v30 = vand.u32 4294901760, %v2420_v37  ;;  %v16290_v37 = vand.u32 4294901760, %v10804_v31 }
 0x3f3   : >> { %v11033_v17 = vsub.f32 %v2283_v32, %v11030_v3  ;;  %2422 = vmatmul.f32.gmra.mxu2 %v2421_v30  ;;  %v11044_v50 = vpop.f32.mrf.mxu2  ;;  %v16289_v32 = vand.u32 4294901760, %v10780_v39 }
 0x3f4   : >> { %16288 = vst [vmem:[#allocation122_spill] sm:$0xff] %v11044_v50 }
 0x3f5   : >> { %v15975_v21 = vand.u32 4294901760, %v11033_v17  ;;  %2531 = vmatmul.f32.gmra.mxu3 %v11030_v3 }
 0x3f7   : >> { %v2428_v22 = vsub.f32 %v11033_v17, %v15975_v21 }
 0x3f9   : >> { %v2429_v63 = vand.u32 4294901760, %v2428_v22  ;;  %v16291_v22 = vand.u32 4294901760, %v10834_v16 }
 0x3fb   : >> { %2430 = vmatmul.f32.gmra.mxu2 %v2429_v63 }
 0x3fd   : >> { %2663 = vmatmul.f32.vlgmr.msrb.gmra.mxu3 %v16289_v32 }
 0x400   : >> { %v2472_v30 = vpop.f32.mrf.mxu3 }
 0x403   : >> { %2561 = vmatmul.f32.vlgmr.msrb.gmra.mxu2 %v10780_v39  ;;  %v16292_v39 = vand.u32 4294901760, %v10850_v44 }
 0x405   : >> { %2669 = vmatmul.f32.gmra.mxu3 %v16290_v37 }
 0x406   : >> { %v2311_v25 = vpop.f32.mrf.mxu2 }
 0x407   : >> { %v11051_v49 = vadd.f32 %v2472_v30, %v2311_v25 }
 0x408   : >> { %v2476_v40 = vpop.f32.mrf.mxu3 }
 0x40b   : >> { %2566 = vmatmul.f32.gmra.mxu2 %v10804_v31  ;;  %v16293_v31 = vand.u32 4294901760, %v10867_v26 }
 0x40d   : >> { %2675 = vmatmul.f32.gmra.mxu3 %v16291_v22 }
 0x40e   : >> { %v2319_v63 = vpop.f32.mrf.mxu2 }
 0x40f   : >> { %v11056_v21 = vadd.f32 %v2476_v40, %v2319_v63 }
 0x410   : >> { %v2480_v8 = vpop.f32.mrf.mxu3 }
 0x413   : >> { %2571 = vmatmul.f32.gmra.mxu2 %v10834_v16  ;;  %v16294_v16 = vand.u32 4294901760, %v10882_v19 }
 0x415   : >> { %2681 = vmatmul.f32.gmra.mxu3 %v16292_v39 }
 0x416   : >> { %v2327_v32 = vpop.f32.mrf.mxu2 }
 0x417   : >> { %v11061_v37 = vadd.f32 %v2480_v8, %v2327_v32 }
 0x418   : >> { %v2484_v25 = vpop.f32.mrf.mxu3 }
 0x41b   : >> { %2576 = vmatmul.f32.gmra.mxu2 %v10850_v44  ;;  %v16295_v44 = vand.u32 4294901760, %v10899_v2 }
 0x41d   : >> { %2687 = vmatmul.f32.gmra.mxu3 %v16293_v31 }
 0x41e   : >> { %v2335_v30 = vpop.f32.mrf.mxu2 }
 0x41f   : >> { %v11066_v22 = vadd.f32 %v2484_v25, %v2335_v30 }
 0x420   : >> { %v2488_v40 = vpop.f32.mrf.mxu3 }
 0x423   : >> { %2581 = vmatmul.f32.gmra.mxu2 %v10867_v26  ;;  %v16296_v26 = vand.u32 4294901760, %v10916_v13 }
 0x425   : >> { %2693 = vmatmul.f32.gmra.mxu3 %v16294_v16 }
 0x426   : >> { %v2343_v63 = vpop.f32.mrf.mxu2 }
 0x427   : >> { %v11071_v39 = vadd.f32 %v2488_v40, %v2343_v63 }
 0x428   : >> { %v2492_v8 = vpop.f32.mrf.mxu3 }
 0x42b   : >> { %2586 = vmatmul.f32.gmra.mxu2 %v10882_v19  ;;  %v16297_v19 = vand.u32 4294901760, %v10931_v18 }
 0x42d   : >> { %2699 = vmatmul.f32.gmra.mxu3 %v16295_v44 }
 0x42e   : >> { %v2351_v32 = vpop.f32.mrf.mxu2 }
 0x42f   : >> { %v11076_v31 = vadd.f32 %v2492_v8, %v2351_v32 }
 0x430   : >> { %v2496_v25 = vpop.f32.mrf.mxu3 }
 0x433   : >> { %2591 = vmatmul.f32.gmra.mxu2 %v10899_v2  ;;  %v16298_v2 = vand.u32 4294901760, %v10948_v46 }
 0x435   : >> { %2705 = vmatmul.f32.gmra.mxu3 %v16296_v26 }
 0x436   : >> { %v2359_v30 = vpop.f32.mrf.mxu2 }
 0x437   : >> { %v11081_v16 = vadd.f32 %v2496_v25, %v2359_v30 }
 0x438   : >> { %v2500_v40 = vpop.f32.mrf.mxu3 }
 0x43b   : >> { %2596 = vmatmul.f32.gmra.mxu2 %v10916_v13  ;;  %v16299_v13 = vand.u32 4294901760, %v10962_v52 }
 0x43d   : >> { %2711 = vmatmul.f32.gmra.mxu3 %v16297_v19 }
 0x43e   : >> { %v2367_v63 = vpop.f32.mrf.mxu2 }
 0x43f   : >> { %v11086_v44 = vadd.f32 %v2500_v40, %v2367_v63 }
 0x440   : >> { %v2504_v8 = vpop.f32.mrf.mxu3 }
 0x443   : >> { %2601 = vmatmul.f32.gmra.mxu2 %v10931_v18  ;;  %v16300_v18 = vand.u32 4294901760, %v10977_v38 }
 0x445   : >> { %2717 = vmatmul.f32.gmra.mxu3 %v16298_v2 }
 0x446   : >> { %v2375_v32 = vpop.f32.mrf.mxu2 }
 0x447   : >> { %v11091_v26 = vadd.f32 %v2504_v8, %v2375_v32 }
 0x448   : >> { %v2508_v25 = vpop.f32.mrf.mxu3 }
 0x44b   : >> { %2606 = vmatmul.f32.gmra.mxu2 %v10948_v46  ;;  %v16301_v46 = vand.u32 4294901760, %v10992_v56 }
 0x44d   : >> { %2723 = vmatmul.f32.gmra.mxu3 %v16299_v13 }
 0x44e   : >> { %v2383_v30 = vpop.f32.mrf.mxu2 }
 0x44f   : >> { %v11096_v19 = vadd.f32 %v2508_v25, %v2383_v30 }
 0x450   : >> { %v2512_v40 = vpop.f32.mrf.mxu3 }
 0x453   : >> { %2611 = vmatmul.f32.gmra.mxu2 %v10962_v52  ;;  %v16302_v52 = vand.u32 4294901760, %v11005_v62 }
 0x455   : >> { %2729 = vmatmul.f32.gmra.mxu3 %v16300_v18 }
 0x456   : >> { %v2391_v63 = vpop.f32.mrf.mxu2 }
 0x457   : >> { %v11101_v2 = vadd.f32 %v2512_v40, %v2391_v63 }
 0x458   : >> { %v2516_v8 = vpop.f32.mrf.mxu3 }
 0x45b   : >> { %2616 = vmatmul.f32.gmra.mxu2 %v10977_v38  ;;  %v16303_v38 = vand.u32 4294901760, %v11020_v60 }
 0x45d   : >> { %2735 = vmatmul.f32.gmra.mxu3 %v16301_v46 }
 0x45e   : >> { %v2399_v32 = vpop.f32.mrf.mxu2 }
 0x45f   : >> { %v11106_v13 = vadd.f32 %v2516_v8, %v2399_v32 }
 0x460   : >> { %v2520_v25 = vpop.f32.mrf.mxu3 }
 0x463   : >> { %2621 = vmatmul.f32.gmra.mxu2 %v10992_v56  ;;  %v16304_v56 = vand.u32 4294901760, %v11033_v17 }
 0x465   : >> { %2741 = vmatmul.f32.gmra.mxu3 %v16302_v52 }
 0x466   : >> { %v2407_v30 = vpop.f32.mrf.mxu2 }
 0x467   : >> { %v11111_v18 = vadd.f32 %v2520_v25, %v2407_v30 }
 0x468   : >> { %v2524_v40 = vpop.f32.mrf.mxu3 }
 0x46b   : >> { %2626 = vmatmul.f32.gmra.mxu2 %v11005_v62 }
 0x46d   : >> { %2747 = vmatmul.f32.gmra.mxu3 %v16303_v38 }
 0x46e   : >> { %v2415_v63 = vpop.f32.mrf.mxu2 }
 0x46f   : >> { %v11116_v46 = vadd.f32 %v2524_v40, %v2415_v63 }
 0x470   : >> { %v2528_v8 = vpop.f32.mrf.mxu3 }
 0x473   : >> { %2631 = vmatmul.f32.gmra.mxu2 %v11020_v60 }
 0x475   : >> { %2753 = vmatmul.f32.gmra.mxu3 %v16304_v56 }
 0x476   : >> { %v2423_v32 = vpop.f32.mrf.mxu2 }
 0x477   : >> { %v11121_v52 = vadd.f32 %v2528_v8, %v2423_v32 }
 0x478   : >> { %v2532_v25 = vpop.f32.mrf.mxu3 }
 0x47b   : >> { %2636 = vmatmul.f32.gmra.mxu2 %v11033_v17 }
 0x47d   : >> { %2871 = vmatmul.f32.vlgmr.msra.gmra.mxu3 %v10774_v5 }
 0x47e   : >> { %v2431_v62 = vpop.f32.mrf.mxu2 }
 0x47f   : >> { %v11125_v30 = vadd.f32 %v2532_v25, %v2431_v62 }
 0x480   : >> { %v2664_v38 = vpop.f32.mrf.mxu3 }
 0x483   : >> { %2786 = vmatmul.f32.vlgmr.msra.gmra.mxu2 %v10774_v5 }
 0x485   : >> { %2875 = vmatmul.f32.gmra.mxu3 %v10798_v1 }
 0x486   : >> { %v2562_v60 = vpop.f32.mrf.mxu2 }
 0x487   : >> { %v2563_v40 = vadd.f32 %v2562_v60, %v11051_v49 }
 0x488   : >> { %v2670_v63 = vpop.f32.mrf.mxu3 }
 0x489   : >> { %v11130_v56 = vadd.f32 %v2664_v38, %v2563_v40 }
 0x48b   : >> { %16305 = vst [vmem:[#allocation123_spill] sm:$0xff] %v11130_v56  ;;  %2790 = vmatmul.f32.gmra.mxu2 %v10798_v1 }
 0x48d   : >> { %2879 = vmatmul.f32.gmra.mxu3 %v10825_v20 }
 0x48e   : >> { %v2567_v17 = vpop.f32.mrf.mxu2 }
 0x48f   : >> { %v2568_v8 = vadd.f32 %v2567_v17, %v11056_v21 }
 0x490   : >> { %v2676_v32 = vpop.f32.mrf.mxu3 }
 0x491   : >> { %v11135_v25 = vadd.f32 %v2670_v63, %v2568_v8 }
 0x493   : >> { %16306 = vst [vmem:[#allocation124_spill] sm:$0xff] %v11135_v25  ;;  %2794 = vmatmul.f32.gmra.mxu2 %v10825_v20 }
 0x495   : >> { %2883 = vmatmul.f32.gmra.mxu3 %v10845_v6 }
 0x496   : >> { %v2572_v5 = vpop.f32.mrf.mxu2 }
 0x497   : >> { %v2573_v49 = vadd.f32 %v2572_v5, %v11061_v37 }
 0x498   : >> { %v2682_v62 = vpop.f32.mrf.mxu3 }
 0x499   : >> { %v11140_v38 = vadd.f32 %v2676_v32, %v2573_v49 }
 0x49b   : >> { %2798 = vmatmul.f32.gmra.mxu2 %v10845_v6 }
 0x49d   : >> { %2887 = vmatmul.f32.gmra.mxu3 %v10860_v23 }
 0x49e   : >> { %v2577_v1 = vpop.f32.mrf.mxu2 }
 0x49f   : >> { %v2578_v21 = vadd.f32 %v2577_v1, %v11066_v22 }
 0x4a0   : >> { %v2688_v60 = vpop.f32.mrf.mxu3 }
 0x4a1   : >> { %v11145_v40 = vadd.f32 %v2682_v62, %v2578_v21 }
 0x4a3   : >> { %2802 = vmatmul.f32.gmra.mxu2 %v10860_v23 }
 0x4a5   : >> { %2891 = vmatmul.f32.gmra.mxu3 %v10877_v0 }
 0x4a6   : >> { %v2582_v20 = vpop.f32.mrf.mxu2 }
 0x4a7   : >> { %v2583_v37 = vadd.f32 %v2582_v20, %v11071_v39 }
 0x4a8   : >> { %v2694_v63 = vpop.f32.mrf.mxu3 }
 0x4a9   : >> { %v11150_v17 = vadd.f32 %v2688_v60, %v2583_v37 }
 0x4ab   : >> { %2806 = vmatmul.f32.gmra.mxu2 %v10877_v0 }
 0x4ad   : >> { %2895 = vmatmul.f32.gmra.mxu3 %v10894_v10 }
 0x4ae   : >> { %v2587_v6 = vpop.f32.mrf.mxu2 }
 0x4af   : >> { %v2588_v22 = vadd.f32 %v2587_v6, %v11076_v31 }
 0x4b0   : >> { %v2700_v8 = vpop.f32.mrf.mxu3 }
 0x4b1   : >> { %v11155_v32 = vadd.f32 %v2694_v63, %v2588_v22 }
 0x4b3   : >> { %2810 = vmatmul.f32.gmra.mxu2 %v10894_v10 }
 0x4b5   : >> { %2899 = vmatmul.f32.gmra.mxu3 %v10909_v12 }
 0x4b6   : >> { %v2592_v23 = vpop.f32.mrf.mxu2 }
 0x4b7   : >> { %v2593_v39 = vadd.f32 %v2592_v23, %v11081_v16 }
 0x4b8   : >> { %v2706_v5 = vpop.f32.mrf.mxu3 }
 0x4b9   : >> { %v11160_v49 = vadd.f32 %v2700_v8, %v2593_v39 }
 0x4bb   : >> { %2814 = vmatmul.f32.gmra.mxu2 %v10909_v12 }
 0x4bd   : >> { %2903 = vmatmul.f32.gmra.mxu3 %v10926_v33 }
 0x4be   : >> { %v2597_v0 = vpop.f32.mrf.mxu2 }
 0x4bf   : >> { %v2598_v31 = vadd.f32 %v2597_v0, %v11086_v44 }
 0x4c0   : >> { %v11165_v62 = vpop.f32.mrf.mxu3 }
 0x4c1   : >> { %v11167_v1 = vadd.f32 %v2706_v5, %v2598_v31 }
 0x4c3   : >> { %2818 = vmatmul.f32.gmra.mxu2 %v10926_v33 }
 0x4c5   : >> { %2907 = vmatmul.f32.gmra.mxu3 %v10941_v29 }
 0x4c6   : >> { %v11171_v10 = vpop.f32.mrf.mxu2 }
 0x4c8   : >> { %v11173_v16 = vpop.f32.mrf.mxu3 }
 0x4cb   : >> { %2822 = vmatmul.f32.gmra.mxu2 %v10941_v29 }
 0x4cd   : >> { %2911 = vmatmul.f32.gmra.mxu3 %v10958_v28 }
 0x4ce   : >> { %v11177_v12 = vpop.f32.mrf.mxu2 }
 0x4d0   : >> { %v11179_v21 = vpop.f32.mrf.mxu3 }
 0x4d3   : >> { %2826 = vmatmul.f32.gmra.mxu2 %v10958_v28 }
 0x4d5   : >> { %2915 = vmatmul.f32.gmra.mxu3 %v10974_v24 }
 0x4d6   : >> { %v11183_v44 = vpop.f32.mrf.mxu2 }
 0x4d8   : >> { %v2730_v33 = vpop.f32.mrf.mxu3 }
 0x4db   : >> { %2830 = vmatmul.f32.gmra.mxu2 %v10974_v24 }
 0x4dd   : >> { %2919 = vmatmul.f32.gmra.mxu3 %v10987_v55 }
 0x4de   : >> { %v2617_v60 = vpop.f32.mrf.mxu2 }
 0x4df   : >> { %v2618_v42 = vadd.f32 %v2617_v60, %v11106_v13 }
 0x4e0   : >> { %v2736_v20 = vpop.f32.mrf.mxu3 }
 0x4e3   : >> { %2834 = vmatmul.f32.gmra.mxu2 %v10987_v55 }
 0x4e5   : >> { %2923 = vmatmul.f32.gmra.mxu3 %v11002_v58 }
 0x4e6   : >> { %v2622_v29 = vpop.f32.mrf.mxu2 }
 0x4e7   : >> { %v2623_v34 = vadd.f32 %v2622_v29, %v11111_v18 }
 0x4e8   : >> { %v2742_v37 = vpop.f32.mrf.mxu3 }
 0x4e9   : >> { %v2737_v53 = vadd.f32 %v2736_v20, %v2623_v34 }
 0x4eb   : >> { %2838 = vmatmul.f32.gmra.mxu2 %v11002_v58 }
 0x4ed   : >> { %2927 = vmatmul.f32.gmra.mxu3 %v11015_v9 }
 0x4ee   : >> { %v2627_v28 = vpop.f32.mrf.mxu2 }
 0x4ef   : >> { %v2628_v27 = vadd.f32 %v2627_v28, %v11116_v46 }
 0x4f0   : >> { %v2748_v63 = vpop.f32.mrf.mxu3 }
 0x4f3   : >> { %2842 = vmatmul.f32.gmra.mxu2 %v11015_v9 }
 0x4f5   : >> { %2931 = vmatmul.f32.gmra.mxu3 %v11030_v3 }
 0x4f6   : >> { %v2632_v24 = vpop.f32.mrf.mxu2 }
 0x4f7   : >> { %v2633_v18 = vadd.f32 %v2632_v24, %v11121_v52 }
 0x4f8   : >> { %v2754_v6 = vpop.f32.mrf.mxu3 }
 0x4fb   : >> { %2846 = vmatmul.f32.gmra.mxu2 %v11030_v3 }
 0x4fe   : >> { %v2637_v22 = vpop.f32.mrf.mxu2 }
 0x500   : >> { %v11194_v55 = vpop.f32.mrf.mxu3 }
 0x501   : >> { %16307 = vst [vmem:[#allocation125_spill] sm:$0xff] %v11194_v55  ;;  %v2731_v55 = vadd.f32 %v2730_v33, %v2618_v42 }
 0x506   : >> { %v11196_v8 = vpop.f32.mrf.mxu2 }
 0x507   : >> { %16308 = vst [vmem:[#allocation126_spill] sm:$0xff] %v11196_v8 }
 0x508   : >> { %v11198_v23 = vpop.f32.mrf.mxu3 }
 0x509   : >> { %16309 = vst [vmem:[#allocation127_spill] sm:$0xff] %v11198_v23  ;;  %v2743_v23 = vadd.f32 %v2742_v37, %v2628_v27 }
 0x50e   : >> { %v11200_v58 = vpop.f32.mrf.mxu2 }
 0x50f   : >> { %16310 = vst [vmem:[#allocation128_spill] sm:$0xff] %v11200_v58 }
 0x510   : >> { %v11202_v39 = vpop.f32.mrf.mxu3 }
 0x516   : >> { %v11204_v5 = vpop.f32.mrf.mxu2 }
 0x518   : >> { %v11206_v9 = vpop.f32.mrf.mxu3 }
 0x51e   : >> { %v11208_v0 = vpop.f32.mrf.mxu2 }
 0x520   : >> { %v11210_v31 = vpop.f32.mrf.mxu3 }
 0x526   : >> { %v11212_v3 = vpop.f32.mrf.mxu2 }
 0x528   : >> { %v11214_v50 = vpop.f32.mrf.mxu3 }
 0x52e   : >> { %v2807_v51 = vpop.f32.mrf.mxu2 }
 0x530   : >> { %v11216_v7 = vpop.f32.mrf.mxu3 }
 0x536   : >> { %v11218_v43 = vpop.f32.mrf.mxu2 }
 0x538   : >> { %v2900_v36 = vpop.f32.mrf.mxu3 }
 0x53e   : >> { %v2815_v41 = vpop.f32.mrf.mxu2 }
 0x540   : >> { %v2904_v47 = vpop.f32.mrf.mxu3 }
 0x546   : >> { %v2819_v54 = vpop.f32.mrf.mxu2 }
 0x548   : >> { %v2908_v15 = vpop.f32.mrf.mxu3 }
 0x54e   : >> { %v2823_v48 = vpop.f32.mrf.mxu2 }
 0x550   : >> { %v2912_v35 = vpop.f32.mrf.mxu3 }
 0x556   : >> { %v2827_v45 = vpop.f32.mrf.mxu2 }
 0x558   : >> { %v2916_v57 = vpop.f32.mrf.mxu3 }
 0x55e   : >> { %v2831_v14 = vpop.f32.mrf.mxu2 }
 0x55f   : >> { %v2832_v56 = vadd.f32 %v2831_v14, %v2731_v55  ;;  %v2638_v14 = vadd.f32 %v2637_v22, %v11125_v30 }
 0x560   : >> { %v2920_v11 = vpop.f32.mrf.mxu3 }
 0x561   : >> { %v2917_v34 = vadd.f32 %v2916_v57, %v2832_v56  ;;  %v2755_v52 = vadd.f32 %v2754_v6, %v2638_v14  ;;  %v2613_v57 = vadd.f32 %v11183_v44, %v11101_v2 }
 0x563   : >> { %v2725_v37 = vadd.f32 %v11179_v21, %v2613_v57 }
 0x565   : >> { %v2828_v30 = vadd.f32 %v2827_v45, %v2725_v37  ;;  %v2800_v45 = vadd.f32 %v11208_v0, %v11145_v40  ;;  %v16313_v40 = vld [vmem:[#allocation127_spill] sm:$0xff] }
 0x566   : >> { %v2835_v4 = vpop.f32.mrf.mxu2 }
 0x567   : >> { %v2836_v61 = vadd.f32 %v2835_v4, %v2737_v53  ;;  %v2749_v53 = vadd.f32 %v2748_v63, %v2633_v18 }
 0x568   : >> { %v2924_v8 = vpop.f32.mrf.mxu3 }
 0x569   : >> { %v11223_v59 = vadd.f32 %v2920_v11, %v2836_v61  ;;  %v2608_v61 = vadd.f32 %v11177_v12, %v11096_v19  ;;  %v2816_v19 = vadd.f32 %v2815_v41, %v11167_v1  ;;  %v11240_v12 = vadd.f32 %v2912_v35, %v2828_v30 }
 0x56a   : >> { %v2812_v35 = vadd.f32 %v11218_v43, %v11160_v49 }
 0x56b   : >> { %2959 = vmax.xlane.f32.xlu1 %v11223_v59  ;;  %v2719_v13 = vadd.f32 %v11173_v16, %v2608_v61  ;;  %v2603_v16 = vadd.f32 %v11171_v10, %v11091_v26 }
 0x56c   : >> { %v11257_v41 = vadd.f32 %v11216_v7, %v2812_v35  ;;  %v16311_v7 = vld [vmem:[#allocation124_spill] sm:$0xff] }
 0x56d   : >> { %v2824_v46 = vadd.f32 %v2823_v48, %v2719_v13  ;;  %v2901_v48 = vadd.f32 %v2900_v36, %v2816_v19  ;;  %v2713_v28 = vadd.f32 %v11165_v62, %v2603_v16  ;;  %v11254_v36 = vadd.f32 %v11206_v9, %v2800_v45  ;;  %v16316_v62 = vld [vmem:[#allocation125_spill] sm:$0xff] }
 0x56e   : >> { %v2839_v58 = vpop.f32.mrf.mxu2 }
 0x56f   : >> { %v2840_v25 = vadd.f32 %v2839_v58, %v2743_v23  ;;  %v2909_v60 = vadd.f32 %v2908_v15, %v2824_v46  ;;  %v2808_v15 = vadd.f32 %v2807_v51, %v11155_v32  ;;  %v2820_v2 = vadd.f32 %v2819_v54, %v2713_v28 }
 0x570   : >> { %v2928_v4 = vpop.f32.mrf.mxu3  ;;  %v2796_v51 = vadd.f32 %v11204_v5, %v11140_v38  ;;  %v2804_v54 = vadd.f32 %v11212_v3, %v11150_v17  ;;  %v16314_v38 = vld [vmem:[#allocation123_spill] sm:$0xff]  ;;  %v16315_v17 = vld [vmem:[#allocation126_spill] sm:$0xff] }
 0x571   : >> { %v11227_v29 = vadd.f32 %v2924_v8, %v2840_v25  ;;  %v2893_v21 = vadd.f32 %v11214_v50, %v2808_v15  ;;  %v11246_v44 = vadd.f32 %v2904_v47, %v2820_v2  ;;  %v16312_v47 = vld [vmem:[#allocation128_spill] sm:$0xff]  ;;  %v2788_v49 = vadd.f32 %v16315_v17, %v16314_v38 }
 0x572   : >> { %v11266_v50 = vadd.f32 %v11202_v39, %v2796_v51  ;;  %v11269_v43 = vadd.f32 %v11210_v31, %v2804_v54  ;;  %v2792_v26 = vadd.f32 %v16312_v47, %v16311_v7 }
 0x573   : >> { %2961 = vmax.xlane.f32.xlu0 %v11227_v29  ;;  %2957 = vmax.xlane.f32.xlu1 %v2917_v34  ;;  %v11282_v1 = vadd.f32 %v16316_v62, %v2788_v49  ;;  %v11336_v62 = vpop.f32.mrf.mxu0 }
 0x574   : >> { %v11276_v32 = vadd.f32 %v16313_v40, %v2792_v26  ;;  %16317 = vst [vmem:[#allocation124_spill] sm:$0xff] %v11336_v62 }
 0x576   : >> { %v2843_v11 = vpop.f32.mrf.mxu2 }
 0x577   : >> { %v2844_v42 = vadd.f32 %v2843_v11, %v2749_v53 }
 0x578   : >> { %v2932_v33 = vpop.f32.mrf.mxu3 }
 0x579   : >> { %v2929_v27 = vadd.f32 %v2928_v4, %v2844_v42 }
 0x57b   : >> { %2963 = vmax.xlane.f32.xlu2 %v2929_v27 }
 0x57e   : >> { %v2847_v25 = vpop.f32.mrf.mxu2 }
 0x57f   : >> { %v2848_v56 = vadd.f32 %v2847_v25, %v2755_v52 }
 0x581   : >> { %v2933_v20 = vadd.f32 %v2932_v33, %v2848_v56 }
 0x583   : >> { %2953 = vmax.xlane.f32.xlu2 %v2909_v60  ;;  %2965 = vmax.xlane.f32.xlu1 %v2933_v20 }
 0x58b   : >> { %2949 = vmax.xlane.f32.xlu2 %v2901_v48  ;;  %2955 = vmax.xlane.f32.xlu1 %v11240_v12 }
 0x593   : >> { %2945 = vmax.xlane.f32.xlu2 %v2893_v21  ;;  %2951 = vmax.xlane.f32.xlu1 %v11246_v44 }
 0x59b   : >> { %2941 = vmax.xlane.f32.xlu2 %v11254_v36  ;;  %2947 = vmax.xlane.f32.xlu1 %v11257_v41 }
 0x5a3   : >> { %2939 = vmax.xlane.f32.xlu2 %v11266_v50  ;;  %2943 = vmax.xlane.f32.xlu1 %v11269_v43 }
 0x5ab   : >> { %2937 = vmax.xlane.f32.xlu2 %v11276_v32 }
 0x5b3   : >> { %2935 = vmax.xlane.f32.xlu2 %v11282_v1 }
 0x5de   : >> { %v2960_v10 = vpop.xlane.xlu1 %2959 }
 0x5df   : >> { %v2979_v13 = vsub.f32 %v11223_v59, %v2960_v10 }
 0x5e1   : >> { %v3007_v52 = vmul.f32 1.442695, %v2979_v13 }
 0x5e6   : >> { %v2958_v63 = vpop.xlane.xlu1 %2957  ;;  %v2962_v31 = vpop.xlane.xlu0 %2961 }
 0x5e7   : >> { %v2978_v24 = vsub.f32 %v2917_v34, %v2958_v63  ;;  %v2980_v34 = vsub.f32 %v11227_v29, %v2962_v31  ;;  %v16327_v31 = vld [vmem:[#allocation35_spill] sm:$0xff] }
 0x5e9   : >> { %v3005_v6 = vmul.f32 1.442695, %v2978_v24  ;;  %v3009_v11 = vmul.f32 1.442695, %v2980_v34  ;;  %v11342_v24 = vpop.f32.mrf.mxu0 }
 0x5ea   : >> { %16318 = vst [vmem:[#allocation128_spill] sm:$0xff] %v11342_v24 }
 0x5eb   : >> { %9019 = vpow2.f32 %v3005_v6 }
 0x5ee   : >> { %v2964_v22 = vpop.xlane.xlu2 %2963 }
 0x5ef   : >> { %v2981_v55 = vsub.f32 %v2929_v27, %v2964_v22 }
 0x5f1   : >> { %v3011_v8 = vmul.f32 1.442695, %v2981_v55  ;;  %v11285_v23 = vpop.eup %9019  ;;  %v11347_v6 = vpop.f32.mrf.mxu0  ;;  %v16321_v55 = vld [vmem:[#allocation33_spill] sm:$0xff] }
 0x5f2   : >> { %3037 = vadd.xlane.f32.xlu2 %v11285_v23  ;;  %16319 = vst [vmem:[#allocation127_spill] sm:$0xff] %v11347_v6  ;;  %v16398_v6 = vld [vmem:[#allocation100_spill] sm:$0xff] }
 0x5f3   : >> { %9021 = vpow2.f32 %v3011_v8  ;;  %v16322_v8 = vld [vmem:[#allocation31_spill] sm:$0xff] }
 0x5f6   : >> { %v2954_v58 = vpop.xlane.xlu2 %2953  ;;  %v2966_v39 = vpop.xlane.xlu1 %2965 }
 0x5f7   : >> { %v2976_v5 = vsub.f32 %v2909_v60, %v2954_v58  ;;  %v2982_v9 = vsub.f32 %v2933_v20, %v2966_v39  ;;  %v16324_v58 = vld [vmem:[#allocation34_spill] sm:$0xff] }
 0x5f9   : >> { %v11288_v0 = vpop.eup %9021  ;;  %v3001_v3 = vmul.f32 1.442695, %v2976_v5  ;;  %v3013_v18 = vmul.f32 1.442695, %v2982_v9  ;;  %v11349_v22 = vpop.f32.mrf.mxu0 }
 0x5fa   : >> { %3043 = vadd.xlane.f32.xlu1 %v11288_v0  ;;  %16320 = vst [vmem:[#allocation123_spill] sm:$0xff] %v11349_v22  ;;  %v11358_v9 = vpop.f32.mrf.mxu1 }
 0x5fb   : >> { %9023 = vpow2.f32 %v3001_v3  ;;  %16326 = vst [vmem:[#allocation33_spill] sm:$0xff] %v11358_v9 }
 0x5fc   : >> { %9025 = vpow2.f32 %v3013_v18 }
 0x5fe   : >> { %v2950_v53 = vpop.xlane.xlu2 %2949  ;;  %v2956_v27 = vpop.xlane.xlu1 %2955 }
 0x5ff   : >> { %v2974_v4 = vsub.f32 %v2901_v48, %v2950_v53  ;;  %v2977_v33 = vsub.f32 %v11240_v12, %v2956_v27 }
 0x601   : >> { %v11292_v61 = vpop.eup %9023  ;;  %v2997_v42 = vmul.f32 1.442695, %v2974_v4  ;;  %v3003_v37 = vmul.f32 1.442695, %v2977_v33 }
 0x602   : >> { %v11294_v14 = vpop.eup %9025  ;;  %3033 = vadd.xlane.f32.xlu2 %v11292_v61  ;;  %v11363_v4 = vpop.f32.mrf.mxu1 }
 0x603   : >> { %9027 = vpow2.f32 %v2997_v42  ;;  %3045 = vadd.xlane.f32.xlu1 %v11294_v14  ;;  %16329 = vst [vmem:[#allocation34_spill] sm:$0xff] %v11363_v4 }
 0x604   : >> { %9029 = vpow2.f32 %v3009_v11 }
 0x606   : >> { %v2946_v46 = vpop.xlane.xlu2 %2945  ;;  %v2952_v60 = vpop.xlane.xlu1 %2951 }
 0x607   : >> { %v2972_v29 = vsub.f32 %v2893_v21, %v2946_v46  ;;  %v2975_v48 = vsub.f32 %v11246_v44, %v2952_v60 }
 0x609   : >> { %v11299_v25 = vpop.eup %9027  ;;  %v2993_v57 = vmul.f32 1.442695, %v2972_v29  ;;  %v2999_v15 = vmul.f32 1.442695, %v2975_v48 }
 0x60a   : >> { %v11301_v56 = vpop.eup %9029  ;;  %3029 = vadd.xlane.f32.xlu2 %v11299_v25 }
 0x60b   : >> { %9031 = vpow2.f32 %v2993_v57  ;;  %3041 = vadd.xlane.f32.xlu1 %v11301_v56 }
 0x60c   : >> { %9033 = vpow2.f32 %v3007_v52 }
 0x60e   : >> { %v2942_v20 = vpop.xlane.xlu2 %2941  ;;  %v2948_v12 = vpop.xlane.xlu1 %2947 }
 0x60f   : >> { %v2970_v59 = vsub.f32 %v11254_v36, %v2942_v20  ;;  %v2973_v45 = vsub.f32 %v11257_v41, %v2948_v12  ;;  %v11373_v20 = vpop.f32.mrf.mxu1 }
 0x610   : >> { %16331 = vst [vmem:[#allocation129_spill] sm:$0xff] %v11373_v20 }
 0x611   : >> { %v11307_v19 = vpop.eup %9031  ;;  %v2989_v30 = vmul.f32 1.442695, %v2970_v59  ;;  %v2995_v51 = vmul.f32 1.442695, %v2973_v45  ;;  %v16334_v45 = vld [vmem:[#allocation59_spill] sm:$0xff] }
 0x612   : >> { %v11309_v16 = vpop.eup %9033  ;;  %3025 = vadd.xlane.f32.xlu2 %v11307_v19 }
 0x613   : >> { %9035 = vpow2.f32 %v2989_v30  ;;  %3039 = vadd.xlane.f32.xlu1 %v11309_v16 }
 0x614   : >> { %9037 = vpow2.f32 %v3003_v37 }
 0x615   : >> { %9039 = vpow2.f32 %v2999_v15 }
 0x616   : >> { %v2940_v28 = vpop.xlane.xlu2 %2939  ;;  %v2944_v54 = vpop.xlane.xlu1 %2943 }
 0x617   : >> { %v2971_v47 = vsub.f32 %v11269_v43, %v2944_v54  ;;  %v2969_v41 = vsub.f32 %v11266_v50, %v2940_v28 }
 0x619   : >> { %v11314_v2 = vpop.eup %9035  ;;  %v2991_v26 = vmul.f32 1.442695, %v2971_v47 }
 0x61a   : >> { %v11316_v21 = vpop.eup %9037  ;;  %3021 = vadd.xlane.f32.xlu2 %v11314_v2 }
 0x61b   : >> { %3035 = vadd.xlane.f32.xlu1 %v11316_v21  ;;  %v11322_v7 = vpop.eup %9039 }
 0x61e   : >> { %v2938_v35 = vpop.xlane.xlu2 %2937 }
 0x61f   : >> { %v2968_v36 = vsub.f32 %v11276_v32, %v2938_v35  ;;  %v2987_v32 = vmul.f32 1.442695, %v2969_v41  ;;  %v16335_v35 = vld [vmem:[#allocation62_spill] sm:$0xff] }
 0x621   : >> { %v2985_v44 = vmul.f32 1.442695, %v2968_v36  ;;  %v1075_v36 = vadd.f32 %v16335_v35, %v16334_v45 }
 0x623   : >> { %9041 = vpow2.f32 %v2985_v44  ;;  %3031 = vadd.xlane.f32.xlu1 %v11322_v7 }
 0x624   : >> { %9043 = vpow2.f32 %v2995_v51 }
 0x625   : >> { %9045 = vpow2.f32 %v2991_v26 }
 0x626   : >> { %v2936_v17 = vpop.xlane.xlu2 %2935  ;;  %9047 = vpow2.f32 %v2987_v32  ;;  %v16336_v32 = vld [vmem:[#allocation63_spill] sm:$0xff] }
 0x627   : >> { %v2967_v43 = vsub.f32 %v11282_v1, %v2936_v17  ;;  %v11353_v1 = vpop.f32.mrf.mxu0  ;;  %v16337_v17 = vld [vmem:[#allocation14_spill] sm:$0xff] }
 0x628   : >> { %16323 = vst [vmem:[#allocation126_spill] sm:$0xff] %v11353_v1 }
 0x629   : >> { %v11326_v40 = vpop.eup %9041  ;;  %v2983_v10 = vmul.f32 1.442695, %v2967_v43  ;;  %v1079_v43 = vadd.f32 %v16337_v17, %v16336_v32 }
 0x62a   : >> { %v11328_v38 = vpop.eup %9043  ;;  %3017 = vadd.xlane.f32.xlu2 %v11326_v40 }
 0x62b   : >> { %3027 = vadd.xlane.f32.xlu1 %v11328_v38  ;;  %v11333_v49 = vpop.eup %9045  ;;  %9049 = vpow2.f32 %v2983_v10  ;;  %v16338_v10 = vld [vmem:[#allocation96_spill] sm:$0xff] }
 0x62c   : >> { %v11339_v63 = vpop.eup %9047 }
 0x62f   : >> { %v11356_v39 = vpop.f32.mrf.mxu0 }
 0x630   : >> { %16325 = vst [vmem:[#allocation125_spill] sm:$0xff] %v11356_v39 }
 0x631   : >> { %v11344_v50 = vpop.eup %9049 }
 0x633   : >> { %3023 = vadd.xlane.f32.xlu1 %v11333_v49 }
 0x637   : >> { %v11361_v53 = vpop.f32.mrf.mxu0 }
 0x638   : >> { %16328 = vst [vmem:[#allocation31_spill] sm:$0xff] %v11361_v53 }
 0x63b   : >> { %3019 = vadd.xlane.f32.xlu1 %v11339_v63 }
 0x63f   : >> { %v11371_v33 = vpop.f32.mrf.mxu0 }
 0x640   : >> { %16330 = vst [vmem:[#allocation35_spill] sm:$0xff] %v11371_v33 }
 0x643   : >> { %3015 = vadd.xlane.f32.xlu1 %v11344_v50 }
 0x653   : >> { %3737 = vxpose.xlu2.b32.start [1/4] (short) %v16321_v55, 128  ;;  %v1325_v55 = vadd.f32 %v16338_v10, %v1075_v36  ;;  %v16342_v36 = vld [vmem:[#allocation16_spill] sm:$0xff] }
 0x65b   : >> { %3738 = vxpose.xlu2.b32.cont [2/4] (short) %v16322_v8, 128 }
 0x663   : >> { %3739 = vxpose.xlu2.b32.cont [3/4] (short) %v16324_v58, 128 }
 0x665   : >> { %v3038_v5 = vpop.xlane.xlu2 %3037 }
 0x666   : >> { %9051 = vrcp.f32 %v3038_v5  ;;  %v3223_v59 = vand.u32 2147483648, %v3038_v5  ;;  %vm3217_vm2 = vweird.f32 %v3038_v5  ;;  %v3221_v37 = vand.u32 2147483647, %v3038_v5 }
 0x668   : >> { %v3224_v26 = vor.u32 1.1754944e-38, %v3223_v59  ;;  %vm3222_vm6 = vcmp.eq.f32.partialorder %v3221_v37, 8.507059e+37 }
 0x66b   : >> { %3740 = vxpose.xlu2.b32.end [4/4] (short) %v16327_v31, 128 }
 0x66c   : >> { %v9052_v3 = vpop.eup %9051 }
 0x66d   : >> { %v3044_v18 = vpop.xlane.xlu1 %3043  ;;  %v3213_v34 = vmul.f32 %v9052_v3, %v3038_v5  ;;  %vm3218_vm1 = vweird.f32 %v9052_v3 }
 0x66e   : >> { %9053 = vrcp.f32 %v3044_v18  ;;  %vm11377_vm3 = vmor %vm3217_vm2, %vm3218_vm1  ;;  %v3268_v54 = vand.u32 2147483648, %v3044_v18  ;;  %vm3262_vm5 = vweird.f32 %v3044_v18  ;;  %v3266_v41 = vand.u32 2147483647, %v3044_v18 }
 0x66f   : >> { %v3214_v11 = vsub.f32 1.0, %v3213_v34 }
 0x670   : >> { %vm3267_vm8 = vcmp.eq.f32.partialorder %v3266_v41, 8.507059e+37 }
 0x671   : >> { %v3215_v46 = vmul.f32 %v9052_v3, %v3214_v11  ;;  %v3269_v11 = vor.u32 1.1754944e-38, %v3268_v54 }
 0x673   : >> { %v3216_v60 = vadd.f32 %v9052_v3, %v3215_v46 }
 0x674   : >> { %v9054_v42 = vpop.eup %9053 }
 0x675   : >> { %v3258_v27 = vmul.f32 %v9054_v42, %v3044_v18  ;;  %v11365_v13 = vpop.xlane.xlu2 %3033  ;;  %vm3263_vm4 = vweird.f32 %v9054_v42  ;;  %v3220_v51 = vsel %vm11377_vm3, %v9052_v3, %v3216_v60  ;;  %v16339_v3 = vld [vmem:[#allocation68_spill] sm:$0xff] }
 0x676   : >> { %v11367_v29 = vpop.xlane.xlu1 %3045  ;;  %vm3264_vm7 = vmor %vm3262_vm5, %vm3263_vm4  ;;  %v3225_v31 = vsel %vm3222_vm6, %v3224_v26, %v3220_v51  ;;  %v1330_v34 = vadd.f32 %v16339_v3, %v1079_v43  ;;  %v16343_v51 = vld [vmem:[#allocation15_spill] sm:$0xff]  ;;  %vm3187_vm12 = vweird.f32 %v11365_v13 }
 0x677   : >> { %v3259_v52 = vsub.f32 1.0, %v3258_v27  ;;  %9055 = vrcp.f32 %v11367_v29  ;;  %v16340_v27 = vld [vmem:[#allocation66_spill] sm:$0xff]  ;;  %v3226_v59 = vmul.f32 %v11285_v23, %v3225_v31  ;;  %v3281_v45 = vand.u32 2147483647, %v11367_v29 }
 0x678   : >> { %9057 = vrcp.f32 %v11365_v13  ;;  %v1619_v46 = vadd.f32 %v16340_v27, %v1325_v55  ;;  %v11417_v54 = vadd.f32 %v16343_v51, %v16342_v36  ;;  %v3193_v23 = vand.u32 2147483648, %v11365_v13 }
 0x679   : >> { %v3260_v57 = vmul.f32 %v9054_v42, %v3259_v52  ;;  %v1869_v52 = vpop.f32.mrf.mxu0  ;;  %vm3277_vm10 = vweird.f32 %v11367_v29  ;;  %v3191_v55 = vand.u32 2147483647, %v11365_v13  ;;  %vm3282_vm13 = vcmp.eq.f32.partialorder %v3281_v45, 8.507059e+37 }
 0x67a   : >> { %v11427_v17 = vadd.f32 %v1869_v52, %v1619_v46  ;;  %v11440_v3 = vor.u32 1.1754944e-38, %v3193_v23 }
 0x67b   : >> { %v3261_v28 = vadd.f32 %v9054_v42, %v3260_v57  ;;  %v3283_v57 = vand.u32 2147483648, %v11367_v29  ;;  %vm11451_vm15 = vcmp.eq.f32.partialorder %v3191_v55, 8.507059e+37 }
 0x67d   : >> { %v11375_v30 = vpop.eup %9055  ;;  %v11381_v12 = vpop.xlane.xlu2 %3029  ;;  %v3265_v5 = vsel %vm3264_vm7, %v9054_v42, %v3261_v28 }
 0x67e   : >> { %v11383_v15 = vpop.eup %9057  ;;  %v3273_v44 = vmul.f32 %v11375_v30, %v11367_v29  ;;  %v11391_v47 = vpop.xlane.xlu1 %3041  ;;  %v3270_v60 = vsel %vm3267_vm8, %v3269_v11, %v3265_v5  ;;  %vm3278_vm9 = vweird.f32 %v11375_v30  ;;  %v11435_v5 = vand.u32 4294901760, %v3226_v59 }
 0x67f   : >> { %9059 = vrcp.f32 %v11391_v47  ;;  %v3183_v58 = vmul.f32 %v11383_v15, %v11365_v13  ;;  %v11408_v42 = vpop.f32.mrf.mxu1  ;;  %v3271_v43 = vmul.f32 %v11288_v0, %v3270_v60  ;;  %vm3279_vm11 = vmor %vm3277_vm10, %vm3278_vm9  ;;  %v3163_v0 = vand.u32 2147483648, %v11381_v12 }
 0x680   : >> { %v3274_v8 = vsub.f32 1.0, %v3273_v44  ;;  %9061 = vrcp.f32 %v11381_v12  ;;  %16341 = vst [vmem:[#allocation59_spill] sm:$0xff] %v11408_v42  ;;  %v16344_v44 = vld [vmem:[#allocation67_spill] sm:$0xff]  ;;  %vm3188_vm14 = vweird.f32 %v11383_v15  ;;  %v3251_v52 = vand.u32 2147483647, %v11391_v47 }
 0x681   : >> { %v3184_v48 = vsub.f32 1.0, %v3183_v58  ;;  %v11420_v26 = vadd.f32 %v16344_v44, %v1330_v34  ;;  %v11448_v46 = vand.u32 4294901760, %v3271_v43  ;;  %v11458_v60 = vsub.f32 %v3226_v59, %v11435_v5  ;;  %vm11492_vm3 = vmor %vm3187_vm12, %vm3188_vm14 }
 0x682   : >> { %v3275_v18 = vmul.f32 %v11375_v30, %v3274_v8  ;;  %v3284_v8 = vor.u32 1.1754944e-38, %v3283_v57  ;;  %v3253_v57 = vand.u32 2147483648, %v11391_v47  ;;  %vm3247_vm1 = vweird.f32 %v11391_v47 }
 0x683   : >> { %v3185_v31 = vmul.f32 %v11383_v15, %v3184_v48  ;;  %v11469_v51 = vor.u32 1.1754944e-38, %v3163_v0  ;;  %vm11496_vm4 = vcmp.eq.f32.partialorder %v3251_v52, 8.507059e+37  ;;  %vm3157_vm5 = vweird.f32 %v11381_v12 }
 0x684   : >> { %v3276_v28 = vadd.f32 %v11375_v30, %v3275_v18  ;;  %v3254_v0 = vor.u32 1.1754944e-38, %v3253_v57 }
 0x685   : >> { %v11406_v37 = vpop.eup %9059  ;;  %v11413_v35 = vpop.xlane.xlu2 %3025 }
 0x686   : >> { %v3243_v41 = vmul.f32 %v11406_v37, %v11391_v47  ;;  %v11425_v32 = vpop.xlane.xlu1 %3039  ;;  %v11432_v10 = vpop.eup %9061  ;;  %v3280_v29 = vsel %vm3279_vm11, %v11375_v30, %v3276_v28  ;;  %v3186_v28 = vadd.f32 %v11383_v15, %v3185_v31  ;;  %vm3248_vm2 = vweird.f32 %v11406_v37 }
 0x687   : >> { %9063 = vrcp.f32 %v11425_v32  ;;  %v3285_v11 = vsel %vm3282_vm13, %v3284_v8, %v3280_v29  ;;  %v3153_v18 = vmul.f32 %v11432_v10, %v11381_v12  ;;  %vm3249_vm6 = vmor %vm3247_vm1, %vm3248_vm2  ;;  %vm3232_vm7 = vweird.f32 %v11425_v32 }
 0x688   : >> { %v3244_v58 = vsub.f32 1.0, %v3243_v41  ;;  %9065 = vrcp.f32 %v11413_v35  ;;  %v3286_v27 = vmul.f32 %v11294_v14, %v3285_v11  ;;  %v3161_v14 = vand.u32 2147483647, %v11381_v12  ;;  %v11477_v41 = vpop.f32.mrf.mxu1 }
 0x689   : >> { %16347 = vst [vmem:[#allocation62_spill] sm:$0xff] %v11477_v41  ;;  %v3154_v55 = vsub.f32 1.0, %v3153_v18  ;;  %v3236_v13 = vand.u32 2147483647, %v11425_v32  ;;  %v15981_v18 = vand.u32 4294901760, %v11458_v60  ;;  %v3238_v47 = vand.u32 2147483648, %v11425_v32 }
 0x68a   : >> { %v3245_v34 = vmul.f32 %v11406_v37, %v3244_v58  ;;  %v11465_v45 = vand.u32 4294901760, %v3286_v27  ;;  %v11486_v58 = vsub.f32 %v3271_v43, %v11448_v46  ;;  %v3190_v43 = vsel %vm11492_vm3, %v11383_v15, %v3186_v28 }
 0x68b   : >> { %v3155_v57 = vmul.f32 %v11432_v10, %v3154_v55  ;;  %vm3158_vm9 = vweird.f32 %v11432_v10  ;;  %v3133_v29 = vand.u32 2147483648, %v11413_v35  ;;  %vm11572_vm11 = vcmp.eq.f32.partialorder %v3161_v14, 8.507059e+37 }
 0x68c   : >> { %v3246_v44 = vadd.f32 %v11406_v37, %v3245_v34  ;;  %3288 = vmatpush.xpose.msra.mxu0 %v11465_v45  ;;  %3535 = vmatpush.xpose.msrb.mxu3 %v11465_v45  ;;  %v11483_v8 = vsub.f32 %v3286_v27, %v11465_v45  ;;  %vm3237_vm12 = vcmp.eq.f32.partialorder %v3236_v13, 8.507059e+37  ;;  %vm11591_vm13 = vmor %vm3157_vm5, %vm3158_vm9  ;;  %vm3127_vm14 = vweird.f32 %v11413_v35 }
 0x68d   : >> { %v11460_v48 = vpop.eup %9063  ;;  %v11467_v36 = vpop.xlane.xlu2 %3021  ;;  %v11567_v30 = vadd.f32 %v11432_v10, %v3155_v57 }
 0x68e   : >> { %v3228_v59 = vmul.f32 %v11460_v48, %v11425_v32  ;;  %v11475_v23 = vpop.xlane.xlu1 %3035  ;;  %9067 = vrcp.f32 %v11467_v36  ;;  %v11501_v11 = vpop.eup %9065  ;;  %3467 = vmatpush.xpose.msrb.mxu2 %v11483_v8  ;;  %vm3233_vm8 = vweird.f32 %v11460_v48  ;;  %v3250_v15 = vsel %vm3249_vm6, %v11406_v37, %v3246_v44 }
 0x68f   : >> { %9069 = vrcp.f32 %v11475_v23  ;;  %v15980_v52 = vand.u32 4294901760, %v11483_v8  ;;  %v3255_v28 = vsel %vm11496_vm4, %v3254_v0, %v3250_v15  ;;  %v3123_v31 = vmul.f32 %v11501_v11, %v11413_v35  ;;  %vm11541_vm10 = vmor %vm3232_vm7, %vm3233_vm8 }
 0x690   : >> { %v3229_v34 = vsub.f32 1.0, %v3228_v59  ;;  %3290 = vmatpush.xpose.msra.mxu0 %v11448_v46  ;;  %3537 = vmatpush.xpose.msrb.mxu3 %v11448_v46  ;;  %v15982_v59 = vand.u32 4294901760, %v11486_v58  ;;  %v3256_v44 = vmul.f32 %v11301_v56, %v3255_v28  ;;  %v3195_v56 = vsel %vm11451_vm15, %v11440_v3, %v3190_v43  ;;  %v11581_v57 = vpop.f32.mrf.mxu1 }
 0x691   : >> { %v3355_v55 = vsub.f32 %v11483_v8, %v15980_v52  ;;  %v3239_v43 = vor.u32 1.1754944e-38, %v3238_v47  ;;  %v3124_v1 = vsub.f32 1.0, %v3123_v31  ;;  %16356 = vst [vmem:[#allocation63_spill] sm:$0xff] %v11581_v57  ;;  %v3196_v31 = vmul.f32 %v11292_v61, %v3195_v56 }
 0x692   : >> { %v3230_v27 = vmul.f32 %v11460_v48, %v3229_v34  ;;  %3470 = vmatpush.xpose.msrb.mxu2 %v11486_v58  ;;  %v11556_v28 = vand.u32 4294901760, %v3256_v44  ;;  %v3361_v41 = vsub.f32 %v11486_v58, %v15982_v59  ;;  %v3131_v59 = vand.u32 2147483647, %v11413_v35 }
 0x693   : >> { %v3356_v32 = vand.u32 4294901760, %v3355_v55  ;;  %v3160_v61 = vsel %vm11591_vm13, %v11432_v10, %v11567_v30  ;;  %v3206_v56 = vand.u32 2147483647, %v11475_v23  ;;  %v11621_v13 = vand.u32 4294901760, %v3196_v31 }
 0x694   : >> { %v3231_v37 = vadd.f32 %v11460_v48, %v3230_v27  ;;  %v11533_v34 = vpop.eup %9067  ;;  %v11552_v27 = vsub.f32 %v11458_v60, %v15981_v18  ;;  %3292 = vmatpush.xpose.msra.mxu0 %v11556_v28  ;;  %3539 = vmatpush.xpose.msrb.mxu3 %v11556_v28  ;;  %v3362_v0 = vand.u32 4294901760, %v3361_v41  ;;  %v3208_v41 = vand.u32 2147483648, %v11475_v23 }
 0x695   : >> { %v11554_v15 = vpop.eup %9069  ;;  %3357 = vmatpush.xpose.msra.mxu1 %v3356_v32  ;;  %v3093_v47 = vmul.f32 %v11533_v34, %v11467_v36  ;;  %vm3128_vm1 = vweird.f32 %v11501_v11  ;;  %vm11631_vm2 = vcmp.eq.f32.partialorder %v3131_v59, 8.507059e+37  ;;  %vm3097_vm3 = vweird.f32 %v11467_v36 }
 0x696   : >> { %v11558_v52 = vpop.xlane.xlu1 %3031  ;;  %v3235_v3 = vsel %vm11541_vm10, %v11460_v48, %v3231_v37  ;;  %v3198_v18 = vmul.f32 %v11554_v15, %v11475_v23  ;;  %v11579_v48 = vsub.f32 %v3256_v44, %v11556_v28  ;;  %v11595_v44 = vor.u32 1.1754944e-38, %v3133_v29  ;;  %vm11677_vm9 = vmor %vm3127_vm14, %vm3128_vm1 }
 0x697   : >> { %9071 = vrcp.f32 %v11558_v52  ;;  %v3240_v14 = vsel %vm3237_vm12, %v3239_v43, %v3235_v3  ;;  %v3125_v3 = vmul.f32 %v11501_v11, %v3124_v1  ;;  %v3094_v30 = vsub.f32 1.0, %v3093_v47 }
 0x698   : >> { %v3199_v37 = vsub.f32 1.0, %v3198_v18  ;;  %3473 = vmatpush.xpose.msrb.mxu2 %v11579_v48  ;;  %v3241_v18 = vmul.f32 %v11309_v16, %v3240_v14  ;;  %v15983_v32 = vand.u32 4294901760, %v11579_v48  ;;  %vm3203_vm15 = vweird.f32 %v11554_v15 }
 0x699   : >> { %3363 = vmatpush.xpose.msra.mxu1 %v3362_v0  ;;  %vm3202_vm4 = vweird.f32 %v11475_v23  ;;  %vm11638_vm5 = vcmp.eq.f32.partialorder %v3206_v56, 8.507059e+37  ;;  %v3126_v57 = vadd.f32 %v11501_v11, %v3125_v3  ;;  %v3209_v59 = vor.u32 1.1754944e-38, %v3208_v41 }
 0x69a   : >> { %v3200_v12 = vmul.f32 %v11554_v15, %v3199_v37  ;;  %v11610_v16 = vand.u32 4294901760, %v3241_v18  ;;  %v3367_v43 = vsub.f32 %v11579_v48, %v15983_v32  ;;  %v3101_v32 = vand.u32 2147483647, %v11467_v36  ;;  %vm3204_vm6 = vmor %vm3202_vm4, %vm3203_vm15 }
 0x69b   : >> { %v3095_v53 = vmul.f32 %v11533_v34, %v3094_v30  ;;  %v11653_v56 = vsub.f32 %v3196_v31, %v11621_v13  ;;  %v11665_v30 = vpop.f32.mrf.mxu1  ;;  %v3103_v31 = vand.u32 2147483648, %v11467_v36  ;;  %vm3172_vm8 = vweird.f32 %v11558_v52 }
 0x69c   : >> { %v3201_v37 = vadd.f32 %v11554_v15, %v3200_v12  ;;  %3294 = vmatpush.xpose.msra.mxu0 %v11610_v16  ;;  %v3368_v0 = vand.u32 4294901760, %v3367_v43  ;;  %3541 = vmatpush.xpose.msrb.mxu3 %v11610_v16  ;;  %v11643_v43 = vsub.f32 %v3241_v18, %v11610_v16  ;;  %v3165_v18 = vsel %vm11572_vm11, %v11469_v51, %v3160_v61 }
 0x69d   : >> { %v11615_v10 = vpop.eup %9071  ;;  %v11619_v14 = vpop.xlane.xlu2 %3017  ;;  %16363 = vst [vmem:[#allocation14_spill] sm:$0xff] %v11665_v30  ;;  %v3178_v51 = vand.u32 2147483648, %v11558_v52  ;;  %v11691_v35 = vadd.f32 %v11533_v34, %v3095_v53  ;;  %vm3098_vm10 = vweird.f32 %v11533_v34  ;;  %vm11713_vm12 = vcmp.eq.f32.partialorder %v3101_v32, 8.507059e+37 }
 0x69e   : >> { %v3168_v1 = vmul.f32 %v11615_v10, %v11558_v52  ;;  %9073 = vrcp.f32 %v11619_v14  ;;  %v11629_v47 = vpop.xlane.xlu1 %3027  ;;  %3369 = vmatpush.xpose.msra.mxu1 %v3368_v0  ;;  %3476 = vmatpush.xpose.msrb.mxu2 %v11643_v43  ;;  %v3205_v23 = vsel %vm3204_vm6, %v11554_v15, %v3201_v37  ;;  %vm3173_vm7 = vweird.f32 %v11615_v10  ;;  %vm11728_vm13 = vmor %vm3097_vm3, %vm3098_vm10 }
 0x69f   : >> { %9075 = vrcp.f32 %v11629_v47  ;;  %v3210_v41 = vsel %vm11638_vm5, %v3209_v59, %v3205_v23  ;;  %v15984_v15 = vand.u32 4294901760, %v11643_v43  ;;  %v3176_v37 = vand.u32 2147483647, %v11558_v52  ;;  %vm11696_vm11 = vmor %vm3172_vm8, %vm3173_vm7 }
 0x6a0   : >> { %v3169_v39 = vsub.f32 1.0, %v3168_v1  ;;  %3296 = vmatpush.xpose.msra.mxu0 %v11435_v5  ;;  %3543 = vmatpush.xpose.msrb.mxu3 %v11435_v5  ;;  %v3130_v0 = vsel %vm11677_vm9, %v11501_v11, %v3126_v57  ;;  %v3179_v61 = vor.u32 1.1754944e-38, %v3178_v51  ;;  %v3100_v51 = vsel %vm11728_vm13, %v11533_v34, %v11691_v35 }
 0x6a1   : >> { %v3373_v1 = vsub.f32 %v11643_v43, %v15984_v15  ;;  %vm3177_vm14 = vcmp.eq.f32.partialorder %v3176_v37, 8.507059e+37  ;;  %v3146_v59 = vand.u32 2147483647, %v11629_v47  ;;  %vm3067_vm15 = vweird.f32 %v11619_v14 }
 0x6a2   : >> { %v3170_v3 = vmul.f32 %v11615_v10, %v3169_v39  ;;  %v3211_v39 = vmul.f32 %v11316_v21, %v3210_v41  ;;  %v3166_v21 = vmul.f32 %v11299_v25, %v3165_v18  ;;  %3479 = vmatpush.xpose.msrb.mxu2 %v11458_v60  ;;  %v15985_v18 = vand.u32 4294901760, %v11653_v56 }
 0x6a3   : >> { %v3374_v57 = vand.u32 4294901760, %v3373_v1  ;;  %v3104_v41 = vor.u32 1.1754944e-38, %v3103_v31  ;;  %v3135_v31 = vsel %vm11631_vm2, %v11595_v44, %v3130_v0  ;;  %v3148_v0 = vand.u32 2147483648, %v11629_v47 }
 0x6a4   : >> { %v11671_v55 = vpop.eup %9073  ;;  %v3171_v29 = vadd.f32 %v11615_v10, %v3170_v3  ;;  %v11701_v52 = vand.u32 4294901760, %v3211_v39  ;;  %v3391_v44 = vsub.f32 %v11653_v56, %v15985_v18  ;;  %v3073_v32 = vand.u32 2147483648, %v11619_v14 }
 0x6a5   : >> { %v11703_v25 = vpop.eup %9075  ;;  %v3063_v11 = vmul.f32 %v11671_v55, %v11619_v14  ;;  %3375 = vmatpush.xpose.msra.mxu1 %v3374_v57  ;;  %vm3142_vm2 = vweird.f32 %v11629_v47  ;;  %vm11776_vm3 = vcmp.eq.f32.partialorder %v3146_v59, 8.507059e+37  ;;  %v3105_v18 = vsel %vm11713_vm12, %v3104_v41, %v3100_v51 }
 0x6a6   : >> { %v11707_v53 = vpop.xlane.xlu1 %3023  ;;  %v3175_v23 = vsel %vm11696_vm11, %v11615_v10, %v3171_v29  ;;  %v3138_v15 = vmul.f32 %v11703_v25, %v11629_v47  ;;  %3298 = vmatpush.xpose.msra.mxu0 %v11701_v52  ;;  %3545 = vmatpush.xpose.msrb.mxu3 %v11701_v52  ;;  %v11722_v1 = vsub.f32 %v3211_v39, %v11701_v52  ;;  %v11733_v10 = vand.u32 4294901760, %v3166_v21 }
 0x6a7   : >> { %9077 = vrcp.f32 %v11707_v53  ;;  %v3180_v39 = vsel %vm3177_vm14, %v3179_v61, %v3175_v23  ;;  %v3064_v37 = vsub.f32 1.0, %v3063_v11  ;;  %vm3143_vm1 = vweird.f32 %v11703_v25  ;;  %v11766_v23 = vpop.f32.mrf.mxu1 }
 0x6a8   : >> { %v3139_v36 = vsub.f32 1.0, %v3138_v15  ;;  %3482 = vmatpush.xpose.msrb.mxu2 %v11722_v1  ;;  %v15986_v29 = vand.u32 4294901760, %v11722_v1  ;;  %v3181_v57 = vmul.f32 %v11322_v7, %v3180_v39  ;;  %v3136_v15 = vmul.f32 %v11307_v19, %v3135_v31  ;;  %16373 = vst [vmem:[#allocation96_spill] sm:$0xff] %v11766_v23  ;;  %vm11787_vm4 = vmor %vm3142_vm2, %vm3143_vm1 }
 0x6a9   : >> { %v16372_v7 = vand.u32 4294901760, %v11552_v27  ;;  %v11764_v11 = vsub.f32 %v3166_v21, %v11733_v10  ;;  %v3071_v61 = vand.u32 2147483647, %v11619_v14  ;;  %v3065_v27 = vmul.f32 %v11671_v55, %v3064_v37 }
 0x6aa   : >> { %v3140_v12 = vmul.f32 %v11703_v25, %v3139_v36  ;;  %3300 = vmatpush.xpose.msra.mxu0 %v11621_v13  ;;  %3547 = vmatpush.xpose.msrb.mxu3 %v11621_v13  ;;  %v3385_v34 = vsub.f32 %v11722_v1, %v15986_v29  ;;  %v11761_v35 = vand.u32 4294901760, %v3181_v57  ;;  %v11796_v47 = vand.u32 4294901760, %v3136_v15 }
 0x6ab   : >> { %3381 = vmatpush.xpose.msra.mxu1 %v16372_v7  ;;  %vm3068_vm5 = vweird.f32 %v11671_v55  ;;  %v3392_v30 = vand.u32 4294901760, %v3391_v44  ;;  %v3066_v23 = vadd.f32 %v11671_v55, %v3065_v27  ;;  %v3118_v51 = vand.u32 2147483648, %v11707_v53 }
 0x6ac   : >> { %v3141_v19 = vadd.f32 %v11703_v25, %v3140_v12  ;;  %3485 = vmatpush.xpose.msrb.mxu2 %v11653_v56  ;;  %v3386_v31 = vand.u32 4294901760, %v3385_v34  ;;  %v11781_v39 = vsub.f32 %v3181_v57, %v11761_v35  ;;  %v3149_v34 = vor.u32 1.1754944e-38, %v3148_v0  ;;  %vm11835_vm7 = vmor %vm3067_vm15, %vm3068_vm5 }
 0x6ad   : >> { %v11772_v36 = vpop.eup %9077  ;;  %v15987_v0 = vand.u32 4294901760, %v11764_v11  ;;  %v11820_v44 = vsub.f32 %v3136_v15, %v11796_v47  ;;  %v3106_v27 = vmul.f32 %v11314_v2, %v3105_v18  ;;  %vm11839_vm8 = vcmp.eq.f32.partialorder %v3071_v61, 8.507059e+37 }
 0x6ae   : >> { %v11783_v7 = vpop.xlane.xlu1 %3019  ;;  %v3108_v37 = vmul.f32 %v11772_v36, %v11707_v53  ;;  %3302 = vmatpush.xpose.msra.mxu0 %v11761_v35  ;;  %3549 = vmatpush.xpose.msrb.mxu3 %v11761_v35  ;;  %v3145_v59 = vsel %vm11787_vm4, %v11703_v25, %v3141_v19  ;;  %v15990_v57 = vand.u32 4294901760, %v11781_v39  ;;  %v3116_v25 = vand.u32 2147483647, %v11707_v53 }
 0x6af   : >> { %9079 = vrcp.f32 %v11783_v7  ;;  %3387 = vmatpush.xpose.msra.mxu1 %v3386_v31  ;;  %v3150_v31 = vsel %vm11776_vm3, %v3149_v34, %v3145_v59  ;;  %vm3113_vm6 = vweird.f32 %v11772_v36  ;;  %vm3112_vm9 = vweird.f32 %v11707_v53  ;;  %v2082_v59 = vpop.f32.mrf.mxu1 }
 0x6b0   : >> { %v3109_v29 = vsub.f32 1.0, %v3108_v37  ;;  %3488 = vmatpush.xpose.msrb.mxu2 %v11781_v39  ;;  %v3151_v19 = vmul.f32 %v11328_v38, %v3150_v31  ;;  %v3397_v3 = vsub.f32 %v11781_v39, %v15990_v57  ;;  %v3070_v34 = vsel %vm11835_vm7, %v11671_v55, %v3066_v23  ;;  %vm11862_vm11 = vmor %vm3112_vm9, %vm3113_vm6 }
 0x6b1   : >> { %vm11849_vm10 = vcmp.eq.f32.partialorder %v3116_v25, 8.507059e+37  ;;  %v3119_v55 = vor.u32 1.1754944e-38, %v3118_v51  ;;  %v11869_v23 = vand.u32 4294901760, %v3106_v27  ;;  %v15988_v31 = vand.u32 4294901760, %v11820_v44 }
 0x6b2   : >> { %v3110_v41 = vmul.f32 %v11772_v36, %v3109_v29  ;;  %3304 = vmatpush.xpose.msra.mxu0 %v11733_v10  ;;  %3551 = vmatpush.xpose.msrb.mxu3 %v11733_v10  ;;  %v11824_v38 = vand.u32 4294901760, %v3151_v19  ;;  %v3398_v21 = vand.u32 4294901760, %v3397_v3  ;;  %v3403_v29 = vsub.f32 %v11764_v11, %v15987_v0 }
 0x6b3   : >> { %3393 = vmatpush.xpose.msra.mxu1 %v3392_v30  ;;  %v3074_v30 = vor.u32 1.1754944e-38, %v3073_v32  ;;  %v3086_v51 = vand.u32 2147483647, %v11783_v7  ;;  %v3088_v15 = vand.u32 2147483648, %v11783_v7  ;;  %v2083_v14 = vadd.f32 %v2082_v59, %v11427_v17 }
 0x6b4   : >> { %v3111_v18 = vadd.f32 %v11772_v36, %v3110_v41  ;;  %3491 = vmatpush.xpose.msrb.mxu2 %v11764_v11  ;;  %v11856_v37 = vsub.f32 %v3151_v19, %v11824_v38  ;;  %v3404_v19 = vand.u32 4294901760, %v3403_v29  ;;  %v3415_v2 = vsub.f32 %v11820_v44, %v15988_v31 }
 0x6b5   : >> { %v11829_v12 = vpop.eup %9079  ;;  %vm3082_vm13 = vweird.f32 %v11783_v7  ;;  %v3089_v59 = vor.u32 1.1754944e-38, %v3088_v15  ;;  %vm3087_vm15 = vcmp.eq.f32.partialorder %v3086_v51, 8.507059e+37  ;;  %v11921_v31 = vand.u32 4294901760, %v2083_v14 }
 0x6b6   : >> { %v3078_v61 = vmul.f32 %v11829_v12, %v11783_v7  ;;  %v11858_v32 = vpop.xlane.xlu1 %3015  ;;  %3306 = vmatpush.xpose.msra.mxu0 %v11824_v38  ;;  %3553 = vmatpush.xpose.msrb.mxu3 %v11824_v38  ;;  %v3115_v3 = vsel %vm11862_vm11, %v11772_v36, %v3111_v18  ;;  %v15989_v41 = vand.u32 4294901760, %v11856_v37  ;;  %vm3083_vm12 = vweird.f32 %v11829_v12  ;;  %v16386_v18 = vld [vmem:[#allocation69_spill] sm:$0xff] }
 0x6b7   : >> { %9081 = vrcp.f32 %v11858_v32  ;;  %3399 = vmatpush.xpose.msra.mxu1 %v3398_v21  ;;  %v3120_v0 = vsel %vm11849_vm10, %v3119_v55, %v3115_v3  ;;  %v11891_v53 = vadd.f32 %v16386_v18, %v11417_v54  ;;  %v1873_v55 = vpop.f32.mrf.mxu0  ;;  %vm3084_vm14 = vmor %vm3082_vm13, %vm3083_vm12  ;;  %v3416_v51 = vand.u32 4294901760, %v3415_v2  ;;  %v16389_v2 = vld [vmem:[#allocation97_spill] sm:$0xff] }
 0x6b8   : >> { %v3079_v25 = vsub.f32 1.0, %v3078_v61  ;;  %3494 = vmatpush.xpose.msrb.mxu2 %v11856_v37  ;;  %v3075_v61 = vsel %vm11839_vm8, %v3074_v30, %v3070_v34  ;;  %v3121_v36 = vmul.f32 %v11333_v49, %v3120_v0  ;;  %v3409_v29 = vsub.f32 %v11856_v37, %v15989_v41  ;;  %v16387_v34 = vld [vmem:[#allocation101_spill] sm:$0xff] }
 0x6b9   : >> { %v11904_v17 = vand.u32 4294901760, %v16387_v34  ;;  %v3076_v3 = vmul.f32 %v11326_v40, %v3075_v61  ;;  %v1874_v15 = vadd.f32 %v1873_v55, %v11420_v26  ;;  %v3058_v41 = vand.u32 2147483648, %v11858_v32 }
 0x6ba   : >> { %v3080_v21 = vmul.f32 %v11829_v12, %v3079_v25  ;;  %3308 = vmatpush.xpose.msra.mxu0 %v11796_v47  ;;  %3555 = vmatpush.xpose.msrb.mxu3 %v11796_v47  ;;  %v11901_v0 = vand.u32 4294901760, %v3121_v36  ;;  %v3410_v54 = vand.u32 4294901760, %v3409_v29  ;;  %v11910_v25 = vsub.f32 %v3106_v27, %v11869_v23  ;;  %v16388_v29 = vld [vmem:[#allocation103_spill] sm:$0xff] }
 0x6bb   : >> { %3405 = vmatpush.xpose.msra.mxu1 %v3404_v19  ;;  %v11919_v18 = vand.u32 4294901760, %v16388_v29  ;;  %v11931_v26 = vand.u32 4294901760, %v3076_v3  ;;  %v11950_v55 = vsub.f32 %v2083_v14, %v11921_v31  ;;  %vm3052_vm2 = vweird.f32 %v11858_v32 }
 0x6bc   : >> { %v3081_v49 = vadd.f32 %v11829_v12, %v3080_v21  ;;  %3497 = vmatpush.xpose.msrb.mxu2 %v11820_v44  ;;  %v11915_v19 = vsub.f32 %v3121_v36, %v11901_v0  ;;  %v11960_v9 = vsub.f32 %v16387_v34, %v11904_v17  ;;  %v3059_v14 = vor.u32 1.1754944e-38, %v3058_v41  ;;  %v16392_v34 = vld [vmem:[#allocation98_spill] sm:$0xff] }
 0x6bd   : >> { %v9082_v30 = vpop.eup %9081 }
 0x6be   : >> { %v3048_v7 = vmul.f32 %v9082_v30, %v11858_v32  ;;  %v3085_v21 = vsel %vm3084_vm14, %v11829_v12, %v3081_v49  ;;  %3310 = vmatpush.xpose.msra.mxu0 %v11901_v0  ;;  %3557 = vmatpush.xpose.msrb.mxu3 %v11901_v0  ;;  %v15991_v36 = vand.u32 4294901760, %v11915_v19  ;;  %v2086_v12 = vpop.f32.mrf.mxu1  ;;  %v3056_v49 = vand.u32 2147483647, %v11858_v32 }
 0x6bf   : >> { %v3090_v40 = vsel %vm3087_vm15, %v3089_v59, %v3085_v21  ;;  %3411 = vmatpush.xpose.msra.mxu1 %v3410_v54  ;;  %vm3053_vm1 = vweird.f32 %v9082_v30  ;;  %v11940_v54 = vand.u32 4294901760, %v16389_v2  ;;  %v1877_v4 = vpop.f32.mrf.mxu0 }
 0x6c0   : >> { %v3049_v27 = vsub.f32 1.0, %v3048_v7  ;;  %v3091_v61 = vmul.f32 %v11339_v63, %v3090_v40  ;;  %3500 = vmatpush.xpose.msrb.mxu2 %v11915_v19  ;;  %v3421_v63 = vsub.f32 %v11915_v19, %v15991_v36  ;;  %v16390_v7 = vld [vmem:[#allocation99_spill] sm:$0xff]  ;;  %v11947_v40 = vsub.f32 %v16388_v29, %v11919_v18  ;;  %vm3054_vm3 = vmor %vm3052_vm2, %vm3053_vm1 }
 0x6c1   : >> { %v11943_v21 = vand.u32 4294901760, %v16390_v7  ;;  %v2087_v29 = vadd.f32 %v2086_v12, %v1874_v15  ;;  %vm3057_vm4 = vcmp.eq.f32.partialorder %v3056_v49, 8.507059e+37  ;;  %v1631_v15 = vadd.f32 %v16392_v34, %v11891_v53  ;;  %v16393_v49 = vld [vmem:[#allocation18_spill] sm:$0xff] }
 0x6c2   : >> { %v3050_v57 = vmul.f32 %v9082_v30, %v3049_v27  ;;  %v11934_v59 = vand.u32 4294901760, %v3091_v61  ;;  %3312 = vmatpush.xpose.msra.mxu0 %v11869_v23  ;;  %3559 = vmatpush.xpose.msrb.mxu3 %v11869_v23  ;;  %v3422_v36 = vand.u32 4294901760, %v3421_v63 }
 0x6c3   : >> { %3417 = vmatpush.xpose.msra.mxu1 %v3416_v51  ;;  %v11968_v51 = vsub.f32 %v3076_v3, %v11931_v26  ;;  %v3321_v3 = vand.u32 4294901760, %v11950_v55 }
 0x6c4   : >> { %v3051_v27 = vadd.f32 %v9082_v30, %v3050_v57  ;;  %v11956_v33 = vsub.f32 %v3091_v61, %v11934_v59  ;;  %3503 = vmatpush.xpose.msrb.mxu2 %v11910_v25  ;;  %v16391_v57 = vand.u32 4294901760, %v11910_v25 }
 0x6c5   : >> { %v16397_v24 = vand.u32 4294901760, %v11968_v51 }
 0x6c6   : >> { %v3427_v32 = vsub.f32 %v11910_v25, %v16391_v57  ;;  %v3055_v61 = vsel %vm3054_vm3, %v9082_v30, %v3051_v27  ;;  %v15992_v63 = vand.u32 4294901760, %v11956_v33  ;;  %3314 = vmatpush.xpose.msra.mxu0 %v11934_v59  ;;  %3561 = vmatpush.xpose.msrb.mxu3 %v11934_v59  ;;  %v11978_v57 = vsub.f32 %v16390_v7, %v11943_v21  ;;  %v16394_v27 = vld [vmem:[#allocation17_spill] sm:$0xff]  ;;  %v2090_v62 = vpop.f32.mrf.mxu1 }
 0x6c7   : >> { %v3060_v41 = vsel %vm3057_vm4, %v3059_v14, %v3055_v61  ;;  %3423 = vmatpush.xpose.msra.mxu1 %v3422_v36  ;;  %v1087_v34 = vadd.f32 %v16394_v27, %v16393_v49  ;;  %v11989_v14 = vsub.f32 %v16389_v2, %v11940_v54  ;;  %v11991_v61 = vand.u32 4294901760, %v2087_v29 }
 0x6c8   : >> { %v3061_v30 = vmul.f32 %v11344_v50, %v3060_v41  ;;  %v3433_v53 = vsub.f32 %v11956_v33, %v15992_v63  ;;  %3506 = vmatpush.xpose.msrb.mxu2 %v11956_v33  ;;  %v15993_v7 = vand.u32 4294901760, %v11960_v9  ;;  %v1878_v36 = vadd.f32 %v1877_v4, %v1631_v15  ;;  %v16395_v63 = vld [vmem:[#allocation102_spill] sm:$0xff] }
 0x6c9   : >> { %v3428_v12 = vand.u32 4294901760, %v3427_v32  ;;  %v1340_v20 = vadd.f32 %v16395_v63, %v1087_v34  ;;  %v16396_v2 = vand.u32 4294901760, %v11947_v40  ;;  %v3322_v27 = vsub.f32 %v11950_v55, %v3321_v3 }
 0x6ca   : >> { %v11995_v50 = vand.u32 4294901760, %v3061_v30  ;;  %3316 = vmatpush.xpose.msra.mxu0 %v11931_v26  ;;  %3563 = vmatpush.xpose.msrb.mxu3 %v11931_v26  ;;  %v3434_v4 = vand.u32 4294901760, %v3433_v53  ;;  %v3987_v63 = vsub.f32 %v11960_v9, %v15993_v7  ;;  %v3328_v41 = vsub.f32 %v2087_v29, %v11991_v61  ;;  %v1881_v53 = vpop.f32.mrf.mxu0 }
 0x6cb   : >> { %v3981_v49 = vsub.f32 %v11947_v40, %v16396_v2  ;;  %3429 = vmatpush.xpose.msra.mxu1 %v3428_v12  ;;  %v2091_v2 = vadd.f32 %v2090_v62, %v1878_v36  ;;  %v3439_v12 = vsub.f32 %v11968_v51, %v16397_v24  ;;  %v3323_v42 = vand.u32 4294901760, %v3322_v27 }
 0x6cc   : >> { %v12006_v32 = vsub.f32 %v3061_v30, %v11995_v50  ;;  %3509 = vmatpush.xpose.msrb.mxu2 %v11968_v51  ;;  %v1637_v7 = vadd.f32 %v16398_v6, %v1340_v20  ;;  %v16399_v34 = vand.u32 4294901760, %v11483_v8  ;;  %v16400_v62 = vand.u32 4294901760, %v11978_v57 }
 0x6cd   : >> { %v3982_v15 = vand.u32 4294901760, %v3981_v49  ;;  %v3988_v36 = vand.u32 4294901760, %v3987_v63  ;;  %v16401_v49 = vand.u32 4294901760, %v11989_v14  ;;  %v12034_v20 = vand.u32 4294901760, %v2091_v2 }
 0x6ce   : >> { %v3444_v30 = vand.u32 4294901760, %v12006_v32  ;;  %3318 = vmatpush.xpose.msra.mxu0 %v11995_v50  ;;  %3565 = vmatpush.xpose.msrb.mxu3 %v11995_v50  ;;  %v3993_v29 = vsub.f32 %v11978_v57, %v16400_v62  ;;  %v1882_v8 = vadd.f32 %v1881_v53, %v1637_v7  ;;  %v3440_v27 = vand.u32 4294901760, %v3439_v12  ;;  %v2094_v63 = vpop.f32.mrf.mxu1 }
 0x6cf   : >> { %3435 = vmatpush.xpose.msra.mxu1 %v3434_v4  ;;  %v3999_v6 = vsub.f32 %v11989_v14, %v16401_v49  ;;  %v3329_v4 = vand.u32 4294901760, %v3328_v41  ;;  %v16402_v62 = vand.u32 4294901760, %v11486_v58  ;;  %v3336_v7 = vsub.f32 %v2091_v2, %v12034_v20 }
 0x6d0   : >> { %v3445_v24 = vsub.f32 %v12006_v32, %v3444_v30  ;;  %3512 = vmatpush.xpose.msrb.mxu2 %v12006_v32  ;;  %v16407_v49 = vand.u32 4294901760, %v11643_v43 }
 0x6d1   : >> { %3324 = vmatmul.f32.vlgmr.msra.gmra.mxu0 %v3323_v42  ;;  %3569 = vmatmul.f32.vlgmr.msrb.gmra.mxu3 %v3321_v3  ;;  %v2095_v42 = vadd.f32 %v2094_v63, %v1882_v8  ;;  %v4000_v3 = vand.u32 4294901760, %v3999_v6  ;;  %v3330_v12 = vsub.f32 %v3328_v41, %v3329_v4  ;;  %v3337_v2 = vand.u32 4294901760, %v3336_v7 }
 0x6d2   : >> { %3594 = vmatpush.xpose.msrb.mxu0 %v16399_v34  ;;  %3983 = vmatpush.msra.mxu3 %v3982_v15  ;;  %v3994_v15 = vand.u32 4294901760, %v3993_v29  ;;  %v3446_v34 = vand.u32 4294901760, %v3445_v24  ;;  %v16404_v29 = vand.u32 4294901760, %v11947_v40  ;;  %v12054_v24 = vpop.f32.mrf.mxu0  ;;  %v16408_v6 = vand.u32 4294901760, %v11978_v57 }
 0x6d3   : >> { %3441 = vmatpush.xpose.msra.mxu1 %v3440_v27  ;;  %3515 = vmatmul.f32.vlgmr.msrb.gmra.mxu2 %v11950_v55  ;;  %v16403_v55 = vand.u32 4294901760, %v11579_v48  ;;  %v12046_v53 = vand.u32 4294901760, %v2095_v42  ;;  %v3331_v58 = vand.u32 4294901760, %v3330_v12  ;;  %16405 = vst [vmem:[#allocation68_spill] sm:$0xff] %v12054_v24  ;;  %v16406_v48 = vand.u32 4294901760, %v11960_v9 }
 0x6d4   : >> { %3830 = vmatpush.msra.mxu2 %v11919_v18  ;;  %3989 = vmatpush.msra.mxu3 %v3988_v36  ;;  %v3338_v36 = vsub.f32 %v3336_v7, %v3337_v2  ;;  %v16409_v8 = vand.u32 4294901760, %v11989_v14 }
 0x6d6   : >> { %3598 = vmatpush.xpose.msrb.mxu0 %v16402_v62  ;;  %3832 = vmatpush.msra.mxu2 %v11904_v17  ;;  %v3339_v27 = vand.u32 4294901760, %v3338_v36  ;;  %v16414_v62 = vand.u32 4294901760, %v11653_v56 }
 0x6d7   : >> { %3995 = vmatpush.msra.mxu3 %v3994_v15  ;;  %3447 = vmatpush.xpose.msra.mxu1 %v3446_v34  ;;  %v12068_v15 = vpop.f32.mrf.mxu1  ;;  %v16413_v34 = vand.u32 4294901760, %v11722_v1 }
 0x6d8   : >> { %3834 = vmatpush.msra.mxu2 %v11943_v21  ;;  %16410 = vst [vmem:[#allocation66_spill] sm:$0xff] %v12068_v15 }
 0x6d9   : >> { %4001 = vmatpush.msra.mxu3 %v4000_v3  ;;  %3332 = vmatmul.f32.gmra.mxu0 %v3331_v58  ;;  %v16418_v3 = vand.u32 4294901760, %v11764_v11  ;;  %v16420_v11 = vand.u32 4294901760, %v11856_v37 }
 0x6da   : >> { %3602 = vmatpush.xpose.msrb.mxu0 %v16403_v55  ;;  %3836 = vmatpush.msra.mxu2 %v11940_v54  ;;  %v12074_v43 = vpop.f32.mrf.mxu0 }
 0x6db   : >> { %4395 = vmatpush.msrb.mxu3 %v11919_v18  ;;  %3673 = vmatpush.xpose.msrb.mxu1 %v11465_v45  ;;  %v3344_v45 = vsub.f32 %v2095_v42, %v12046_v53  ;;  %16412 = vst [vmem:[#allocation16_spill] sm:$0xff] %v12074_v43 }
 0x6dc   : >> { %4304 = vmatpush.msrb.mxu2 %v16404_v29  ;;  %3449 = vmatmul.f32.vlgmr.msra.gmra.mxu1 %v11921_v31 }
 0x6dd   : >> { %4397 = vmatpush.msrb.mxu3 %v11904_v17  ;;  %3520 = vmatmul.f32.gmra.mxu2 %v3328_v41  ;;  %v16411_v41 = vand.u32 4294901760, %v11458_v60 }
 0x6de   : >> { %3575 = vmatmul.f32.gmra.mxu3 %v3329_v4  ;;  %4308 = vmatpush.msrb.mxu2 %v16406_v48  ;;  %v3345_v4 = vand.u32 4294901760, %v3344_v45 }
 0x6df   : >> { %4399 = vmatpush.msrb.mxu3 %v11943_v21  ;;  %3606 = vmatpush.xpose.msrb.mxu0 %v16407_v49 }
 0x6e0   : >> { %3675 = vmatpush.xpose.msrb.mxu1 %v11448_v46  ;;  %4312 = vmatpush.msrb.mxu2 %v16408_v6  ;;  %v3346_v46 = vsub.f32 %v3344_v45, %v3345_v4 }
 0x6e1   : >> { %4401 = vmatpush.msrb.mxu3 %v11940_v54  ;;  %3340 = vmatmul.f32.gmra.mxu0 %v3339_v27 }
 0x6e2   : >> { %4316 = vmatpush.msrb.mxu2 %v16409_v8  ;;  %v3347_v63 = vand.u32 4294901760, %v3346_v46  ;;  %v16423_v8 = vand.u32 4294901760, %v11915_v19 }
 0x6e3   : >> { %3610 = vmatpush.xpose.msrb.mxu0 %v16411_v41 }
 0x6e4   : >> { %3677 = vmatpush.xpose.msrb.mxu1 %v11556_v28  ;;  %v12083_v28 = vpop.f32.mrf.mxu1 }
 0x6e5   : >> { %3453 = vmatmul.f32.gmra.mxu1 %v11991_v61  ;;  %3525 = vmatmul.f32.gmra.mxu2 %v3336_v7  ;;  %16415 = vst [vmem:[#allocation15_spill] sm:$0xff] %v12083_v28 }
 0x6e6   : >> { %3581 = vmatmul.f32.gmra.mxu3 %v3337_v2 }
 0x6e7   : >> { %3614 = vmatpush.xpose.msrb.mxu0 %v16413_v34 }
 0x6e8   : >> { %3679 = vmatpush.xpose.msrb.mxu1 %v11610_v16  ;;  %v16416_v16 = vand.u32 4294901760, %v11781_v39 }
 0x6e9   : >> { %3348 = vmatmul.f32.gmra.mxu0 %v3347_v63 }
 0x6eb   : >> { %3618 = vmatpush.xpose.msrb.mxu0 %v16414_v62  ;;  %v16427_v62 = vand.u32 4294901760, %v11956_v33 }
 0x6ec   : >> { %3681 = vmatpush.xpose.msrb.mxu1 %v11435_v5  ;;  %v3753_v60 = vpop.trf.xlu2  ;;  %v12094_v5 = vpop.f32.mrf.mxu0 }
 0x6ed   : >> { %3457 = vmatmul.f32.gmra.mxu1 %v12034_v20  ;;  %v3770_v7 = vsel %vm358_vm0, %v3753_v60, 0  ;;  %3530 = vmatmul.f32.gmra.mxu2 %v3344_v45  ;;  %16417 = vst [vmem:[#allocation67_spill] sm:$0xff] %v12094_v5  ;;  %v12108_v2 = vpop.f32.mrf.mxu1  ;;  %v16422_v45 = vand.u32 4294901760, %v11820_v44 }
 0x6ee   : >> { %3587 = vmatmul.f32.gmra.mxu3 %v3345_v4  ;;  %v12086_v1 = vand.u32 4294901760, %v3770_v7  ;;  %16419 = vst [vmem:[#allocation69_spill] sm:$0xff] %v12108_v2  ;;  %v16425_v4 = vand.u32 4294901760, %v11910_v25 }
 0x6ef   : >> { %3622 = vmatpush.xpose.msrb.mxu0 %v16416_v16 }
 0x6f0   : >> { %3683 = vmatpush.xpose.msrb.mxu1 %v11701_v52  ;;  %v12092_v56 = vsub.f32 %v3770_v7, %v12086_v1  ;;  %v16429_v7 = vand.u32 4294901760, %v11968_v51 }
 0x6f2   : >> { %v3839_v42 = vand.u32 4294901760, %v12092_v56 }
 0x6f3   : >> { %3626 = vmatpush.xpose.msrb.mxu0 %v16418_v3 }
 0x6f4   : >> { %3685 = vmatpush.xpose.msrb.mxu1 %v11621_v13  ;;  %v3840_v12 = vsub.f32 %v12092_v56, %v3839_v42  ;;  %v3754_v39 = vpop.trf.xlu2  ;;  %v12117_v48 = vpop.f32.mrf.mxu0 }
 0x6f5   : >> { %3461 = vmatmul.f32.gmra.mxu1 %v12046_v53  ;;  %v3773_v52 = vsel %vm358_vm0, %v3754_v39, 0  ;;  %16421 = vst [vmem:[#allocation101_spill] sm:$0xff] %v12117_v48 }
 0x6f6   : >> { %4003 = vmatmul.f32.vlgmr.msra.gmra.mxu3 %v12086_v1  ;;  %v3841_v55 = vand.u32 4294901760, %v3840_v12  ;;  %v12106_v58 = vand.u32 4294901760, %v3773_v52 }
 0x6f7   : >> { %3630 = vmatpush.xpose.msrb.mxu0 %v16420_v11 }
 0x6f8   : >> { %3687 = vmatpush.xpose.msrb.mxu1 %v11761_v35  ;;  %v12114_v13 = vsub.f32 %v3773_v52, %v12106_v58  ;;  %3842 = vmatmul.f32.vlgmr.msra.gmra.mxu2 %v3841_v55 }
 0x6fa   : >> { %v3847_v29 = vand.u32 4294901760, %v12114_v13 }
 0x6fb   : >> { %3634 = vmatpush.xpose.msrb.mxu0 %v16422_v45 }
 0x6fc   : >> { %3689 = vmatpush.xpose.msrb.mxu1 %v11733_v10  ;;  %v3755_v36 = vpop.trf.xlu2  ;;  %v3848_v37 = vsub.f32 %v12114_v13, %v3847_v29  ;;  %v12135_v10 = vpop.f32.mrf.mxu1 }
 0x6fd   : >> { %v3776_v35 = vsel %vm358_vm0, %v3755_v36, 0  ;;  %16424 = vst [vmem:[#allocation103_spill] sm:$0xff] %v12135_v10  ;;  %v12144_v46 = vpop.f32.mrf.mxu0 }
 0x6fe   : >> { %4007 = vmatmul.f32.gmra.mxu3 %v12106_v58  ;;  %v12127_v49 = vand.u32 4294901760, %v3776_v35  ;;  %v3849_v6 = vand.u32 4294901760, %v3848_v37  ;;  %16426 = vst [vmem:[#allocation97_spill] sm:$0xff] %v12144_v46 }
 0x6ff   : >> { %3638 = vmatpush.xpose.msrb.mxu0 %v16423_v8 }
 0x700   : >> { %3691 = vmatpush.xpose.msrb.mxu1 %v11824_v38  ;;  %v12133_v44 = vsub.f32 %v3776_v35, %v12127_v49  ;;  %3850 = vmatmul.f32.gmra.mxu2 %v3849_v6 }
 0x702   : >> { %v3855_v27 = vand.u32 4294901760, %v12133_v44 }
 0x703   : >> { %3642 = vmatpush.xpose.msrb.mxu0 %v16425_v4 }
 0x704   : >> { %3693 = vmatpush.xpose.msrb.mxu1 %v11796_v47  ;;  %v3756_v41 = vpop.trf.xlu2  ;;  %v3856_v19 = vsub.f32 %v12133_v44, %v3855_v27  ;;  %v12157_v60 = vpop.f32.mrf.mxu1 }
 0x705   : >> { %v3779_v38 = vsel %vm358_vm0, %v3756_v41, 0  ;;  %16428 = vst [vmem:[#allocation99_spill] sm:$0xff] %v12157_v60  ;;  %v12169_v39 = vpop.f32.mrf.mxu0 }
 0x706   : >> { %4011 = vmatmul.f32.gmra.mxu3 %v12127_v49  ;;  %v12148_v34 = vand.u32 4294901760, %v3779_v38  ;;  %v3857_v63 = vand.u32 4294901760, %v3856_v19  ;;  %16430 = vst [vmem:[#allocation98_spill] sm:$0xff] %v12169_v39 }
 0x707   : >> { %3646 = vmatpush.xpose.msrb.mxu0 %v16427_v62 }
 0x708   : >> { %3695 = vmatpush.xpose.msrb.mxu1 %v11901_v0  ;;  %v12154_v47 = vsub.f32 %v3779_v38, %v12148_v34  ;;  %3858 = vmatmul.f32.gmra.mxu2 %v3857_v63 }
 0x70a   : >> { %v3863_v25 = vand.u32 4294901760, %v12154_v47 }
 0x70b   : >> { %3650 = vmatpush.xpose.msrb.mxu0 %v16429_v7 }
 0x70c   : >> { %3697 = vmatpush.xpose.msrb.mxu1 %v11869_v23  ;;  %v3757_v16 = vpop.trf.xlu2  ;;  %v3864_v33 = vsub.f32 %v12154_v47, %v3863_v25 }
 0x70d   : >> { %v3782_v0 = vsel %vm358_vm0, %v3757_v16, 0 }
 0x70e   : >> { %4015 = vmatmul.f32.gmra.mxu3 %v12148_v34  ;;  %v12167_v3 = vand.u32 4294901760, %v3782_v0  ;;  %v3865_v12 = vand.u32 4294901760, %v3864_v33 }
 0x70f   : >> { %3654 = vmatpush.xpose.msrb.mxu0 %v3444_v30 }
 0x710   : >> { %3699 = vmatpush.xpose.msrb.mxu1 %v11934_v59  ;;  %v12176_v23 = vsub.f32 %v3782_v0, %v12167_v3  ;;  %3866 = vmatmul.f32.gmra.mxu2 %v3865_v12  ;;  %v12185_v59 = vpop.f32.mrf.mxu1 }
 0x711   : >> { %16431 = vst [vmem:[#allocation18_spill] sm:$0xff] %v12185_v59 }
 0x712   : >> { %3656 = vmatmul.f32.vlgmr.msrb.gmra.mxu0 %v11921_v31  ;;  %v3871_v51 = vand.u32 4294901760, %v12176_v23 }
 0x713   : >> { %4081 = vmatpush.msra.mxu0 %v11947_v40 }
 0x714   : >> { %3701 = vmatpush.xpose.msrb.mxu1 %v11931_v26  ;;  %v3758_v52 = vpop.trf.xlu2  ;;  %v3872_v32 = vsub.f32 %v12176_v23, %v3871_v51  ;;  %v12198_v26 = vpop.f32.mrf.mxu0 }
 0x715   : >> { %4084 = vmatpush.msra.mxu0 %v11960_v9  ;;  %v3785_v40 = vsel %vm358_vm0, %v3758_v52, 0  ;;  %16432 = vst [vmem:[#allocation17_spill] sm:$0xff] %v12198_v26 }
 0x716   : >> { %4019 = vmatmul.f32.gmra.mxu3 %v12167_v3  ;;  %v12190_v30 = vand.u32 4294901760, %v3785_v40  ;;  %v3873_v55 = vand.u32 4294901760, %v3872_v32 }
 0x717   : >> { %4087 = vmatpush.msra.mxu0 %v11978_v57 }
 0x718   : >> { %3703 = vmatpush.xpose.msrb.mxu1 %v11995_v50  ;;  %v12196_v9 = vsub.f32 %v3785_v40, %v12190_v30  ;;  %3874 = vmatmul.f32.gmra.mxu2 %v3873_v55  ;;  %v12212_v36 = vpop.f32.mrf.mxu1 }
 0x719   : >> { %4090 = vmatpush.msra.mxu0 %v11989_v14  ;;  %16433 = vst [vmem:[#allocation102_spill] sm:$0xff] %v12212_v36 }
 0x71a   : >> { %3660 = vmatmul.f32.gmra.mxu0 %v11991_v61  ;;  %v3879_v57 = vand.u32 4294901760, %v12196_v9 }
 0x71b   : >> { %3705 = vmatmul.f32.vlgmr.msrb.gmra.mxu1 %v11921_v31 }
 0x71c   : >> { %4185 = vmatpush.msra.mxu1 %v11919_v18  ;;  %v3759_v11 = vpop.trf.xlu2  ;;  %v3880_v14 = vsub.f32 %v12196_v9, %v3879_v57 }
 0x71d   : >> { %v3788_v18 = vsel %vm358_vm0, %v3759_v11, 0 }
 0x71e   : >> { %4187 = vmatpush.msra.mxu1 %v11904_v17  ;;  %4023 = vmatmul.f32.gmra.mxu3 %v12190_v30  ;;  %v12210_v50 = vand.u32 4294901760, %v3788_v18  ;;  %v3881_v45 = vand.u32 4294901760, %v3880_v14 }
 0x720   : >> { %4189 = vmatpush.msra.mxu1 %v11943_v21  ;;  %v12216_v31 = vsub.f32 %v3788_v18, %v12210_v50  ;;  %3882 = vmatmul.f32.gmra.mxu2 %v3881_v45  ;;  %v12221_v21 = vpop.f32.mrf.mxu0 }
 0x721   : >> { %16434 = vst [vmem:[#allocation100_spill] sm:$0xff] %v12221_v21 }
 0x722   : >> { %4191 = vmatpush.msra.mxu1 %v11940_v54  ;;  %3664 = vmatmul.f32.gmra.mxu0 %v12034_v20  ;;  %v16000_v17 = vand.u32 4294901760, %v12216_v31 }
 0x723   : >> { %3709 = vmatmul.f32.gmra.mxu1 %v11991_v61  ;;  %v12233_v61 = vpop.f32.mrf.mxu1 }
 0x724   : >> { %v3760_v37 = vpop.trf.xlu2  ;;  %v3888_v35 = vsub.f32 %v12216_v31, %v16000_v17  ;;  %16435 = vst [vmem:[#allocation130_spill] sm:$0xff] %v12233_v61 }
 0x725   : >> { %v3791_v6 = vsel %vm358_vm0, %v3760_v37, 0 }
 0x726   : >> { %4027 = vmatmul.f32.gmra.mxu3 %v12210_v50  ;;  %v12228_v54 = vand.u32 4294901760, %v3791_v6  ;;  %v3889_v8 = vand.u32 4294901760, %v3888_v35 }
 0x728   : >> { %v12231_v4 = vsub.f32 %v3791_v6, %v12228_v54  ;;  %3890 = vmatmul.f32.gmra.mxu2 %v3889_v8  ;;  %v12241_v63 = vpop.f32.mrf.mxu0 }
 0x729   : >> { %16436 = vst [vmem:[#allocation131_spill] sm:$0xff] %v12241_v63 }
 0x72a   : >> { %3668 = vmatmul.f32.gmra.mxu0 %v12046_v53  ;;  %v15999_v41 = vand.u32 4294901760, %v12231_v4 }
 0x72b   : >> { %3713 = vmatmul.f32.gmra.mxu1 %v12034_v20  ;;  %v12253_v0 = vpop.f32.mrf.mxu1 }
 0x72c   : >> { %v3761_v19 = vpop.trf.xlu2  ;;  %v3896_v38 = vsub.f32 %v12231_v4, %v15999_v41  ;;  %16437 = vst [vmem:[#allocation132_spill] sm:$0xff] %v12253_v0 }
 0x72d   : >> { %v3794_v62 = vsel %vm358_vm0, %v3761_v19, 0 }
 0x72e   : >> { %4031 = vmatmul.f32.gmra.mxu3 %v12228_v54  ;;  %v12245_v7 = vand.u32 4294901760, %v3794_v62  ;;  %v3897_v16 = vand.u32 4294901760, %v3896_v38 }
 0x730   : >> { %v12248_v33 = vsub.f32 %v3794_v62, %v12245_v7  ;;  %3898 = vmatmul.f32.gmra.mxu2 %v3897_v16  ;;  %v12262_v11 = vpop.f32.mrf.mxu0 }
 0x731   : >> { %16438 = vst [vmem:[#allocation133_spill] sm:$0xff] %v12262_v11 }
 0x732   : >> { %v15997_v20 = vand.u32 4294901760, %v12248_v33  ;;  %4093 = vmatmul.f32.vlgmr.msra.gmra.mxu0 %v12092_v56 }
 0x733   : >> { %3717 = vmatmul.f32.gmra.mxu1 %v12046_v53  ;;  %v12274_v37 = vpop.f32.mrf.mxu1 }
 0x734   : >> { %v3762_v12 = vpop.trf.xlu2  ;;  %v3904_v52 = vsub.f32 %v12248_v33, %v15997_v20  ;;  %16439 = vst [vmem:[#allocation134_spill] sm:$0xff] %v12274_v37 }
 0x735   : >> { %v3797_v32 = vsel %vm358_vm0, %v3762_v12, 0 }
 0x736   : >> { %4035 = vmatmul.f32.gmra.mxu3 %v12245_v7  ;;  %v12260_v40 = vand.u32 4294901760, %v3797_v32  ;;  %v3905_v55 = vand.u32 4294901760, %v3904_v52 }
 0x738   : >> { %v12265_v53 = vsub.f32 %v3797_v32, %v12260_v40  ;;  %3906 = vmatmul.f32.gmra.mxu2 %v3905_v55  ;;  %v12283_v56 = vpop.f32.mrf.mxu0 }
 0x739   : >> { %16440 = vst [vmem:[#allocation135_spill] sm:$0xff] %v12283_v56 }
 0x73a   : >> { %v15996_v14 = vand.u32 4294901760, %v12265_v53  ;;  %4098 = vmatmul.f32.gmra.mxu0 %v12114_v13 }
 0x73b   : >> { %4195 = vmatmul.f32.vlgmr.msra.gmra.mxu1 %v3839_v42  ;;  %v12296_v32 = vpop.f32.mrf.mxu1 }
 0x73c   : >> { %v3763_v18 = vpop.trf.xlu2  ;;  %v3912_v45 = vsub.f32 %v12265_v53, %v15996_v14  ;;  %16441 = vst [vmem:[#allocation136_spill] sm:$0xff] %v12296_v32 }
 0x73d   : >> { %v3800_v35 = vsel %vm358_vm0, %v3763_v18, 0 }
 0x73e   : >> { %4039 = vmatmul.f32.gmra.mxu3 %v12260_v40  ;;  %v12278_v6 = vand.u32 4294901760, %v3800_v35  ;;  %v3913_v8 = vand.u32 4294901760, %v3912_v45 }
 0x740   : >> { %v12281_v19 = vsub.f32 %v3800_v35, %v12278_v6  ;;  %3914 = vmatmul.f32.gmra.mxu2 %v3913_v8 }
 0x742   : >> { %v15995_v42 = vand.u32 4294901760, %v12281_v19  ;;  %4103 = vmatmul.f32.gmra.mxu0 %v12133_v44 }
 0x743   : >> { %4201 = vmatmul.f32.gmra.mxu1 %v3847_v29  ;;  %v12305_v29 = vpop.f32.mrf.mxu0  ;;  %v12317_v44 = vpop.f32.mrf.mxu1 }
 0x744   : >> { %v3764_v38 = vpop.trf.xlu2  ;;  %v3920_v62 = vsub.f32 %v12281_v19, %v15995_v42  ;;  %16442 = vst [vmem:[#allocation137_spill] sm:$0xff] %v12305_v29 }
 0x745   : >> { %v3803_v16 = vsel %vm358_vm0, %v3764_v38, 0  ;;  %16443 = vst [vmem:[#allocation138_spill] sm:$0xff] %v12317_v44 }
 0x746   : >> { %4043 = vmatmul.f32.gmra.mxu3 %v12278_v6  ;;  %v12294_v12 = vand.u32 4294901760, %v3803_v16  ;;  %v3921_v52 = vand.u32 4294901760, %v3920_v62 }
 0x748   : >> { %v12299_v55 = vsub.f32 %v3803_v16, %v12294_v12  ;;  %3922 = vmatmul.f32.gmra.mxu2 %v3921_v52 }
 0x74a   : >> { %v15994_v13 = vand.u32 4294901760, %v12299_v55  ;;  %4108 = vmatmul.f32.gmra.mxu0 %v12154_v47 }
 0x74b   : >> { %4207 = vmatmul.f32.gmra.mxu1 %v3855_v27 }
 0x74c   : >> { %v3765_v18 = vpop.trf.xlu2  ;;  %v3928_v45 = vsub.f32 %v12299_v55, %v15994_v13 }
 0x74d   : >> { %v3806_v35 = vsel %vm358_vm0, %v3765_v18, 0 }
 0x74e   : >> { %4047 = vmatmul.f32.gmra.mxu3 %v12294_v12  ;;  %v12312_v8 = vand.u32 4294901760, %v3806_v35  ;;  %v3929_v38 = vand.u32 4294901760, %v3928_v45  ;;  %v3325_v16 = vpop.f32.mrf.mxu0 }
 0x750   : >> { %v12315_v62 = vsub.f32 %v3806_v35, %v12312_v8  ;;  %3930 = vmatmul.f32.gmra.mxu2 %v3929_v38 }
 0x752   : >> { %v15998_v27 = vand.u32 4294901760, %v12315_v62  ;;  %4113 = vmatmul.f32.gmra.mxu0 %v12176_v23 }
 0x753   : >> { %4213 = vmatmul.f32.gmra.mxu1 %v3863_v25 }
 0x754   : >> { %v3766_v52 = vpop.trf.xlu2  ;;  %v3936_v18 = vsub.f32 %v12315_v62, %v15998_v27  ;;  %v3570_v35 = vpop.f32.mrf.mxu3 }
 0x755   : >> { %v3809_v45 = vsel %vm358_vm0, %v3766_v52, 0 }
 0x756   : >> { %4051 = vmatmul.f32.gmra.mxu3 %v12312_v8  ;;  %v12328_v38 = vand.u32 4294901760, %v3809_v45  ;;  %v3937_v13 = vand.u32 4294901760, %v3936_v18  ;;  %v3516_v42 = vpop.f32.mrf.mxu2  ;;  %v3333_v41 = vpop.f32.mrf.mxu0 }
 0x758   : >> { %v12331_v47 = vsub.f32 %v3809_v45, %v12328_v38  ;;  %3938 = vmatmul.f32.gmra.mxu2 %v3937_v13 }
 0x759   : >> { %v3450_v25 = vpop.f32.mrf.mxu1 }
 0x75a   : >> { %v3451_v14 = vadd.f32 %v3450_v25, %v3325_v16  ;;  %v16001_v20 = vand.u32 4294901760, %v12331_v47  ;;  %4118 = vmatmul.f32.gmra.mxu0 %v12196_v9 }
 0x75b   : >> { %4219 = vmatmul.f32.gmra.mxu1 %v3871_v51 }
 0x75c   : >> { %v3517_v52 = vadd.f32 %v3516_v42, %v3451_v14  ;;  %v3767_v27 = vpop.trf.xlu2  ;;  %v3944_v18 = vsub.f32 %v12331_v47, %v16001_v20 }
 0x75d   : >> { %v3812_v45 = vsel %vm358_vm0, %v3767_v27, 0 }
 0x75e   : >> { %4055 = vmatmul.f32.gmra.mxu3 %v12328_v38  ;;  %v12342_v13 = vand.u32 4294901760, %v3812_v45  ;;  %v3945_v16 = vand.u32 4294901760, %v3944_v18  ;;  %v12344_v25 = vadd.f32 %v3570_v35, %v3517_v52 }
 0x760   : >> { %16444 = vst [vmem:[#allocation139_spill] sm:$0xff] %v12344_v25  ;;  %v12347_v51 = vsub.f32 %v3812_v45, %v12342_v13  ;;  %3946 = vmatmul.f32.gmra.mxu2 %v3945_v16  ;;  %v3521_v17 = vpop.f32.mrf.mxu2  ;;  %v3341_v16 = vpop.f32.mrf.mxu0 }
 0x761   : >> { %v3576_v23 = vpop.f32.mrf.mxu3 }
 0x762   : >> { %v3454_v14 = vpop.f32.mrf.mxu1  ;;  %v16002_v20 = vand.u32 4294901760, %v12347_v51  ;;  %4123 = vmatmul.f32.gmra.mxu0 %v12216_v31 }
 0x763   : >> { %v3455_v42 = vadd.f32 %v3454_v14, %v3333_v41  ;;  %4225 = vmatmul.f32.gmra.mxu1 %v3879_v57 }
 0x764   : >> { %v3768_v44 = vpop.trf.xlu2  ;;  %v3952_v35 = vsub.f32 %v12347_v51, %v16002_v20 }
 0x765   : >> { %v3522_v27 = vadd.f32 %v3521_v17, %v3455_v42  ;;  %v3815_v52 = vsel %vm358_vm0, %v3768_v44, 0  ;;  %v16446_v44 = vand.u32 4294901760, %v12216_v31  ;;  %v16448_v31 = vand.u32 4294901760, %v12231_v4 }
 0x766   : >> { %4059 = vmatmul.f32.gmra.mxu3 %v12342_v13  ;;  %v12358_v18 = vand.u32 4294901760, %v3815_v52  ;;  %v3953_v41 = vand.u32 4294901760, %v3952_v35 }
 0x767   : >> { %v12360_v45 = vadd.f32 %v3576_v23, %v3522_v27 }
 0x768   : >> { %v12363_v57 = vsub.f32 %v3815_v52, %v12358_v18  ;;  %3954 = vmatmul.f32.gmra.mxu2 %v3953_v41  ;;  %v3526_v42 = vpop.f32.mrf.mxu2  ;;  %v3349_v41 = vpop.f32.mrf.mxu0 }
 0x769   : >> { %16445 = vst [vmem:[#allocation140_spill] sm:$0xff] %v12360_v45  ;;  %v3582_v9 = vpop.f32.mrf.mxu3 }
 0x76a   : >> { %v3458_v17 = vpop.f32.mrf.mxu1  ;;  %v3959_v20 = vand.u32 4294901760, %v12363_v57  ;;  %4128 = vmatmul.f32.gmra.mxu0 %v12231_v4 }
 0x76b   : >> { %v3459_v14 = vadd.f32 %v3458_v17, %v3341_v16  ;;  %4231 = vmatmul.f32.gmra.mxu1 %v16446_v44 }
 0x76c   : >> { %v3960_v23 = vsub.f32 %v12363_v57, %v3959_v20 }
 0x76d   : >> { %v3527_v25 = vadd.f32 %v3526_v42, %v3459_v14 }
 0x76e   : >> { %4063 = vmatmul.f32.gmra.mxu3 %v12358_v18  ;;  %v3961_v27 = vand.u32 4294901760, %v3960_v23 }
 0x76f   : >> { %v12373_v35 = vadd.f32 %v3582_v9, %v3527_v25  ;;  %v16450_v9 = vand.u32 4294901760, %v12248_v33 }
 0x770   : >> { %3962 = vmatmul.f32.gmra.mxu2 %v3961_v27  ;;  %v3531_v14 = vpop.f32.mrf.mxu2 }
 0x771   : >> { %16447 = vst [vmem:[#allocation141_spill] sm:$0xff] %v12373_v35  ;;  %v3588_v52 = vpop.f32.mrf.mxu3 }
 0x772   : >> { %v3462_v16 = vpop.f32.mrf.mxu1  ;;  %4133 = vmatmul.f32.gmra.mxu0 %v12248_v33 }
 0x773   : >> { %v3463_v17 = vadd.f32 %v3462_v16, %v3349_v41  ;;  %4237 = vmatmul.f32.gmra.mxu1 %v16448_v31  ;;  %v16452_v41 = vand.u32 4294901760, %v12265_v53  ;;  %v16453_v16 = vand.u32 4294901760, %v12281_v19  ;;  %v16454_v31 = vand.u32 4294901760, %v12299_v55 }
 0x775   : >> { %v3532_v42 = vadd.f32 %v3531_v14, %v3463_v17 }
 0x776   : >> { %4403 = vmatmul.f32.vlgmr.msrb.gmra.mxu3 %v12086_v1 }
 0x777   : >> { %v12379_v44 = vadd.f32 %v3588_v52, %v3532_v42  ;;  %v16456_v42 = vand.u32 4294901760, %v12315_v62 }
 0x778   : >> { %4318 = vmatmul.f32.vlgmr.msrb.gmra.mxu2 %v12086_v1 }
 0x779   : >> { %16449 = vst [vmem:[#allocation142_spill] sm:$0xff] %v12379_v44  ;;  %v4004_v25 = vpop.f32.mrf.mxu3 }
 0x77a   : >> { %4138 = vmatmul.f32.gmra.mxu0 %v12265_v53 }
 0x77b   : >> { %4243 = vmatmul.f32.gmra.mxu1 %v16450_v9  ;;  %v3843_v23 = vpop.f32.mrf.mxu2  ;;  %v16457_v9 = vand.u32 4294901760, %v12331_v47 }
 0x77c   : >> { %v12385_v27 = vadd.f32 %v4004_v25, %v3843_v23 }
 0x77e   : >> { %16451 = vst [vmem:[#allocation143_spill] sm:$0xff] %v12385_v27  ;;  %4407 = vmatmul.f32.gmra.mxu3 %v12106_v58 }
 0x780   : >> { %4322 = vmatmul.f32.gmra.mxu2 %v12106_v58 }
 0x781   : >> { %v4008_v4 = vpop.f32.mrf.mxu3 }
 0x782   : >> { %4143 = vmatmul.f32.gmra.mxu0 %v12281_v19 }
 0x783   : >> { %4249 = vmatmul.f32.gmra.mxu1 %v16452_v41  ;;  %v3851_v1 = vpop.f32.mrf.mxu2 }
 0x784   : >> { %v12392_v52 = vadd.f32 %v4008_v4, %v3851_v1  ;;  %v16459_v4 = vand.u32 4294901760, %v12347_v51 }
 0x786   : >> { %4411 = vmatmul.f32.gmra.mxu3 %v12127_v49 }
 0x788   : >> { %4326 = vmatmul.f32.gmra.mxu2 %v12127_v49 }
 0x789   : >> { %v4012_v33 = vpop.f32.mrf.mxu3 }
 0x78a   : >> { %4148 = vmatmul.f32.gmra.mxu0 %v12299_v55 }
 0x78b   : >> { %4255 = vmatmul.f32.gmra.mxu1 %v16453_v16  ;;  %v3859_v58 = vpop.f32.mrf.mxu2 }
 0x78c   : >> { %v12399_v17 = vadd.f32 %v4012_v33, %v3859_v58 }
 0x78e   : >> { %4415 = vmatmul.f32.gmra.mxu3 %v12148_v34 }
 0x790   : >> { %4330 = vmatmul.f32.gmra.mxu2 %v12148_v34 }
 0x791   : >> { %v4016_v53 = vpop.f32.mrf.mxu3 }
 0x792   : >> { %4153 = vmatmul.f32.gmra.mxu0 %v12315_v62 }
 0x793   : >> { %4261 = vmatmul.f32.gmra.mxu1 %v16454_v31  ;;  %v3867_v49 = vpop.f32.mrf.mxu2 }
 0x794   : >> { %v12406_v14 = vadd.f32 %v4016_v53, %v3867_v49 }
 0x796   : >> { %16455 = vst [vmem:[#allocation144_spill] sm:$0xff] %v12406_v14  ;;  %4419 = vmatmul.f32.gmra.mxu3 %v12167_v3 }
 0x798   : >> { %4334 = vmatmul.f32.gmra.mxu2 %v12167_v3  ;;  %v12433_v33 = vpop.f32.mrf.mxu1 }
 0x799   : >> { %v4020_v19 = vpop.f32.mrf.mxu3  ;;  %16461 = vst [vmem:[#allocation147_spill] sm:$0xff] %v12433_v33 }
 0x79a   : >> { %4158 = vmatmul.f32.gmra.mxu0 %v12331_v47  ;;  %v12430_v47 = vpop.f32.mrf.mxu0 }
 0x79b   : >> { %4267 = vmatmul.f32.gmra.mxu1 %v16456_v42  ;;  %v3875_v34 = vpop.f32.mrf.mxu2  ;;  %16460 = vst [vmem:[#allocation146_spill] sm:$0xff] %v12430_v47 }
 0x79c   : >> { %v12413_v25 = vadd.f32 %v4020_v19, %v3875_v34 }
 0x79e   : >> { %4423 = vmatmul.f32.gmra.mxu3 %v12190_v30 }
 0x7a0   : >> { %4338 = vmatmul.f32.gmra.mxu2 %v12190_v30  ;;  %v12445_v53 = vpop.f32.mrf.mxu1 }
 0x7a1   : >> { %v4024_v55 = vpop.f32.mrf.mxu3  ;;  %16463 = vst [vmem:[#allocation149_spill] sm:$0xff] %v12445_v53 }
 0x7a2   : >> { %4163 = vmatmul.f32.gmra.mxu0 %v12347_v51  ;;  %v12443_v58 = vpop.f32.mrf.mxu0 }
 0x7a3   : >> { %4273 = vmatmul.f32.gmra.mxu1 %v16457_v9  ;;  %v3883_v3 = vpop.f32.mrf.mxu2  ;;  %16462 = vst [vmem:[#allocation148_spill] sm:$0xff] %v12443_v58 }
 0x7a4   : >> { %v12420_v23 = vadd.f32 %v4024_v55, %v3883_v3 }
 0x7a6   : >> { %16458 = vst [vmem:[#allocation145_spill] sm:$0xff] %v12420_v23  ;;  %4427 = vmatmul.f32.gmra.mxu3 %v12210_v50 }
 0x7a8   : >> { %4342 = vmatmul.f32.gmra.mxu2 %v12210_v50  ;;  %v12457_v49 = vpop.f32.mrf.mxu1 }
 0x7a9   : >> { %v4028_v62 = vpop.f32.mrf.mxu3  ;;  %16465 = vst [vmem:[#allocation151_spill] sm:$0xff] %v12457_v49 }
 0x7aa   : >> { %4168 = vmatmul.f32.gmra.mxu0 %v12363_v57  ;;  %v12453_v57 = vpop.f32.mrf.mxu0 }
 0x7ab   : >> { %4279 = vmatmul.f32.gmra.mxu1 %v16459_v4  ;;  %v3891_v30 = vpop.f32.mrf.mxu2  ;;  %16464 = vst [vmem:[#allocation150_spill] sm:$0xff] %v12453_v57 }
 0x7ac   : >> { %v12427_v41 = vadd.f32 %v4028_v62, %v3891_v30 }
 0x7ae   : >> { %4431 = vmatmul.f32.gmra.mxu3 %v12228_v54 }
 0x7b0   : >> { %4346 = vmatmul.f32.gmra.mxu2 %v12228_v54 }
 0x7b1   : >> { %v4032_v1 = vpop.f32.mrf.mxu3 }
 0x7b2   : >> { %v12465_v42 = vpop.f32.mrf.mxu0 }
 0x7b3   : >> { %4285 = vmatmul.f32.gmra.mxu1 %v3959_v20  ;;  %v3899_v50 = vpop.f32.mrf.mxu2  ;;  %16466 = vst [vmem:[#allocation152_spill] sm:$0xff] %v12465_v42 }
 0x7b4   : >> { %v12437_v51 = vadd.f32 %v4032_v1, %v3899_v50 }
 0x7b6   : >> { %4435 = vmatmul.f32.gmra.mxu3 %v12245_v7 }
 0x7b8   : >> { %4350 = vmatmul.f32.gmra.mxu2 %v12245_v7 }
 0x7b9   : >> { %v12441_v16 = vpop.f32.mrf.mxu3 }
 0x7ba   : >> { %v12476_v9 = vpop.f32.mrf.mxu0 }
 0x7bb   : >> { %v12447_v54 = vpop.f32.mrf.mxu2  ;;  %16468 = vst [vmem:[#allocation154_spill] sm:$0xff] %v12476_v9 }
 0x7be   : >> { %4439 = vmatmul.f32.gmra.mxu3 %v12260_v40 }
 0x7c0   : >> { %4354 = vmatmul.f32.gmra.mxu2 %v12260_v40  ;;  %v12468_v40 = vpop.f32.mrf.mxu1 }
 0x7c1   : >> { %v12451_v20 = vpop.f32.mrf.mxu3  ;;  %16467 = vst [vmem:[#allocation153_spill] sm:$0xff] %v12468_v40 }
 0x7c2   : >> { %v12489_v4 = vpop.f32.mrf.mxu0 }
 0x7c3   : >> { %v12455_v31 = vpop.f32.mrf.mxu2 }
 0x7c6   : >> { %4443 = vmatmul.f32.gmra.mxu3 %v12278_v6 }
 0x7c8   : >> { %4358 = vmatmul.f32.gmra.mxu2 %v12278_v6  ;;  %v12481_v3 = vpop.f32.mrf.mxu1 }
 0x7c9   : >> { %v12461_v7 = vpop.f32.mrf.mxu3  ;;  %16469 = vst [vmem:[#allocation155_spill] sm:$0xff] %v12481_v3 }
 0x7ca   : >> { %v4104_v33 = vpop.f32.mrf.mxu0 }
 0x7cb   : >> { %v12463_v19 = vpop.f32.mrf.mxu2 }
 0x7ce   : >> { %4447 = vmatmul.f32.gmra.mxu3 %v12294_v12 }
 0x7d0   : >> { %4362 = vmatmul.f32.gmra.mxu2 %v12294_v12  ;;  %v12493_v1 = vpop.f32.mrf.mxu1 }
 0x7d1   : >> { %v12471_v34 = vpop.f32.mrf.mxu3 }
 0x7d2   : >> { %v12507_v49 = vpop.f32.mrf.mxu0 }
 0x7d3   : >> { %v12473_v55 = vpop.f32.mrf.mxu2  ;;  %16470 = vst [vmem:[#allocation156_spill] sm:$0xff] %v12507_v49 }
 0x7d6   : >> { %4451 = vmatmul.f32.gmra.mxu3 %v12312_v8 }
 0x7d8   : >> { %4366 = vmatmul.f32.gmra.mxu2 %v12312_v8 }
 0x7d9   : >> { %v12479_v6 = vpop.f32.mrf.mxu3 }
 0x7da   : >> { %v12515_v40 = vpop.f32.mrf.mxu0 }
 0x7db   : >> { %v12483_v62 = vpop.f32.mrf.mxu2 }
 0x7de   : >> { %4455 = vmatmul.f32.gmra.mxu3 %v12328_v38 }
 0x7e0   : >> { %4370 = vmatmul.f32.gmra.mxu2 %v12328_v38  ;;  %v4208_v38 = vpop.f32.mrf.mxu1 }
 0x7e1   : >> { %v12487_v12 = vpop.f32.mrf.mxu3 }
 0x7e2   : >> { %v12524_v29 = vpop.f32.mrf.mxu0 }
 0x7e3   : >> { %v12491_v30 = vpop.f32.mrf.mxu2  ;;  %16475 = vst [vmem:[#allocation161_spill] sm:$0xff] %v12524_v29 }
 0x7e4   : >> { %v4057_v29 = vadd.f32 %v12487_v12, %v12491_v30 }
 0x7e6   : >> { %4459 = vmatmul.f32.gmra.mxu3 %v12342_v13 }
 0x7e8   : >> { %4374 = vmatmul.f32.gmra.mxu2 %v12342_v13  ;;  %v12509_v58 = vpop.f32.mrf.mxu1 }
 0x7e9   : >> { %v12497_v8 = vpop.f32.mrf.mxu3  ;;  %16471 = vst [vmem:[#allocation157_spill] sm:$0xff] %v12509_v58 }
 0x7ea   : >> { %v12535_v21 = vpop.f32.mrf.mxu0 }
 0x7eb   : >> { %v12499_v50 = vpop.f32.mrf.mxu2  ;;  %v4125_v12 = vadd.f32 %v12535_v21, %v12427_v41 }
 0x7ee   : >> { %4463 = vmatmul.f32.gmra.mxu3 %v12358_v18 }
 0x7f0   : >> { %4378 = vmatmul.f32.gmra.mxu2 %v12358_v18  ;;  %v12519_v35 = vpop.f32.mrf.mxu1  ;;  %v4105_v18 = vadd.f32 %v4104_v33, %v12399_v17 }
 0x7f1   : >> { %v12503_v53 = vpop.f32.mrf.mxu3 }
 0x7f2   : >> { %v4209_v32 = vadd.f32 %v4208_v38, %v4105_v18  ;;  %v12543_v38 = vpop.f32.mrf.mxu0 }
 0x7f3   : >> { %v12505_v47 = vpop.f32.mrf.mxu2 }
 0x7f8   : >> { %v12526_v37 = vpop.f32.mrf.mxu1 }
 0x7f9   : >> { %v12511_v45 = vpop.f32.mrf.mxu3  ;;  %16476 = vst [vmem:[#allocation162_spill] sm:$0xff] %v12526_v37  ;;  %v4045_v37 = vadd.f32 %v12461_v7, %v12463_v19  ;;  %v4065_v19 = vadd.f32 %v12503_v53, %v12505_v47  ;;  %v4049_v47 = vadd.f32 %v12471_v34, %v12473_v55  ;;  %v4041_v55 = vadd.f32 %v12451_v20, %v12455_v31 }
 0x7fa   : >> { %16472 = vst [vmem:[#allocation158_spill] sm:$0xff] %v12511_v45 }
 0x7fb   : >> { %v12513_v13 = vpop.f32.mrf.mxu2 }
 0x7fc   : >> { %16473 = vst [vmem:[#allocation159_spill] sm:$0xff] %v12513_v13 }
 0x800   : >> { %v12537_v36 = vpop.f32.mrf.mxu1 }
 0x801   : >> { %v12517_v57 = vpop.f32.mrf.mxu3 }
 0x802   : >> { %16474 = vst [vmem:[#allocation160_spill] sm:$0xff] %v12517_v57 }
 0x803   : >> { %v12521_v42 = vpop.f32.mrf.mxu2 }
 0x808   : >> { %v12545_v18 = vpop.f32.mrf.mxu1 }
 0x809   : >> { %v4412_v44 = vpop.f32.mrf.mxu3  ;;  %16480 = vst [vmem:[#allocation166_spill] sm:$0xff] %v12545_v18  ;;  %v16485_v31 = vld [vmem:[#allocation160_spill] sm:$0xff] }
 0x80b   : >> { %v4327_v56 = vpop.f32.mrf.mxu2 }
 0x80c   : >> { %v4328_v11 = vadd.f32 %v4327_v56, %v4209_v32  ;;  %v4134_v32 = vpop.f32.mrf.mxu0 }
 0x80e   : >> { %v12528_v0 = vadd.f32 %v4412_v44, %v4328_v11 }
 0x810   : >> { %16477 = vst [vmem:[#allocation163_spill] sm:$0xff] %v12528_v0  ;;  %4471 = vmax.xlane.f32.xlu2 %v12528_v0  ;;  %v4244_v26 = vpop.f32.mrf.mxu1 }
 0x811   : >> { %v12531_v63 = vpop.f32.mrf.mxu3 }
 0x812   : >> { %16478 = vst [vmem:[#allocation164_spill] sm:$0xff] %v12531_v63  ;;  %v4053_v63 = vadd.f32 %v12479_v6, %v12483_v62 }
 0x813   : >> { %v12533_v61 = vpop.f32.mrf.mxu2 }
 0x814   : >> { %16479 = vst [vmem:[#allocation165_spill] sm:$0xff] %v12533_v61  ;;  %v12557_v60 = vpop.f32.mrf.mxu0 }
 0x818   : >> { %v12561_v10 = vpop.f32.mrf.mxu1 }
 0x819   : >> { %v12539_v17 = vpop.f32.mrf.mxu3 }
 0x81b   : >> { %v12541_v33 = vpop.f32.mrf.mxu2 }
 0x81c   : >> { %v4144_v5 = vpop.f32.mrf.mxu0 }
 0x81d   : >> { %v4145_v23 = vadd.f32 %v4144_v5, %v4045_v37 }
 0x820   : >> { %v4256_v22 = vpop.f32.mrf.mxu1 }
 0x821   : >> { %v12547_v11 = vpop.f32.mrf.mxu3  ;;  %v4257_v18 = vadd.f32 %v4256_v22, %v4145_v23 }
 0x822   : >> { %16481 = vst [vmem:[#allocation167_spill] sm:$0xff] %v12547_v11 }
 0x823   : >> { %v12549_v56 = vpop.f32.mrf.mxu2 }
 0x824   : >> { %16482 = vst [vmem:[#allocation168_spill] sm:$0xff] %v12549_v56  ;;  %v4149_v15 = vpop.f32.mrf.mxu0 }
 0x825   : >> { %v4150_v21 = vadd.f32 %v4149_v15, %v4049_v47  ;;  %v4100_v15 = vadd.f32 %v12489_v4, %v12392_v52  ;;  %v16486_v4 = vld [vmem:[#allocation166_spill] sm:$0xff] }
 0x828   : >> { %v12567_v24 = vpop.f32.mrf.mxu1 }
 0x829   : >> { %v12551_v44 = vpop.f32.mrf.mxu3 }
 0x82b   : >> { %v12553_v59 = vpop.f32.mrf.mxu2 }
 0x82c   : >> { %v4154_v13 = vpop.f32.mrf.mxu0 }
 0x82d   : >> { %v4155_v61 = vadd.f32 %v4154_v13, %v4053_v63  ;;  %v4037_v13 = vadd.f32 %v12441_v16, %v12447_v54 }
 0x82f   : >> { %v4135_v5 = vadd.f32 %v4134_v32, %v4037_v13  ;;  %v16494_v13 = vld [vmem:[#allocation156_spill] sm:$0xff] }
 0x830   : >> { %v4268_v9 = vpop.f32.mrf.mxu1 }
 0x831   : >> { %v12555_v39 = vpop.f32.mrf.mxu3  ;;  %v4269_v49 = vadd.f32 %v4268_v9, %v4155_v61  ;;  %v4245_v37 = vadd.f32 %v4244_v26, %v4135_v5  ;;  %v16496_v5 = vld [vmem:[#allocation157_spill] sm:$0xff] }
 0x832   : >> { %16483 = vst [vmem:[#allocation169_spill] sm:$0xff] %v12555_v39 }
 0x833   : >> { %v12559_v46 = vpop.f32.mrf.mxu2 }
 0x834   : >> { %16484 = vst [vmem:[#allocation170_spill] sm:$0xff] %v12559_v46  ;;  %v4159_v11 = vpop.f32.mrf.mxu0 }
 0x835   : >> { %v4160_v57 = vadd.f32 %v4159_v11, %v4057_v29 }
 0x838   : >> { %v4274_v56 = vpop.f32.mrf.mxu1 }
 0x839   : >> { %v4436_v48 = vpop.f32.mrf.mxu3  ;;  %v4275_v62 = vadd.f32 %v4274_v56, %v4160_v57 }
 0x83b   : >> { %v4351_v2 = vpop.f32.mrf.mxu2 }
 0x83c   : >> { %v4164_v9 = vpop.f32.mrf.mxu0 }
 0x841   : >> { %v12563_v28 = vpop.f32.mrf.mxu3 }
 0x843   : >> { %v12565_v43 = vpop.f32.mrf.mxu2 }
 0x844   : >> { %v4169_v57 = vpop.f32.mrf.mxu0 }
 0x849   : >> { %v4444_v0 = vpop.f32.mrf.mxu3 }
 0x84b   : >> { %v4359_v45 = vpop.f32.mrf.mxu2 }
 0x84c   : >> { %v4360_v6 = vadd.f32 %v4359_v45, %v4257_v18  ;;  %v4352_v45 = vadd.f32 %v4351_v2, %v4245_v37 }
 0x84e   : >> { %v12586_v22 = vadd.f32 %v4444_v0, %v4360_v6  ;;  %v12594_v30 = vadd.f32 %v4436_v48, %v4352_v45  ;;  %v4115_v48 = vadd.f32 %v12515_v40, %v12413_v25  ;;  %v4140_v25 = vadd.f32 %v12557_v60, %v4041_v55  ;;  %v16490_v6 = vld [vmem:[#allocation169_spill] sm:$0xff] }
 0x84f   : >> { %v4130_v60 = vadd.f32 %v12543_v38, %v12437_v51  ;;  %v16491_v51 = vld [vmem:[#allocation162_spill] sm:$0xff]  ;;  %v16492_v38 = vld [vmem:[#allocation168_spill] sm:$0xff] }
 0x850   : >> { %v4221_v32 = vadd.f32 %v12519_v35, %v4115_v48 }
 0x851   : >> { %v12569_v3 = vpop.f32.mrf.mxu3 }
 0x853   : >> { %v4363_v27 = vpop.f32.mrf.mxu2 }
 0x859   : >> { %v4452_v58 = vpop.f32.mrf.mxu3 }
 0x85b   : >> { %v4367_v14 = vpop.f32.mrf.mxu2 }
 0x85c   : >> { %v4368_v39 = vadd.f32 %v4367_v14, %v4269_v49  ;;  %v4280_v14 = vpop.f32.mrf.mxu1  ;;  %v4061_v49 = vadd.f32 %v12497_v8, %v12499_v50  ;;  %v4233_v8 = vadd.f32 %v12537_v36, %v4125_v12  ;;  %v4170_v50 = vadd.f32 %v4169_v57, %v4065_v19 }
 0x85e   : >> { %v12577_v46 = vadd.f32 %v4452_v58, %v4368_v39  ;;  %v4165_v29 = vadd.f32 %v4164_v9, %v4061_v49  ;;  %v4344_v2 = vadd.f32 %v12553_v59, %v4233_v8  ;;  %v4336_v59 = vadd.f32 %v12541_v33, %v4221_v32  ;;  %v16489_v33 = vld [vmem:[#allocation161_spill] sm:$0xff]  ;;  %v16493_v9 = vld [vmem:[#allocation144_spill] sm:$0xff] }
 0x860   : >> { %4491 = vmax.xlane.f32.xlu0 %v12577_v46  ;;  %v4281_v23 = vadd.f32 %v4280_v14, %v4165_v29  ;;  %v12604_v36 = vadd.f32 %v12551_v44, %v4344_v2  ;;  %v12619_v35 = vadd.f32 %v12539_v17, %v4336_v59  ;;  %v4251_v44 = vadd.f32 %v12561_v10, %v4140_v25  ;;  %v16487_v10 = vld [vmem:[#allocation170_spill] sm:$0xff]  ;;  %v16495_v14 = vld [vmem:[#allocation167_spill] sm:$0xff]  ;;  %v16497_v29 = vld [vmem:[#allocation165_spill] sm:$0xff] }
 0x861   : >> { %v4456_v63 = vpop.f32.mrf.mxu3  ;;  %v16500_v59 = vld [vmem:[#allocation154_spill] sm:$0xff] }
 0x862   : >> { %v4356_v52 = vadd.f32 %v12565_v43, %v4251_v44 }
 0x863   : >> { %v4371_v61 = vpop.f32.mrf.mxu2 }
 0x864   : >> { %v4372_v7 = vadd.f32 %v4371_v61, %v4275_v62  ;;  %v4286_v26 = vpop.f32.mrf.mxu1  ;;  %v12630_v20 = vadd.f32 %v12563_v28, %v4356_v52 }
 0x865   : >> { %v4287_v18 = vadd.f32 %v4286_v26, %v4170_v50 }
 0x866   : >> { %v12584_v39 = vadd.f32 %v4456_v63, %v4372_v7  ;;  %v4263_v63 = vadd.f32 %v12567_v24, %v4150_v21  ;;  %v4203_v24 = vadd.f32 %v12493_v1, %v4100_v15  ;;  %v4239_v1 = vadd.f32 %v16486_v4, %v4130_v60  ;;  %v16503_v4 = vld [vmem:[#allocation158_spill] sm:$0xff] }
 0x867   : >> { %v4110_v7 = vadd.f32 %v16494_v13, %v16493_v9 }
 0x868   : >> { %4493 = vmax.xlane.f32.xlu1 %v12584_v39  ;;  %4487 = vmax.xlane.f32.xlu0 %v12586_v22  ;;  %v4364_v34 = vadd.f32 %v4363_v27, %v4263_v63  ;;  %v4324_v27 = vadd.f32 %v12521_v42, %v4203_v24  ;;  %v4348_v17 = vadd.f32 %v16487_v10, %v4239_v1  ;;  %v16488_v42 = vld [vmem:[#allocation145_spill] sm:$0xff]  ;;  %v16502_v24 = vld [vmem:[#allocation159_spill] sm:$0xff] }
 0x869   : >> { %v4460_v16 = vpop.f32.mrf.mxu3  ;;  %v4120_v43 = vadd.f32 %v16489_v33, %v16488_v42  ;;  %v4215_v37 = vadd.f32 %v16496_v5, %v4110_v7 }
 0x86a   : >> { %v12616_v40 = vadd.f32 %v12569_v3, %v4364_v34  ;;  %v12633_v3 = vadd.f32 %v16485_v31, %v4324_v27  ;;  %v12642_v62 = vadd.f32 %v16490_v6, %v4348_v17 }
 0x86b   : >> { %v4375_v58 = vpop.f32.mrf.mxu2  ;;  %v4227_v28 = vadd.f32 %v16491_v51, %v4120_v43  ;;  %v4332_v45 = vadd.f32 %v16497_v29, %v4215_v37 }
 0x86c   : >> { %v4376_v54 = vadd.f32 %v4375_v58, %v4281_v23  ;;  %v16498_v23 = vld [vmem:[#allocation164_spill] sm:$0xff] }
 0x86d   : >> { %v4340_v61 = vadd.f32 %v16492_v38, %v4227_v28  ;;  %v12656_v58 = vadd.f32 %v16498_v23, %v4332_v45 }
 0x86e   : >> { %v4461_v0 = vadd.f32 %v4460_v16, %v4376_v54 }
 0x86f   : >> { %v12650_v49 = vadd.f32 %v16495_v14, %v4340_v61  ;;  %v16504_v14 = vld [vmem:[#allocation163_spill] sm:$0xff] }
 0x870   : >> { %4495 = vmax.xlane.f32.xlu1 %v4461_v0  ;;  %4483 = vmax.xlane.f32.xlu0 %v12594_v30 }
 0x871   : >> { %v4464_v56 = vpop.f32.mrf.mxu3 }
 0x873   : >> { %v4379_v11 = vpop.f32.mrf.mxu2 }
 0x874   : >> { %v4380_v53 = vadd.f32 %v4379_v11, %v4287_v18 }
 0x876   : >> { %v4465_v41 = vadd.f32 %v4464_v56, %v4380_v53 }
 0x878   : >> { %4497 = vmax.xlane.f32.xlu1 %v4465_v41  ;;  %4479 = vmax.xlane.f32.xlu0 %v12604_v36 }
 0x880   : >> { %4489 = vmax.xlane.f32.xlu1 %v12616_v40  ;;  %4475 = vmax.xlane.f32.xlu0 %v12619_v35 }
 0x883   : >> { %v4472_v61 = vpop.xlane.xlu2 %4471 }
 0x884   : >> { %v4501_v5 = vsub.f32 %v16504_v14, %v4472_v61 }
 0x886   : >> { %v4519_v37 = vmul.f32 1.442695, %v4501_v5 }
 0x888   : >> { %4485 = vmax.xlane.f32.xlu1 %v12630_v20  ;;  %4469 = vmax.xlane.f32.xlu0 %v12633_v3 }
 0x890   : >> { %4481 = vmax.xlane.f32.xlu1 %v12642_v62 }
 0x898   : >> { %4477 = vmax.xlane.f32.xlu1 %v12650_v49 }
 0x8a0   : >> { %4473 = vmax.xlane.f32.xlu1 %v12656_v58 }
 0x8d3   : >> { %v4492_v54 = vpop.xlane.xlu0 %4491 }
 0x8d4   : >> { %v4511_v18 = vsub.f32 %v12577_v46, %v4492_v54  ;;  %v16499_v46 = vld [vmem:[#allocation143_spill] sm:$0xff] }
 0x8d5   : >> { %v4095_v34 = vadd.f32 %v16500_v59, %v16499_v46 }
 0x8d6   : >> { %v4539_v11 = vmul.f32 1.442695, %v4511_v18 }
 0x8db   : >> { %v4494_v16 = vpop.xlane.xlu1 %4493  ;;  %v4488_v50 = vpop.xlane.xlu0 %4487 }
 0x8dc   : >> { %v4512_v57 = vsub.f32 %v12584_v39, %v4494_v16  ;;  %v4509_v39 = vsub.f32 %v12586_v22, %v4488_v50 }
 0x8de   : >> { %v4541_v19 = vmul.f32 1.442695, %v4512_v57  ;;  %v4535_v32 = vmul.f32 1.442695, %v4509_v39 }
 0x8e0   : >> { %9083 = vpow2.f32 %v4541_v19 }
 0x8e3   : >> { %v4496_v12 = vpop.xlane.xlu1 %4495 }
 0x8e4   : >> { %v4513_v26 = vsub.f32 %v4461_v0, %v4496_v12  ;;  %v4484_v0 = vpop.xlane.xlu0 %4483 }
 0x8e5   : >> { %v4507_v25 = vsub.f32 %v12594_v30, %v4484_v0  ;;  %v16507_v0 = vld [vmem:[#allocation42_spill] sm:$0xff] }
 0x8e6   : >> { %v12660_v8 = vpop.eup %9083  ;;  %v4543_v2 = vmul.f32 1.442695, %v4513_v26 }
 0x8e7   : >> { %4573 = vadd.xlane.f32.xlu1 %v12660_v8  ;;  %v4531_v52 = vmul.f32 1.442695, %v4507_v25 }
 0x8e8   : >> { %9085 = vpow2.f32 %v4543_v2  ;;  %v16505_v2 = vld [vmem:[#allocation37_spill] sm:$0xff] }
 0x8e9   : >> { %9087 = vpow2.f32 %v4539_v11  ;;  %v16506_v11 = vld [vmem:[#allocation39_spill] sm:$0xff] }
 0x8eb   : >> { %v4498_v47 = vpop.xlane.xlu1 %4497 }
 0x8ec   : >> { %v4514_v53 = vsub.f32 %v4465_v41, %v4498_v47  ;;  %v16501_v41 = vld [vmem:[#allocation155_spill] sm:$0xff]  ;;  %v4480_v27 = vpop.xlane.xlu0 %4479 }
 0x8ed   : >> { %v4197_v15 = vadd.f32 %v16501_v41, %v4095_v34  ;;  %v4505_v30 = vsub.f32 %v12604_v36, %v4480_v27 }
 0x8ee   : >> { %v12664_v56 = vpop.eup %9085  ;;  %v4545_v48 = vmul.f32 1.442695, %v4514_v53 }
 0x8ef   : >> { %4575 = vadd.xlane.f32.xlu1 %v12664_v56  ;;  %v12668_v63 = vpop.eup %9087  ;;  %v4320_v44 = vadd.f32 %v16502_v24, %v4197_v15  ;;  %v4527_v17 = vmul.f32 1.442695, %v4505_v30 }
 0x8f0   : >> { %9089 = vpow2.f32 %v4545_v48 }
 0x8f1   : >> { %9091 = vpow2.f32 %v4535_v32  ;;  %v12681_v1 = vadd.f32 %v16503_v4, %v4320_v44 }
 0x8f2   : >> { %9093 = vpow2.f32 %v4531_v52  ;;  %v16508_v52 = vld [vmem:[#allocation44_spill] sm:$0xff] }
 0x8f3   : >> { %v4490_v21 = vpop.xlane.xlu1 %4489 }
 0x8f4   : >> { %v4510_v22 = vsub.f32 %v12616_v40, %v4490_v21  ;;  %v4476_v33 = vpop.xlane.xlu0 %4475 }
 0x8f5   : >> { %v4503_v28 = vsub.f32 %v12619_v35, %v4476_v33 }
 0x8f6   : >> { %v12672_v55 = vpop.eup %9089  ;;  %v4537_v31 = vmul.f32 1.442695, %v4510_v22 }
 0x8f7   : >> { %4571 = vadd.xlane.f32.xlu1 %v12668_v63  ;;  %4577 = vadd.xlane.f32.xlu0 %v12672_v55  ;;  %v12683_v10 = vpop.eup %9091  ;;  %v4523_v38 = vmul.f32 1.442695, %v4503_v28 }
 0x8f8   : >> { %9095 = vpow2.f32 %v4537_v31  ;;  %v12689_v6 = vpop.eup %9093 }
 0x8f9   : >> { %9097 = vpow2.f32 %v4527_v17 }
 0x8fb   : >> { %v4486_v60 = vpop.xlane.xlu1 %4485 }
 0x8fc   : >> { %v4508_v40 = vsub.f32 %v12630_v20, %v4486_v60  ;;  %v4470_v19 = vpop.xlane.xlu0 %4469 }
 0x8fd   : >> { %v4500_v12 = vsub.f32 %v12633_v3, %v4470_v19 }
 0x8fe   : >> { %v4533_v43 = vmul.f32 1.442695, %v4508_v40  ;;  %v12691_v51 = vpop.eup %9095 }
 0x8ff   : >> { %4567 = vadd.xlane.f32.xlu1 %v12683_v10  ;;  %4467 = vmax.xlane.f32.xlu0 %v12681_v1  ;;  %v12697_v13 = vpop.eup %9097  ;;  %v4517_v26 = vmul.f32 1.442695, %v4500_v12 }
 0x900   : >> { %9099 = vpow2.f32 %v4533_v43 }
 0x901   : >> { %9101 = vpow2.f32 %v4523_v38 }
 0x903   : >> { %v4482_v42 = vpop.xlane.xlu1 %4481 }
 0x904   : >> { %v4506_v36 = vsub.f32 %v12642_v62, %v4482_v42 }
 0x906   : >> { %v4529_v9 = vmul.f32 1.442695, %v4506_v36  ;;  %v12699_v7 = vpop.eup %9099 }
 0x907   : >> { %4563 = vadd.xlane.f32.xlu1 %v12689_v6  ;;  %4569 = vadd.xlane.f32.xlu0 %v12691_v51  ;;  %v12705_v29 = vpop.eup %9101 }
 0x908   : >> { %9103 = vpow2.f32 %v4529_v9 }
 0x909   : >> { %9105 = vpow2.f32 %v4519_v37 }
 0x90b   : >> { %v4478_v20 = vpop.xlane.xlu1 %4477 }
 0x90c   : >> { %v4504_v35 = vsub.f32 %v12650_v49, %v4478_v20 }
 0x90e   : >> { %v4525_v62 = vmul.f32 1.442695, %v4504_v35  ;;  %v12707_v23 = vpop.eup %9103 }
 0x90f   : >> { %4559 = vadd.xlane.f32.xlu1 %v12697_v13  ;;  %4565 = vadd.xlane.f32.xlu0 %v12699_v7  ;;  %v12712_v57 = vpop.eup %9105 }
 0x910   : >> { %9107 = vpow2.f32 %v4525_v62 }
 0x913   : >> { %v4474_v45 = vpop.xlane.xlu1 %4473 }
 0x914   : >> { %v4502_v16 = vsub.f32 %v12656_v58, %v4474_v45 }
 0x916   : >> { %v4521_v54 = vmul.f32 1.442695, %v4502_v16  ;;  %v12714_v49 = vpop.eup %9107 }
 0x917   : >> { %4555 = vadd.xlane.f32.xlu1 %v12705_v29  ;;  %4561 = vadd.xlane.f32.xlu0 %v12707_v23 }
 0x918   : >> { %9109 = vpow2.f32 %v4521_v54 }
 0x919   : >> { %9111 = vpow2.f32 %v4517_v26 }
 0x91e   : >> { %v12719_v50 = vpop.eup %9109 }
 0x91f   : >> { %4551 = vadd.xlane.f32.xlu1 %v12712_v57  ;;  %4557 = vadd.xlane.f32.xlu0 %v12714_v49  ;;  %v12722_v58 = vpop.eup %9111 }
 0x927   : >> { %4553 = vadd.xlane.f32.xlu0 %v12719_v50 }
 0x92f   : >> { %4549 = vadd.xlane.f32.xlu0 %v12722_v58 }
 0x958   : >> { %5269 = vxpose.xlu0.b32.start [1/4] (short) %v16505_v2, 128 }
 0x95a   : >> { %v4574_v18 = vpop.xlane.xlu1 %4573 }
 0x95b   : >> { %9113 = vrcp.f32 %v4574_v18  ;;  %v4785_v46 = vand.u32 2147483648, %v4574_v18  ;;  %vm4779_vm6 = vweird.f32 %v4574_v18  ;;  %v4783_v15 = vand.u32 2147483647, %v4574_v18 }
 0x95d   : >> { %v4786_v24 = vor.u32 1.1754944e-38, %v4785_v46  ;;  %vm4784_vm8 = vcmp.eq.f32.partialorder %v4783_v15, 8.507059e+37 }
 0x960   : >> { %5270 = vxpose.xlu0.b32.cont [2/4] (short) %v16506_v11, 128 }
 0x961   : >> { %v9114_v47 = vpop.eup %9113 }
 0x962   : >> { %v4775_v53 = vmul.f32 %v9114_v47, %v4574_v18  ;;  %v4576_v3 = vpop.xlane.xlu1 %4575  ;;  %vm4780_vm5 = vweird.f32 %v9114_v47 }
 0x963   : >> { %9115 = vrcp.f32 %v4576_v3  ;;  %vm4781_vm7 = vmor %vm4779_vm6, %vm4780_vm5  ;;  %v4800_v4 = vand.u32 2147483648, %v4576_v3  ;;  %vm4794_vm10 = vweird.f32 %v4576_v3  ;;  %v4798_v40 = vand.u32 2147483647, %v4576_v3 }
 0x964   : >> { %v4776_v48 = vsub.f32 1.0, %v4775_v53 }
 0x965   : >> { %v4801_v9 = vor.u32 1.1754944e-38, %v4800_v4  ;;  %vm4799_vm12 = vcmp.eq.f32.partialorder %v4798_v40, 8.507059e+37 }
 0x966   : >> { %v4777_v39 = vmul.f32 %v9114_v47, %v4776_v48 }
 0x968   : >> { %5271 = vxpose.xlu0.b32.cont [3/4] (short) %v16507_v0, 128  ;;  %v4778_v32 = vadd.f32 %v9114_v47, %v4777_v39 }
 0x969   : >> { %v9116_v21 = vpop.eup %9115 }
 0x96a   : >> { %v4790_v59 = vmul.f32 %v9116_v21, %v4576_v3  ;;  %v12728_v34 = vpop.xlane.xlu1 %4571  ;;  %v4578_v41 = vpop.xlane.xlu0 %4577  ;;  %v4782_v22 = vsel %vm4781_vm7, %v9114_v47, %v4778_v32  ;;  %vm4795_vm9 = vweird.f32 %v9116_v21 }
 0x96b   : >> { %9117 = vrcp.f32 %v12728_v34  ;;  %v4787_v60 = vsel %vm4784_vm8, %v4786_v24, %v4782_v22  ;;  %vm12735_vm11 = vmor %vm4794_vm10, %vm4795_vm9  ;;  %v4815_v35 = vand.u32 2147483648, %v4578_v41  ;;  %vm4809_vm15 = vweird.f32 %v4578_v41 }
 0x96c   : >> { %v4791_v25 = vsub.f32 1.0, %v4790_v59  ;;  %9119 = vrcp.f32 %v4578_v41  ;;  %v4788_v36 = vmul.f32 %v12660_v8, %v4787_v60  ;;  %v4813_v8 = vand.u32 2147483647, %v4578_v41 }
 0x96d   : >> { %vm4764_vm1 = vweird.f32 %v12728_v34  ;;  %v4768_v26 = vand.u32 2147483647, %v12728_v34  ;;  %v4816_v39 = vor.u32 1.1754944e-38, %v4815_v35 }
 0x96e   : >> { %v4792_v44 = vmul.f32 %v9116_v21, %v4791_v25  ;;  %v12744_v16 = vand.u32 4294901760, %v4788_v36  ;;  %vm4814_vm4 = vcmp.eq.f32.partialorder %v4813_v8, 8.507059e+37 }
 0x96f   : >> { %vm4769_vm5 = vcmp.eq.f32.partialorder %v4768_v26, 8.507059e+37 }
 0x970   : >> { %v4793_v27 = vadd.f32 %v9116_v21, %v4792_v44  ;;  %5272 = vxpose.xlu0.b32.end [4/4] (short) %v16508_v52, 128  ;;  %v12770_v0 = vsub.f32 %v4788_v36, %v12744_v16 }
 0x971   : >> { %v9118_v31 = vpop.eup %9117 }
 0x972   : >> { %v9120_v30 = vpop.eup %9119  ;;  %v4760_v17 = vmul.f32 %v9118_v31, %v12728_v34  ;;  %v12733_v42 = vpop.xlane.xlu1 %4567  ;;  %v4797_v61 = vsel %vm12735_vm11, %v9116_v21, %v4793_v27  ;;  %vm4765_vm14 = vweird.f32 %v9118_v31  ;;  %v4898_v25 = vand.u32 4294901760, %v12770_v0 }
 0x973   : >> { %v4468_v33 = vpop.xlane.xlu0 %4467  ;;  %v4805_v28 = vmul.f32 %v9120_v30, %v4578_v41  ;;  %9121 = vrcp.f32 %v12733_v42  ;;  %vm4810_vm13 = vweird.f32 %v9120_v30  ;;  %v4802_v45 = vsel %vm4799_vm12, %v4801_v9, %v4797_v61  ;;  %vm12762_vm3 = vmor %vm4764_vm1, %vm4765_vm14 }
 0x974   : >> { %v4761_v38 = vsub.f32 1.0, %v4760_v17  ;;  %v4499_v20 = vsub.f32 %v12681_v1, %v4468_v33  ;;  %v4770_v1 = vand.u32 2147483648, %v12728_v34  ;;  %vm12751_vm2 = vmor %vm4809_vm15, %vm4810_vm13  ;;  %v4803_v53 = vmul.f32 %v12664_v56, %v4802_v45 }
 0x975   : >> { %v4806_v14 = vsub.f32 1.0, %v4805_v28  ;;  %v4738_v22 = vand.u32 2147483647, %v12733_v42  ;;  %v4740_v60 = vand.u32 2147483648, %v12733_v42  ;;  %v12810_v33 = vsub.f32 %v12770_v0, %v4898_v25 }
 0x976   : >> { %v4762_v5 = vmul.f32 %v9118_v31, %v4761_v38  ;;  %v4515_v37 = vmul.f32 1.442695, %v4499_v20  ;;  %v4771_v56 = vor.u32 1.1754944e-38, %v4770_v1  ;;  %v12778_v41 = vand.u32 4294901760, %v4803_v53 }
 0x977   : >> { %v4807_v62 = vmul.f32 %v9120_v30, %v4806_v14  ;;  %vm4734_vm6 = vweird.f32 %v12733_v42  ;;  %vm12814_vm8 = vcmp.eq.f32.partialorder %v4738_v22, 8.507059e+37  ;;  %v4741_v20 = vor.u32 1.1754944e-38, %v4740_v60 }
 0x978   : >> { %v4763_v54 = vadd.f32 %v9118_v31, %v4762_v5  ;;  %9123 = vpow2.f32 %v4515_v37 }
 0x979   : >> { %v12746_v19 = vpop.eup %9121  ;;  %v4808_v12 = vadd.f32 %v9120_v30, %v4807_v62  ;;  %v4900_v62 = vand.u32 4294901760, %v12810_v33 }
 0x97a   : >> { %v4730_v18 = vmul.f32 %v12746_v19, %v12733_v42  ;;  %v12757_v11 = vpop.xlane.xlu1 %4563  ;;  %v4767_v21 = vsel %vm12762_vm3, %v9118_v31, %v4763_v54  ;;  %vm4735_vm7 = vweird.f32 %v12746_v19 }
 0x97b   : >> { %v12759_v47 = vpop.xlane.xlu0 %4569  ;;  %v4812_v48 = vsel %vm12751_vm2, %v9120_v30, %v4808_v12  ;;  %9125 = vrcp.f32 %v12757_v11  ;;  %v4772_v15 = vsel %vm4769_vm5, %v4771_v56, %v4767_v21  ;;  %v12801_v30 = vsub.f32 %v4803_v53, %v12778_v41  ;;  %vm12837_vm9 = vmor %vm4734_vm6, %vm4735_vm7 }
 0x97c   : >> { %9127 = vrcp.f32 %v12759_v47  ;;  %v4731_v32 = vsub.f32 1.0, %v4730_v18  ;;  %v4817_v46 = vsel %vm4814_vm4, %v4816_v39, %v4812_v48  ;;  %v4773_v40 = vmul.f32 %v12668_v63, %v4772_v15 }
 0x97d   : >> { %v4818_v34 = vmul.f32 %v12672_v55, %v4817_v46  ;;  %v4710_v36 = vand.u32 2147483648, %v12757_v11  ;;  %v4892_v9 = vand.u32 4294901760, %v12801_v30  ;;  %v4753_v35 = vand.u32 2147483647, %v12759_v47 }
 0x97e   : >> { %v12775_v59 = vpop.eup %9123  ;;  %v4732_v27 = vmul.f32 %v12746_v19, %v4731_v32  ;;  %v12827_v14 = vand.u32 4294901760, %v4773_v40  ;;  %v4755_v37 = vand.u32 2147483648, %v12759_v47  ;;  %v4708_v54 = vand.u32 2147483647, %v12757_v11 }
 0x97f   : >> { %4547 = vadd.xlane.f32.xlu1 %v12775_v59  ;;  %v12783_v24 = vand.u32 4294901760, %v4818_v34  ;;  %vm4749_vm10 = vweird.f32 %v12759_v47  ;;  %v12847_v26 = vor.u32 1.1754944e-38, %v4710_v36  ;;  %v4893_v21 = vsub.f32 %v12801_v30, %v4892_v9 }
 0x980   : >> { %v4733_v63 = vadd.f32 %v12746_v19, %v4732_v27  ;;  %v12865_v56 = vsub.f32 %v4773_v40, %v12827_v14  ;;  %vm12875_vm13 = vcmp.eq.f32.partialorder %v4753_v35, 8.507059e+37  ;;  %v4756_v46 = vor.u32 1.1754944e-38, %v4755_v37 }
 0x981   : >> { %v12785_v44 = vpop.eup %9125  ;;  %4820 = vmatpush.xpose.msrb.mxu0 %v12783_v24  ;;  %v12793_v55 = vsub.f32 %v4818_v34, %v12783_v24  ;;  %5205 = vmatpush.xpose.msra.mxu3 %v12783_v24  ;;  %vm4704_vm14 = vweird.f32 %v12757_v11  ;;  %vm12912_vm3 = vcmp.eq.f32.partialorder %v4708_v54, 8.507059e+37 }
 0x982   : >> { %v12788_v52 = vpop.eup %9127  ;;  %v12796_v31 = vpop.xlane.xlu1 %4559  ;;  %v4700_v28 = vmul.f32 %v12785_v44, %v12757_v11  ;;  %v4737_v2 = vsel %vm12837_vm9, %v12746_v19, %v4733_v63  ;;  %vm4705_vm15 = vweird.f32 %v12785_v44 }
 0x983   : >> { %v12798_v4 = vpop.xlane.xlu0 %4565  ;;  %v4745_v17 = vmul.f32 %v12788_v52, %v12759_v47  ;;  %9129 = vrcp.f32 %v12796_v31  ;;  %v4886_v61 = vand.u32 4294901760, %v12793_v55  ;;  %vm4750_vm11 = vweird.f32 %v12788_v52 }
 0x984   : >> { %9131 = vrcp.f32 %v12798_v4  ;;  %v4701_v12 = vsub.f32 1.0, %v4700_v28  ;;  %vm12871_vm12 = vmor %vm4749_vm10, %vm4750_vm11  ;;  %v4680_v15 = vand.u32 2147483648, %v12796_v31  ;;  %v4742_v22 = vsel %vm12814_vm8, %v4741_v20, %v4737_v2 }
 0x985   : >> { %v4746_v38 = vsub.f32 1.0, %v4745_v17  ;;  %4822 = vmatpush.xpose.msrb.mxu0 %v12778_v41  ;;  %5207 = vmatpush.xpose.msra.mxu3 %v12778_v41  ;;  %v4887_v8 = vsub.f32 %v12793_v55, %v4886_v61  ;;  %v4723_v40 = vand.u32 2147483647, %v12798_v4  ;;  %v4678_v63 = vand.u32 2147483647, %v12796_v31  ;;  %vm12961_vm8 = vmor %vm4704_vm14, %vm4705_vm15 }
 0x986   : >> { %5126 = vmatpush.xpose.msra.mxu2 %v4886_v61  ;;  %v4702_v27 = vmul.f32 %v12785_v44, %v4701_v12  ;;  %v4904_v28 = vand.u32 4294901760, %v12865_v56  ;;  %v4725_v36 = vand.u32 2147483648, %v12798_v4  ;;  %v4743_v20 = vmul.f32 %v12683_v10, %v4742_v22 }
 0x987   : >> { %v4747_v5 = vmul.f32 %v12788_v52, %v4746_v38  ;;  %v4888_v3 = vand.u32 4294901760, %v4887_v8  ;;  %v12902_v61 = vor.u32 1.1754944e-38, %v4680_v15  ;;  %vm4719_vm1 = vweird.f32 %v12798_v4 }
 0x988   : >> { %v4703_v35 = vadd.f32 %v12785_v44, %v4702_v27  ;;  %vm4674_vm4 = vweird.f32 %v12796_v31  ;;  %vm12918_vm5 = vcmp.eq.f32.partialorder %v4723_v40, 8.507059e+37  ;;  %v4905_v2 = vsub.f32 %v12865_v56, %v4904_v28 }
 0x989   : >> { %v12845_v1 = vpop.eup %9129  ;;  %v4748_v42 = vadd.f32 %v12788_v52, %v4747_v5  ;;  %4824 = vmatpush.xpose.msrb.mxu0 %v12744_v16  ;;  %5209 = vmatpush.xpose.msra.mxu3 %v12744_v16  ;;  %v12945_v32 = vand.u32 4294901760, %v4743_v20  ;;  %vm12972_vm10 = vcmp.eq.f32.partialorder %v4678_v63, 8.507059e+37 }
 0x98a   : >> { %v12853_v18 = vpop.eup %9131  ;;  %v4670_v53 = vmul.f32 %v12845_v1, %v12796_v31  ;;  %v12859_v48 = vpop.xlane.xlu1 %4555  ;;  %4889 = vmatpush.xpose.msrb.mxu1 %v4888_v3  ;;  %5130 = vmatpush.xpose.msra.mxu2 %v4892_v9  ;;  %vm4675_vm7 = vweird.f32 %v12845_v1  ;;  %v4906_v27 = vand.u32 4294901760, %v4905_v2 }
 0x98b   : >> { %v12861_v39 = vpop.xlane.xlu0 %4561  ;;  %v4715_v34 = vmul.f32 %v12853_v18, %v12798_v4  ;;  %9133 = vrcp.f32 %v12859_v48  ;;  %v4752_v47 = vsel %vm12871_vm12, %v12788_v52, %v4748_v42  ;;  %v4894_v52 = vand.u32 4294901760, %v4893_v21 }
 0x98c   : >> { %9135 = vrcp.f32 %v12861_v39  ;;  %v4671_v17 = vsub.f32 1.0, %v4670_v53  ;;  %v4757_v38 = vsel %vm12875_vm13, %v4756_v46, %v4752_v47  ;;  %vm4720_vm2 = vweird.f32 %v12853_v18  ;;  %vm13006_vm13 = vmor %vm4674_vm4, %vm4675_vm7 }
 0x98d   : >> { %v4716_v60 = vsub.f32 1.0, %v4715_v34  ;;  %4826 = vmatpush.xpose.msrb.mxu0 %v12827_v14  ;;  %5211 = vmatpush.xpose.msra.mxu3 %v12827_v14  ;;  %v4758_v9 = vmul.f32 %v12691_v51, %v4757_v38  ;;  %v4693_v8 = vand.u32 2147483647, %v12861_v39  ;;  %vm12938_vm6 = vmor %vm4719_vm1, %vm4720_vm2  ;;  %v4726_v21 = vor.u32 1.1754944e-38, %v4725_v36 }
 0x98e   : >> { %4895 = vmatpush.xpose.msrb.mxu1 %v4894_v52  ;;  %5134 = vmatpush.xpose.msra.mxu2 %v4898_v25  ;;  %v4650_v25 = vand.u32 2147483648, %v12859_v48  ;;  %v4672_v51 = vmul.f32 %v12845_v1, %v4671_v17  ;;  %v4695_v34 = vand.u32 2147483648, %v12861_v39  ;;  %vm4689_vm9 = vweird.f32 %v12861_v39 }
 0x98f   : >> { %v4717_v43 = vmul.f32 %v12853_v18, %v4716_v60  ;;  %v12925_v12 = vand.u32 4294901760, %v4758_v9  ;;  %vm12976_vm11 = vcmp.eq.f32.partialorder %v4693_v8, 8.507059e+37  ;;  %v4707_v60 = vsel %vm12961_vm8, %v12785_v44, %v4703_v35 }
 0x990   : >> { %v12966_v15 = vor.u32 1.1754944e-38, %v4650_v25  ;;  %v4673_v33 = vadd.f32 %v12845_v1, %v4672_v51  ;;  %v12989_v52 = vsub.f32 %v4743_v20, %v12945_v32  ;;  %v4712_v8 = vsel %vm12912_vm3, %v12847_v26, %v4707_v60 }
 0x991   : >> { %v12909_v5 = vpop.eup %9133  ;;  %v4718_v10 = vadd.f32 %v12853_v18, %v4717_v43  ;;  %4828 = vmatpush.xpose.msrb.mxu0 %v12925_v12  ;;  %5213 = vmatpush.xpose.msra.mxu3 %v12925_v12  ;;  %v12984_v17 = vsub.f32 %v4758_v9, %v12925_v12  ;;  %v4696_v43 = vor.u32 1.1754944e-38, %v4695_v34  ;;  %vm4644_vm3 = vweird.f32 %v12859_v48 }
 0x992   : >> { %v12927_v54 = vpop.xlane.xlu1 %4551  ;;  %v12932_v53 = vpop.eup %9135  ;;  %v4640_v19 = vmul.f32 %v12909_v5, %v12859_v48  ;;  %4901 = vmatpush.xpose.msrb.mxu1 %v4900_v62  ;;  %5138 = vmatpush.xpose.msra.mxu2 %v4904_v28  ;;  %v4916_v20 = vand.u32 4294901760, %v12989_v52  ;;  %vm4645_vm2 = vweird.f32 %v12909_v5 }
 0x993   : >> { %v12929_v42 = vpop.xlane.xlu0 %4557  ;;  %9137 = vrcp.f32 %v12927_v54  ;;  %v4722_v46 = vsel %vm12938_vm6, %v12853_v18, %v4718_v10  ;;  %v4685_v4 = vmul.f32 %v12932_v53, %v12861_v39  ;;  %v4648_v18 = vand.u32 2147483647, %v12859_v48 }
 0x994   : >> { %9139 = vrcp.f32 %v12929_v42  ;;  %v4641_v40 = vsub.f32 1.0, %v4640_v19  ;;  %v4727_v63 = vsel %vm12918_vm5, %v4726_v21, %v4722_v46  ;;  %vm4690_vm12 = vweird.f32 %v12932_v53 }
 0x995   : >> { %v4686_v11 = vsub.f32 1.0, %v4685_v4  ;;  %4830 = vmatpush.xpose.msrb.mxu0 %v12945_v32  ;;  %v4728_v44 = vmul.f32 %v12699_v7, %v4727_v63  ;;  %v4618_v38 = vand.u32 2147483647, %v12927_v54  ;;  %v4620_v9 = vand.u32 2147483648, %v12927_v54  ;;  %5215 = vmatpush.xpose.msra.mxu3 %v12945_v32  ;;  %vm13028_vm15 = vmor %vm4689_vm9, %vm4690_vm12 }
 0x996   : >> { %4907 = vmatpush.xpose.msrb.mxu1 %v4906_v27  ;;  %v4910_v35 = vand.u32 4294901760, %v12984_v17  ;;  %vm4659_vm14 = vweird.f32 %v12929_v42  ;;  %v4642_v2 = vmul.f32 %v12909_v5, %v4641_v40  ;;  %vm4614_vm1 = vweird.f32 %v12927_v54  ;;  %vm13140_vm12 = vmor %vm4644_vm3, %vm4645_vm2 }
 0x997   : >> { %v4687_v28 = vmul.f32 %v12932_v53, %v4686_v11  ;;  %v13014_v25 = vand.u32 4294901760, %v4728_v44  ;;  %v4663_v21 = vand.u32 2147483647, %v12929_v42  ;;  %v4677_v46 = vsel %vm13006_vm13, %v12845_v1, %v4673_v33 }
 0x998   : >> { %5142 = vmatpush.xpose.msra.mxu2 %v4910_v35  ;;  %v4911_v37 = vsub.f32 %v12984_v17, %v4910_v35  ;;  %v13046_v4 = vor.u32 1.1754944e-38, %v4620_v9  ;;  %v4665_v34 = vand.u32 2147483648, %v12929_v42  ;;  %v4713_v11 = vmul.f32 %v12689_v6, %v4712_v8 }
 0x999   : >> { %v12995_v36 = vpop.eup %9137  ;;  %v4688_v7 = vadd.f32 %v12932_v53, %v4687_v28  ;;  %4832 = vmatpush.xpose.msrb.mxu0 %v13014_v25  ;;  %5217 = vmatpush.xpose.msra.mxu3 %v13014_v25  ;;  %v4917_v60 = vsub.f32 %v12989_v52, %v4916_v20  ;;  %v13055_v40 = vsub.f32 %v4728_v44, %v13014_v25  ;;  %vm13067_vm5 = vcmp.eq.f32.partialorder %v4648_v18, 8.507059e+37 }
 0x99a   : >> { %v4610_v45 = vmul.f32 %v12995_v36, %v12927_v54  ;;  %v13021_v31 = vpop.eup %9139  ;;  %v4912_v47 = vand.u32 4294901760, %v4911_v37  ;;  %vm4615_vm4 = vweird.f32 %v12995_v36  ;;  %v13058_v1 = vand.u32 4294901760, %v4713_v11 }
 0x99b   : >> { %v13016_v51 = vpop.xlane.xlu0 %4553  ;;  %v4692_v26 = vsel %vm13028_vm15, %v12932_v53, %v4688_v7  ;;  %v4655_v19 = vmul.f32 %v13021_v31, %v12929_v42  ;;  %v4682_v6 = vsel %vm12972_vm10, %v12902_v61, %v4677_v46  ;;  %vm13072_vm6 = vcmp.eq.f32.partialorder %v4618_v38, 8.507059e+37  ;;  %vm13113_vm10 = vmor %vm4614_vm1, %vm4615_vm4 }
 0x99c   : >> { %9141 = vrcp.f32 %v13016_v51  ;;  %v4611_v39 = vsub.f32 1.0, %v4610_v45  ;;  %4913 = vmatpush.xpose.msrb.mxu1 %v4912_v47  ;;  %5146 = vmatpush.xpose.msra.mxu2 %v4916_v20  ;;  %v4697_v33 = vsel %vm12976_vm11, %v4696_v43, %v4692_v26  ;;  %vm4660_vm7 = vweird.f32 %v13021_v31 }
 0x99d   : >> { %v4656_v27 = vsub.f32 1.0, %v4655_v19  ;;  %v4922_v22 = vand.u32 4294901760, %v13055_v40  ;;  %4834 = vmatpush.xpose.msrb.mxu0 %v13058_v1  ;;  %v4918_v61 = vand.u32 4294901760, %v4917_v60  ;;  %5219 = vmatpush.xpose.msra.mxu3 %v13058_v1  ;;  %v4698_v18 = vmul.f32 %v12707_v23, %v4697_v33  ;;  %vm13100_vm9 = vmor %vm4659_vm14, %vm4660_vm7 }
 0x99e   : >> { %v4612_v53 = vmul.f32 %v12995_v36, %v4611_v39  ;;  %v13085_v43 = vsub.f32 %v4713_v11, %v13058_v1  ;;  %v4683_v38 = vmul.f32 %v12697_v13, %v4682_v6  ;;  %v4643_v35 = vadd.f32 %v12909_v5, %v4642_v2 }
 0x99f   : >> { %v4657_v9 = vmul.f32 %v13021_v31, %v4656_v27  ;;  %vm13090_vm8 = vcmp.eq.f32.partialorder %v4663_v21, 8.507059e+37  ;;  %v13104_v13 = vand.u32 4294901760, %v4698_v18  ;;  %v4923_v8 = vsub.f32 %v13055_v40, %v4922_v22 }
 0x9a0   : >> { %v4613_v28 = vadd.f32 %v12995_v36, %v4612_v53  ;;  %4919 = vmatpush.xpose.msrb.mxu1 %v4918_v61  ;;  %5150 = vmatpush.xpose.msra.mxu2 %v4922_v22  ;;  %v4928_v2 = vand.u32 4294901760, %v13085_v43  ;;  %v4666_v21 = vor.u32 1.1754944e-38, %v4665_v34  ;;  %v4635_v26 = vand.u32 2147483648, %v13016_v51 }
 0x9a1   : >> { %v4658_v20 = vadd.f32 %v13021_v31, %v4657_v9  ;;  %4836 = vmatpush.xpose.msrb.mxu0 %v13104_v13  ;;  %v4924_v19 = vand.u32 4294901760, %v4923_v8  ;;  %5221 = vmatpush.xpose.msra.mxu3 %v13104_v13  ;;  %v13126_v54 = vand.u32 4294901760, %v4683_v38  ;;  %vm4629_vm13 = vweird.f32 %v13016_v51 }
 0x9a2   : >> { %v13079_v62 = vpop.eup %9141  ;;  %v4617_v39 = vsel %vm13113_vm10, %v12995_v36, %v4613_v28  ;;  %v4929_v46 = vsub.f32 %v13085_v43, %v4928_v2  ;;  %v4633_v11 = vand.u32 2147483647, %v13016_v51  ;;  %v4647_v6 = vsel %vm13140_vm12, %v12909_v5, %v4643_v35 }
 0x9a3   : >> { %v4625_v7 = vmul.f32 %v13079_v62, %v13016_v51  ;;  %v13096_v45 = vpop.xlane.xlu0 %4549  ;;  %v4662_v3 = vsel %vm13100_vm9, %v13021_v31, %v4658_v20  ;;  %vm4630_vm11 = vweird.f32 %v13079_v62  ;;  %v13132_v31 = vsub.f32 %v4698_v18, %v13104_v13 }
 0x9a4   : >> { %9143 = vrcp.f32 %v13096_v45  ;;  %v4667_v34 = vsel %vm13090_vm8, %v4666_v21, %v4662_v3  ;;  %4925 = vmatpush.xpose.msrb.mxu1 %v4924_v19  ;;  %5154 = vmatpush.xpose.msra.mxu2 %v4928_v2  ;;  %v13148_v27 = vsub.f32 %v4683_v38, %v13126_v54  ;;  %v4930_v33 = vand.u32 4294901760, %v4929_v46  ;;  %vm13157_vm14 = vmor %vm4629_vm13, %vm4630_vm11 }
 0x9a5   : >> { %v4626_v37 = vsub.f32 1.0, %v4625_v7  ;;  %v4668_v53 = vmul.f32 %v12714_v49, %v4667_v34  ;;  %v4934_v48 = vand.u32 4294901760, %v13132_v31  ;;  %4838 = vmatpush.xpose.msrb.mxu0 %v13126_v54  ;;  %5223 = vmatpush.xpose.msra.mxu3 %v13126_v54  ;;  %v4652_v22 = vsel %vm13067_vm5, %v12966_v15, %v4647_v6 }
 0x9a6   : >> { %v4940_v9 = vand.u32 4294901760, %v13148_v27  ;;  %v4622_v5 = vsel %vm13072_vm6, %v13046_v4, %v4617_v39  ;;  %v4636_v18 = vor.u32 1.1754944e-38, %v4635_v26  ;;  %vm4634_vm15 = vcmp.eq.f32.partialorder %v4633_v11, 8.507059e+37 }
 0x9a7   : >> { %v4627_v47 = vmul.f32 %v13079_v62, %v4626_v37  ;;  %v13163_v49 = vand.u32 4294901760, %v4668_v53  ;;  %v4935_v35 = vsub.f32 %v13132_v31, %v4934_v48  ;;  %v4605_v20 = vand.u32 2147483648, %v13096_v45 }
 0x9a8   : >> { %4931 = vmatpush.xpose.msrb.mxu1 %v4930_v33  ;;  %5158 = vmatpush.xpose.msra.mxu2 %v4934_v48  ;;  %v4653_v15 = vmul.f32 %v12705_v29, %v4652_v22  ;;  %v4941_v23 = vsub.f32 %v13148_v27, %v4940_v9  ;;  %v4603_v42 = vand.u32 2147483647, %v13096_v45  ;;  %vm4599_vm2 = vweird.f32 %v13096_v45 }
 0x9a9   : >> { %v4628_v60 = vadd.f32 %v13079_v62, %v4627_v47  ;;  %v13180_v63 = vsub.f32 %v4668_v53, %v13163_v49  ;;  %v4936_v44 = vand.u32 4294901760, %v4935_v35  ;;  %4840 = vmatpush.xpose.msrb.mxu0 %v13163_v49  ;;  %5225 = vmatpush.xpose.msra.mxu3 %v13163_v49  ;;  %v4606_v26 = vor.u32 1.1754944e-38, %v4605_v20  ;;  %v16554_v35 = vld [vmem:[#allocation79_spill] sm:$0xff] }
 0x9aa   : >> { %v9144_v28 = vpop.eup %9143  ;;  %v13185_v7 = vand.u32 4294901760, %v4653_v15  ;;  %vm4604_vm4 = vcmp.eq.f32.partialorder %v4603_v42, 8.507059e+37 }
 0x9ab   : >> { %v4632_v61 = vsel %vm13157_vm14, %v13079_v62, %v4628_v60  ;;  %v4595_v38 = vmul.f32 %v9144_v28, %v13096_v45  ;;  %v4623_v62 = vmul.f32 %v12712_v57, %v4622_v5  ;;  %v4946_v8 = vand.u32 4294901760, %v13180_v63 }
 0x9ac   : >> { %v4637_v10 = vsel %vm4634_vm15, %v4636_v18, %v4632_v61  ;;  %vm4600_vm1 = vweird.f32 %v9144_v28  ;;  %4937 = vmatpush.xpose.msrb.mxu1 %v4936_v44  ;;  %5162 = vmatpush.xpose.msra.mxu2 %v4940_v9  ;;  %v13195_v21 = vsub.f32 %v4653_v15, %v13185_v7  ;;  %v16555_v15 = vld [vmem:[#allocation105_spill] sm:$0xff]  ;;  %v16556_v44 = vld [vmem:[#allocation104_spill] sm:$0xff] }
 0x9ad   : >> { %v4596_v4 = vsub.f32 1.0, %v4595_v38  ;;  %v4638_v29 = vmul.f32 %v12719_v50, %v4637_v10  ;;  %v4947_v57 = vsub.f32 %v13180_v63, %v4946_v8  ;;  %vm4601_vm3 = vmor %vm4599_vm2, %vm4600_vm1  ;;  %4842 = vmatpush.xpose.msrb.mxu0 %v13185_v7  ;;  %v4942_v50 = vand.u32 4294901760, %v4941_v23  ;;  %5227 = vmatpush.xpose.msra.mxu3 %v13185_v7  ;;  %v16553_v38 = vld [vmem:[#allocation19_spill] sm:$0xff]  ;;  %v16558_v23 = vld [vmem:[#allocation80_spill] sm:$0xff] }
 0x9ae   : >> { %v4952_v39 = vand.u32 4294901760, %v13195_v21  ;;  %v13201_v19 = vand.u32 4294901760, %v4623_v62  ;;  %v1091_v20 = vadd.f32 %v16554_v35, %v16553_v38 }
 0x9af   : >> { %v4597_v2 = vmul.f32 %v9144_v28, %v4596_v4  ;;  %v13191_v3 = vand.u32 4294901760, %v4638_v29  ;;  %v4948_v34 = vand.u32 4294901760, %v4947_v57  ;;  %v16560_v57 = vld [vmem:[#allocation107_spill] sm:$0xff] }
 0x9b0   : >> { %4943 = vmatpush.xpose.msrb.mxu1 %v4942_v50  ;;  %5166 = vmatpush.xpose.msra.mxu2 %v4946_v8  ;;  %v4953_v53 = vsub.f32 %v13195_v21, %v4952_v39  ;;  %v13212_v60 = vsub.f32 %v4623_v62, %v13201_v19  ;;  %v1345_v4 = vadd.f32 %v16555_v15, %v1091_v20  ;;  %v16557_v62 = vld [vmem:[#allocation20_spill] sm:$0xff] }
 0x9b1   : >> { %v4598_v37 = vadd.f32 %v9144_v28, %v4597_v2  ;;  %v13204_v46 = vsub.f32 %v4638_v29, %v13191_v3  ;;  %4844 = vmatpush.xpose.msrb.mxu0 %v13191_v3  ;;  %5229 = vmatpush.xpose.msra.mxu3 %v13191_v3  ;;  %v1095_v8 = vadd.f32 %v16558_v23, %v16557_v62  ;;  %v16559_v29 = vld [vmem:[#allocation68_spill] sm:$0xff]  ;;  %v16574_v62 = vld [vmem:[#allocation74_spill] sm:$0xff] }
 0x9b2   : >> { %v1643_v10 = vadd.f32 %v16556_v44, %v1345_v4  ;;  %v16571_v20 = vld [vmem:[#allocation76_spill] sm:$0xff]  ;;  %v16572_v4 = vld [vmem:[#allocation71_spill] sm:$0xff]  ;;  %v16573_v44 = vld [vmem:[#allocation70_spill] sm:$0xff] }
 0x9b3   : >> { %v4602_v47 = vsel %vm4601_vm3, %v9144_v28, %v4598_v37  ;;  %v4958_v45 = vand.u32 4294901760, %v13204_v46  ;;  %v4964_v28 = vand.u32 4294901760, %v13212_v60  ;;  %v1350_v37 = vadd.f32 %v16560_v57, %v1095_v8  ;;  %v16575_v23 = vld [vmem:[#allocation72_spill] sm:$0xff] }
 0x9b4   : >> { %v4607_v36 = vsel %vm4604_vm4, %v4606_v26, %v4602_v47  ;;  %4949 = vmatpush.xpose.msrb.mxu1 %v4948_v34  ;;  %5170 = vmatpush.xpose.msra.mxu2 %v4952_v39  ;;  %v1886_v2 = vadd.f32 %v16559_v29, %v1643_v10  ;;  %v16561_v26 = vld [vmem:[#allocation66_spill] sm:$0xff]  ;;  %v16562_v39 = vld [vmem:[#allocation48_spill] sm:$0xff]  ;;  %v1043_v10 = vadd.f32 %v16573_v44, %v16572_v4  ;;  %v16576_v29 = vld [vmem:[#allocation45_spill] sm:$0xff] }
 0x9b5   : >> { %v4608_v11 = vmul.f32 %v12722_v58, %v4607_v36  ;;  %v4959_v48 = vsub.f32 %v13204_v46, %v4958_v45  ;;  %4846 = vmatpush.xpose.msrb.mxu0 %v13201_v19  ;;  %v4954_v58 = vand.u32 4294901760, %v4953_v53  ;;  %5231 = vmatpush.xpose.msra.mxu3 %v13201_v19  ;;  %v4965_v22 = vsub.f32 %v13212_v60, %v4964_v28  ;;  %v16563_v47 = vld [vmem:[#allocation78_spill] sm:$0xff]  ;;  %v16565_v53 = vld [vmem:[#allocation21_spill] sm:$0xff]  ;;  %v16585_v44 = vld [vmem:[#allocation43_spill] sm:$0xff] }
 0x9b6   : >> { %v2099_v50 = vadd.f32 %v16561_v26, %v1886_v2  ;;  %v1055_v34 = vadd.f32 %v16563_v47, %v16562_v39  ;;  %v1047_v8 = vadd.f32 %v16575_v23, %v16574_v62  ;;  %v16578_v47 = vld [vmem:[#allocation15_spill] sm:$0xff]  ;;  %v16584_v4 = vld [vmem:[#allocation38_spill] sm:$0xff] }
 0x9b7   : >> { %v13214_v33 = vand.u32 4294901760, %v4608_v11  ;;  %v4960_v51 = vand.u32 4294901760, %v4959_v48  ;;  %v4966_v61 = vand.u32 4294901760, %v4965_v22  ;;  %v16566_v48 = vld [vmem:[#allocation81_spill] sm:$0xff]  ;;  %v16568_v22 = vld [vmem:[#allocation16_spill] sm:$0xff] }
 0x9b8   : >> { %4955 = vmatpush.xpose.msrb.mxu1 %v4954_v58  ;;  %5174 = vmatpush.xpose.msra.mxu2 %v4958_v45  ;;  %v16564_v45 = vld [vmem:[#allocation106_spill] sm:$0xff]  ;;  %v1099_v58 = vadd.f32 %v16566_v48, %v16565_v53 }
 0x9b9   : >> { %v13218_v6 = vsub.f32 %v4608_v11, %v13214_v33  ;;  %4848 = vmatpush.xpose.msrb.mxu0 %v13214_v33  ;;  %5233 = vmatpush.xpose.msra.mxu3 %v13214_v33  ;;  %v1649_v36 = vadd.f32 %v16564_v45, %v1350_v37  ;;  %v16577_v37 = vld [vmem:[#allocation47_spill] sm:$0xff] }
 0x9ba   : >> { %v1355_v15 = vadd.f32 %v16571_v20, %v1099_v58 }
 0x9bb   : >> { %v4970_v9 = vand.u32 4294901760, %v13218_v6 }
 0x9bc   : >> { %4961 = vmatpush.xpose.msrb.mxu1 %v4960_v51  ;;  %5178 = vmatpush.xpose.msra.mxu2 %v4964_v28  ;;  %v16567_v28 = vld [vmem:[#allocation51_spill] sm:$0xff] }
 0x9bd   : >> { %v4971_v5 = vsub.f32 %v13218_v6, %v4970_v9  ;;  %v1300_v51 = vadd.f32 %v16567_v28, %v1055_v34  ;;  %v16580_v28 = vld [vmem:[#allocation22_spill] sm:$0xff] }
 0x9bf   : >> { %v4972_v18 = vand.u32 4294901760, %v4971_v5  ;;  %v1890_v5 = vadd.f32 %v16568_v22, %v1649_v36  ;;  %v1589_v26 = vadd.f32 %v16577_v37, %v1300_v51  ;;  %v16579_v36 = vld [vmem:[#allocation41_spill] sm:$0xff]  ;;  %v16581_v22 = vld [vmem:[#allocation82_spill] sm:$0xff]  ;;  %v1285_v51 = vadd.f32 %v16584_v4, %v1043_v10  ;;  %v16587_v37 = vld [vmem:[#allocation40_spill] sm:$0xff] }
 0x9c0   : >> { %4967 = vmatpush.xpose.msrb.mxu1 %v4966_v61  ;;  %5182 = vmatpush.xpose.msra.mxu2 %v4970_v9  ;;  %v13243_v9 = vand.u32 4294901760, %v2099_v50  ;;  %v16569_v61 = vld [vmem:[#allocation77_spill] sm:$0xff]  ;;  %v1290_v53 = vadd.f32 %v16579_v36, %v1047_v8  ;;  %v16586_v8 = vld [vmem:[#allocation67_spill] sm:$0xff] }
 0x9c1   : >> { %v2103_v34 = vadd.f32 %v16578_v47, %v1890_v5  ;;  %v16588_v36 = vld [vmem:[#allocation127_spill] sm:$0xff] }
 0x9c2   : >> { %v13256_v39 = vsub.f32 %v2099_v50, %v13243_v9  ;;  %v1577_v47 = vadd.f32 %v16587_v37, %v1290_v53 }
 0x9c3   : >> { %v13267_v23 = vand.u32 4294901760, %v2103_v34 }
 0x9c4   : >> { %4973 = vmatpush.xpose.msrb.mxu1 %v4972_v18  ;;  %v16570_v18 = vld [vmem:[#allocation75_spill] sm:$0xff]  ;;  %v4853_v5 = vand.u32 4294901760, %v13256_v39 }
 0x9c5   : >> { %v1051_v38 = vadd.f32 %v16570_v18, %v16569_v61  ;;  %v1103_v61 = vadd.f32 %v16581_v22, %v16580_v28  ;;  %v16582_v18 = vld [vmem:[#allocation123_spill] sm:$0xff]  ;;  %v13281_v53 = vsub.f32 %v2103_v34, %v13267_v23 }
 0x9c6   : >> { %v1850_v20 = vadd.f32 %v16582_v18, %v1589_v26  ;;  %v16590_v22 = vld [vmem:[#allocation59_spill] sm:$0xff] }
 0x9c7   : >> { %v1295_v2 = vadd.f32 %v16576_v29, %v1051_v38  ;;  %v16583_v38 = vld [vmem:[#allocation73_spill] sm:$0xff] }
 0x9c9   : >> { %v1583_v50 = vadd.f32 %v16585_v44, %v1295_v2  ;;  %v2063_v2 = vadd.f32 %v16590_v22, %v1850_v20 }
 0x9cb   : >> { %v1846_v26 = vadd.f32 %v16588_v36, %v1583_v50  ;;  %v16595_v50 = vld [vmem:[#allocation129_spill] sm:$0xff] }
 0x9cc   : >> { %v16598_v36 = vld [vmem:[#allocation101_spill] sm:$0xff] }
 0x9cd   : >> { %v2059_v20 = vadd.f32 %v16595_v50, %v1846_v26  ;;  %v4861_v26 = vand.u32 4294901760, %v13281_v53 }
 0x9cf   : >> { %v13302_v22 = vand.u32 4294901760, %v2059_v20 }
 0x9f2   : >> { %v4548_v42 = vpop.xlane.xlu1 %4547 }
 0x9f3   : >> { %9145 = vrcp.f32 %v4548_v42  ;;  %v4590_v45 = vand.u32 2147483648, %v4548_v42  ;;  %v4588_v58 = vand.u32 2147483647, %v4548_v42  ;;  %vm4584_vm6 = vweird.f32 %v4548_v42 }
 0x9f5   : >> { %vm4589_vm8 = vcmp.eq.f32.partialorder %v4588_v58, 8.507059e+37 }
 0x9f9   : >> { %v9146_v11 = vpop.eup %9145 }
 0x9fa   : >> { %v4580_v35 = vmul.f32 %v9146_v11, %v4548_v42  ;;  %vm4585_vm5 = vweird.f32 %v9146_v11  ;;  %v16591_v42 = vld [vmem:[#allocation36_spill] sm:$0xff] }
 0x9fb   : >> { %vm4586_vm7 = vmor %vm4584_vm6, %vm4585_vm5  ;;  %v1571_v18 = vadd.f32 %v16591_v42, %v1285_v51  ;;  %v13288_v51 = vand.u32 4294901760, %v2063_v2 }
 0x9fc   : >> { %v4581_v57 = vsub.f32 1.0, %v4580_v35  ;;  %v1655_v35 = vadd.f32 %v16583_v38, %v1355_v15  ;;  %v16589_v15 = vld [vmem:[#allocation109_spill] sm:$0xff]  ;;  %v16592_v38 = vld [vmem:[#allocation128_spill] sm:$0xff] }
 0x9fd   : >> { %v1360_v10 = vadd.f32 %v16589_v15, %v1103_v61  ;;  %v1842_v4 = vadd.f32 %v16592_v38, %v1577_v47  ;;  %v16599_v15 = vld [vmem:[#allocation33_spill] sm:$0xff]  ;;  %v13306_v42 = vsub.f32 %v2063_v2, %v13288_v51  ;;  %v4862_v2 = vsub.f32 %v13281_v53, %v4861_v26 }
 0x9fe   : >> { %v4582_v48 = vmul.f32 %v9146_v11, %v4581_v57  ;;  %v1894_v29 = vadd.f32 %v16586_v8, %v1655_v35  ;;  %v4591_v57 = vor.u32 1.1754944e-38, %v4590_v45  ;;  %v4854_v45 = vsub.f32 %v13256_v39, %v4853_v5  ;;  %v16594_v35 = vld [vmem:[#allocation124_spill] sm:$0xff] }
 0x9ff   : >> { %v1838_v61 = vadd.f32 %v16594_v35, %v1571_v18  ;;  %v16596_v8 = vld [vmem:[#allocation108_spill] sm:$0xff] }
 0xa00   : >> { %v4583_v62 = vadd.f32 %v9146_v11, %v4582_v48 }
 0xa02   : >> { %v4587_v28 = vsel %vm4586_vm7, %v9146_v11, %v4583_v62  ;;  %v16593_v11 = vld [vmem:[#allocation69_spill] sm:$0xff] }
 0xa03   : >> { %v4592_v48 = vsel %vm4589_vm8, %v4591_v57, %v4587_v28  ;;  %v2107_v58 = vadd.f32 %v16593_v11, %v1894_v29  ;;  %v1661_v57 = vadd.f32 %v16596_v8, %v1360_v10  ;;  %v4855_v29 = vand.u32 4294901760, %v4854_v45 }
 0xa04   : >> { %v4593_v44 = vmul.f32 %v12775_v59, %v4592_v48  ;;  %v16597_v59 = vld [vmem:[#allocation34_spill] sm:$0xff]  ;;  %v2051_v10 = vadd.f32 %v16599_v15, %v1838_v61  ;;  %v13325_v11 = vsub.f32 %v2059_v20, %v13302_v22  ;;  %v4863_v61 = vand.u32 4294901760, %v4862_v2 }
 0xa05   : >> { %v2055_v37 = vadd.f32 %v16597_v59, %v1842_v4  ;;  %v4867_v47 = vand.u32 4294901760, %v2107_v58  ;;  %v1898_v28 = vadd.f32 %v16598_v36, %v1661_v57  ;;  %v16600_v4 = vld [vmem:[#allocation103_spill] sm:$0xff] }
 0xa06   : >> { %v13286_v62 = vand.u32 4294901760, %v4593_v44  ;;  %v13321_v45 = vand.u32 4294901760, %v2051_v10 }
 0xa07   : >> { %v13309_v18 = vand.u32 4294901760, %v2055_v37  ;;  %v13313_v38 = vsub.f32 %v2107_v58, %v4867_v47 }
 0xa08   : >> { %4850 = vmatpush.xpose.msrb.mxu0 %v13286_v62  ;;  %5235 = vmatpush.xpose.msra.mxu3 %v13286_v62  ;;  %v13295_v34 = vsub.f32 %v4593_v44, %v13286_v62  ;;  %v2111_v44 = vadd.f32 %v16600_v4, %v1898_v28  ;;  %v13338_v20 = vsub.f32 %v2051_v10, %v13321_v45 }
 0xa09   : >> { %v4869_v50 = vand.u32 4294901760, %v13313_v38 }
 0xa0a   : >> { %v4976_v48 = vand.u32 4294901760, %v13295_v34  ;;  %v4875_v58 = vand.u32 4294901760, %v2111_v44 }
 0xa0b   : >> { %4856 = vmatmul.f32.vlgmr.msrb.gmra.mxu0 %v4855_v29  ;;  %5237 = vmatmul.f32.vlgmr.msra.gmra.mxu3 %v13243_v9 }
 0xa0c   : >> { %4999 = vmatpush.xpose.msra.mxu0 %v12793_v55  ;;  %5717 = vmatpush.msrb.mxu3 %v13288_v51  ;;  %v4977_v55 = vsub.f32 %v13295_v34, %v4976_v48  ;;  %v13343_v8 = vsub.f32 %v2111_v44, %v4875_v58 }
 0xa0d   : >> { %5186 = vmatpush.xpose.msra.mxu2 %v4976_v48 }
 0xa0e   : >> { %5719 = vmatpush.msrb.mxu3 %v13302_v22  ;;  %v4978_v35 = vand.u32 4294901760, %v4977_v55  ;;  %v4877_v57 = vand.u32 4294901760, %v13343_v8 }
 0xa10   : >> { %5002 = vmatpush.xpose.msra.mxu0 %v12801_v30  ;;  %5721 = vmatpush.msrb.mxu3 %v13309_v18  ;;  %v13331_v30 = vsub.f32 %v2055_v37, %v13309_v18 }
 0xa11   : >> { %5613 = vmatpush.msrb.mxu2 %v13306_v42  ;;  %4979 = vmatpush.xpose.msrb.mxu1 %v4978_v35 }
 0xa12   : >> { %5188 = vmatmul.f32.vlgmr.msra.gmra.mxu2 %v13243_v9  ;;  %5723 = vmatpush.msrb.mxu3 %v13321_v45 }
 0xa13   : >> { %5616 = vmatpush.msrb.mxu2 %v13325_v11  ;;  %4864 = vmatmul.f32.gmra.mxu0 %v4863_v61 }
 0xa14   : >> { %5005 = vmatpush.xpose.msra.mxu0 %v12770_v0  ;;  %5241 = vmatmul.f32.gmra.mxu3 %v13267_v23  ;;  %v4870_v0 = vsub.f32 %v13313_v38, %v4869_v50 }
 0xa15   : >> { %5067 = vmatpush.xpose.msra.mxu1 %v12783_v24  ;;  %5619 = vmatpush.msrb.mxu2 %v13331_v30 }
 0xa16   : >> { %4981 = vmatmul.f32.vlgmr.msrb.gmra.mxu1 %v13243_v9  ;;  %v4871_v24 = vand.u32 4294901760, %v4870_v0 }
 0xa17   : >> { %5622 = vmatpush.msrb.mxu2 %v13338_v20 }
 0xa18   : >> { %5008 = vmatpush.xpose.msra.mxu0 %v12865_v56  ;;  %v4878_v56 = vsub.f32 %v13343_v8, %v4877_v57 }
 0xa19   : >> { %5069 = vmatpush.xpose.msra.mxu1 %v12778_v41 }
 0xa1a   : >> { %5192 = vmatmul.f32.gmra.mxu2 %v13267_v23  ;;  %v4879_v41 = vand.u32 4294901760, %v4878_v56 }
 0xa1b   : >> { %4872 = vmatmul.f32.gmra.mxu0 %v4871_v24 }
 0xa1c   : >> { %5011 = vmatpush.xpose.msra.mxu0 %v12984_v17  ;;  %5245 = vmatmul.f32.gmra.mxu3 %v4867_v47 }
 0xa1d   : >> { %5071 = vmatpush.xpose.msra.mxu1 %v12744_v16  ;;  %v5285_v16 = vpop.trf.xlu0 }
 0xa1e   : >> { %4985 = vmatmul.f32.gmra.mxu1 %v13267_v23 }
 0xa20   : >> { %5014 = vmatpush.xpose.msra.mxu0 %v12989_v52  ;;  %v5518_v52 = vand.u32 4294901760, %v13325_v11 }
 0xa21   : >> { %5073 = vmatpush.xpose.msra.mxu1 %v12827_v14  ;;  %v5302_v14 = vsel %vm358_vm0, %v5285_v16, 0 }
 0xa22   : >> { %5196 = vmatmul.f32.gmra.mxu2 %v4867_v47 }
 0xa23   : >> { %4880 = vmatmul.f32.gmra.mxu0 %v4879_v41 }
 0xa24   : >> { %5017 = vmatpush.xpose.msra.mxu0 %v13055_v40  ;;  %5249 = vmatmul.f32.gmra.mxu3 %v4875_v58 }
 0xa25   : >> { %5075 = vmatpush.xpose.msra.mxu1 %v12925_v12  ;;  %v13379_v12 = vand.u32 4294901760, %v5302_v14 }
 0xa26   : >> { %4989 = vmatmul.f32.gmra.mxu1 %v4867_v47 }
 0xa27   : >> { %v5370_v17 = vsub.f32 %v5302_v14, %v13379_v12 }
 0xa28   : >> { %5020 = vmatpush.xpose.msra.mxu0 %v13085_v43  ;;  %v5286_v43 = vpop.trf.xlu0 }
 0xa29   : >> { %5077 = vmatpush.xpose.msra.mxu1 %v12945_v32  ;;  %v5512_v32 = vand.u32 4294901760, %v13306_v42 }
 0xa2a   : >> { %5200 = vmatmul.f32.gmra.mxu2 %v4875_v58 }
 0xa2b   : >> { %v5513_v40 = vsub.f32 %v13306_v42, %v5512_v32 }
 0xa2c   : >> { %5023 = vmatpush.xpose.msra.mxu0 %v13132_v31  ;;  %v5530_v31 = vand.u32 4294901760, %v13338_v20 }
 0xa2d   : >> { %5079 = vmatpush.xpose.msra.mxu1 %v13014_v25  ;;  %v5371_v25 = vand.u32 4294901760, %v5370_v17 }
 0xa2e   : >> { %4993 = vmatmul.f32.gmra.mxu1 %v4875_v58 }
 0xa2f   : >> { %5727 = vmatmul.f32.vlgmr.msrb.gmra.mxu3 %v5371_v25  ;;  %v5372_v37 = vsub.f32 %v5370_v17, %v5371_v25 }
 0xa30   : >> { %5026 = vmatpush.xpose.msra.mxu0 %v13148_v27 }
 0xa31   : >> { %5081 = vmatpush.xpose.msra.mxu1 %v13058_v1  ;;  %v5524_v1 = vand.u32 4294901760, %v13331_v30  ;;  %v5373_v36 = vand.u32 4294901760, %v5372_v37 }
 0xa32   : >> { %5625 = vmatmul.f32.vlgmr.msrb.gmra.mxu2 %v5370_v17 }
 0xa34   : >> { %5029 = vmatpush.xpose.msra.mxu0 %v13180_v63  ;;  %v5525_v63 = vsub.f32 %v13331_v30, %v5524_v1 }
 0xa35   : >> { %5083 = vmatpush.xpose.msra.mxu1 %v13104_v13  ;;  %v5305_v13 = vsel %vm358_vm0, %v5286_v43, 0 }
 0xa36   : >> { %v13396_v27 = vand.u32 4294901760, %v5305_v13 }
 0xa38   : >> { %5032 = vmatpush.xpose.msra.mxu0 %v13195_v21  ;;  %v5531_v21 = vsub.f32 %v13338_v20, %v5530_v31 }
 0xa39   : >> { %5085 = vmatpush.xpose.msra.mxu1 %v13126_v54  ;;  %v5519_v54 = vsub.f32 %v13325_v11, %v5518_v52 }
 0xa3c   : >> { %5035 = vmatpush.xpose.msra.mxu0 %v13204_v46  ;;  %v5526_v46 = vand.u32 4294901760, %v5525_v63 }
 0xa3d   : >> { %5087 = vmatpush.xpose.msra.mxu1 %v13163_v49  ;;  %v5514_v49 = vand.u32 4294901760, %v5513_v40 }
 0xa40   : >> { %5038 = vmatpush.xpose.msra.mxu0 %v13212_v60  ;;  %v5287_v60 = vpop.trf.xlu0 }
 0xa41   : >> { %5089 = vmatpush.xpose.msra.mxu1 %v13185_v7  ;;  %v5378_v7 = vsub.f32 %v5305_v13, %v13396_v27 }
 0xa43   : >> { %5630 = vmatmul.f32.gmra.mxu2 %v5378_v7 }
 0xa44   : >> { %5041 = vmatpush.xpose.msra.mxu0 %v13218_v6  ;;  %v5532_v6 = vand.u32 4294901760, %v5531_v21 }
 0xa45   : >> { %5091 = vmatpush.xpose.msra.mxu1 %v13191_v3  ;;  %v5520_v3 = vand.u32 4294901760, %v5519_v54 }
 0xa48   : >> { %5044 = vmatpush.xpose.msra.mxu0 %v13295_v34 }
 0xa49   : >> { %5093 = vmatpush.xpose.msra.mxu1 %v13201_v19  ;;  %v5379_v19 = vand.u32 4294901760, %v5378_v7 }
 0xa4b   : >> { %5047 = vmatmul.f32.vlgmr.msra.gmra.mxu0 %v13256_v39  ;;  %5733 = vmatmul.f32.gmra.mxu3 %v5379_v19 }
 0xa4c   : >> { %5362 = vmatpush.msrb.mxu0 %v13288_v51 }
 0xa4d   : >> { %5095 = vmatpush.xpose.msra.mxu1 %v13214_v33  ;;  %v5308_v33 = vsel %vm358_vm0, %v5287_v60, 0 }
 0xa4e   : >> { %5364 = vmatpush.msrb.mxu0 %v13302_v22  ;;  %v13407_v9 = vand.u32 4294901760, %v5308_v33 }
 0xa50   : >> { %5366 = vmatpush.msrb.mxu0 %v13309_v18  ;;  %v5386_v23 = vsub.f32 %v5308_v33, %v13407_v9 }
 0xa51   : >> { %5097 = vmatpush.xpose.msra.mxu1 %v13286_v62 }
 0xa52   : >> { %5368 = vmatpush.msrb.mxu0 %v13321_v45  ;;  %5635 = vmatmul.f32.gmra.mxu2 %v5386_v23  ;;  %v5387_v39 = vand.u32 4294901760, %v5386_v23 }
 0xa53   : >> { %5052 = vmatmul.f32.gmra.mxu0 %v13281_v53 }
 0xa54   : >> { %5836 = vmatpush.msra.mxu0 %v5512_v32  ;;  %5101 = vmatmul.f32.vlgmr.msra.gmra.mxu1 %v4853_v5  ;;  %v5288_v5 = vpop.trf.xlu0  ;;  %v5388_v55 = vsub.f32 %v5386_v23, %v5387_v39 }
 0xa55   : >> { %5515 = vmatpush.msrb.mxu1 %v5514_v49  ;;  %v5311_v62 = vsel %vm358_vm0, %v5288_v5, 0  ;;  %5739 = vmatmul.f32.gmra.mxu3 %v5387_v39 }
 0xa56   : >> { %5840 = vmatpush.msra.mxu0 %v5518_v52  ;;  %v13417_v59 = vand.u32 4294901760, %v5311_v62 }
 0xa57   : >> { %5521 = vmatpush.msrb.mxu1 %v5520_v3 }
 0xa58   : >> { %5844 = vmatpush.msra.mxu0 %v5524_v1 }
 0xa59   : >> { %5527 = vmatpush.msrb.mxu1 %v5526_v46 }
 0xa5a   : >> { %5848 = vmatpush.msra.mxu0 %v5530_v31 }
 0xa5b   : >> { %5533 = vmatpush.msrb.mxu1 %v5532_v6  ;;  %5057 = vmatmul.f32.gmra.mxu0 %v13313_v38 }
 0xa5c   : >> { %5107 = vmatmul.f32.gmra.mxu1 %v4861_v26  ;;  %v5289_v53 = vpop.trf.xlu0  ;;  %v5380_v26 = vsub.f32 %v5378_v7, %v5379_v19 }
 0xa5d   : >> { %5927 = vmatpush.msra.mxu1 %v13288_v51  ;;  %v5394_v51 = vsub.f32 %v5311_v62, %v13417_v59  ;;  %v5314_v29 = vsel %vm358_vm0, %v5289_v53, 0 }
 0xa5e   : >> { %v13425_v47 = vand.u32 4294901760, %v5314_v29  ;;  %v5381_v42 = vand.u32 4294901760, %v5380_v26 }
 0xa5f   : >> { %5929 = vmatpush.msra.mxu1 %v13302_v22  ;;  %5640 = vmatmul.f32.gmra.mxu2 %v5394_v51  ;;  %v5395_v34 = vand.u32 4294901760, %v5394_v51 }
 0xa60   : >> { %v5402_v28 = vsub.f32 %v5314_v29, %v13425_v47 }
 0xa61   : >> { %5931 = vmatpush.msra.mxu1 %v13309_v18  ;;  %5745 = vmatmul.f32.gmra.mxu3 %v5395_v34  ;;  %v5396_v35 = vsub.f32 %v5394_v51, %v5395_v34 }
 0xa62   : >> { %v5403_v15 = vand.u32 4294901760, %v5402_v28 }
 0xa63   : >> { %5933 = vmatpush.msra.mxu1 %v13321_v45  ;;  %5062 = vmatmul.f32.gmra.mxu0 %v13343_v8  ;;  %v5389_v45 = vand.u32 4294901760, %v5388_v55  ;;  %v5397_v20 = vand.u32 4294901760, %v5396_v35 }
 0xa64   : >> { %5113 = vmatmul.f32.gmra.mxu1 %v4869_v50  ;;  %v5290_v10 = vpop.trf.xlu0  ;;  %v5404_v0 = vsub.f32 %v5402_v28, %v5403_v15 }
 0xa65   : >> { %v5317_v22 = vsel %vm358_vm0, %v5290_v10, 0 }
 0xa66   : >> { %v13431_v48 = vand.u32 4294901760, %v5317_v22  ;;  %v5405_v16 = vand.u32 4294901760, %v5404_v0 }
 0xa67   : >> { %5645 = vmatmul.f32.gmra.mxu2 %v5402_v28 }
 0xa68   : >> { %v5410_v18 = vsub.f32 %v5317_v22, %v13431_v48 }
 0xa69   : >> { %5751 = vmatmul.f32.gmra.mxu3 %v5403_v15 }
 0xa6a   : >> { %v5411_v38 = vand.u32 4294901760, %v5410_v18 }
 0xa6b   : >> { %5374 = vmatmul.f32.vlgmr.msrb.gmra.mxu0 %v5373_v36 }
 0xa6c   : >> { %5119 = vmatmul.f32.gmra.mxu1 %v4877_v57  ;;  %v5291_v4 = vpop.trf.xlu0  ;;  %v5412_v32 = vsub.f32 %v5410_v18, %v5411_v38 }
 0xa6d   : >> { %v5320_v44 = vsel %vm358_vm0, %v5291_v4, 0 }
 0xa6e   : >> { %v13436_v2 = vand.u32 4294901760, %v5320_v44  ;;  %v5413_v1 = vand.u32 4294901760, %v5412_v32 }
 0xa6f   : >> { %5650 = vmatmul.f32.gmra.mxu2 %v5410_v18 }
 0xa70   : >> { %v5418_v11 = vsub.f32 %v5320_v44, %v13436_v2 }
 0xa71   : >> { %5757 = vmatmul.f32.gmra.mxu3 %v5411_v38 }
 0xa72   : >> { %v5419_v30 = vand.u32 4294901760, %v5418_v11 }
 0xa73   : >> { %5382 = vmatmul.f32.gmra.mxu0 %v5381_v42 }
 0xa74   : >> { %5535 = vmatmul.f32.vlgmr.msrb.gmra.mxu1 %v13379_v12  ;;  %v5292_v58 = vpop.trf.xlu0  ;;  %v5420_v13 = vsub.f32 %v5418_v11, %v5419_v30 }
 0xa75   : >> { %v5323_v61 = vsel %vm358_vm0, %v5292_v58, 0 }
 0xa76   : >> { %v13441_v50 = vand.u32 4294901760, %v5323_v61  ;;  %v5421_v7 = vand.u32 4294901760, %v5420_v13 }
 0xa77   : >> { %5655 = vmatmul.f32.gmra.mxu2 %v5418_v11 }
 0xa78   : >> { %v5426_v8 = vsub.f32 %v5323_v61, %v13441_v50 }
 0xa79   : >> { %5763 = vmatmul.f32.gmra.mxu3 %v5419_v30 }
 0xa7a   : >> { %v5427_v24 = vand.u32 4294901760, %v5426_v8 }
 0xa7b   : >> { %5390 = vmatmul.f32.gmra.mxu0 %v5389_v45 }
 0xa7c   : >> { %5539 = vmatmul.f32.gmra.mxu1 %v13396_v27  ;;  %v5293_v57 = vpop.trf.xlu0  ;;  %v5428_v21 = vsub.f32 %v5426_v8, %v5427_v24 }
 0xa7d   : >> { %v5326_v56 = vsel %vm358_vm0, %v5293_v57, 0 }
 0xa7e   : >> { %v13446_v41 = vand.u32 4294901760, %v5326_v56  ;;  %v5429_v6 = vand.u32 4294901760, %v5428_v21 }
 0xa7f   : >> { %5660 = vmatmul.f32.gmra.mxu2 %v5426_v8 }
 0xa80   : >> { %v5434_v14 = vsub.f32 %v5326_v56, %v13446_v41 }
 0xa81   : >> { %5769 = vmatmul.f32.gmra.mxu3 %v5427_v24 }
 0xa82   : >> { %v5435_v17 = vand.u32 4294901760, %v5434_v14 }
 0xa83   : >> { %5398 = vmatmul.f32.gmra.mxu0 %v5397_v20 }
 0xa84   : >> { %5543 = vmatmul.f32.gmra.mxu1 %v13407_v9  ;;  %v5294_v52 = vpop.trf.xlu0  ;;  %v5436_v5 = vsub.f32 %v5434_v14, %v5435_v17 }
 0xa85   : >> { %v5329_v25 = vsel %vm358_vm0, %v5294_v52, 0 }
 0xa86   : >> { %v13451_v40 = vand.u32 4294901760, %v5329_v25  ;;  %v5437_v53 = vand.u32 4294901760, %v5436_v5 }
 0xa87   : >> { %5665 = vmatmul.f32.gmra.mxu2 %v5434_v14 }
 0xa88   : >> { %v5442_v43 = vsub.f32 %v5329_v25, %v13451_v40  ;;  %v13464_v39 = vpop.f32.mrf.mxu0 }
 0xa89   : >> { %5775 = vmatmul.f32.gmra.mxu3 %v5435_v17  ;;  %16601 = vst [vmem:[#allocation160_spill] sm:$0xff] %v13464_v39 }
 0xa8a   : >> { %v5443_v54 = vand.u32 4294901760, %v5442_v43 }
 0xa8b   : >> { %5406 = vmatmul.f32.gmra.mxu0 %v5405_v16 }
 0xa8c   : >> { %5547 = vmatmul.f32.gmra.mxu1 %v13417_v59  ;;  %v5295_v31 = vpop.trf.xlu0  ;;  %v5444_v26 = vsub.f32 %v5442_v43, %v5443_v54 }
 0xa8d   : >> { %v5332_v49 = vsel %vm358_vm0, %v5295_v31, 0 }
 0xa8e   : >> { %v13456_v63 = vand.u32 4294901760, %v5332_v49  ;;  %v5445_v18 = vand.u32 4294901760, %v5444_v26 }
 0xa8f   : >> { %5670 = vmatmul.f32.gmra.mxu2 %v5442_v43 }
 0xa90   : >> { %v5450_v3 = vsub.f32 %v5332_v49, %v13456_v63  ;;  %v13473_v28 = vpop.f32.mrf.mxu0 }
 0xa91   : >> { %5781 = vmatmul.f32.gmra.mxu3 %v5443_v54  ;;  %16603 = vst [vmem:[#allocation170_spill] sm:$0xff] %v13473_v28 }
 0xa92   : >> { %v5451_v19 = vand.u32 4294901760, %v5450_v3 }
 0xa93   : >> { %5414 = vmatmul.f32.gmra.mxu0 %v5413_v1  ;;  %v13471_v36 = vpop.f32.mrf.mxu1 }
 0xa94   : >> { %5551 = vmatmul.f32.gmra.mxu1 %v13425_v47  ;;  %v5296_v46 = vpop.trf.xlu0  ;;  %16602 = vst [vmem:[#allocation166_spill] sm:$0xff] %v13471_v36  ;;  %v5452_v38 = vsub.f32 %v5450_v3, %v5451_v19 }
 0xa95   : >> { %v5335_v60 = vsel %vm358_vm0, %v5296_v46, 0 }
 0xa96   : >> { %v13461_v33 = vand.u32 4294901760, %v5335_v60  ;;  %v5453_v30 = vand.u32 4294901760, %v5452_v38 }
 0xa97   : >> { %5675 = vmatmul.f32.gmra.mxu2 %v5450_v3 }
 0xa98   : >> { %v5458_v23 = vsub.f32 %v5335_v60, %v13461_v33  ;;  %v13483_v45 = vpop.f32.mrf.mxu0 }
 0xa99   : >> { %5787 = vmatmul.f32.gmra.mxu3 %v5451_v19  ;;  %16605 = vst [vmem:[#allocation161_spill] sm:$0xff] %v13483_v45 }
 0xa9a   : >> { %v5459_v62 = vand.u32 4294901760, %v5458_v23 }
 0xa9b   : >> { %5422 = vmatmul.f32.gmra.mxu0 %v5421_v7  ;;  %v13480_v44 = vpop.f32.mrf.mxu1 }
 0xa9c   : >> { %5555 = vmatmul.f32.gmra.mxu1 %v13431_v48  ;;  %v5297_v51 = vpop.trf.xlu0  ;;  %16604 = vst [vmem:[#allocation145_spill] sm:$0xff] %v13480_v44  ;;  %v5460_v20 = vsub.f32 %v5458_v23, %v5459_v62 }
 0xa9d   : >> { %v5338_v37 = vsel %vm358_vm0, %v5297_v51, 0 }
 0xa9e   : >> { %v13468_v34 = vand.u32 4294901760, %v5338_v37  ;;  %v5461_v56 = vand.u32 4294901760, %v5460_v20 }
 0xa9f   : >> { %5680 = vmatmul.f32.gmra.mxu2 %v5458_v23 }
 0xaa0   : >> { %v5466_v29 = vsub.f32 %v5338_v37, %v13468_v34  ;;  %v13492_v57 = vpop.f32.mrf.mxu0 }
 0xaa1   : >> { %5793 = vmatmul.f32.gmra.mxu3 %v5459_v62  ;;  %16607 = vst [vmem:[#allocation162_spill] sm:$0xff] %v13492_v57 }
 0xaa2   : >> { %v5467_v15 = vand.u32 4294901760, %v5466_v29 }
 0xaa3   : >> { %5430 = vmatmul.f32.gmra.mxu0 %v5429_v6  ;;  %v13490_v0 = vpop.f32.mrf.mxu1 }
 0xaa4   : >> { %5559 = vmatmul.f32.gmra.mxu1 %v13436_v2  ;;  %v5298_v10 = vpop.trf.xlu0  ;;  %16606 = vst [vmem:[#allocation169_spill] sm:$0xff] %v13490_v0  ;;  %v5468_v17 = vsub.f32 %v5466_v29, %v5467_v15 }
 0xaa5   : >> { %v5341_v22 = vsel %vm358_vm0, %v5298_v10, 0 }
 0xaa6   : >> { %v13477_v42 = vand.u32 4294901760, %v5341_v22  ;;  %v5469_v1 = vand.u32 4294901760, %v5468_v17 }
 0xaa7   : >> { %5685 = vmatmul.f32.gmra.mxu2 %v5466_v29 }
 0xaa8   : >> { %v5474_v55 = vsub.f32 %v5341_v22, %v13477_v42 }
 0xaa9   : >> { %5799 = vmatmul.f32.gmra.mxu3 %v5467_v15 }
 0xaaa   : >> { %v5475_v4 = vand.u32 4294901760, %v5474_v55 }
 0xaab   : >> { %5438 = vmatmul.f32.gmra.mxu0 %v5437_v53  ;;  %v13501_v43 = vpop.f32.mrf.mxu1 }
 0xaac   : >> { %5563 = vmatmul.f32.gmra.mxu1 %v13441_v50  ;;  %v5299_v11 = vpop.trf.xlu0  ;;  %16609 = vst [vmem:[#allocation144_spill] sm:$0xff] %v13501_v43  ;;  %v5476_v13 = vsub.f32 %v5474_v55, %v5475_v4 }
 0xaad   : >> { %v5344_v35 = vsel %vm358_vm0, %v5299_v11, 0 }
 0xaae   : >> { %v13486_v58 = vand.u32 4294901760, %v5344_v35  ;;  %v5477_v54 = vand.u32 4294901760, %v5476_v13 }
 0xaaf   : >> { %5690 = vmatmul.f32.gmra.mxu2 %v5474_v55 }
 0xab0   : >> { %v5482_v61 = vsub.f32 %v5344_v35, %v13486_v58 }
 0xab1   : >> { %5805 = vmatmul.f32.gmra.mxu3 %v5475_v4  ;;  %v13569_v4 = vpop.f32.mrf.mxu3 }
 0xab2   : >> { %v5483_v8 = vand.u32 4294901760, %v5482_v61  ;;  %16618 = vst [vmem:[#allocation159_spill] sm:$0xff] %v13569_v4 }
 0xab3   : >> { %5446 = vmatmul.f32.gmra.mxu0 %v5445_v18 }
 0xab4   : >> { %5567 = vmatmul.f32.gmra.mxu1 %v13446_v41  ;;  %v5300_v24 = vpop.trf.xlu0  ;;  %v5484_v7 = vsub.f32 %v5482_v61, %v5483_v8 }
 0xab5   : >> { %v5347_v16 = vsel %vm358_vm0, %v5300_v24, 0 }
 0xab6   : >> { %v13495_v14 = vand.u32 4294901760, %v5347_v16  ;;  %v5485_v3 = vand.u32 4294901760, %v5484_v7 }
 0xab7   : >> { %5695 = vmatmul.f32.gmra.mxu2 %v5482_v61 }
 0xab8   : >> { %v5490_v32 = vsub.f32 %v5347_v16, %v13495_v14 }
 0xab9   : >> { %5811 = vmatmul.f32.gmra.mxu3 %v5483_v8  ;;  %v13583_v61 = vpop.f32.mrf.mxu3 }
 0xaba   : >> { %v5491_v52 = vand.u32 4294901760, %v5490_v32  ;;  %16620 = vst [vmem:[#allocation163_spill] sm:$0xff] %v13583_v61 }
 0xabb   : >> { %5454 = vmatmul.f32.gmra.mxu0 %v5453_v30 }
 0xabc   : >> { %5571 = vmatmul.f32.gmra.mxu1 %v13451_v40  ;;  %v5492_v46 = vsub.f32 %v5490_v32, %v5491_v52 }
 0xabe   : >> { %v5493_v60 = vand.u32 4294901760, %v5492_v46 }
 0xabf   : >> { %5700 = vmatmul.f32.gmra.mxu2 %v5490_v32 }
 0xac1   : >> { %5817 = vmatmul.f32.gmra.mxu3 %v5491_v52 }
 0xac3   : >> { %5462 = vmatmul.f32.gmra.mxu0 %v5461_v56 }
 0xac4   : >> { %5575 = vmatmul.f32.gmra.mxu1 %v13456_v63 }
 0xac8   : >> { %v13499_v25 = vpop.f32.mrf.mxu0 }
 0xac9   : >> { %16608 = vst [vmem:[#allocation168_spill] sm:$0xff] %v13499_v25 }
 0xacb   : >> { %5470 = vmatmul.f32.gmra.mxu0 %v5469_v1 }
 0xacc   : >> { %5579 = vmatmul.f32.gmra.mxu1 %v13461_v33 }
 0xad0   : >> { %v13504_v31 = vpop.f32.mrf.mxu0 }
 0xad1   : >> { %16610 = vst [vmem:[#allocation156_spill] sm:$0xff] %v13504_v31  ;;  %v13506_v49 = vpop.f32.mrf.mxu1 }
 0xad2   : >> { %16611 = vst [vmem:[#allocation167_spill] sm:$0xff] %v13506_v49 }
 0xad3   : >> { %5478 = vmatmul.f32.gmra.mxu0 %v5477_v54 }
 0xad4   : >> { %5583 = vmatmul.f32.gmra.mxu1 %v13468_v34 }
 0xad8   : >> { %v13509_v21 = vpop.f32.mrf.mxu0 }
 0xad9   : >> { %16612 = vst [vmem:[#allocation157_spill] sm:$0xff] %v13509_v21  ;;  %v13511_v19 = vpop.f32.mrf.mxu1 }
 0xada   : >> { %16613 = vst [vmem:[#allocation165_spill] sm:$0xff] %v13511_v19 }
 0xadb   : >> { %5486 = vmatmul.f32.gmra.mxu0 %v5485_v3 }
 0xadc   : >> { %5587 = vmatmul.f32.gmra.mxu1 %v13477_v42 }
 0xae0   : >> { %v13514_v6 = vpop.f32.mrf.mxu0 }
 0xae1   : >> { %16614 = vst [vmem:[#allocation164_spill] sm:$0xff] %v13514_v6  ;;  %v13516_v23 = vpop.f32.mrf.mxu1 }
 0xae2   : >> { %16615 = vst [vmem:[#allocation143_spill] sm:$0xff] %v13516_v23 }
 0xae3   : >> { %5494 = vmatmul.f32.gmra.mxu0 %v5493_v60 }
 0xae4   : >> { %5591 = vmatmul.f32.gmra.mxu1 %v13486_v58 }
 0xae8   : >> { %v13519_v5 = vpop.f32.mrf.mxu0 }
 0xae9   : >> { %v13521_v62 = vpop.f32.mrf.mxu1 }
 0xaea   : >> { %16616 = vst [vmem:[#allocation154_spill] sm:$0xff] %v13521_v62 }
 0xaeb   : >> { %5850 = vmatmul.f32.vlgmr.msra.gmra.mxu0 %v13379_v12 }
 0xaec   : >> { %5595 = vmatmul.f32.gmra.mxu1 %v13495_v14 }
 0xaf0   : >> { %v13525_v51 = vpop.f32.mrf.mxu0 }
 0xaf1   : >> { %v13527_v37 = vpop.f32.mrf.mxu1 }
 0xaf3   : >> { %5854 = vmatmul.f32.gmra.mxu0 %v13396_v27 }
 0xaf4   : >> { %5935 = vmatmul.f32.vlgmr.msra.gmra.mxu1 %v13379_v12 }
 0xaf8   : >> { %v13531_v53 = vpop.f32.mrf.mxu0 }
 0xaf9   : >> { %v13533_v29 = vpop.f32.mrf.mxu1 }
 0xafb   : >> { %5858 = vmatmul.f32.gmra.mxu0 %v13407_v9 }
 0xafc   : >> { %5939 = vmatmul.f32.gmra.mxu1 %v13396_v27 }
 0xb00   : >> { %v13537_v26 = vpop.f32.mrf.mxu0 }
 0xb01   : >> { %v13539_v15 = vpop.f32.mrf.mxu1 }
 0xb03   : >> { %5862 = vmatmul.f32.gmra.mxu0 %v13417_v59 }
 0xb04   : >> { %5943 = vmatmul.f32.gmra.mxu1 %v13407_v9 }
 0xb08   : >> { %v13543_v10 = vpop.f32.mrf.mxu0 }
 0xb09   : >> { %v13545_v22 = vpop.f32.mrf.mxu1 }
 0xb0b   : >> { %5866 = vmatmul.f32.gmra.mxu0 %v13425_v47 }
 0xb0c   : >> { %5947 = vmatmul.f32.gmra.mxu1 %v13417_v59  ;;  %v13567_v59 = vpop.f32.mrf.mxu2 }
 0xb0d   : >> { %16617 = vst [vmem:[#allocation155_spill] sm:$0xff] %v13567_v59 }
 0xb10   : >> { %v13549_v12 = vpop.f32.mrf.mxu0 }
 0xb11   : >> { %v13551_v18 = vpop.f32.mrf.mxu1 }
 0xb13   : >> { %5870 = vmatmul.f32.gmra.mxu0 %v13431_v48 }
 0xb14   : >> { %5951 = vmatmul.f32.gmra.mxu1 %v13425_v47 }
 0xb18   : >> { %v13555_v27 = vpop.f32.mrf.mxu0 }
 0xb19   : >> { %v13557_v55 = vpop.f32.mrf.mxu1 }
 0xb1a   : >> { %v5557_v6 = vadd.f32 %v13557_v55, %v13549_v12 }
 0xb1b   : >> { %5874 = vmatmul.f32.gmra.mxu0 %v13436_v2 }
 0xb1c   : >> { %5955 = vmatmul.f32.gmra.mxu1 %v13431_v48  ;;  %v13577_v48 = vpop.f32.mrf.mxu2 }
 0xb1d   : >> { %16619 = vst [vmem:[#allocation158_spill] sm:$0xff] %v13577_v48 }
 0xb20   : >> { %v13561_v9 = vpop.f32.mrf.mxu0 }
 0xb21   : >> { %v13563_v38 = vpop.f32.mrf.mxu1 }
 0xb22   : >> { %v5561_v39 = vadd.f32 %v13563_v38, %v13555_v27 }
 0xb23   : >> { %5878 = vmatmul.f32.gmra.mxu0 %v13441_v50 }
 0xb24   : >> { %5959 = vmatmul.f32.gmra.mxu1 %v13436_v2  ;;  %v13589_v20 = vpop.f32.mrf.mxu2 }
 0xb25   : >> { %16621 = vst [vmem:[#allocation37_spill] sm:$0xff] %v13589_v20 }
 0xb28   : >> { %v13571_v47 = vpop.f32.mrf.mxu0 }
 0xb29   : >> { %v13573_v11 = vpop.f32.mrf.mxu1 }
 0xb2a   : >> { %v5565_v0 = vadd.f32 %v13573_v11, %v13561_v9 }
 0xb2b   : >> { %5882 = vmatmul.f32.gmra.mxu0 %v13446_v41 }
 0xb2c   : >> { %5963 = vmatmul.f32.gmra.mxu1 %v13441_v50  ;;  %v13594_v50 = vpop.f32.mrf.mxu3  ;;  %v13601_v16 = vpop.f32.mrf.mxu2 }
 0xb2d   : >> { %16622 = vst [vmem:[#allocation39_spill] sm:$0xff] %v13594_v50 }
 0xb2e   : >> { %16623 = vst [vmem:[#allocation42_spill] sm:$0xff] %v13601_v16 }
 0xb30   : >> { %v13579_v35 = vpop.f32.mrf.mxu0 }
 0xb31   : >> { %v13581_v30 = vpop.f32.mrf.mxu1 }
 0xb33   : >> { %5886 = vmatmul.f32.gmra.mxu0 %v13451_v40 }
 0xb34   : >> { %5967 = vmatmul.f32.gmra.mxu1 %v13446_v41  ;;  %v13605_v41 = vpop.f32.mrf.mxu3  ;;  %v5626_v52 = vpop.f32.mrf.mxu2 }
 0xb35   : >> { %16624 = vst [vmem:[#allocation44_spill] sm:$0xff] %v13605_v41 }
 0xb38   : >> { %v13587_v2 = vpop.f32.mrf.mxu0 }
 0xb39   : >> { %v13591_v8 = vpop.f32.mrf.mxu1 }
 0xb3b   : >> { %5890 = vmatmul.f32.gmra.mxu0 %v13456_v63 }
 0xb3c   : >> { %5971 = vmatmul.f32.gmra.mxu1 %v13451_v40  ;;  %v5728_v40 = vpop.f32.mrf.mxu3 }
 0xb40   : >> { %v13597_v24 = vpop.f32.mrf.mxu0 }
 0xb41   : >> { %v13599_v56 = vpop.f32.mrf.mxu1 }
 0xb43   : >> { %5894 = vmatmul.f32.gmra.mxu0 %v13461_v33 }
 0xb44   : >> { %5975 = vmatmul.f32.gmra.mxu1 %v13456_v63  ;;  %v13619_v63 = vpop.f32.mrf.mxu2  ;;  %v13623_v7 = vpop.f32.mrf.mxu3 }
 0xb45   : >> { %16625 = vst [vmem:[#allocation19_spill] sm:$0xff] %v13623_v7 }
 0xb48   : >> { %v13607_v32 = vpop.f32.mrf.mxu0 }
 0xb49   : >> { %v13609_v17 = vpop.f32.mrf.mxu1 }
 0xb4b   : >> { %5898 = vmatmul.f32.gmra.mxu0 %v13468_v34 }
 0xb4c   : >> { %5979 = vmatmul.f32.gmra.mxu1 %v13461_v33  ;;  %v13629_v33 = vpop.f32.mrf.mxu2  ;;  %v13635_v4 = vpop.f32.mrf.mxu3 }
 0xb50   : >> { %v13613_v1 = vpop.f32.mrf.mxu0 }
 0xb51   : >> { %v13615_v13 = vpop.f32.mrf.mxu1 }
 0xb53   : >> { %5902 = vmatmul.f32.gmra.mxu0 %v13477_v42 }
 0xb54   : >> { %5983 = vmatmul.f32.gmra.mxu1 %v13468_v34  ;;  %v5537_v34 = vadd.f32 %v13527_v37, %v13519_v5  ;;  %v13643_v59 = vpop.f32.mrf.mxu2  ;;  %v13646_v41 = vpop.f32.mrf.mxu3 }
 0xb58   : >> { %v13621_v54 = vpop.f32.mrf.mxu0 }
 0xb59   : >> { %v13625_v3 = vpop.f32.mrf.mxu1 }
 0xb5b   : >> { %5906 = vmatmul.f32.gmra.mxu0 %v13486_v58 }
 0xb5c   : >> { %5987 = vmatmul.f32.gmra.mxu1 %v13477_v42  ;;  %v5627_v42 = vadd.f32 %v5626_v52, %v5537_v34  ;;  %v13655_v5 = vpop.f32.mrf.mxu3 }
 0xb5e   : >> { %v5729_v48 = vadd.f32 %v5728_v40, %v5627_v42 }
 0xb60   : >> { %v13631_v46 = vpop.f32.mrf.mxu0 }
 0xb61   : >> { %v13633_v60 = vpop.f32.mrf.mxu1 }
 0xb63   : >> { %5910 = vmatmul.f32.gmra.mxu0 %v13495_v14 }
 0xb64   : >> { %5991 = vmatmul.f32.gmra.mxu1 %v13486_v58  ;;  %v13652_v58 = vpop.f32.mrf.mxu2  ;;  %v5758_v40 = vpop.f32.mrf.mxu3 }
 0xb68   : >> { %v5851_v61 = vpop.f32.mrf.mxu0 }
 0xb69   : >> { %v13641_v50 = vpop.f32.mrf.mxu1  ;;  %v5852_v20 = vadd.f32 %v5851_v61, %v5729_v48 }
 0xb6c   : >> { %5995 = vmatmul.f32.gmra.mxu1 %v13495_v14  ;;  %v5651_v14 = vpop.f32.mrf.mxu2 }
 0xb70   : >> { %v13648_v49 = vpop.f32.mrf.mxu0 }
 0xb71   : >> { %16626 = vst [vmem:[#allocation79_spill] sm:$0xff] %v13648_v49  ;;  %v5936_v16 = vpop.f32.mrf.mxu1  ;;  %v5652_v49 = vadd.f32 %v5651_v14, %v5557_v6 }
 0xb72   : >> { %v13650_v19 = vadd.f32 %v5936_v16, %v5852_v20  ;;  %v5764_v16 = vpop.f32.mrf.mxu3 }
 0xb73   : >> { %v5759_v38 = vadd.f32 %v5758_v40, %v5652_v49 }
 0xb74   : >> { %16627 = vst [vmem:[#allocation105_spill] sm:$0xff] %v13650_v19  ;;  %5999 = vmax.xlane.f32.xlu2 %v13650_v19  ;;  %v5656_v61 = vpop.f32.mrf.mxu2 }
 0xb75   : >> { %v5657_v44 = vadd.f32 %v5656_v61, %v5561_v39  ;;  %v5569_v39 = vadd.f32 %v13581_v30, %v13571_v47 }
 0xb77   : >> { %v5765_v45 = vadd.f32 %v5764_v16, %v5657_v44  ;;  %v5581_v16 = vadd.f32 %v13609_v17, %v13597_v24 }
 0xb78   : >> { %v13657_v37 = vpop.f32.mrf.mxu0 }
 0xb79   : >> { %v13659_v52 = vpop.f32.mrf.mxu1 }
 0xb7a   : >> { %16628 = vst [vmem:[#allocation104_spill] sm:$0xff] %v13659_v52  ;;  %v5770_v36 = vpop.f32.mrf.mxu3 }
 0xb7c   : >> { %v5661_v31 = vpop.f32.mrf.mxu2 }
 0xb80   : >> { %v13661_v34 = vpop.f32.mrf.mxu0 }
 0xb81   : >> { %v13663_v48 = vpop.f32.mrf.mxu1 }
 0xb82   : >> { %16629 = vst [vmem:[#allocation20_spill] sm:$0xff] %v13663_v48  ;;  %v5776_v43 = vpop.f32.mrf.mxu3  ;;  %v5662_v48 = vadd.f32 %v5661_v31, %v5565_v0  ;;  %v5573_v0 = vadd.f32 %v13591_v8, %v13579_v35 }
 0xb84   : >> { %v5666_v28 = vpop.f32.mrf.mxu2  ;;  %v5771_v12 = vadd.f32 %v5770_v36, %v5662_v48 }
 0xb88   : >> { %v13665_v42 = vpop.f32.mrf.mxu0 }
 0xb89   : >> { %v13667_v20 = vpop.f32.mrf.mxu1 }
 0xb8a   : >> { %v5782_v44 = vpop.f32.mrf.mxu3 }
 0xb8c   : >> { %v5671_v27 = vpop.f32.mrf.mxu2 }
 0xb8d   : >> { %v5672_v47 = vadd.f32 %v5671_v27, %v5573_v0 }
 0xb8f   : >> { %v5783_v30 = vadd.f32 %v5782_v44, %v5672_v47 }
 0xb90   : >> { %v5871_v25 = vpop.f32.mrf.mxu0 }
 0xb91   : >> { %v13669_v23 = vpop.f32.mrf.mxu1  ;;  %v5872_v55 = vadd.f32 %v5871_v25, %v5759_v38 }
 0xb94   : >> { %v5676_v49 = vpop.f32.mrf.mxu2 }
 0xb98   : >> { %v5875_v62 = vpop.f32.mrf.mxu0 }
 0xb99   : >> { %v5956_v21 = vpop.f32.mrf.mxu1  ;;  %v5876_v57 = vadd.f32 %v5875_v62, %v5765_v45 }
 0xb9a   : >> { %v13682_v45 = vadd.f32 %v5956_v21, %v5872_v55  ;;  %v5788_v21 = vpop.f32.mrf.mxu3 }
 0xb9c   : >> { %v5681_v48 = vpop.f32.mrf.mxu2 }
 0xba0   : >> { %v5879_v19 = vpop.f32.mrf.mxu0 }
 0xba1   : >> { %v5960_v52 = vpop.f32.mrf.mxu1  ;;  %v5880_v61 = vadd.f32 %v5879_v19, %v5771_v12 }
 0xba2   : >> { %v13677_v7 = vadd.f32 %v5960_v52, %v5876_v57  ;;  %v5667_v57 = vadd.f32 %v5666_v28, %v5569_v39  ;;  %v5577_v28 = vadd.f32 %v13599_v56, %v13587_v2  ;;  %v5794_v8 = vpop.f32.mrf.mxu3  ;;  %v5682_v2 = vadd.f32 %v5681_v48, %v5581_v16 }
 0xba4   : >> { %6011 = vmax.xlane.f32.xlu1 %v13677_v7  ;;  %v5777_v31 = vadd.f32 %v5776_v43, %v5667_v57  ;;  %v5677_v43 = vadd.f32 %v5676_v49, %v5577_v28  ;;  %v5686_v56 = vpop.f32.mrf.mxu2  ;;  %v5589_v49 = vadd.f32 %v13625_v3, %v13613_v1  ;;  %v5593_v28 = vadd.f32 %v13633_v60, %v13621_v54 }
 0xba6   : >> { %v5789_v27 = vadd.f32 %v5788_v21, %v5677_v43 }
 0xba8   : >> { %v5883_v9 = vpop.f32.mrf.mxu0 }
 0xba9   : >> { %v5964_v11 = vpop.f32.mrf.mxu1  ;;  %v5884_v36 = vadd.f32 %v5883_v9, %v5777_v31  ;;  %v5795_v9 = vadd.f32 %v5794_v8, %v5682_v2  ;;  %v5597_v8 = vadd.f32 %v13641_v50, %v13631_v46  ;;  %v5549_v50 = vadd.f32 %v13545_v22, %v13537_v26 }
 0xbaa   : >> { %v13684_v62 = vadd.f32 %v5964_v11, %v5880_v61  ;;  %v5585_v61 = vadd.f32 %v13615_v13, %v13607_v32  ;;  %v5800_v44 = vpop.f32.mrf.mxu3 }
 0xbac   : >> { %6013 = vmax.xlane.f32.xlu0 %v13684_v62  ;;  %6009 = vmax.xlane.f32.xlu1 %v13682_v45  ;;  %v5687_v24 = vadd.f32 %v5686_v56, %v5585_v61  ;;  %v5691_v17 = vpop.f32.mrf.mxu2  ;;  %v5553_v56 = vadd.f32 %v13551_v18, %v13543_v10  ;;  %v5545_v10 = vadd.f32 %v13539_v15, %v13531_v53  ;;  %v16631_v15 = vld [vmem:[#allocation19_spill] sm:$0xff] }
 0xbad   : >> { %v5692_v13 = vadd.f32 %v5691_v17, %v5589_v49  ;;  %v16630_v49 = vld [vmem:[#allocation20_spill] sm:$0xff] }
 0xbae   : >> { %v5637_v26 = vadd.f32 %v13629_v33, %v5545_v10  ;;  %v16632_v33 = vld [vmem:[#allocation79_spill] sm:$0xff] }
 0xbb0   : >> { %v5887_v25 = vpop.f32.mrf.mxu0 }
 0xbb1   : >> { %v5968_v19 = vpop.f32.mrf.mxu1  ;;  %v5888_v52 = vadd.f32 %v5887_v25, %v5783_v30 }
 0xbb2   : >> { %v13690_v6 = vadd.f32 %v5968_v19, %v5884_v36  ;;  %v5801_v36 = vadd.f32 %v5800_v44, %v5687_v24  ;;  %v5806_v19 = vpop.f32.mrf.mxu3  ;;  %v5642_v24 = vadd.f32 %v13643_v59, %v5549_v50  ;;  %v5541_v59 = vadd.f32 %v13533_v29, %v13525_v51 }
 0xbb3   : >> { %v5807_v30 = vadd.f32 %v5806_v19, %v5692_v13 }
 0xbb4   : >> { %6015 = vmax.xlane.f32.xlu1 %v13690_v6  ;;  %v5747_v18 = vadd.f32 %v13646_v41, %v5642_v24 }
 0xbb8   : >> { %v5891_v14 = vpop.f32.mrf.mxu0 }
 0xbb9   : >> { %v5972_v40 = vpop.f32.mrf.mxu1  ;;  %v5892_v39 = vadd.f32 %v5891_v14, %v5789_v27 }
 0xbba   : >> { %v13695_v35 = vadd.f32 %v5972_v40, %v5888_v52  ;;  %v5696_v52 = vpop.f32.mrf.mxu2  ;;  %v5812_v3 = vpop.f32.mrf.mxu3 }
 0xbbb   : >> { %v5697_v1 = vadd.f32 %v5696_v52, %v5593_v28 }
 0xbbc   : >> { %6017 = vmax.xlane.f32.xlu1 %v13695_v35 }
 0xbbd   : >> { %v5813_v16 = vadd.f32 %v5812_v3, %v5697_v1 }
 0xbc0   : >> { %v5895_v38 = vpop.f32.mrf.mxu0 }
 0xbc1   : >> { %v5976_v12 = vpop.f32.mrf.mxu1  ;;  %v5896_v11 = vadd.f32 %v5895_v38, %v5795_v9 }
 0xbc2   : >> { %v13700_v55 = vadd.f32 %v5976_v12, %v5892_v39  ;;  %v5701_v38 = vpop.f32.mrf.mxu2  ;;  %v5818_v60 = vpop.f32.mrf.mxu3 }
 0xbc3   : >> { %v5702_v54 = vadd.f32 %v5701_v38, %v5597_v8 }
 0xbc4   : >> { %6019 = vmax.xlane.f32.xlu1 %v13700_v55 }
 0xbc5   : >> { %v5819_v61 = vadd.f32 %v5818_v60, %v5702_v54 }
 0xbc8   : >> { %v5899_v57 = vpop.f32.mrf.mxu0 }
 0xbc9   : >> { %v5980_v0 = vpop.f32.mrf.mxu1  ;;  %v5900_v25 = vadd.f32 %v5899_v57, %v5801_v36 }
 0xbca   : >> { %v13705_v31 = vadd.f32 %v5980_v0, %v5896_v11  ;;  %v5647_v11 = vadd.f32 %v13652_v58, %v5553_v56  ;;  %v5864_v58 = vadd.f32 %v13661_v34, %v5747_v18 }
 0xbcc   : >> { %6021 = vmax.xlane.f32.xlu1 %v13705_v31  ;;  %v5753_v46 = vadd.f32 %v13655_v5, %v5647_v11  ;;  %v5949_v22 = vadd.f32 %v13667_v20, %v5864_v58  ;;  %v16633_v20 = vld [vmem:[#allocation104_spill] sm:$0xff] }
 0xbce   : >> { %v5868_v0 = vadd.f32 %v13665_v42, %v5753_v46  ;;  %v5632_v42 = vadd.f32 %v13619_v63, %v5541_v59 }
 0xbd0   : >> { %v5903_v21 = vpop.f32.mrf.mxu0  ;;  %v13729_v17 = vadd.f32 %v13669_v23, %v5868_v0  ;;  %v5741_v23 = vadd.f32 %v13635_v4, %v5637_v26  ;;  %v5735_v41 = vadd.f32 %v16631_v15, %v5632_v42 }
 0xbd1   : >> { %v5984_v47 = vpop.f32.mrf.mxu1  ;;  %v5904_v14 = vadd.f32 %v5903_v21, %v5807_v30 }
 0xbd2   : >> { %v13710_v32 = vadd.f32 %v5984_v47, %v5900_v25  ;;  %v5860_v5 = vadd.f32 %v13657_v37, %v5741_v23  ;;  %v5856_v34 = vadd.f32 %v16632_v33, %v5735_v41 }
 0xbd4   : >> { %6023 = vmax.xlane.f32.xlu1 %v13710_v32  ;;  %v13744_v53 = vadd.f32 %v16630_v49, %v5860_v5  ;;  %v13750_v36 = vadd.f32 %v16633_v20, %v5856_v34  ;;  %v16634_v20 = vld [vmem:[#allocation105_spill] sm:$0xff] }
 0xbd8   : >> { %v5907_v43 = vpop.f32.mrf.mxu0 }
 0xbd9   : >> { %v5988_v40 = vpop.f32.mrf.mxu1  ;;  %v5908_v27 = vadd.f32 %v5907_v43, %v5813_v16 }
 0xbda   : >> { %v13715_v48 = vadd.f32 %v5988_v40, %v5904_v14 }
 0xbdc   : >> { %6025 = vmax.xlane.f32.xlu1 %v13715_v48 }
 0xbe0   : >> { %v5911_v2 = vpop.f32.mrf.mxu0 }
 0xbe1   : >> { %v5992_v39 = vpop.f32.mrf.mxu1  ;;  %v5912_v9 = vadd.f32 %v5911_v2, %v5819_v61 }
 0xbe2   : >> { %v5993_v12 = vadd.f32 %v5992_v39, %v5908_v27 }
 0xbe4   : >> { %6027 = vmax.xlane.f32.xlu1 %v5993_v12 }
 0xbe7   : >> { %v6000_v33 = vpop.xlane.xlu2 %5999 }
 0xbe9   : >> { %v5996_v44 = vpop.f32.mrf.mxu1 }
 0xbea   : >> { %v5997_v57 = vadd.f32 %v5996_v44, %v5912_v9 }
 0xbec   : >> { %6029 = vmax.xlane.f32.xlu1 %v5997_v57 }
 0xbf4   : >> { %6007 = vmax.xlane.f32.xlu1 %v13729_v17 }
 0xbfc   : >> { %6005 = vmax.xlane.f32.xlu1 %v5949_v22 }
 0xc04   : >> { %6003 = vmax.xlane.f32.xlu1 %v13744_v53 }
 0xc0c   : >> { %6001 = vmax.xlane.f32.xlu1 %v13750_v36 }
 0xc17   : >> { %v13753_v51 = vpop.xlane.xlu1 %6011 }
 0xc18   : >> { %v6037_v59 = vsub.f32 %v13677_v7, %v13753_v51 }
 0xc1f   : >> { %v6010_v29 = vpop.xlane.xlu1 %6009  ;;  %v6014_v30 = vpop.xlane.xlu0 %6013 }
 0xc20   : >> { %v6038_v14 = vsub.f32 %v13684_v62, %v6014_v30 }
 0xc22   : >> { %v6061_v1 = vmul.f32 1.442695, %v6038_v14 }
 0xc27   : >> { %v6016_v4 = vpop.xlane.xlu1 %6015 }
 0xc28   : >> { %v6039_v10 = vsub.f32 %v13690_v6, %v6016_v4  ;;  %v6059_v6 = vmul.f32 1.442695, %v6037_v59  ;;  %v16636_v4 = vld [vmem:[#allocation91_spill] sm:$0xff] }
 0xc2a   : >> { %v6063_v18 = vmul.f32 1.442695, %v6039_v10 }
 0xc2f   : >> { %v6018_v37 = vpop.xlane.xlu1 %6017 }
 0xc30   : >> { %v6040_v21 = vsub.f32 %v13695_v35, %v6018_v37  ;;  %v16637_v37 = vld [vmem:[#allocation92_spill] sm:$0xff] }
 0xc32   : >> { %v6065_v28 = vmul.f32 1.442695, %v6040_v21 }
 0xc37   : >> { %v6020_v63 = vpop.xlane.xlu1 %6019 }
 0xc3f   : >> { %v6022_v25 = vpop.xlane.xlu1 %6021 }
 0xc40   : >> { %v6042_v19 = vsub.f32 %v13705_v31, %v6022_v25  ;;  %v6036_v31 = vsub.f32 %v13682_v45, %v6010_v29  ;;  %v16638_v25 = vld [vmem:[#allocation93_spill] sm:$0xff] }
 0xc42   : >> { %v6069_v47 = vmul.f32 1.442695, %v6042_v19  ;;  %v6057_v35 = vmul.f32 1.442695, %v6036_v31 }
 0xc44   : >> { %9147 = vpow2.f32 %v6069_v47 }
 0xc45   : >> { %9149 = vpow2.f32 %v6065_v28 }
 0xc46   : >> { %9151 = vpow2.f32 %v6061_v1 }
 0xc47   : >> { %v6024_v13 = vpop.xlane.xlu1 %6023  ;;  %9153 = vpow2.f32 %v6057_v35 }
 0xc48   : >> { %v6043_v61 = vsub.f32 %v13710_v32, %v6024_v13 }
 0xc4a   : >> { %v13757_v52 = vpop.eup %9147  ;;  %v6071_v9 = vmul.f32 1.442695, %v6043_v61 }
 0xc4b   : >> { %6101 = vadd.xlane.f32.xlu2 %v13757_v52  ;;  %v13761_v3 = vpop.eup %9149 }
 0xc4c   : >> { %v13765_v16 = vpop.eup %9151 }
 0xc4d   : >> { %v13768_v38 = vpop.eup %9153 }
 0xc4f   : >> { %v6026_v40 = vpop.xlane.xlu1 %6025 }
 0xc53   : >> { %6097 = vadd.xlane.f32.xlu2 %v13761_v3 }
 0xc57   : >> { %v6028_v43 = vpop.xlane.xlu1 %6027 }
 0xc58   : >> { %v6045_v8 = vsub.f32 %v5993_v12, %v6028_v43  ;;  %v6044_v12 = vsub.f32 %v13715_v48, %v6026_v40  ;;  %v6041_v48 = vsub.f32 %v13700_v55, %v6020_v63 }
 0xc5a   : >> { %v6075_v27 = vmul.f32 1.442695, %v6045_v8  ;;  %v6073_v2 = vmul.f32 1.442695, %v6044_v12  ;;  %v6067_v0 = vmul.f32 1.442695, %v6041_v48 }
 0xc5b   : >> { %6093 = vadd.xlane.f32.xlu2 %v13765_v16  ;;  %v16642_v48 = vld [vmem:[#allocation83_spill] sm:$0xff] }
 0xc5c   : >> { %9155 = vpow2.f32 %v6075_v27 }
 0xc5f   : >> { %v6030_v62 = vpop.xlane.xlu1 %6029 }
 0xc60   : >> { %v6046_v39 = vsub.f32 %v5997_v57, %v6030_v62 }
 0xc62   : >> { %v13770_v54 = vpop.eup %9155  ;;  %v6077_v45 = vmul.f32 1.442695, %v6046_v39 }
 0xc63   : >> { %6089 = vadd.xlane.f32.xlu2 %v13768_v38  ;;  %6107 = vadd.xlane.f32.xlu1 %v13770_v54 }
 0xc64   : >> { %9157 = vpow2.f32 %v6077_v45 }
 0xc65   : >> { %9159 = vpow2.f32 %v6073_v2 }
 0xc66   : >> { %9161 = vpow2.f32 %v6071_v9  ;;  %v16639_v9 = vld [vmem:[#allocation25_spill] sm:$0xff] }
 0xc67   : >> { %v6008_v60 = vpop.xlane.xlu1 %6007 }
 0xc68   : >> { %v6035_v42 = vsub.f32 %v13729_v17, %v6008_v60 }
 0xc6a   : >> { %v13775_v56 = vpop.eup %9157  ;;  %v6055_v49 = vmul.f32 1.442695, %v6035_v42 }
 0xc6b   : >> { %6109 = vadd.xlane.f32.xlu1 %v13775_v56  ;;  %v13779_v57 = vpop.eup %9159 }
 0xc6c   : >> { %v13783_v24 = vpop.eup %9161 }
 0xc6f   : >> { %v6006_v44 = vpop.xlane.xlu1 %6005 }
 0xc70   : >> { %v6034_v11 = vsub.f32 %v5949_v22, %v6006_v44  ;;  %v16640_v44 = vld [vmem:[#allocation49_spill] sm:$0xff] }
 0xc72   : >> { %v6053_v50 = vmul.f32 1.442695, %v6034_v11  ;;  %v13843_v11 = vadd.f32 %v16640_v44, %v16639_v9  ;;  %v16654_v9 = vld [vmem:[#allocation24_spill] sm:$0xff] }
 0xc73   : >> { %6105 = vadd.xlane.f32.xlu1 %v13779_v57 }
 0xc74   : >> { %9163 = vpow2.f32 %v6053_v50  ;;  %v16641_v50 = vld [vmem:[#allocation23_spill] sm:$0xff] }
 0xc75   : >> { %9165 = vpow2.f32 %v6067_v0 }
 0xc76   : >> { %9167 = vpow2.f32 %v6063_v18 }
 0xc77   : >> { %v6004_v46 = vpop.xlane.xlu1 %6003 }
 0xc78   : >> { %v6033_v7 = vsub.f32 %v13744_v53, %v6004_v46  ;;  %v16635_v53 = vld [vmem:[#allocation89_spill] sm:$0xff]  ;;  %v1107_v46 = vadd.f32 %v16642_v48, %v16641_v50 }
 0xc7a   : >> { %v13785_v32 = vpop.eup %9163  ;;  %v6051_v41 = vmul.f32 1.442695, %v6033_v7 }
 0xc7b   : >> { %6103 = vadd.xlane.f32.xlu1 %v13783_v24  ;;  %6085 = vadd.xlane.f32.xlu2 %v13785_v32  ;;  %v13791_v22 = vpop.eup %9165 }
 0xc7c   : >> { %v13796_v23 = vpop.eup %9167 }
 0xc7f   : >> { %v6002_v58 = vpop.xlane.xlu1 %6001 }
 0xc80   : >> { %v6032_v26 = vsub.f32 %v13750_v36, %v6002_v58  ;;  %v6031_v36 = vsub.f32 %v16634_v20, %v6000_v33 }
 0xc82   : >> { %v6049_v55 = vmul.f32 1.442695, %v6032_v26  ;;  %v6047_v51 = vmul.f32 1.442695, %v6031_v36 }
 0xc83   : >> { %6099 = vadd.xlane.f32.xlu1 %v13791_v22 }
 0xc84   : >> { %9169 = vpow2.f32 %v6049_v55 }
 0xc85   : >> { %9171 = vpow2.f32 %v6059_v6 }
 0xc86   : >> { %9173 = vpow2.f32 %v6055_v49 }
 0xc87   : >> { %9175 = vpow2.f32 %v6051_v41 }
 0xc88   : >> { %9177 = vpow2.f32 %v6047_v51 }
 0xc8a   : >> { %v13798_v5 = vpop.eup %9169 }
 0xc8b   : >> { %6095 = vadd.xlane.f32.xlu1 %v13796_v23  ;;  %6081 = vadd.xlane.f32.xlu2 %v13798_v5  ;;  %v13803_v15 = vpop.eup %9171 }
 0xc8c   : >> { %v13807_v34 = vpop.eup %9173 }
 0xc8d   : >> { %v13811_v29 = vpop.eup %9175 }
 0xc8e   : >> { %v13814_v17 = vpop.eup %9177 }
 0xc93   : >> { %6091 = vadd.xlane.f32.xlu1 %v13803_v15 }
 0xc9b   : >> { %6087 = vadd.xlane.f32.xlu1 %v13807_v34 }
 0xca3   : >> { %6083 = vadd.xlane.f32.xlu1 %v13811_v29 }
 0xcab   : >> { %6079 = vadd.xlane.f32.xlu1 %v13814_v17 }
 0xcb4   : >> { %6801 = vxpose.xlu2.b32.start [1/4] (short) %v16635_v53, 128 }
 0xcbc   : >> { %6802 = vxpose.xlu2.b32.cont [2/4] (short) %v16636_v4, 128 }
 0xcbe   : >> { %v6102_v63 = vpop.xlane.xlu2 %6101 }
 0xcbf   : >> { %9179 = vrcp.f32 %v6102_v63  ;;  %vm6281_vm13 = vweird.f32 %v6102_v63  ;;  %v6287_v26 = vand.u32 2147483648, %v6102_v63  ;;  %v6285_v6 = vand.u32 2147483647, %v6102_v63 }
 0xcc1   : >> { %v6288_v53 = vor.u32 1.1754944e-38, %v6287_v26  ;;  %vm6286_vm4 = vcmp.eq.f32.partialorder %v6285_v6, 8.507059e+37  ;;  %v16657_v6 = vld [vmem:[#allocation110_spill] sm:$0xff] }
 0xcc4   : >> { %6803 = vxpose.xlu2.b32.cont [3/4] (short) %v16637_v37, 128 }
 0xcc5   : >> { %v13824_v47 = vpop.eup %9179 }
 0xcc6   : >> { %v13821_v19 = vpop.xlane.xlu2 %6097  ;;  %v6277_v13 = vmul.f32 %v13824_v47, %v6102_v63  ;;  %vm6282_vm10 = vweird.f32 %v13824_v47 }
 0xcc7   : >> { %9181 = vrcp.f32 %v13821_v19  ;;  %vm13861_vm14 = vmor %vm6281_vm13, %vm6282_vm10  ;;  %v6257_v42 = vand.u32 2147483648, %v13821_v19  ;;  %vm6251_vm3 = vweird.f32 %v13821_v19  ;;  %v6255_v4 = vand.u32 2147483647, %v13821_v19 }
 0xcc8   : >> { %v6278_v30 = vsub.f32 1.0, %v6277_v13 }
 0xcc9   : >> { %vm6256_vm8 = vcmp.eq.f32.partialorder %v6255_v4, 8.507059e+37 }
 0xcca   : >> { %v6279_v43 = vmul.f32 %v13824_v47, %v6278_v30  ;;  %v6258_v30 = vor.u32 1.1754944e-38, %v6257_v42 }
 0xccc   : >> { %6804 = vxpose.xlu2.b32.end [4/4] (short) %v16638_v25, 128  ;;  %v6280_v39 = vadd.f32 %v13824_v47, %v6279_v43 }
 0xccd   : >> { %v13827_v28 = vpop.eup %9181 }
 0xcce   : >> { %v6247_v14 = vmul.f32 %v13827_v28, %v13821_v19  ;;  %v13831_v1 = vpop.xlane.xlu2 %6093  ;;  %v6284_v41 = vsel %vm13861_vm14, %v13824_v47, %v6280_v39  ;;  %vm6252_vm15 = vweird.f32 %v13827_v28 }
 0xccf   : >> { %vm13878_vm5 = vmor %vm6251_vm3, %vm6252_vm15 }
 0xcd0   : >> { %v6248_v8 = vsub.f32 1.0, %v6247_v14 }
 0xcd2   : >> { %v6249_v60 = vmul.f32 %v13827_v28, %v6248_v8 }
 0xcd4   : >> { %v6250_v33 = vadd.f32 %v13827_v28, %v6249_v60 }
 0xcd6   : >> { %v6108_v21 = vpop.xlane.xlu1 %6107  ;;  %v13875_v37 = vpop.xlane.xlu2 %6089  ;;  %v6254_v19 = vsel %vm13878_vm5, %v13827_v28, %v6250_v33  ;;  %v16651_v28 = vld [vmem:[#allocation53_spill] sm:$0xff] }
 0xcd7   : >> { %9183 = vrcp.f32 %v6108_v21  ;;  %v6332_v45 = vand.u32 2147483648, %v6108_v21  ;;  %vm6326_vm11 = vweird.f32 %v6108_v21  ;;  %v6330_v61 = vand.u32 2147483647, %v6108_v21 }
 0xcd9   : >> { %v6333_v49 = vor.u32 1.1754944e-38, %v6332_v45  ;;  %vm6331_vm1 = vcmp.eq.f32.partialorder %v6330_v61, 8.507059e+37  ;;  %v16653_v45 = vld [vmem:[#allocation46_spill] sm:$0xff]  ;;  %v6259_v61 = vsel %vm6256_vm8, %v6258_v30, %v6254_v19 }
 0xcda   : >> { %v1365_v60 = vadd.f32 %v16653_v45, %v1107_v46 }
 0xcdc   : >> { %v13921_v42 = vadd.f32 %v16657_v6, %v1365_v60  ;;  %v6197_v6 = vand.u32 2147483648, %v13875_v37 }
 0xcdd   : >> { %v9184_v40 = vpop.eup %9183 }
 0xcde   : >> { %v13833_v31 = vpop.xlane.xlu1 %6109  ;;  %v6322_v35 = vmul.f32 %v9184_v40, %v6108_v21  ;;  %vm6327_vm9 = vweird.f32 %v9184_v40 }
 0xcdf   : >> { %9185 = vrcp.f32 %v13833_v31  ;;  %vm13847_vm12 = vmor %vm6326_vm11, %vm6327_vm9  ;;  %v6347_v63 = vand.u32 2147483648, %v13833_v31  ;;  %vm6341_vm6 = vweird.f32 %v13833_v31  ;;  %v6345_v21 = vand.u32 2147483647, %v13833_v31 }
 0xce0   : >> { %9187 = vrcp.f32 %v13831_v1  ;;  %v6323_v27 = vsub.f32 1.0, %v6322_v35  ;;  %v6289_v35 = vsel %vm6286_vm4, %v6288_v53, %v6284_v41 }
 0xce1   : >> { %vm6346_vm9 = vcmp.eq.f32.partialorder %v6345_v21, 8.507059e+37  ;;  %v6290_v0 = vmul.f32 %v13757_v52, %v6289_v35 }
 0xce2   : >> { %v6324_v62 = vmul.f32 %v9184_v40, %v6323_v27 }
 0xce4   : >> { %v6325_v2 = vadd.f32 %v9184_v40, %v6324_v62  ;;  %v16652_v62 = vld [vmem:[#allocation55_spill] sm:$0xff] }
 0xce5   : >> { %v9186_v12 = vpop.eup %9185  ;;  %v13904_v39 = vadd.f32 %v16652_v62, %v16651_v28 }
 0xce6   : >> { %v6337_v10 = vmul.f32 %v9186_v12, %v13833_v31  ;;  %v13852_v18 = vpop.xlane.xlu1 %6105  ;;  %v13854_v58 = vpop.eup %9187  ;;  %v6329_v55 = vsel %vm13847_vm12, %v9184_v40, %v6325_v2  ;;  %vm6342_vm2 = vweird.f32 %v9186_v12  ;;  %vm6221_vm12 = vweird.f32 %v13831_v1 }
 0xce7   : >> { %9189 = vrcp.f32 %v13852_v18  ;;  %v6217_v20 = vmul.f32 %v13854_v58, %v13831_v1  ;;  %v6334_v51 = vsel %vm6331_vm1, %v6333_v49, %v6329_v55  ;;  %vm13890_vm7 = vmor %vm6341_vm6, %vm6342_vm2  ;;  %v16656_v55 = vld [vmem:[#allocation111_spill] sm:$0xff]  ;;  %v6317_v49 = vand.u32 2147483648, %v13852_v18 }
 0xce8   : >> { %v6338_v7 = vsub.f32 1.0, %v6337_v10  ;;  %v6335_v40 = vmul.f32 %v13770_v54, %v6334_v51  ;;  %9191 = vrcp.f32 %v13875_v37  ;;  %v6348_v54 = vor.u32 1.1754944e-38, %v6347_v63 }
 0xce9   : >> { %v6218_v43 = vsub.f32 1.0, %v6217_v20  ;;  %vm6311_vm11 = vweird.f32 %v13852_v18  ;;  %v6315_v33 = vand.u32 2147483647, %v13852_v18  ;;  %v13941_v51 = vand.u32 4294901760, %v6290_v0 }
 0xcea   : >> { %v6339_v36 = vmul.f32 %v9186_v12, %v6338_v7  ;;  %v13910_v48 = vand.u32 4294901760, %v6335_v40  ;;  %v6260_v7 = vmul.f32 %v13761_v3, %v6259_v61  ;;  %vm6222_vm14 = vweird.f32 %v13854_v58 }
 0xceb   : >> { %v6219_v10 = vmul.f32 %v13854_v58, %v6218_v43  ;;  %v6318_v21 = vor.u32 1.1754944e-38, %v6317_v49  ;;  %vm6316_vm15 = vcmp.eq.f32.partialorder %v6315_v33, 8.507059e+37  ;;  %vm13972_vm1 = vmor %vm6221_vm12, %vm6222_vm14  ;;  %v13984_v45 = vsub.f32 %v6290_v0, %v13941_v51 }
 0xcec   : >> { %v6340_v47 = vadd.f32 %v9186_v12, %v6339_v36  ;;  %v13939_v3 = vsub.f32 %v6335_v40, %v13910_v48  ;;  %v13966_v40 = vand.u32 4294901760, %v6260_v7 }
 0xced   : >> { %v13884_v13 = vpop.eup %9189  ;;  %v6220_v4 = vadd.f32 %v13854_v58, %v6219_v10  ;;  %v6195_v10 = vand.u32 2147483647, %v13875_v37 }
 0xcee   : >> { %v6344_v31 = vsel %vm13890_vm7, %v9186_v12, %v6340_v47  ;;  %v6307_v8 = vmul.f32 %v13884_v13, %v13852_v18  ;;  %v13900_v27 = vpop.xlane.xlu1 %6103  ;;  %v16655_v12 = vld [vmem:[#allocation84_spill] sm:$0xff]  ;;  %vm6312_vm10 = vweird.f32 %v13884_v13  ;;  %v13925_v41 = vpop.eup %9191  ;;  %v6424_v28 = vand.u32 4294901760, %v13939_v3 }
 0xcef   : >> { %9193 = vrcp.f32 %v13900_v27  ;;  %v1111_v44 = vadd.f32 %v16655_v12, %v16654_v9  ;;  %v6349_v50 = vsel %vm6346_vm9, %v6348_v54, %v6344_v31  ;;  %vm13934_vm13 = vmor %vm6311_vm11, %vm6312_vm10  ;;  %v6187_v47 = vmul.f32 %v13925_v41, %v13875_v37  ;;  %v13959_v19 = vpop.xlane.xlu2 %6085 }
 0xcf0   : >> { %v6308_v2 = vsub.f32 1.0, %v6307_v8  ;;  %v6350_v46 = vmul.f32 %v13775_v56, %v6349_v50  ;;  %v6227_v56 = vand.u32 2147483648, %v13831_v1  ;;  %v6224_v62 = vsel %vm13972_vm1, %v13854_v58, %v6220_v4 }
 0xcf1   : >> { %v13918_v59 = vadd.f32 %v16656_v55, %v1111_v44  ;;  %v6188_v60 = vsub.f32 1.0, %v6187_v47  ;;  %vm6296_vm3 = vweird.f32 %v13900_v27  ;;  %v6302_v58 = vand.u32 2147483648, %v13900_v27 }
 0xcf2   : >> { %v6309_v26 = vmul.f32 %v13884_v13, %v6308_v2  ;;  %v13930_v20 = vand.u32 4294901760, %v6350_v46  ;;  %v6228_v43 = vor.u32 1.1754944e-38, %v6227_v56  ;;  %v6300_v44 = vand.u32 2147483647, %v13900_v27 }
 0xcf3   : >> { %v6425_v0 = vsub.f32 %v13939_v3, %v6424_v28  ;;  %v6189_v56 = vmul.f32 %v13925_v41, %v6188_v60  ;;  %v6303_v36 = vor.u32 1.1754944e-38, %v6302_v58  ;;  %vm6192_vm9 = vweird.f32 %v13925_v41 }
 0xcf4   : >> { %v6310_v52 = vadd.f32 %v13884_v13, %v6309_v26  ;;  %6352 = vmatpush.xpose.msra.mxu2 %v13930_v20  ;;  %v13952_v63 = vsub.f32 %v6350_v46, %v13930_v20  ;;  %6737 = vmatpush.xpose.msrb.mxu1 %v13930_v20  ;;  %vm6301_vm6 = vcmp.eq.f32.partialorder %v6300_v44, 8.507059e+37  ;;  %vm6191_vm11 = vweird.f32 %v13875_v37 }
 0xcf5   : >> { %v13943_v53 = vpop.eup %9193  ;;  %v6426_v47 = vand.u32 4294901760, %v6425_v0  ;;  %vm14064_vm12 = vcmp.eq.f32.partialorder %v6195_v10, 8.507059e+37 }
 0xcf6   : >> { %v6314_v18 = vsel %vm13934_vm13, %v13884_v13, %v6310_v52  ;;  %v13955_v25 = vpop.xlane.xlu1 %6099  ;;  %v6292_v30 = vmul.f32 %v13943_v53, %v13900_v27  ;;  %v6225_v13 = vand.u32 2147483647, %v13831_v1  ;;  %v6418_v14 = vand.u32 4294901760, %v13952_v63  ;;  %vm14073_vm13 = vmor %vm6191_vm11, %vm6192_vm9 }
 0xcf7   : >> { %9195 = vrcp.f32 %v13955_v25  ;;  %v6319_v8 = vsel %vm6316_vm15, %v6318_v21, %v6314_v18  ;;  %vm6297_vm2 = vweird.f32 %v13943_v53  ;;  %vm6266_vm8 = vweird.f32 %v13955_v25 }
 0xcf8   : >> { %v6293_v31 = vsub.f32 1.0, %v6292_v30  ;;  %9197 = vrcp.f32 %v13959_v19  ;;  %6354 = vmatpush.xpose.msra.mxu2 %v13910_v48  ;;  %6658 = vmatpush.xpose.msrb.mxu0 %v6418_v14  ;;  %v6320_v1 = vmul.f32 %v13779_v57, %v6319_v8  ;;  %v6419_v2 = vsub.f32 %v13952_v63, %v6418_v14  ;;  %vm14003_vm5 = vmor %vm6296_vm3, %vm6297_vm2 }
 0xcf9   : >> { %6739 = vmatpush.xpose.msrb.mxu1 %v13910_v48  ;;  %v13995_v57 = vsub.f32 %v6260_v7, %v13966_v40  ;;  %vm6226_vm4 = vcmp.eq.f32.partialorder %v6225_v13, 8.507059e+37  ;;  %v6442_v7 = vand.u32 4294901760, %v13984_v45 }
 0xcfa   : >> { %v6294_v54 = vmul.f32 %v13943_v53, %v6293_v31  ;;  %v13992_v61 = vand.u32 4294901760, %v6320_v1  ;;  %v6420_v50 = vand.u32 4294901760, %v6419_v2  ;;  %v6229_v52 = vsel %vm6226_vm4, %v6228_v43, %v6224_v62 }
 0xcfb   : >> { %v6454_v21 = vand.u32 4294901760, %v13995_v57  ;;  %v6230_v14 = vmul.f32 %v13765_v16, %v6229_v52  ;;  %v6272_v43 = vand.u32 2147483648, %v13955_v25  ;;  %v6270_v62 = vand.u32 2147483647, %v13955_v25 }
 0xcfc   : >> { %v6295_v12 = vadd.f32 %v13943_v53, %v6294_v54  ;;  %6356 = vmatpush.xpose.msra.mxu2 %v13992_v61  ;;  %6662 = vmatpush.xpose.msrb.mxu0 %v6424_v28  ;;  %v14013_v27 = vsub.f32 %v6320_v1, %v13992_v61  ;;  %v6190_v16 = vadd.f32 %v13925_v41, %v6189_v56  ;;  %vm6161_vm4 = vweird.f32 %v13959_v19 }
 0xcfd   : >> { %v13997_v9 = vpop.eup %9195  ;;  %6421 = vmatpush.xpose.msra.mxu3 %v6420_v50  ;;  %6741 = vmatpush.xpose.msrb.mxu1 %v13992_v61  ;;  %v14060_v58 = vsub.f32 %v13984_v45, %v6442_v7  ;;  %v6273_v50 = vor.u32 1.1754944e-38, %v6272_v43  ;;  %vm6271_vm14 = vcmp.eq.f32.partialorder %v6270_v62, 8.507059e+37  ;;  %v14084_v26 = vsub.f32 %v13995_v57, %v6454_v21 }
 0xcfe   : >> { %v6262_v46 = vmul.f32 %v13997_v9, %v13955_v25  ;;  %v14010_v55 = vpop.xlane.xlu1 %6095  ;;  %v6299_v49 = vsel %vm14003_vm5, %v13943_v53, %v6295_v12  ;;  %v14021_v33 = vpop.eup %9197  ;;  %v6430_v53 = vand.u32 4294901760, %v14013_v27  ;;  %vm6267_vm7 = vweird.f32 %v13997_v9 }
 0xcff   : >> { %9199 = vrcp.f32 %v14010_v55  ;;  %v14025_v18 = vpop.xlane.xlu2 %6081  ;;  %v6304_v13 = vsel %vm6301_vm6, %v6303_v36, %v6299_v49  ;;  %v6157_v35 = vmul.f32 %v14021_v33, %v13959_v19  ;;  %vm14045_vm10 = vmor %vm6266_vm8, %vm6267_vm7  ;;  %v14062_v12 = vand.u32 4294901760, %v6230_v14 }
 0xd00   : >> { %v6263_v4 = vsub.f32 1.0, %v6262_v46  ;;  %6666 = vmatpush.xpose.msrb.mxu0 %v6430_v53  ;;  %v6305_v31 = vmul.f32 %v13783_v24, %v6304_v13  ;;  %v6431_v8 = vsub.f32 %v14013_v27, %v6430_v53  ;;  %9201 = vrcp.f32 %v14025_v18 }
 0xd01   : >> { %6427 = vmatpush.xpose.msra.mxu3 %v6426_v47  ;;  %v6158_v0 = vsub.f32 1.0, %v6157_v35  ;;  %v6194_v46 = vsel %vm14073_vm13, %v13925_v41, %v6190_v16  ;;  %v6198_v49 = vor.u32 1.1754944e-38, %v6197_v6  ;;  %v6444_v53 = vand.u32 4294901760, %v14060_v58 }
 0xd02   : >> { %v6264_v30 = vmul.f32 %v13997_v9, %v6263_v4  ;;  %v14049_v24 = vand.u32 4294901760, %v6305_v31  ;;  %v6432_v60 = vand.u32 4294901760, %v6431_v8  ;;  %v6242_v4 = vand.u32 2147483648, %v14010_v55 }
 0xd03   : >> { %v6240_v35 = vand.u32 2147483647, %v14010_v55  ;;  %v6159_v6 = vmul.f32 %v14021_v33, %v6158_v0  ;;  %vm6236_vm1 = vweird.f32 %v14010_v55  ;;  %vm6162_vm5 = vweird.f32 %v14021_v33 }
 0xd04   : >> { %v6265_v28 = vadd.f32 %v13997_v9, %v6264_v30  ;;  %6358 = vmatpush.xpose.msra.mxu2 %v14049_v24  ;;  %6743 = vmatpush.xpose.msrb.mxu1 %v14049_v24  ;;  %v14079_v10 = vsub.f32 %v6305_v31, %v14049_v24  ;;  %v14095_v30 = vsub.f32 %v6230_v14, %v14062_v12  ;;  %v6456_v31 = vand.u32 4294901760, %v14084_v26  ;;  %vm14150_vm7 = vmor %vm6161_vm4, %vm6162_vm5 }
 0xd05   : >> { %v9200_v54 = vpop.eup %9199  ;;  %6433 = vmatpush.xpose.msra.mxu3 %v6432_v60  ;;  %v6199_v14 = vsel %vm14064_vm12, %v6198_v49, %v6194_v46  ;;  %v6243_v1 = vor.u32 1.1754944e-38, %v6242_v4  ;;  %vm6241_vm3 = vcmp.eq.f32.partialorder %v6240_v35, 8.507059e+37  ;;  %v6167_v4 = vand.u32 2147483648, %v13959_v19 }
 0xd06   : >> { %v6269_v25 = vsel %vm14045_vm10, %v13997_v9, %v6265_v28  ;;  %v14055_v2 = vpop.xlane.xlu1 %6091  ;;  %v6232_v37 = vmul.f32 %v9200_v54, %v14010_v55  ;;  %v14089_v36 = vpop.eup %9201  ;;  %v6436_v47 = vand.u32 4294901760, %v14079_v10  ;;  %vm6237_vm15 = vweird.f32 %v9200_v54 }
 0xd07   : >> { %9203 = vrcp.f32 %v14055_v2  ;;  %v6274_v56 = vsel %vm6271_vm14, %v6273_v50, %v6269_v25  ;;  %v6127_v28 = vmul.f32 %v14089_v36, %v14025_v18  ;;  %vm14114_vm2 = vmor %vm6236_vm1, %vm6237_vm15  ;;  %v6466_v44 = vand.u32 4294901760, %v14095_v30 }
 0xd08   : >> { %v6233_v52 = vsub.f32 1.0, %v6232_v37  ;;  %6360 = vmatpush.xpose.msra.mxu2 %v13941_v51  ;;  %v6275_v41 = vmul.f32 %v13791_v22, %v6274_v56  ;;  %6670 = vmatpush.xpose.msrb.mxu0 %v6436_v47  ;;  %v6437_v43 = vsub.f32 %v14079_v10, %v6436_v47  ;;  %v6200_v55 = vmul.f32 %v13768_v38, %v6199_v14 }
 0xd09   : >> { %6745 = vmatpush.xpose.msrb.mxu1 %v13941_v51  ;;  %v6128_v46 = vsub.f32 1.0, %v6127_v28  ;;  %v6165_v56 = vand.u32 2147483647, %v13959_v19  ;;  %v6210_v47 = vand.u32 2147483647, %v14055_v2  ;;  %vm6206_vm8 = vweird.f32 %v14055_v2 }
 0xd0a   : >> { %v6234_v13 = vmul.f32 %v9200_v54, %v6233_v52  ;;  %v14111_v22 = vand.u32 4294901760, %v6275_v41  ;;  %v6438_v25 = vand.u32 4294901760, %v6437_v43  ;;  %v6212_v52 = vand.u32 2147483648, %v14055_v2 }
 0xd0b   : >> { %v6129_v14 = vmul.f32 %v14089_v36, %v6128_v46  ;;  %vm6166_vm10 = vcmp.eq.f32.partialorder %v6165_v56, 8.507059e+37  ;;  %vm6211_vm11 = vcmp.eq.f32.partialorder %v6210_v47, 8.507059e+37  ;;  %vm6132_vm12 = vweird.f32 %v14089_v36 }
 0xd0c   : >> { %v6235_v62 = vadd.f32 %v9200_v54, %v6234_v13  ;;  %6362 = vmatpush.xpose.msra.mxu2 %v14111_v22  ;;  %6439 = vmatpush.xpose.msra.mxu3 %v6438_v25  ;;  %v14132_v9 = vsub.f32 %v6275_v41, %v14111_v22  ;;  %v6168_v25 = vor.u32 1.1754944e-38, %v6167_v4  ;;  %vm6131_vm14 = vweird.f32 %v14025_v18 }
 0xd0d   : >> { %v14106_v8 = vpop.eup %9203  ;;  %6674 = vmatpush.xpose.msrb.mxu0 %v6442_v7  ;;  %6747 = vmatpush.xpose.msrb.mxu1 %v14111_v22  ;;  %vm14209_vm15 = vmor %vm6131_vm14, %vm6132_vm12  ;;  %v6135_v4 = vand.u32 2147483647, %v14025_v18 }
 0xd0e   : >> { %v6202_v60 = vmul.f32 %v14106_v8, %v14055_v2  ;;  %v14120_v58 = vpop.xlane.xlu1 %6087  ;;  %v6239_v50 = vsel %vm14114_vm2, %v9200_v54, %v6235_v62  ;;  %v6160_v54 = vadd.f32 %v14021_v33, %v6159_v6  ;;  %vm6207_vm6 = vweird.f32 %v14106_v8 }
 0xd0f   : >> { %9205 = vrcp.f32 %v14120_v58  ;;  %v6244_v0 = vsel %vm6241_vm3, %v6243_v1, %v6239_v50  ;;  %v6448_v7 = vand.u32 4294901760, %v14132_v9  ;;  %v14157_v6 = vand.u32 4294901760, %v6200_v55  ;;  %vm14167_vm9 = vmor %vm6206_vm8, %vm6207_vm6 }
 0xd10   : >> { %v6203_v37 = vsub.f32 1.0, %v6202_v60  ;;  %v6245_v38 = vmul.f32 %v13796_v23, %v6244_v0  ;;  %6364 = vmatpush.xpose.msra.mxu2 %v13966_v40  ;;  %6445 = vmatpush.xpose.msra.mxu3 %v6444_v53  ;;  %v6164_v19 = vsel %vm14150_vm7, %v14021_v33, %v6160_v54  ;;  %v14178_v53 = vsub.f32 %v14095_v30, %v6466_v44 }
 0xd11   : >> { %6678 = vmatpush.xpose.msrb.mxu0 %v6448_v7  ;;  %v6449_v41 = vsub.f32 %v14132_v9, %v6448_v7  ;;  %6749 = vmatpush.xpose.msrb.mxu1 %v13966_v40  ;;  %v6213_v62 = vor.u32 1.1754944e-38, %v6212_v52  ;;  %v14193_v0 = vsub.f32 %v6200_v55, %v14157_v6  ;;  %v6130_v54 = vadd.f32 %v14089_v36, %v6129_v14 }
 0xd12   : >> { %v6204_v49 = vmul.f32 %v14106_v8, %v6203_v37  ;;  %v14146_v13 = vand.u32 4294901760, %v6245_v38  ;;  %v6137_v55 = vand.u32 2147483648, %v14025_v18  ;;  %v6180_v7 = vand.u32 2147483647, %v14120_v58 }
 0xd13   : >> { %v6450_v1 = vand.u32 4294901760, %v6449_v41  ;;  %vm6176_vm1 = vweird.f32 %v14120_v58  ;;  %v16678_v41 = vld [vmem:[#allocation97_spill] sm:$0xff]  ;;  %v6468_v18 = vand.u32 4294901760, %v14178_v53  ;;  %vm6136_vm4 = vcmp.eq.f32.partialorder %v6135_v4, 8.507059e+37 }
 0xd14   : >> { %v6205_v35 = vadd.f32 %v14106_v8, %v6204_v49  ;;  %v14173_v2 = vsub.f32 %v6245_v38, %v14146_v13  ;;  %6366 = vmatpush.xpose.msra.mxu2 %v14146_v13  ;;  %v6169_v38 = vsel %vm6166_vm10, %v6168_v25, %v6164_v19  ;;  %v1902_v19 = vadd.f32 %v16678_v41, %v13921_v42 }
 0xd15   : >> { %v14159_v43 = vpop.eup %9205  ;;  %6451 = vmatpush.xpose.msra.mxu3 %v6450_v1  ;;  %6682 = vmatpush.xpose.msrb.mxu0 %v6454_v21  ;;  %v6182_v21 = vand.u32 2147483648, %v14120_v58  ;;  %v6170_v26 = vmul.f32 %v13785_v32, %v6169_v38  ;;  %vm6181_vm3 = vcmp.eq.f32.partialorder %v6180_v7, 8.507059e+37  ;;  %v6478_v32 = vand.u32 4294901760, %v14193_v0  ;;  %v16681_v38 = vld [vmem:[#allocation13_spill] sm:$0xff]  ;;  %v16685_v7 = vld [vmem:[#allocation99_spill] sm:$0xff] }
 0xd16   : >> { %v6209_v33 = vsel %vm14167_vm9, %v14106_v8, %v6205_v35  ;;  %v6172_v16 = vmul.f32 %v14159_v43, %v14120_v58  ;;  %v14185_v60 = vpop.xlane.xlu1 %6083  ;;  %v6460_v8 = vand.u32 4294901760, %v14173_v2  ;;  %6751 = vmatpush.xpose.msrb.mxu1 %v14146_v13  ;;  %vm6177_vm13 = vweird.f32 %v14159_v43 }
 0xd17   : >> { %9207 = vrcp.f32 %v14185_v60  ;;  %v6214_v37 = vsel %vm6211_vm11, %v6213_v62, %v6209_v33  ;;  %vm14222_vm2 = vmor %vm6176_vm1, %vm6177_vm13  ;;  %v6183_v28 = vor.u32 1.1754944e-38, %v6182_v21  ;;  %v6152_v1 = vand.u32 2147483648, %v14185_v60  ;;  %v16683_v21 = vld [vmem:[#allocation26_spill] sm:$0xff] }
 0xd18   : >> { %v6173_v50 = vsub.f32 1.0, %v6172_v16  ;;  %v6215_v46 = vmul.f32 %v13803_v15, %v6214_v37  ;;  %v6461_v52 = vsub.f32 %v14173_v2, %v6460_v8  ;;  %6368 = vmatpush.xpose.msra.mxu2 %v14062_v12  ;;  %v6138_v16 = vor.u32 1.1754944e-38, %v6137_v55 }
 0xd19   : >> { %6457 = vmatpush.xpose.msra.mxu3 %v6456_v31  ;;  %6686 = vmatpush.xpose.msrb.mxu0 %v6460_v8  ;;  %v6134_v31 = vsel %vm14209_vm15, %v14089_v36, %v6130_v54  ;;  %v6150_v54 = vand.u32 2147483647, %v14185_v60  ;;  %v2115_v15 = vadd.f32 %v16685_v7, %v1902_v19  ;;  %vm6146_vm6 = vweird.f32 %v14185_v60 }
 0xd1a   : >> { %v6174_v49 = vmul.f32 %v14159_v43, %v6173_v50  ;;  %v14207_v56 = vand.u32 4294901760, %v6215_v46  ;;  %v6462_v23 = vand.u32 4294901760, %v6461_v52  ;;  %6753 = vmatpush.xpose.msrb.mxu1 %v14062_v12  ;;  %v14250_v50 = vand.u32 4294901760, %v6170_v26  ;;  %v16684_v52 = vld [vmem:[#allocation85_spill] sm:$0xff] }
 0xd1b   : >> { %v6139_v8 = vsel %vm6136_vm4, %v6138_v16, %v6134_v31  ;;  %v1115_v55 = vadd.f32 %v16684_v52, %v16683_v21  ;;  %v6153_v14 = vor.u32 1.1754944e-38, %v6152_v1  ;;  %vm6151_vm8 = vcmp.eq.f32.partialorder %v6150_v54, 8.507059e+37  ;;  %v16687_v16 = vld [vmem:[#allocation65_spill] sm:$0xff]  ;;  %v16690_v21 = vld [vmem:[#allocation52_spill] sm:$0xff] }
 0xd1c   : >> { %v6175_v47 = vadd.f32 %v14159_v43, %v6174_v49  ;;  %v14229_v58 = vsub.f32 %v6215_v46, %v14207_v56  ;;  %6370 = vmatpush.xpose.msra.mxu2 %v14207_v56  ;;  %v14270_v31 = vsub.f32 %v6170_v26, %v14250_v50  ;;  %v16688_v26 = vld [vmem:[#allocation98_spill] sm:$0xff] }
 0xd1d   : >> { %v9208_v35 = vpop.eup %9207  ;;  %6463 = vmatpush.xpose.msra.mxu3 %v6462_v23  ;;  %6690 = vmatpush.xpose.msrb.mxu0 %v6466_v44  ;;  %v16682_v44 = vld [vmem:[#allocation56_spill] sm:$0xff]  ;;  %v6479_v23 = vsub.f32 %v14193_v0, %v6478_v32 }
 0xd1e   : >> { %v6179_v42 = vsel %vm14222_vm2, %v14159_v43, %v6175_v47  ;;  %v6142_v33 = vmul.f32 %v9208_v35, %v14185_v60  ;;  %v14239_v62 = vpop.xlane.xlu1 %6079  ;;  %v6472_v36 = vand.u32 4294901760, %v14229_v58  ;;  %6755 = vmatpush.xpose.msrb.mxu1 %v14207_v56  ;;  %vm6147_vm5 = vweird.f32 %v9208_v35  ;;  %v16686_v60 = vld [vmem:[#allocation27_spill] sm:$0xff] }
 0xd1f   : >> { %9209 = vrcp.f32 %v14239_v62  ;;  %v6184_v43 = vsel %vm6181_vm3, %v6183_v28, %v6179_v42  ;;  %v1071_v49 = vadd.f32 %v16682_v44, %v16681_v38  ;;  %vm6148_vm7 = vmor %vm6146_vm6, %vm6147_vm5  ;;  %v6140_v42 = vmul.f32 %v13798_v5, %v6139_v8 }
 0xd20   : >> { %v6143_v53 = vsub.f32 1.0, %v6142_v33  ;;  %v6185_v25 = vmul.f32 %v13807_v34, %v6184_v43  ;;  %v6473_v46 = vsub.f32 %v14229_v58, %v6472_v36  ;;  %6372 = vmatpush.xpose.msra.mxu2 %v14157_v6  ;;  %v6480_v5 = vand.u32 4294901760, %v6479_v23 }
 0xd21   : >> { %6469 = vmatpush.xpose.msra.mxu3 %v6468_v18  ;;  %6694 = vmatpush.xpose.msrb.mxu0 %v6472_v36  ;;  %v1673_v18 = vadd.f32 %v16686_v60, %v13918_v59  ;;  %v14277_v36 = vand.u32 4294901760, %v2115_v15  ;;  %v6490_v54 = vand.u32 4294901760, %v14270_v31  ;;  %v6120_v44 = vand.u32 2147483647, %v14239_v62 }
 0xd22   : >> { %v6144_v37 = vmul.f32 %v9208_v35, %v6143_v53  ;;  %v14260_v34 = vand.u32 4294901760, %v6185_v25  ;;  %v6474_v47 = vand.u32 4294901760, %v6473_v46  ;;  %6757 = vmatpush.xpose.msrb.mxu1 %v14157_v6  ;;  %v1320_v53 = vadd.f32 %v16687_v16, %v1071_v49  ;;  %v16694_v16 = vld [vmem:[#allocation18_spill] sm:$0xff] }
 0xd23   : >> { %v14287_v46 = vand.u32 4294901760, %v6140_v42  ;;  %v14298_v23 = vsub.f32 %v2115_v15, %v14277_v36  ;;  %vm6116_vm10 = vweird.f32 %v14239_v62  ;;  %v6491_v15 = vsub.f32 %v14270_v31, %v6490_v54 }
 0xd24   : >> { %v6145_v4 = vadd.f32 %v9208_v35, %v6144_v37  ;;  %v14267_v19 = vsub.f32 %v6185_v25, %v14260_v34  ;;  %6374 = vmatpush.xpose.msra.mxu2 %v14260_v34  ;;  %v1906_v25 = vadd.f32 %v16688_v26, %v1673_v18  ;;  %vm6121_vm12 = vcmp.eq.f32.partialorder %v6120_v44, 8.507059e+37  ;;  %v16695_v26 = vld [vmem:[#allocation29_spill] sm:$0xff] }
 0xd25   : >> { %v9210_v41 = vpop.eup %9209  ;;  %6475 = vmatpush.xpose.msra.mxu3 %v6474_v47  ;;  %6698 = vmatpush.xpose.msrb.mxu0 %v6478_v32  ;;  %v16689_v32 = vld [vmem:[#allocation50_spill] sm:$0xff] }
 0xd26   : >> { %v6149_v28 = vsel %vm6148_vm7, %v9208_v35, %v6145_v4  ;;  %v6112_v33 = vmul.f32 %v9210_v41, %v14239_v62  ;;  %v6484_v43 = vand.u32 4294901760, %v14267_v19  ;;  %v6122_v35 = vand.u32 2147483648, %v14239_v62  ;;  %6759 = vmatpush.xpose.msrb.mxu1 %v14260_v34  ;;  %v16692_v4 = vld [vmem:[#allocation112_spill] sm:$0xff] }
 0xd27   : >> { %v6154_v1 = vsel %vm6151_vm8, %v6153_v14, %v6149_v28  ;;  %vm6117_vm9 = vweird.f32 %v9210_v41  ;;  %v1063_v52 = vadd.f32 %v16690_v21, %v16689_v32  ;;  %v1375_v47 = vadd.f32 %v16692_v4, %v1115_v55  ;;  %v16693_v28 = vld [vmem:[#allocation95_spill] sm:$0xff]  ;;  %v16700_v21 = vld [vmem:[#allocation54_spill] sm:$0xff] }
 0xd28   : >> { %v6113_v37 = vsub.f32 1.0, %v6112_v33  ;;  %v6155_v59 = vmul.f32 %v13811_v29, %v6154_v1  ;;  %v6485_v8 = vsub.f32 %v14267_v19, %v6484_v43  ;;  %v16691_v29 = vld [vmem:[#allocation64_spill] sm:$0xff]  ;;  %6376 = vmatpush.xpose.msra.mxu2 %v14250_v50  ;;  %v1613_v33 = vadd.f32 %v16693_v28, %v1320_v53  ;;  %vm6118_vm11 = vmor %vm6116_vm10, %vm6117_vm9  ;;  %v16701_v4 = vld [vmem:[#allocation94_spill] sm:$0xff] }
 0xd29   : >> { %v1315_v7 = vadd.f32 %v16691_v29, %v13904_v39  ;;  %6481 = vmatpush.xpose.msra.mxu3 %v6480_v5  ;;  %6702 = vmatpush.xpose.msrb.mxu0 %v6484_v43  ;;  %v2119_v39 = vadd.f32 %v16694_v16, %v1906_v25  ;;  %v6123_v55 = vor.u32 1.1754944e-38, %v6122_v35  ;;  %v14312_v43 = vsub.f32 %v6140_v42, %v14287_v46  ;;  %v16697_v53 = vld [vmem:[#allocation60_spill] sm:$0xff]  ;;  %v16698_v25 = vld [vmem:[#allocation30_spill] sm:$0xff] }
 0xd2a   : >> { %v6114_v38 = vmul.f32 %v9210_v41, %v6113_v37  ;;  %v14290_v49 = vand.u32 4294901760, %v6155_v59  ;;  %v6486_v60 = vand.u32 4294901760, %v6485_v8  ;;  %6761 = vmatpush.xpose.msrb.mxu1 %v14250_v50  ;;  %v16696_v37 = vld [vmem:[#allocation86_spill] sm:$0xff]  ;;  %v1679_v8 = vadd.f32 %v16698_v25, %v1375_v47  ;;  %v16702_v47 = vld [vmem:[#allocation17_spill] sm:$0xff] }
 0xd2b   : >> { %v1119_v5 = vadd.f32 %v16696_v37, %v16695_v26  ;;  %v1305_v29 = vadd.f32 %v16700_v21, %v13843_v11  ;;  %v16705_v26 = vld [vmem:[#allocation31_spill] sm:$0xff]  ;;  %v16706_v11 = vld [vmem:[#allocation96_spill] sm:$0xff]  ;;  %v16709_v21 = vld [vmem:[#allocation102_spill] sm:$0xff] }
 0xd2c   : >> { %v6115_v14 = vadd.f32 %v9210_v41, %v6114_v38  ;;  %v14303_v18 = vsub.f32 %v6155_v59, %v14290_v49  ;;  %v1310_v59 = vadd.f32 %v16697_v53, %v1063_v52  ;;  %6378 = vmatpush.xpose.msra.mxu2 %v14290_v49  ;;  %v16699_v38 = vld [vmem:[#allocation35_spill] sm:$0xff]  ;;  %v1607_v52 = vadd.f32 %v16701_v4, %v1315_v7 }
 0xd2d   : >> { %v1866_v32 = vadd.f32 %v16699_v38, %v1613_v33  ;;  %6487 = vmatpush.xpose.msra.mxu3 %v6486_v60  ;;  %6706 = vmatpush.xpose.msrb.mxu0 %v6490_v54  ;;  %v1910_v28 = vadd.f32 %v16702_v47, %v1679_v8  ;;  %v6492_v33 = vand.u32 4294901760, %v6491_v15  ;;  %v6502_v54 = vand.u32 4294901760, %v14312_v43  ;;  %v16703_v60 = vld [vmem:[#allocation114_spill] sm:$0xff] }
 0xd2e   : >> { %v6119_v1 = vsel %vm6118_vm11, %v9210_v41, %v6115_v14  ;;  %v6496_v62 = vand.u32 4294901760, %v14303_v18  ;;  %v6385_v41 = vand.u32 4294901760, %v14298_v23  ;;  %v14326_v14 = vand.u32 4294901760, %v2119_v39  ;;  %6763 = vmatpush.xpose.msrb.mxu1 %v14290_v49  ;;  %v16707_v8 = vld [vmem:[#allocation90_spill] sm:$0xff] }
 0xd2f   : >> { %v6124_v35 = vsel %vm6121_vm12, %v6123_v55, %v6119_v1  ;;  %v16704_v55 = vld [vmem:[#allocation57_spill] sm:$0xff]  ;;  %v1862_v37 = vadd.f32 %v16705_v26, %v1607_v52  ;;  %v2079_v7 = vadd.f32 %v16706_v11, %v1866_v32  ;;  %v2123_v4 = vadd.f32 %v16709_v21, %v1910_v28  ;;  %v16711_v47 = vld [vmem:[#allocation14_spill] sm:$0xff]  ;;  %v16714_v11 = vld [vmem:[#allocation100_spill] sm:$0xff] }
 0xd30   : >> { %v6125_v44 = vmul.f32 %v13814_v17, %v6124_v35  ;;  %v6497_v42 = vsub.f32 %v14303_v18, %v6496_v62  ;;  %v1380_v17 = vadd.f32 %v16703_v60, %v1119_v5  ;;  %v1601_v1 = vadd.f32 %v16704_v55, %v1310_v59  ;;  %6380 = vmatpush.xpose.msra.mxu2 %v14287_v46  ;;  %v16708_v35 = vld [vmem:[#allocation125_spill] sm:$0xff]  ;;  %v16713_v55 = vld [vmem:[#allocation63_spill] sm:$0xff]  ;;  %v16716_v21 = vld [vmem:[#allocation130_spill] sm:$0xff] }
 0xd31   : >> { %v6386_v53 = vsub.f32 %v14298_v23, %v6385_v41  ;;  %6493 = vmatpush.xpose.msra.mxu3 %v6492_v33  ;;  %6710 = vmatpush.xpose.msrb.mxu0 %v6496_v62  ;;  %v1595_v5 = vadd.f32 %v16707_v8, %v1305_v29  ;;  %v14347_v38 = vsub.f32 %v2119_v39, %v14326_v14  ;;  %v16710_v62 = vld [vmem:[#allocation126_spill] sm:$0xff]  ;;  %v16712_v33 = vld [vmem:[#allocation113_spill] sm:$0xff]  ;;  %v14357_v29 = vand.u32 4294901760, %v2079_v7 }
 0xd32   : >> { %v14330_v16 = vand.u32 4294901760, %v6125_v44  ;;  %v6498_v15 = vand.u32 4294901760, %v6497_v42  ;;  %v1858_v59 = vadd.f32 %v16708_v35, %v1601_v1  ;;  %6765 = vmatpush.xpose.msrb.mxu1 %v14287_v46  ;;  %v6503_v32 = vsub.f32 %v14312_v43, %v6502_v54 }
 0xd33   : >> { %v1854_v42 = vadd.f32 %v16710_v62, %v1595_v5  ;;  %v1685_v60 = vadd.f32 %v16712_v33, %v1380_v17  ;;  %v6387_v39 = vand.u32 4294901760, %v6386_v53  ;;  %v6399_v26 = vand.u32 4294901760, %v2123_v4  ;;  %v16715_v53 = vld [vmem:[#allocation62_spill] sm:$0xff] }
 0xd34   : >> { %v14342_v25 = vsub.f32 %v6125_v44, %v14330_v16  ;;  %v2075_v44 = vadd.f32 %v16711_v47, %v1862_v37  ;;  %6382 = vmatpush.xpose.msra.mxu2 %v14330_v16  ;;  %v2071_v1 = vadd.f32 %v16713_v55, %v1858_v59  ;;  %v6393_v17 = vand.u32 4294901760, %v14347_v38 }
 0xd35   : >> { %6499 = vmatpush.xpose.msra.mxu3 %v6498_v15  ;;  %6714 = vmatpush.xpose.msrb.mxu0 %v6502_v54  ;;  %v1914_v8 = vadd.f32 %v16714_v11, %v1685_v60  ;;  %v6504_v37 = vand.u32 4294901760, %v6503_v32  ;;  %v2067_v15 = vadd.f32 %v16715_v53, %v1854_v42  ;;  %v14370_v5 = vsub.f32 %v2079_v7, %v14357_v29 }
 0xd36   : >> { %v6508_v52 = vand.u32 4294901760, %v14342_v25  ;;  %6767 = vmatpush.xpose.msrb.mxu1 %v14330_v16  ;;  %v14367_v54 = vand.u32 4294901760, %v2075_v44  ;;  %v14373_v59 = vand.u32 4294901760, %v2071_v1  ;;  %v6394_v32 = vsub.f32 %v14347_v38, %v6393_v17 }
 0xd37   : >> { %6388 = vmatmul.f32.vlgmr.msra.gmra.mxu2 %v6387_v39  ;;  %v2127_v62 = vadd.f32 %v16716_v21, %v1914_v8  ;;  %v14384_v7 = vand.u32 4294901760, %v2067_v15 }
 0xd38   : >> { %v6509_v28 = vsub.f32 %v14342_v25, %v6508_v52  ;;  %6531 = vmatpush.xpose.msrb.mxu2 %v13952_v63  ;;  %v14375_v63 = vsub.f32 %v2123_v4, %v6399_v26  ;;  %v14388_v4 = vsub.f32 %v2075_v44, %v14367_v54 }
 0xd39   : >> { %6769 = vmatmul.f32.vlgmr.msrb.gmra.mxu1 %v14277_v36  ;;  %6505 = vmatpush.xpose.msra.mxu3 %v6504_v37  ;;  %v6407_v42 = vand.u32 4294901760, %v2127_v62  ;;  %v14401_v44 = vsub.f32 %v2067_v15, %v14384_v7 }
 0xd3a   : >> { %7249 = vmatpush.msra.mxu1 %v14357_v29  ;;  %v6510_v35 = vand.u32 4294901760, %v6509_v28  ;;  %6718 = vmatpush.xpose.msrb.mxu0 %v6508_v52  ;;  %v14394_v52 = vsub.f32 %v2071_v1, %v14373_v59  ;;  %v6401_v47 = vand.u32 4294901760, %v14375_v63 }
 0xd3b   : >> { %v14405_v33 = vsub.f32 %v2127_v62, %v6407_v42 }
 0xd3c   : >> { %7251 = vmatpush.msra.mxu1 %v14367_v54  ;;  %6534 = vmatpush.xpose.msrb.mxu2 %v13939_v3  ;;  %v6395_v3 = vand.u32 4294901760, %v6394_v32 }
 0xd3d   : >> { %6720 = vmatmul.f32.vlgmr.msrb.gmra.mxu0 %v14277_v36  ;;  %6511 = vmatpush.xpose.msra.mxu3 %v6510_v35  ;;  %v6409_v60 = vand.u32 4294901760, %v14405_v33 }
 0xd3e   : >> { %7145 = vmatpush.msra.mxu0 %v14370_v5  ;;  %7253 = vmatpush.msra.mxu1 %v14373_v59 }
 0xd3f   : >> { %6396 = vmatmul.f32.gmra.mxu2 %v6395_v3 }
 0xd40   : >> { %7148 = vmatpush.msra.mxu0 %v14388_v4  ;;  %7255 = vmatpush.msra.mxu1 %v14384_v7 }
 0xd41   : >> { %6537 = vmatpush.xpose.msrb.mxu2 %v14013_v27  ;;  %6599 = vmatpush.xpose.msrb.mxu3 %v13930_v20  ;;  %v6402_v27 = vsub.f32 %v14375_v63, %v6401_v47 }
 0xd42   : >> { %7151 = vmatpush.msra.mxu0 %v14394_v52  ;;  %6513 = vmatmul.f32.vlgmr.msra.gmra.mxu3 %v14277_v36  ;;  %v6410_v36 = vsub.f32 %v14405_v33, %v6409_v60 }
 0xd43   : >> { %6773 = vmatmul.f32.gmra.mxu1 %v14326_v14  ;;  %v6403_v20 = vand.u32 4294901760, %v6402_v27 }
 0xd44   : >> { %7154 = vmatpush.msra.mxu0 %v14401_v44 }
 0xd45   : >> { %6540 = vmatpush.xpose.msrb.mxu2 %v14079_v10  ;;  %6601 = vmatpush.xpose.msrb.mxu3 %v13910_v48  ;;  %v6411_v48 = vand.u32 4294901760, %v6410_v36 }
 0xd46   : >> { %6724 = vmatmul.f32.gmra.mxu0 %v14326_v14 }
 0xd47   : >> { %6404 = vmatmul.f32.gmra.mxu2 %v6403_v20 }
 0xd49   : >> { %6543 = vmatpush.xpose.msrb.mxu2 %v13984_v45  ;;  %6603 = vmatpush.xpose.msrb.mxu3 %v13992_v61  ;;  %v7044_v61 = vand.u32 4294901760, %v14370_v5 }
 0xd4a   : >> { %6517 = vmatmul.f32.gmra.mxu3 %v14326_v14 }
 0xd4b   : >> { %6777 = vmatmul.f32.gmra.mxu1 %v6399_v26 }
 0xd4d   : >> { %6546 = vmatpush.xpose.msrb.mxu2 %v14132_v9  ;;  %6605 = vmatpush.xpose.msrb.mxu3 %v14049_v24  ;;  %v7050_v24 = vand.u32 4294901760, %v14388_v4 }
 0xd4e   : >> { %6728 = vmatmul.f32.gmra.mxu0 %v6399_v26 }
 0xd4f   : >> { %6412 = vmatmul.f32.gmra.mxu2 %v6411_v48 }
 0xd51   : >> { %6549 = vmatpush.xpose.msrb.mxu2 %v13995_v57  ;;  %6607 = vmatpush.xpose.msrb.mxu3 %v13941_v51  ;;  %v6817_v51 = vpop.trf.xlu2 }
 0xd52   : >> { %6521 = vmatmul.f32.gmra.mxu3 %v6399_v26 }
 0xd53   : >> { %6781 = vmatmul.f32.gmra.mxu1 %v6407_v42 }
 0xd55   : >> { %6552 = vmatpush.xpose.msrb.mxu2 %v14173_v2  ;;  %6609 = vmatpush.xpose.msrb.mxu3 %v14111_v22 }
 0xd56   : >> { %6732 = vmatmul.f32.gmra.mxu0 %v6407_v42 }
 0xd59   : >> { %6555 = vmatpush.xpose.msrb.mxu2 %v14095_v30  ;;  %6611 = vmatpush.xpose.msrb.mxu3 %v13966_v40  ;;  %v6834_v40 = vsel %vm358_vm0, %v6817_v51, 0  ;;  %v7056_v30 = vand.u32 4294901760, %v14394_v52  ;;  %v6818_v22 = vpop.trf.xlu2 }
 0xd5a   : >> { %6525 = vmatmul.f32.gmra.mxu3 %v6407_v42  ;;  %v14442_v45 = vand.u32 4294901760, %v6834_v40  ;;  %v6837_v9 = vsel %vm358_vm0, %v6818_v22, 0 }
 0xd5b   : >> { %v14459_v2 = vand.u32 4294901760, %v6837_v9 }
 0xd5c   : >> { %v6902_v57 = vsub.f32 %v6834_v40, %v14442_v45 }
 0xd5d   : >> { %6558 = vmatpush.xpose.msrb.mxu2 %v14229_v58  ;;  %6613 = vmatpush.xpose.msrb.mxu3 %v14146_v13  ;;  %v7051_v13 = vsub.f32 %v14388_v4, %v7050_v24  ;;  %v6910_v58 = vsub.f32 %v6837_v9, %v14459_v2 }
 0xd5e   : >> { %7157 = vmatmul.f32.vlgmr.msra.gmra.mxu0 %v6902_v57  ;;  %v6903_v10 = vand.u32 4294901760, %v6902_v57 }
 0xd60   : >> { %7259 = vmatmul.f32.vlgmr.msra.gmra.mxu1 %v6903_v10 }
 0xd61   : >> { %6561 = vmatpush.xpose.msrb.mxu2 %v14193_v0  ;;  %6615 = vmatpush.xpose.msrb.mxu3 %v14062_v12  ;;  %v7045_v12 = vsub.f32 %v14370_v5, %v7044_v61 }
 0xd63   : >> { %v7046_v0 = vand.u32 4294901760, %v7045_v12 }
 0xd65   : >> { %6564 = vmatpush.xpose.msrb.mxu2 %v14267_v19  ;;  %6617 = vmatpush.xpose.msrb.mxu3 %v14207_v56  ;;  %v7057_v56 = vsub.f32 %v14394_v52, %v7056_v30  ;;  %v6911_v19 = vand.u32 4294901760, %v6910_v58 }
 0xd66   : >> { %7162 = vmatmul.f32.gmra.mxu0 %v6910_v58 }
 0xd68   : >> { %7265 = vmatmul.f32.gmra.mxu1 %v6911_v19 }
 0xd69   : >> { %6567 = vmatpush.xpose.msrb.mxu2 %v14270_v31  ;;  %6619 = vmatpush.xpose.msrb.mxu3 %v14157_v6  ;;  %v7062_v6 = vand.u32 4294901760, %v14401_v44  ;;  %v7058_v31 = vand.u32 4294901760, %v7057_v56 }
 0xd6d   : >> { %6570 = vmatpush.xpose.msrb.mxu2 %v14303_v18  ;;  %6621 = vmatpush.xpose.msrb.mxu3 %v14260_v34  ;;  %v7063_v34 = vsub.f32 %v14401_v44, %v7062_v6 }
 0xd6f   : >> { %v7064_v18 = vand.u32 4294901760, %v7063_v34 }
 0xd71   : >> { %6573 = vmatpush.xpose.msrb.mxu2 %v14312_v43  ;;  %6623 = vmatpush.xpose.msrb.mxu3 %v14250_v50  ;;  %v7052_v50 = vand.u32 4294901760, %v7051_v13 }
 0xd75   : >> { %6576 = vmatpush.xpose.msrb.mxu2 %v14342_v25  ;;  %6625 = vmatpush.xpose.msrb.mxu3 %v14290_v49 }
 0xd78   : >> { %6579 = vmatmul.f32.vlgmr.msrb.gmra.mxu2 %v14298_v23 }
 0xd79   : >> { %6894 = vmatpush.msra.mxu2 %v14357_v29  ;;  %6627 = vmatpush.xpose.msrb.mxu3 %v14287_v46  ;;  %v6819_v46 = vpop.trf.xlu2 }
 0xd7a   : >> { %v6840_v49 = vsel %vm358_vm0, %v6819_v46, 0 }
 0xd7b   : >> { %6896 = vmatpush.msra.mxu2 %v14367_v54  ;;  %v14470_v43 = vand.u32 4294901760, %v6840_v49 }
 0xd7d   : >> { %6898 = vmatpush.msra.mxu2 %v14373_v59  ;;  %6629 = vmatpush.xpose.msrb.mxu3 %v14330_v16  ;;  %v6918_v14 = vsub.f32 %v6840_v49, %v14470_v43 }
 0xd7f   : >> { %6900 = vmatpush.msra.mxu2 %v14384_v7  ;;  %7167 = vmatmul.f32.gmra.mxu0 %v6918_v14  ;;  %v6919_v23 = vand.u32 4294901760, %v6918_v14 }
 0xd80   : >> { %6633 = vmatmul.f32.vlgmr.msrb.gmra.mxu3 %v6385_v41  ;;  %6584 = vmatmul.f32.gmra.mxu2 %v14347_v38  ;;  %v6904_v38 = vsub.f32 %v6902_v57, %v6903_v10 }
 0xd81   : >> { %7368 = vmatpush.msrb.mxu2 %v7044_v61  ;;  %7047 = vmatpush.msra.mxu3 %v7046_v0  ;;  %v6820_v41 = vpop.trf.xlu2 }
 0xd82   : >> { %v6843_v16 = vsel %vm358_vm0, %v6820_v41, 0  ;;  %7271 = vmatmul.f32.gmra.mxu1 %v6919_v23  ;;  %v6905_v26 = vand.u32 4294901760, %v6904_v38 }
 0xd83   : >> { %7372 = vmatpush.msrb.mxu2 %v7050_v24  ;;  %7053 = vmatpush.msra.mxu3 %v7052_v50  ;;  %v14480_v25 = vand.u32 4294901760, %v6843_v16 }
 0xd85   : >> { %7376 = vmatpush.msrb.mxu2 %v7056_v30  ;;  %7059 = vmatpush.msra.mxu3 %v7058_v31 }
 0xd87   : >> { %7380 = vmatpush.msrb.mxu2 %v7062_v6  ;;  %7065 = vmatpush.msra.mxu3 %v7064_v18 }
 0xd88   : >> { %6589 = vmatmul.f32.gmra.mxu2 %v14375_v63  ;;  %6639 = vmatmul.f32.gmra.mxu3 %v6393_v17  ;;  %v6912_v17 = vsub.f32 %v6910_v58, %v6911_v19 }
 0xd89   : >> { %7459 = vmatpush.msrb.mxu3 %v14357_v29  ;;  %v6926_v29 = vsub.f32 %v6843_v16, %v14480_v25  ;;  %v6821_v28 = vpop.trf.xlu2 }
 0xd8a   : >> { %v6846_v55 = vsel %vm358_vm0, %v6821_v28, 0 }
 0xd8b   : >> { %7461 = vmatpush.msrb.mxu3 %v14367_v54  ;;  %7172 = vmatmul.f32.gmra.mxu0 %v6926_v29  ;;  %v6927_v39 = vand.u32 4294901760, %v6926_v29  ;;  %v14488_v1 = vand.u32 4294901760, %v6846_v55  ;;  %v6913_v54 = vand.u32 4294901760, %v6912_v17 }
 0xd8d   : >> { %7463 = vmatpush.msrb.mxu3 %v14373_v59  ;;  %7277 = vmatmul.f32.gmra.mxu1 %v6927_v39  ;;  %v6934_v11 = vsub.f32 %v6846_v55, %v14488_v1  ;;  %v6920_v59 = vsub.f32 %v6918_v14, %v6919_v23  ;;  %v6928_v42 = vsub.f32 %v6926_v29, %v6927_v39 }
 0xd8f   : >> { %7465 = vmatpush.msrb.mxu3 %v14384_v7  ;;  %v6935_v8 = vand.u32 4294901760, %v6934_v11  ;;  %v6921_v32 = vand.u32 4294901760, %v6920_v59  ;;  %v6929_v44 = vand.u32 4294901760, %v6928_v42 }
 0xd90   : >> { %6594 = vmatmul.f32.gmra.mxu2 %v14405_v33  ;;  %6645 = vmatmul.f32.gmra.mxu3 %v6401_v47 }
 0xd91   : >> { %v6822_v37 = vpop.trf.xlu2  ;;  %v6936_v20 = vsub.f32 %v6934_v11, %v6935_v8 }
 0xd92   : >> { %v6849_v53 = vsel %vm358_vm0, %v6822_v37, 0 }
 0xd93   : >> { %7177 = vmatmul.f32.gmra.mxu0 %v6934_v11  ;;  %v14494_v15 = vand.u32 4294901760, %v6849_v53  ;;  %v6937_v51 = vand.u32 4294901760, %v6936_v20 }
 0xd95   : >> { %7283 = vmatmul.f32.gmra.mxu1 %v6935_v8  ;;  %v6942_v5 = vsub.f32 %v6849_v53, %v14494_v15 }
 0xd97   : >> { %v6943_v35 = vand.u32 4294901760, %v6942_v5 }
 0xd98   : >> { %6651 = vmatmul.f32.gmra.mxu3 %v6409_v60  ;;  %6906 = vmatmul.f32.vlgmr.msra.gmra.mxu2 %v6905_v26 }
 0xd99   : >> { %v6823_v63 = vpop.trf.xlu2  ;;  %v6944_v57 = vsub.f32 %v6942_v5, %v6943_v35 }
 0xd9a   : >> { %v6852_v21 = vsel %vm358_vm0, %v6823_v63, 0 }
 0xd9b   : >> { %7182 = vmatmul.f32.gmra.mxu0 %v6942_v5  ;;  %v14499_v62 = vand.u32 4294901760, %v6852_v21  ;;  %v6945_v30 = vand.u32 4294901760, %v6944_v57 }
 0xd9d   : >> { %7289 = vmatmul.f32.gmra.mxu1 %v6943_v35  ;;  %v6950_v7 = vsub.f32 %v6852_v21, %v14499_v62 }
 0xd9f   : >> { %v6951_v4 = vand.u32 4294901760, %v6950_v7 }
 0xda0   : >> { %7067 = vmatmul.f32.vlgmr.msra.gmra.mxu3 %v14442_v45  ;;  %6914 = vmatmul.f32.gmra.mxu2 %v6913_v54 }
 0xda1   : >> { %v6824_v52 = vpop.trf.xlu2  ;;  %v6952_v13 = vsub.f32 %v6950_v7, %v6951_v4 }
 0xda2   : >> { %v6855_v3 = vsel %vm358_vm0, %v6824_v52, 0 }
 0xda3   : >> { %7187 = vmatmul.f32.gmra.mxu0 %v6950_v7  ;;  %v14504_v47 = vand.u32 4294901760, %v6855_v3  ;;  %v6953_v58 = vand.u32 4294901760, %v6952_v13 }
 0xda5   : >> { %7295 = vmatmul.f32.gmra.mxu1 %v6951_v4  ;;  %v6958_v33 = vsub.f32 %v6855_v3, %v14504_v47 }
 0xda7   : >> { %v6959_v27 = vand.u32 4294901760, %v6958_v33 }
 0xda8   : >> { %7071 = vmatmul.f32.gmra.mxu3 %v14459_v2  ;;  %6922 = vmatmul.f32.gmra.mxu2 %v6921_v32 }
 0xda9   : >> { %v6825_v60 = vpop.trf.xlu2  ;;  %v6960_v19 = vsub.f32 %v6958_v33, %v6959_v27 }
 0xdaa   : >> { %v6858_v36 = vsel %vm358_vm0, %v6825_v60, 0 }
 0xdab   : >> { %7192 = vmatmul.f32.gmra.mxu0 %v6958_v33  ;;  %v14509_v48 = vand.u32 4294901760, %v6858_v36  ;;  %v6961_v18 = vand.u32 4294901760, %v6960_v19 }
 0xdad   : >> { %7301 = vmatmul.f32.gmra.mxu1 %v6959_v27  ;;  %v6966_v40 = vsub.f32 %v6858_v36, %v14509_v48 }
 0xdaf   : >> { %v6967_v61 = vand.u32 4294901760, %v6966_v40 }
 0xdb0   : >> { %7075 = vmatmul.f32.gmra.mxu3 %v14470_v43  ;;  %6930 = vmatmul.f32.gmra.mxu2 %v6929_v44 }
 0xdb1   : >> { %v6826_v24 = vpop.trf.xlu2  ;;  %v6968_v41 = vsub.f32 %v6966_v40, %v6967_v61 }
 0xdb2   : >> { %v6861_v12 = vsel %vm358_vm0, %v6826_v24, 0 }
 0xdb3   : >> { %7197 = vmatmul.f32.gmra.mxu0 %v6966_v40  ;;  %v14514_v10 = vand.u32 4294901760, %v6861_v12  ;;  %v6969_v28 = vand.u32 4294901760, %v6968_v41 }
 0xdb5   : >> { %7307 = vmatmul.f32.gmra.mxu1 %v6967_v61  ;;  %v6974_v22 = vsub.f32 %v6861_v12, %v14514_v10 }
 0xdb6   : >> { %v14549_v61 = vpop.f32.mrf.mxu1 }
 0xdb7   : >> { %v6975_v9 = vand.u32 4294901760, %v6974_v22  ;;  %16718 = vst [vmem:[#allocation68_spill] sm:$0xff] %v14549_v61 }
 0xdb8   : >> { %7079 = vmatmul.f32.gmra.mxu3 %v14480_v25  ;;  %6938 = vmatmul.f32.gmra.mxu2 %v6937_v51 }
 0xdb9   : >> { %v6827_v6 = vpop.trf.xlu2  ;;  %v6976_v11 = vsub.f32 %v6974_v22, %v6975_v9 }
 0xdba   : >> { %v6864_v0 = vsel %vm358_vm0, %v6827_v6, 0  ;;  %v6389_v38 = vpop.f32.mrf.mxu2  ;;  %v14547_v40 = vpop.f32.mrf.mxu0 }
 0xdbb   : >> { %7202 = vmatmul.f32.gmra.mxu0 %v6974_v22  ;;  %v14519_v56 = vand.u32 4294901760, %v6864_v0  ;;  %v6977_v54 = vand.u32 4294901760, %v6976_v11  ;;  %16717 = vst [vmem:[#allocation80_spill] sm:$0xff] %v14547_v40 }
 0xdbd   : >> { %7313 = vmatmul.f32.gmra.mxu1 %v6975_v9  ;;  %v6982_v50 = vsub.f32 %v6864_v0, %v14519_v56 }
 0xdbf   : >> { %v6983_v34 = vand.u32 4294901760, %v6982_v50 }
 0xdc0   : >> { %7083 = vmatmul.f32.gmra.mxu3 %v14488_v1  ;;  %6946 = vmatmul.f32.gmra.mxu2 %v6945_v30  ;;  %v14555_v6 = vpop.f32.mrf.mxu1 }
 0xdc1   : >> { %v6828_v31 = vpop.trf.xlu2  ;;  %v6984_v63 = vsub.f32 %v6982_v50, %v6983_v34  ;;  %16719 = vst [vmem:[#allocation107_spill] sm:$0xff] %v14555_v6 }
 0xdc2   : >> { %v6867_v46 = vsel %vm358_vm0, %v6828_v31, 0  ;;  %v6397_v35 = vpop.f32.mrf.mxu2 }
 0xdc3   : >> { %7207 = vmatmul.f32.gmra.mxu0 %v6982_v50  ;;  %v14524_v49 = vand.u32 4294901760, %v6867_v46  ;;  %v6985_v4 = vand.u32 4294901760, %v6984_v63  ;;  %v14552_v9 = vpop.f32.mrf.mxu0 }
 0xdc5   : >> { %7319 = vmatmul.f32.gmra.mxu1 %v6983_v34  ;;  %v6990_v14 = vsub.f32 %v6867_v46, %v14524_v49  ;;  %v6514_v53 = vpop.f32.mrf.mxu3 }
 0xdc6   : >> { %v6515_v34 = vadd.f32 %v6514_v53, %v6389_v38 }
 0xdc7   : >> { %v6991_v23 = vand.u32 4294901760, %v6990_v14 }
 0xdc8   : >> { %7087 = vmatmul.f32.gmra.mxu3 %v14494_v15  ;;  %6954 = vmatmul.f32.gmra.mxu2 %v6953_v58  ;;  %v14562_v41 = vpop.f32.mrf.mxu1 }
 0xdc9   : >> { %v6829_v16 = vpop.trf.xlu2  ;;  %v6992_v33 = vsub.f32 %v6990_v14, %v6991_v23  ;;  %16720 = vst [vmem:[#allocation66_spill] sm:$0xff] %v14562_v41 }
 0xdca   : >> { %v6870_v29 = vsel %vm358_vm0, %v6829_v16, 0  ;;  %v6405_v44 = vpop.f32.mrf.mxu2 }
 0xdcb   : >> { %7212 = vmatmul.f32.gmra.mxu0 %v6990_v14  ;;  %v14529_v39 = vand.u32 4294901760, %v6870_v29  ;;  %v6993_v36 = vand.u32 4294901760, %v6992_v33  ;;  %v14558_v46 = vpop.f32.mrf.mxu0 }
 0xdcd   : >> { %7325 = vmatmul.f32.gmra.mxu1 %v6991_v23  ;;  %v6998_v55 = vsub.f32 %v6870_v29, %v14529_v39  ;;  %v6518_v52 = vpop.f32.mrf.mxu3 }
 0xdce   : >> { %v6519_v29 = vadd.f32 %v6518_v52, %v6397_v35 }
 0xdcf   : >> { %v6999_v26 = vand.u32 4294901760, %v6998_v55 }
 0xdd0   : >> { %7091 = vmatmul.f32.gmra.mxu3 %v14499_v62  ;;  %6962 = vmatmul.f32.gmra.mxu2 %v6961_v18  ;;  %v14569_v53 = vpop.f32.mrf.mxu1 }
 0xdd1   : >> { %v6830_v8 = vpop.trf.xlu2  ;;  %v7000_v12 = vsub.f32 %v6998_v55, %v6999_v26 }
 0xdd2   : >> { %v6873_v17 = vsel %vm358_vm0, %v6830_v8, 0  ;;  %v6413_v30 = vpop.f32.mrf.mxu2 }
 0xdd3   : >> { %7217 = vmatmul.f32.gmra.mxu0 %v6998_v55  ;;  %v14534_v37 = vand.u32 4294901760, %v6873_v17  ;;  %v7001_v22 = vand.u32 4294901760, %v7000_v12  ;;  %v14565_v11 = vpop.f32.mrf.mxu0 }
 0xdd5   : >> { %7331 = vmatmul.f32.gmra.mxu1 %v6999_v26  ;;  %v7006_v5 = vsub.f32 %v6873_v17, %v14534_v37  ;;  %v6522_v24 = vpop.f32.mrf.mxu3 }
 0xdd7   : >> { %v7007_v59 = vand.u32 4294901760, %v7006_v5 }
 0xdd8   : >> { %7095 = vmatmul.f32.gmra.mxu3 %v14504_v47  ;;  %6970 = vmatmul.f32.gmra.mxu2 %v6969_v28 }
 0xdd9   : >> { %v6831_v21 = vpop.trf.xlu2  ;;  %v7008_v13 = vsub.f32 %v7006_v5, %v7007_v59 }
 0xdda   : >> { %v6876_v32 = vsel %vm358_vm0, %v6831_v21, 0 }
 0xddb   : >> { %7222 = vmatmul.f32.gmra.mxu0 %v7006_v5  ;;  %v14539_v7 = vand.u32 4294901760, %v6876_v32  ;;  %v7009_v50 = vand.u32 4294901760, %v7008_v13  ;;  %v14574_v21 = vpop.f32.mrf.mxu0 }
 0xddd   : >> { %7337 = vmatmul.f32.gmra.mxu1 %v7007_v59  ;;  %v7014_v42 = vsub.f32 %v6876_v32, %v14539_v7  ;;  %v6526_v0 = vpop.f32.mrf.mxu3  ;;  %v14576_v32 = vpop.f32.mrf.mxu1 }
 0xddf   : >> { %v7015_v3 = vand.u32 4294901760, %v7014_v42 }
 0xde0   : >> { %7099 = vmatmul.f32.gmra.mxu3 %v14509_v48  ;;  %6978 = vmatmul.f32.gmra.mxu2 %v6977_v54  ;;  %v6523_v54 = vadd.f32 %v6522_v24, %v6405_v44 }
 0xde1   : >> { %v6832_v27 = vpop.trf.xlu2  ;;  %v7016_v19 = vsub.f32 %v7014_v42, %v7015_v3 }
 0xde2   : >> { %v6879_v20 = vsel %vm358_vm0, %v6832_v27, 0 }
 0xde3   : >> { %7227 = vmatmul.f32.gmra.mxu0 %v7014_v42  ;;  %v14544_v60 = vand.u32 4294901760, %v6879_v20  ;;  %v7017_v16 = vand.u32 4294901760, %v7016_v19  ;;  %v14582_v33 = vpop.f32.mrf.mxu0 }
 0xde5   : >> { %7343 = vmatmul.f32.gmra.mxu1 %v7015_v3  ;;  %v7022_v51 = vsub.f32 %v6879_v20, %v14544_v60  ;;  %v14586_v27 = vpop.f32.mrf.mxu1 }
 0xde7   : >> { %v7023_v57 = vand.u32 4294901760, %v7022_v51 }
 0xde8   : >> { %7103 = vmatmul.f32.gmra.mxu3 %v14514_v10  ;;  %6986 = vmatmul.f32.gmra.mxu2 %v6985_v4  ;;  %v6527_v4 = vadd.f32 %v6526_v0, %v6413_v30 }
 0xde9   : >> { %v7024_v28 = vsub.f32 %v7022_v51, %v7023_v57 }
 0xdeb   : >> { %7232 = vmatmul.f32.gmra.mxu0 %v7022_v51  ;;  %v7025_v17 = vand.u32 4294901760, %v7024_v28 }
 0xded   : >> { %7349 = vmatmul.f32.gmra.mxu1 %v7023_v57 }
 0xdf0   : >> { %7107 = vmatmul.f32.gmra.mxu3 %v14519_v56  ;;  %6994 = vmatmul.f32.gmra.mxu2 %v6993_v36 }
 0xdf8   : >> { %7111 = vmatmul.f32.gmra.mxu3 %v14524_v49  ;;  %7002 = vmatmul.f32.gmra.mxu2 %v7001_v22 }
 0xdfb   : >> { %v6580_v58 = vpop.f32.mrf.mxu2 }
 0xdfc   : >> { %v6581_v31 = vadd.f32 %v6580_v58, %v6515_v34  ;;  %v14592_v57 = vpop.f32.mrf.mxu0 }
 0xdff   : >> { %v14594_v24 = vpop.f32.mrf.mxu1 }
 0xe00   : >> { %7115 = vmatmul.f32.gmra.mxu3 %v14529_v39  ;;  %7010 = vmatmul.f32.gmra.mxu2 %v7009_v50 }
 0xe03   : >> { %v6634_v18 = vpop.f32.mrf.mxu3  ;;  %v6585_v14 = vpop.f32.mrf.mxu2 }
 0xe04   : >> { %v14560_v23 = vadd.f32 %v6634_v18, %v6581_v31  ;;  %v6586_v38 = vadd.f32 %v6585_v14, %v6519_v29 }
 0xe08   : >> { %7119 = vmatmul.f32.gmra.mxu3 %v14534_v37  ;;  %7018 = vmatmul.f32.gmra.mxu2 %v7017_v16 }
 0xe0b   : >> { %v6590_v55 = vpop.f32.mrf.mxu2  ;;  %v6640_v26 = vpop.f32.mrf.mxu3 }
 0xe0c   : >> { %v14567_v8 = vadd.f32 %v6640_v26, %v6586_v38  ;;  %v6591_v5 = vadd.f32 %v6590_v55, %v6523_v54 }
 0xe10   : >> { %7123 = vmatmul.f32.gmra.mxu3 %v14539_v7  ;;  %7026 = vmatmul.f32.gmra.mxu2 %v7025_v17 }
 0xe13   : >> { %v6595_v35 = vpop.f32.mrf.mxu2  ;;  %v6646_v59 = vpop.f32.mrf.mxu3 }
 0xe14   : >> { %v14572_v63 = vadd.f32 %v6646_v59, %v6591_v5  ;;  %v6596_v42 = vadd.f32 %v6595_v35, %v6527_v4 }
 0xe18   : >> { %7127 = vmatmul.f32.gmra.mxu3 %v14544_v60  ;;  %7382 = vmatmul.f32.vlgmr.msrb.gmra.mxu2 %v14442_v45 }
 0xe1b   : >> { %v6652_v52 = vpop.f32.mrf.mxu3  ;;  %v6907_v3 = vpop.f32.mrf.mxu2 }
 0xe1c   : >> { %v14580_v44 = vadd.f32 %v6652_v52, %v6596_v42 }
 0xe20   : >> { %7467 = vmatmul.f32.vlgmr.msrb.gmra.mxu3 %v14442_v45  ;;  %7386 = vmatmul.f32.gmra.mxu2 %v14459_v2  ;;  %v14600_v45 = vpop.f32.mrf.mxu0 }
 0xe23   : >> { %v7068_v20 = vpop.f32.mrf.mxu3  ;;  %v6915_v36 = vpop.f32.mrf.mxu2 }
 0xe24   : >> { %v14588_v51 = vadd.f32 %v7068_v20, %v6907_v3 }
 0xe28   : >> { %7471 = vmatmul.f32.gmra.mxu3 %v14459_v2  ;;  %7390 = vmatmul.f32.gmra.mxu2 %v14470_v43  ;;  %v14604_v2 = vpop.f32.mrf.mxu1  ;;  %v14610_v31 = vpop.f32.mrf.mxu0 }
 0xe2b   : >> { %v7072_v12 = vpop.f32.mrf.mxu3  ;;  %v6923_v30 = vpop.f32.mrf.mxu2 }
 0xe2c   : >> { %v14596_v22 = vadd.f32 %v7072_v12, %v6915_v36 }
 0xe30   : >> { %7475 = vmatmul.f32.gmra.mxu3 %v14470_v43  ;;  %7394 = vmatmul.f32.gmra.mxu2 %v14480_v25  ;;  %v14612_v43 = vpop.f32.mrf.mxu1  ;;  %v14618_v29 = vpop.f32.mrf.mxu0 }
 0xe33   : >> { %v7076_v13 = vpop.f32.mrf.mxu3  ;;  %v6931_v0 = vpop.f32.mrf.mxu2 }
 0xe34   : >> { %v14602_v58 = vadd.f32 %v7076_v13, %v6923_v30 }
 0xe38   : >> { %7479 = vmatmul.f32.gmra.mxu3 %v14480_v25  ;;  %7398 = vmatmul.f32.gmra.mxu2 %v14488_v1  ;;  %v14622_v25 = vpop.f32.mrf.mxu1 }
 0xe3b   : >> { %v7080_v50 = vpop.f32.mrf.mxu3  ;;  %v6939_v34 = vpop.f32.mrf.mxu2 }
 0xe3c   : >> { %v14608_v19 = vadd.f32 %v7080_v50, %v6931_v0 }
 0xe40   : >> { %7483 = vmatmul.f32.gmra.mxu3 %v14488_v1  ;;  %7402 = vmatmul.f32.gmra.mxu2 %v14494_v15  ;;  %v14628_v1 = vpop.f32.mrf.mxu0  ;;  %v14630_v26 = vpop.f32.mrf.mxu1 }
 0xe43   : >> { %v7084_v18 = vpop.f32.mrf.mxu3  ;;  %v6947_v14 = vpop.f32.mrf.mxu2 }
 0xe44   : >> { %v14616_v16 = vadd.f32 %v7084_v18, %v6939_v34 }
 0xe48   : >> { %7487 = vmatmul.f32.gmra.mxu3 %v14494_v15  ;;  %7406 = vmatmul.f32.gmra.mxu2 %v14499_v62  ;;  %v14636_v15 = vpop.f32.mrf.mxu0 }
 0xe4b   : >> { %v7088_v28 = vpop.f32.mrf.mxu3  ;;  %v6955_v38 = vpop.f32.mrf.mxu2 }
 0xe4c   : >> { %v14624_v55 = vadd.f32 %v7088_v28, %v6947_v14  ;;  %v7159_v28 = vadd.f32 %v14574_v21, %v14588_v51  ;;  %v7169_v21 = vadd.f32 %v14592_v57, %v14602_v58 }
 0xe4e   : >> { %v7184_v58 = vadd.f32 %v14618_v29, %v14624_v55 }
 0xe50   : >> { %7491 = vmatmul.f32.gmra.mxu3 %v14499_v62  ;;  %7410 = vmatmul.f32.gmra.mxu2 %v14504_v47  ;;  %v14640_v62 = vpop.f32.mrf.mxu1  ;;  %v7198_v20 = vpop.f32.mrf.mxu0 }
 0xe53   : >> { %v7092_v17 = vpop.f32.mrf.mxu3  ;;  %v6963_v54 = vpop.f32.mrf.mxu2 }
 0xe54   : >> { %v14632_v5 = vadd.f32 %v7092_v17, %v6955_v38 }
 0xe58   : >> { %7495 = vmatmul.f32.gmra.mxu3 %v14504_v47  ;;  %7414 = vmatmul.f32.gmra.mxu2 %v14509_v48  ;;  %v7308_v36 = vpop.f32.mrf.mxu1 }
 0xe5b   : >> { %v7096_v35 = vpop.f32.mrf.mxu3  ;;  %v6971_v59 = vpop.f32.mrf.mxu2 }
 0xe5c   : >> { %v14638_v4 = vadd.f32 %v7096_v35, %v6963_v54 }
 0xe60   : >> { %7499 = vmatmul.f32.gmra.mxu3 %v14509_v48  ;;  %7418 = vmatmul.f32.gmra.mxu2 %v14514_v10 }
 0xe63   : >> { %v7100_v42 = vpop.f32.mrf.mxu3  ;;  %v14644_v52 = vpop.f32.mrf.mxu2 }
 0xe64   : >> { %v7101_v3 = vadd.f32 %v7100_v42, %v6971_v59 }
 0xe66   : >> { %v7199_v47 = vadd.f32 %v7198_v20, %v7101_v3 }
 0xe68   : >> { %7503 = vmatmul.f32.gmra.mxu3 %v14514_v10  ;;  %7422 = vmatmul.f32.gmra.mxu2 %v14519_v56  ;;  %v14648_v12 = vadd.f32 %v7308_v36, %v7199_v47 }
 0xe6b   : >> { %v14650_v30 = vpop.f32.mrf.mxu3  ;;  %v14652_v13 = vpop.f32.mrf.mxu2 }
 0xe70   : >> { %7507 = vmatmul.f32.gmra.mxu3 %v14519_v56  ;;  %7426 = vmatmul.f32.gmra.mxu2 %v14524_v49 }
 0xe73   : >> { %v14656_v48 = vpop.f32.mrf.mxu3  ;;  %v14658_v0 = vpop.f32.mrf.mxu2 }
 0xe78   : >> { %7511 = vmatmul.f32.gmra.mxu3 %v14524_v49  ;;  %7430 = vmatmul.f32.gmra.mxu2 %v14529_v39 }
 0xe7b   : >> { %v14662_v10 = vpop.f32.mrf.mxu3  ;;  %v14664_v50 = vpop.f32.mrf.mxu2 }
 0xe80   : >> { %7515 = vmatmul.f32.gmra.mxu3 %v14529_v39  ;;  %7434 = vmatmul.f32.gmra.mxu2 %v14534_v37 }
 0xe83   : >> { %v14668_v34 = vpop.f32.mrf.mxu3  ;;  %v14670_v56 = vpop.f32.mrf.mxu2 }
 0xe88   : >> { %7519 = vmatmul.f32.gmra.mxu3 %v14534_v37  ;;  %7438 = vmatmul.f32.gmra.mxu2 %v14539_v7  ;;  %v7261_v37 = vadd.f32 %v14576_v32, %v7159_v28 }
 0xe8b   : >> { %v14674_v18 = vpop.f32.mrf.mxu3  ;;  %v14676_v49 = vpop.f32.mrf.mxu2 }
 0xe90   : >> { %7523 = vmatmul.f32.gmra.mxu3 %v14539_v7  ;;  %7442 = vmatmul.f32.gmra.mxu2 %v14544_v60  ;;  %v7164_v7 = vadd.f32 %v14582_v33, %v14596_v22  ;;  %v7174_v33 = vadd.f32 %v14600_v45, %v14608_v19 }
 0xe92   : >> { %v7267_v35 = vadd.f32 %v14586_v27, %v7164_v7  ;;  %v7279_v27 = vadd.f32 %v14604_v2, %v7174_v33  ;;  %v7291_v2 = vadd.f32 %v14622_v25, %v7184_v58 }
 0xe93   : >> { %v14680_v14 = vpop.f32.mrf.mxu3  ;;  %v14682_v39 = vpop.f32.mrf.mxu2 }
 0xe98   : >> { %7527 = vmatmul.f32.gmra.mxu3 %v14544_v60  ;;  %v7273_v60 = vadd.f32 %v14594_v24, %v7169_v21  ;;  %v7179_v24 = vadd.f32 %v14610_v31, %v14616_v16  ;;  %v7189_v21 = vadd.f32 %v14628_v1, %v14632_v5  ;;  %v14728_v1 = vpop.f32.mrf.mxu1 }
 0xe9a   : >> { %v7297_v31 = vadd.f32 %v14630_v26, %v7189_v21 }
 0xe9b   : >> { %v14688_v38 = vpop.f32.mrf.mxu3  ;;  %v7383_v17 = vpop.f32.mrf.mxu2 }
 0xe9c   : >> { %v7384_v54 = vadd.f32 %v7383_v17, %v7261_v37 }
 0xea3   : >> { %v7468_v59 = vpop.f32.mrf.mxu3  ;;  %v7387_v42 = vpop.f32.mrf.mxu2 }
 0xea4   : >> { %v14693_v3 = vadd.f32 %v7468_v59, %v7384_v54  ;;  %v7388_v20 = vadd.f32 %v7387_v42, %v7267_v35  ;;  %v7285_v35 = vadd.f32 %v14612_v43, %v7179_v24 }
 0xeab   : >> { %v7472_v32 = vpop.f32.mrf.mxu3  ;;  %v7391_v51 = vpop.f32.mrf.mxu2 }
 0xeac   : >> { %v14698_v47 = vadd.f32 %v7472_v32, %v7388_v20  ;;  %v7392_v36 = vadd.f32 %v7391_v51, %v7273_v60  ;;  %v7194_v51 = vadd.f32 %v14636_v15, %v14638_v4  ;;  %v7320_v4 = vpop.f32.mrf.mxu1 }
 0xeae   : >> { %v7303_v33 = vadd.f32 %v14640_v62, %v7194_v51  ;;  %v7109_v62 = vadd.f32 %v14656_v48, %v14652_v13  ;;  %v7117_v13 = vadd.f32 %v14668_v34, %v14664_v50  ;;  %v7125_v34 = vadd.f32 %v14680_v14, %v14676_v49 }
 0xeb3   : >> { %v7476_v22 = vpop.f32.mrf.mxu3  ;;  %v7395_v28 = vpop.f32.mrf.mxu2 }
 0xeb4   : >> { %v14703_v37 = vadd.f32 %v7476_v22, %v7392_v36  ;;  %v7396_v17 = vadd.f32 %v7395_v28, %v7279_v27  ;;  %v14725_v36 = vpop.f32.mrf.mxu0 }
 0xebb   : >> { %v7480_v54 = vpop.f32.mrf.mxu3  ;;  %v7399_v7 = vpop.f32.mrf.mxu2 }
 0xebc   : >> { %v14705_v57 = vadd.f32 %v7480_v54, %v7396_v17  ;;  %v7400_v45 = vadd.f32 %v7399_v7, %v7285_v35  ;;  %v7208_v17 = vpop.f32.mrf.mxu0 }
 0xec3   : >> { %v7484_v19 = vpop.f32.mrf.mxu3  ;;  %v7403_v59 = vpop.f32.mrf.mxu2 }
 0xec4   : >> { %v14713_v42 = vadd.f32 %v7484_v19, %v7400_v45  ;;  %v7404_v20 = vadd.f32 %v7403_v59, %v7291_v2  ;;  %v7213_v24 = vpop.f32.mrf.mxu0  ;;  %v7209_v45 = vadd.f32 %v7208_v17, %v7109_v62  ;;  %v7326_v2 = vpop.f32.mrf.mxu1 }
 0xec6   : >> { %7539 = vmax.xlane.f32.xlu0 %v14713_v42  ;;  %v7321_v19 = vadd.f32 %v7320_v4, %v7209_v45 }
 0xecb   : >> { %v7488_v16 = vpop.f32.mrf.mxu3  ;;  %v7407_v60 = vpop.f32.mrf.mxu2 }
 0xecc   : >> { %v14719_v29 = vadd.f32 %v7488_v16, %v7404_v20  ;;  %v7408_v43 = vadd.f32 %v7407_v60, %v7297_v31  ;;  %v7218_v60 = vpop.f32.mrf.mxu0 }
 0xed3   : >> { %v7492_v55 = vpop.f32.mrf.mxu3  ;;  %v7411_v32 = vpop.f32.mrf.mxu2 }
 0xed4   : >> { %v14721_v25 = vadd.f32 %v7492_v55, %v7408_v43  ;;  %v7412_v27 = vadd.f32 %v7411_v32, %v7303_v33  ;;  %v7332_v43 = vpop.f32.mrf.mxu1 }
 0xedb   : >> { %v7496_v26 = vpop.f32.mrf.mxu3  ;;  %v7415_v5 = vpop.f32.mrf.mxu2 }
 0xedc   : >> { %v14730_v22 = vadd.f32 %v7496_v26, %v7412_v27  ;;  %v7416_v28 = vadd.f32 %v7415_v5, %v14648_v12  ;;  %v7113_v12 = vadd.f32 %v14662_v10, %v14658_v0  ;;  %v7219_v0 = vadd.f32 %v7218_v60, %v7117_v13  ;;  %v7223_v10 = vpop.f32.mrf.mxu0 }
 0xedd   : >> { %v7121_v27 = vadd.f32 %v14674_v18, %v14670_v56 }
 0xede   : >> { %7545 = vmax.xlane.f32.xlu2 %v14730_v22  ;;  %v7214_v16 = vadd.f32 %v7213_v24, %v7113_v12  ;;  %v7333_v26 = vadd.f32 %v7332_v43, %v7219_v0 }
 0xedf   : >> { %v7224_v50 = vadd.f32 %v7223_v10, %v7121_v27 }
 0xee0   : >> { %v7327_v48 = vadd.f32 %v7326_v2, %v7214_v16 }
 0xee3   : >> { %v7500_v54 = vpop.f32.mrf.mxu3  ;;  %v14734_v7 = vpop.f32.mrf.mxu2 }
 0xee4   : >> { %v14736_v15 = vadd.f32 %v7500_v54, %v7416_v28  ;;  %v7338_v28 = vpop.f32.mrf.mxu1  ;;  %v7228_v24 = vpop.f32.mrf.mxu0 }
 0xee5   : >> { %v7339_v62 = vadd.f32 %v7338_v28, %v7224_v50  ;;  %v7229_v12 = vadd.f32 %v7228_v24, %v7125_v34 }
 0xeeb   : >> { %v7504_v58 = vpop.f32.mrf.mxu3  ;;  %v7423_v35 = vpop.f32.mrf.mxu2 }
 0xeec   : >> { %v7424_v59 = vadd.f32 %v7423_v35, %v7321_v19  ;;  %v7344_v56 = vpop.f32.mrf.mxu1  ;;  %v7129_v19 = vadd.f32 %v14688_v38, %v14682_v39  ;;  %v7233_v16 = vpop.f32.mrf.mxu0 }
 0xeee   : >> { %v7234_v13 = vadd.f32 %v7233_v16, %v7129_v19 }
 0xef3   : >> { %v7508_v20 = vpop.f32.mrf.mxu3  ;;  %v7427_v21 = vpop.f32.mrf.mxu2 }
 0xef4   : >> { %v14742_v31 = vadd.f32 %v7508_v20, %v7424_v59  ;;  %v7428_v55 = vadd.f32 %v7427_v21, %v7327_v48  ;;  %v7345_v59 = vadd.f32 %v7344_v56, %v7229_v12  ;;  %v7350_v49 = vpop.f32.mrf.mxu1  ;;  %v7105_v48 = vadd.f32 %v14650_v30, %v14644_v52 }
 0xef5   : >> { %v7351_v43 = vadd.f32 %v7350_v49, %v7234_v13 }
 0xef6   : >> { %7551 = vmax.xlane.f32.xlu1 %v14742_v31 }
 0xefb   : >> { %v7512_v32 = vpop.f32.mrf.mxu3  ;;  %v7431_v51 = vpop.f32.mrf.mxu2 }
 0xefc   : >> { %v7513_v33 = vadd.f32 %v7512_v32, %v7428_v55  ;;  %v7432_v5 = vadd.f32 %v7431_v51, %v7333_v26  ;;  %v7204_v51 = vadd.f32 %v14725_v36, %v7105_v48 }
 0xefe   : >> { %7553 = vmax.xlane.f32.xlu1 %v7513_v33  ;;  %v7315_v39 = vadd.f32 %v14728_v1, %v7204_v51 }
 0xf00   : >> { %v7420_v38 = vadd.f32 %v14734_v7, %v7315_v39 }
 0xf02   : >> { %v7505_v10 = vadd.f32 %v7504_v58, %v7420_v38 }
 0xf03   : >> { %v7516_v17 = vpop.f32.mrf.mxu3  ;;  %v7435_v54 = vpop.f32.mrf.mxu2 }
 0xf04   : >> { %v14749_v4 = vadd.f32 %v7516_v17, %v7432_v5  ;;  %v7436_v35 = vadd.f32 %v7435_v54, %v7339_v62 }
 0xf06   : >> { %7555 = vmax.xlane.f32.xlu1 %v14749_v4 }
 0xf0b   : >> { %v7520_v45 = vpop.f32.mrf.mxu3  ;;  %v7439_v18 = vpop.f32.mrf.mxu2 }
 0xf0c   : >> { %v7521_v2 = vadd.f32 %v7520_v45, %v7436_v35  ;;  %v7440_v20 = vadd.f32 %v7439_v18, %v7345_v59 }
 0xf0e   : >> { %7557 = vmax.xlane.f32.xlu1 %v7521_v2 }
 0xf13   : >> { %v7524_v21 = vpop.f32.mrf.mxu3  ;;  %v7443_v14 = vpop.f32.mrf.mxu2 }
 0xf14   : >> { %v7525_v60 = vadd.f32 %v7524_v21, %v7440_v20  ;;  %v7444_v55 = vadd.f32 %v7443_v14, %v7351_v43 }
 0xf16   : >> { %7559 = vmax.xlane.f32.xlu1 %v7525_v60 }
 0xf1b   : >> { %v7528_v32 = vpop.f32.mrf.mxu3 }
 0xf1c   : >> { %v7529_v0 = vadd.f32 %v7528_v32, %v7444_v55 }
 0xf1e   : >> { %7561 = vmax.xlane.f32.xlu1 %v7529_v0 }
 0xf26   : >> { %7549 = vmax.xlane.f32.xlu1 %v7505_v10 }
 0xf2e   : >> { %7547 = vmax.xlane.f32.xlu1 %v14736_v15 }
 0xf36   : >> { %7543 = vmax.xlane.f32.xlu1 %v14721_v25 }
 0xf3e   : >> { %7541 = vmax.xlane.f32.xlu1 %v14719_v29 }
 0xf46   : >> { %7537 = vmax.xlane.f32.xlu1 %v14705_v57 }
 0xf4e   : >> { %7535 = vmax.xlane.f32.xlu1 %v14703_v37 }
 0xf51   : >> { %v7546_v35 = vpop.xlane.xlu2 %7545 }
 0xf52   : >> { %v7570_v18 = vsub.f32 %v14730_v22, %v7546_v35 }
 0xf54   : >> { %v7593_v59 = vmul.f32 1.442695, %v7570_v18 }
 0xf56   : >> { %7533 = vmax.xlane.f32.xlu1 %v14698_v47 }
 0xf5e   : >> { %7531 = vmax.xlane.f32.xlu1 %v14693_v3 }
 0xf69   : >> { %v7552_v52 = vpop.xlane.xlu1 %7551 }
 0xf6a   : >> { %v7573_v22 = vsub.f32 %v14742_v31, %v7552_v52 }
 0xf6c   : >> { %v7599_v13 = vmul.f32 1.442695, %v7573_v22 }
 0xf71   : >> { %v7554_v30 = vpop.xlane.xlu1 %7553 }
 0xf72   : >> { %v7574_v36 = vsub.f32 %v7513_v33, %v7554_v30 }
 0xf74   : >> { %v7601_v1 = vmul.f32 1.442695, %v7574_v36 }
 0xf76   : >> { %9211 = vpow2.f32 %v7601_v1 }
 0xf79   : >> { %v7556_v7 = vpop.xlane.xlu1 %7555 }
 0xf7a   : >> { %v7575_v19 = vsub.f32 %v14749_v4, %v7556_v7 }
 0xf7c   : >> { %v14768_v58 = vpop.eup %9211  ;;  %v7603_v20 = vmul.f32 1.442695, %v7575_v19 }
 0xf7d   : >> { %7633 = vadd.xlane.f32.xlu1 %v14768_v58 }
 0xf81   : >> { %v7558_v27 = vpop.xlane.xlu1 %7557 }
 0xf82   : >> { %v7576_v62 = vsub.f32 %v7521_v2, %v7558_v27 }
 0xf84   : >> { %v7605_v33 = vmul.f32 1.442695, %v7576_v62 }
 0xf89   : >> { %v7560_v26 = vpop.xlane.xlu1 %7559 }
 0xf8a   : >> { %v7577_v5 = vsub.f32 %v7525_v60, %v7560_v26 }
 0xf8c   : >> { %v7607_v28 = vmul.f32 1.442695, %v7577_v5 }
 0xf8e   : >> { %9213 = vpow2.f32 %v7607_v28 }
 0xf91   : >> { %v7562_v17 = vpop.xlane.xlu1 %7561 }
 0xf92   : >> { %v7578_v54 = vsub.f32 %v7529_v0, %v7562_v17 }
 0xf94   : >> { %v14771_v50 = vpop.eup %9213  ;;  %v7609_v34 = vmul.f32 1.442695, %v7578_v54 }
 0xf95   : >> { %7639 = vadd.xlane.f32.xlu0 %v14771_v50 }
 0xf96   : >> { %9215 = vpow2.f32 %v7609_v34 }
 0xf97   : >> { %9217 = vpow2.f32 %v7605_v33 }
 0xf99   : >> { %v7550_v24 = vpop.xlane.xlu1 %7549 }
 0xf9a   : >> { %v7572_v45 = vsub.f32 %v7505_v10, %v7550_v24  ;;  %v7540_v10 = vpop.xlane.xlu0 %7539 }
 0xf9c   : >> { %v14774_v12 = vpop.eup %9215  ;;  %v7597_v56 = vmul.f32 1.442695, %v7572_v45 }
 0xf9d   : >> { %7641 = vadd.xlane.f32.xlu0 %v14774_v12  ;;  %v14779_v21 = vpop.eup %9217 }
 0xf9e   : >> { %9219 = vpow2.f32 %v7597_v56 }
 0xf9f   : >> { %9221 = vpow2.f32 %v7593_v59 }
 0xfa0   : >> { %9223 = vpow2.f32 %v7603_v20 }
 0xfa1   : >> { %v7548_v2 = vpop.xlane.xlu1 %7547  ;;  %9225 = vpow2.f32 %v7599_v13 }
 0xfa2   : >> { %v7571_v14 = vsub.f32 %v14736_v15, %v7548_v2 }
 0xfa4   : >> { %v14781_v16 = vpop.eup %9219  ;;  %v7595_v48 = vmul.f32 1.442695, %v7571_v14 }
 0xfa5   : >> { %7637 = vadd.xlane.f32.xlu0 %v14779_v21  ;;  %7629 = vadd.xlane.f32.xlu1 %v14781_v16  ;;  %v14786_v49 = vpop.eup %9221 }
 0xfa6   : >> { %v14788_v4 = vpop.eup %9223  ;;  %9227 = vpow2.f32 %v7595_v48 }
 0xfa7   : >> { %v14794_v32 = vpop.eup %9225 }
 0xfa9   : >> { %v7544_v60 = vpop.xlane.xlu1 %7543 }
 0xfaa   : >> { %v7569_v51 = vsub.f32 %v14721_v25, %v7544_v60 }
 0xfac   : >> { %v7591_v0 = vmul.f32 1.442695, %v7569_v51  ;;  %v14799_v38 = vpop.eup %9227 }
 0xfad   : >> { %7635 = vadd.xlane.f32.xlu0 %v14788_v4  ;;  %7625 = vadd.xlane.f32.xlu1 %v14786_v49 }
 0xfb1   : >> { %v7542_v43 = vpop.xlane.xlu1 %7541 }
 0xfb2   : >> { %v7568_v55 = vsub.f32 %v14719_v29, %v7542_v43  ;;  %v7567_v29 = vsub.f32 %v14713_v42, %v7540_v10 }
 0xfb4   : >> { %v7589_v31 = vmul.f32 1.442695, %v7568_v55  ;;  %v7587_v36 = vmul.f32 1.442695, %v7567_v29 }
 0xfb5   : >> { %7631 = vadd.xlane.f32.xlu0 %v14794_v32 }
 0xfb6   : >> { %9229 = vpow2.f32 %v7589_v31 }
 0xfb7   : >> { %9231 = vpow2.f32 %v7591_v0 }
 0xfb9   : >> { %v7538_v15 = vpop.xlane.xlu1 %7537 }
 0xfba   : >> { %v7566_v39 = vsub.f32 %v14705_v57, %v7538_v15  ;;  %v16721_v15 = vld [vmem:[#allocation32_spill] sm:$0xff] }
 0xfbc   : >> { %v14801_v52 = vpop.eup %9229  ;;  %v7585_v30 = vmul.f32 1.442695, %v7566_v39  ;;  %v16722_v39 = vld [vmem:[#allocation87_spill] sm:$0xff] }
 0xfbd   : >> { %7627 = vadd.xlane.f32.xlu0 %v14799_v38  ;;  %7621 = vadd.xlane.f32.xlu1 %v14801_v52  ;;  %v14806_v1 = vpop.eup %9231  ;;  %v1123_v10 = vadd.f32 %v16722_v39, %v16721_v15 }
 0xfbe   : >> { %9233 = vpow2.f32 %v7585_v30 }
 0xfbf   : >> { %9235 = vpow2.f32 %v7587_v36 }
 0xfc1   : >> { %v7536_v25 = vpop.xlane.xlu1 %7535 }
 0xfc2   : >> { %v7565_v57 = vsub.f32 %v14703_v37, %v7536_v25 }
 0xfc4   : >> { %v14808_v7 = vpop.eup %9233  ;;  %v7583_v27 = vmul.f32 1.442695, %v7565_v57 }
 0xfc5   : >> { %7623 = vadd.xlane.f32.xlu0 %v14806_v1  ;;  %7617 = vadd.xlane.f32.xlu1 %v14808_v7  ;;  %v14814_v28 = vpop.eup %9235 }
 0xfc6   : >> { %9237 = vpow2.f32 %v7583_v27  ;;  %v16723_v27 = vld [vmem:[#allocation116_spill] sm:$0xff] }
 0xfc9   : >> { %v7534_v26 = vpop.xlane.xlu1 %7533 }
 0xfca   : >> { %v7564_v5 = vsub.f32 %v14698_v47, %v7534_v26  ;;  %v1385_v26 = vadd.f32 %v16723_v27, %v1123_v10 }
 0xfcc   : >> { %v7581_v42 = vmul.f32 1.442695, %v7564_v5  ;;  %v14818_v37 = vpop.eup %9237 }
 0xfcd   : >> { %7619 = vadd.xlane.f32.xlu0 %v14814_v28 }
 0xfce   : >> { %9239 = vpow2.f32 %v7581_v42 }
 0xfd1   : >> { %v7532_v17 = vpop.xlane.xlu1 %7531 }
 0xfd2   : >> { %v7563_v54 = vsub.f32 %v14693_v3, %v7532_v17 }
 0xfd4   : >> { %v14820_v34 = vpop.eup %9239  ;;  %v7579_v62 = vmul.f32 1.442695, %v7563_v54 }
 0xfd5   : >> { %7615 = vadd.xlane.f32.xlu0 %v14818_v37  ;;  %7613 = vadd.xlane.f32.xlu1 %v14820_v34 }
 0xfd6   : >> { %9241 = vpow2.f32 %v7579_v62 }
 0xfdc   : >> { %v14824_v47 = vpop.eup %9241 }
 0xfdd   : >> { %7611 = vadd.xlane.f32.xlu0 %v14824_v47 }
 0xff0   : >> { %v7634_v33 = vpop.xlane.xlu1 %7633 }
 0xff1   : >> { %9243 = vrcp.f32 %v7634_v33  ;;  %v7819_v19 = vand.u32 2147483648, %v7634_v33  ;;  %vm7813_vm13 = vweird.f32 %v7634_v33  ;;  %v7817_v59 = vand.u32 2147483647, %v7634_v33 }
 0xff3   : >> { %v7820_v22 = vor.u32 1.1754944e-38, %v7819_v19  ;;  %vm7818_vm15 = vcmp.eq.f32.partialorder %v7817_v59, 8.507059e+37  ;;  %v16727_v59 = vld [vmem:[#allocation131_spill] sm:$0xff] }
 0xff7   : >> { %v9244_v24 = vpop.eup %9243 }
 0xff8   : >> { %v7809_v35 = vmul.f32 %v9244_v24, %v7634_v33  ;;  %vm7814_vm0 = vweird.f32 %v9244_v24  ;;  %v16724_v33 = vld [vmem:[#allocation115_spill] sm:$0xff] }
 0xff9   : >> { %vm7815_vm14 = vmor %vm7813_vm13, %vm7814_vm0 }
 0xffa   : >> { %v7810_v45 = vsub.f32 1.0, %v7809_v35  ;;  %v16725_v35 = vld [vmem:[#allocation28_spill] sm:$0xff] }
 0xffc   : >> { %v7811_v3 = vmul.f32 %v9244_v24, %v7810_v45  ;;  %v16726_v45 = vld [vmem:[#allocation88_spill] sm:$0xff] }
 0xffe   : >> { %v7812_v18 = vadd.f32 %v9244_v24, %v7811_v3  ;;  %v1127_v3 = vadd.f32 %v16726_v45, %v16725_v35 }
0x1000   : >> { %v7816_v2 = vsel %vm7815_vm14, %v9244_v24, %v7812_v18  ;;  %v1691_v24 = vadd.f32 %v16724_v33, %v1385_v26 }
0x1001   : >> { %v7821_v14 = vsel %vm7818_vm15, %v7820_v22, %v7816_v2 }
0x1002   : >> { %v7822_v55 = vmul.f32 %v14768_v58, %v7821_v14  ;;  %v1918_v2 = vadd.f32 %v16727_v59, %v1691_v24 }
0x1004   : >> { %v14834_v57 = vand.u32 4294901760, %v7822_v55 }
0x1006   : >> { %v14840_v62 = vsub.f32 %v7822_v55, %v14834_v57 }
0x1008   : >> { %v7640_v56 = vpop.xlane.xlu0 %7639 }
0x1009   : >> { %9245 = vrcp.f32 %v7640_v56  ;;  %v7864_v51 = vand.u32 2147483648, %v7640_v56  ;;  %vm7858_vm2 = vweird.f32 %v7640_v56  ;;  %v7862_v30 = vand.u32 2147483647, %v7640_v56 }
0x100b   : >> { %v7865_v5 = vor.u32 1.1754944e-38, %v7864_v51  ;;  %vm7863_vm4 = vcmp.eq.f32.partialorder %v7862_v30, 8.507059e+37  ;;  %v16730_v51 = vld [vmem:[#allocation118_spill] sm:$0xff]  ;;  %v16731_v30 = vld [vmem:[#allocation132_spill] sm:$0xff] }
0x100c   : >> { %v1390_v15 = vadd.f32 %v16730_v51, %v1127_v3 }
0x100f   : >> { %v9246_v20 = vpop.eup %9245 }
0x1010   : >> { %v7854_v60 = vmul.f32 %v9246_v20, %v7640_v56  ;;  %v7642_v13 = vpop.xlane.xlu0 %7641  ;;  %vm7859_vm1 = vweird.f32 %v9246_v20 }
0x1011   : >> { %9247 = vrcp.f32 %v7642_v13  ;;  %vm7860_vm3 = vmor %vm7858_vm2, %vm7859_vm1  ;;  %v7879_v18 = vand.u32 2147483648, %v7642_v13  ;;  %vm7873_vm6 = vweird.f32 %v7642_v13 }
0x1012   : >> { %v7855_v48 = vsub.f32 1.0, %v7854_v60 }
0x1013   : >> { %v7880_v39 = vor.u32 1.1754944e-38, %v7879_v18  ;;  %v16733_v18 = vld [vmem:[#allocation133_spill] sm:$0xff] }
0x1014   : >> { %v7856_v43 = vmul.f32 %v9246_v20, %v7855_v48 }
0x1016   : >> { %v7857_v31 = vadd.f32 %v9246_v20, %v7856_v43 }
0x1017   : >> { %v9248_v0 = vpop.eup %9247 }
0x1018   : >> { %v7869_v29 = vmul.f32 %v9248_v0, %v7642_v13  ;;  %v14830_v25 = vpop.xlane.xlu0 %7637  ;;  %v14832_v36 = vpop.xlane.xlu1 %7629  ;;  %v7861_v58 = vsel %vm7860_vm3, %v9246_v20, %v7857_v31  ;;  %vm7874_vm5 = vweird.f32 %v9248_v0  ;;  %v7877_v20 = vand.u32 2147483647, %v7642_v13 }
0x1019   : >> { %9249 = vrcp.f32 %v14830_v25  ;;  %v7866_v54 = vsel %vm7863_vm4, %v7865_v5, %v7861_v58  ;;  %vm14849_vm7 = vmor %vm7873_vm6, %vm7874_vm5  ;;  %v16005_v31 = vand.u32 4294901760, %v14840_v62  ;;  %v7849_v33 = vand.u32 2147483648, %v14830_v25 }
0x101a   : >> { %v7870_v42 = vsub.f32 1.0, %v7869_v29  ;;  %9251 = vrcp.f32 %v14832_v36  ;;  %v7867_v22 = vmul.f32 %v14771_v50, %v7866_v54  ;;  %v14867_v29 = vadd.f32 %v16731_v30, %v1918_v2 }
0x101b   : >> { %vm7878_vm8 = vcmp.eq.f32.partialorder %v7877_v20, 8.507059e+37  ;;  %v7847_v54 = vand.u32 2147483647, %v14830_v25  ;;  %vm7843_vm10 = vweird.f32 %v14830_v25  ;;  %v7789_v30 = vand.u32 2147483648, %v14832_v36 }
0x101c   : >> { %v7871_v17 = vmul.f32 %v9248_v0, %v7870_v42  ;;  %v14869_v26 = vand.u32 4294901760, %v7867_v22  ;;  %v16732_v42 = vld [vmem:[#allocation117_spill] sm:$0xff]  ;;  %vm7783_vm13 = vweird.f32 %v14832_v36 }
0x101d   : >> { %vm7848_vm12 = vcmp.eq.f32.partialorder %v7847_v54, 8.507059e+37 }
0x101e   : >> { %v7872_v56 = vadd.f32 %v9248_v0, %v7871_v17  ;;  %v1697_v17 = vadd.f32 %v16732_v42, %v1390_v15 }
0x101f   : >> { %v9250_v19 = vpop.eup %9249 }
0x1020   : >> { %v14847_v60 = vpop.eup %9251  ;;  %v7839_v48 = vmul.f32 %v9250_v19, %v14830_v25  ;;  %v14854_v43 = vpop.xlane.xlu0 %7635  ;;  %v7876_v13 = vsel %vm14849_vm7, %v9248_v0, %v7872_v56  ;;  %vm7844_vm9 = vweird.f32 %v9250_v19  ;;  %v14874_v0 = vsub.f32 %v14840_v62, %v16005_v31 }
0x1021   : >> { %v14856_v55 = vpop.xlane.xlu1 %7625  ;;  %v7779_v50 = vmul.f32 %v14847_v60, %v14832_v36  ;;  %9253 = vrcp.f32 %v14854_v43  ;;  %v7881_v5 = vsel %vm7878_vm8, %v7880_v39, %v7876_v13  ;;  %v14885_v56 = vand.u32 4294901760, %v14867_v29  ;;  %vm14890_vm11 = vmor %vm7843_vm10, %vm7844_vm9 }
0x1022   : >> { %v7840_v10 = vsub.f32 1.0, %v7839_v48  ;;  %9255 = vrcp.f32 %v14856_v55  ;;  %v7882_v24 = vmul.f32 %v14774_v12, %v7881_v5  ;;  %v14888_v59 = vadd.f32 %v16733_v18, %v1697_v17 }
0x1023   : >> { %v7780_v27 = vsub.f32 1.0, %v7779_v50  ;;  %v14897_v12 = vsub.f32 %v7867_v22, %v14869_v26  ;;  %v7787_v48 = vand.u32 2147483647, %v14832_v36  ;;  %v7850_v50 = vor.u32 1.1754944e-38, %v7849_v33 }
0x1024   : >> { %v7841_v58 = vmul.f32 %v9250_v19, %v7840_v10  ;;  %v14894_v20 = vand.u32 4294901760, %v7882_v24  ;;  %vm7784_vm0 = vweird.f32 %v14847_v60  ;;  %v7834_v18 = vand.u32 2147483648, %v14854_v43 }
0x1025   : >> { %v7781_v45 = vmul.f32 %v14847_v60, %v7780_v27  ;;  %v7956_v5 = vand.u32 4294901760, %v14897_v12  ;;  %vm14925_vm14 = vmor %vm7783_vm13, %vm7784_vm0  ;;  %vm14929_vm15 = vcmp.eq.f32.partialorder %v7787_v48, 8.507059e+37  ;;  %vm7828_vm2 = vweird.f32 %v14854_v43 }
0x1026   : >> { %v7842_v35 = vadd.f32 %v9250_v19, %v7841_v58  ;;  %7884 = vmatpush.xpose.msrb.mxu0 %v14894_v20  ;;  %v14913_v39 = vsub.f32 %v7882_v24, %v14894_v20  ;;  %8269 = vmatpush.xpose.msra.mxu3 %v14894_v20  ;;  %vm7753_vm4 = vweird.f32 %v14856_v55 }
0x1027   : >> { %v14882_v3 = vpop.eup %9253 }
0x1028   : >> { %v14899_v25 = vpop.eup %9255  ;;  %v7846_v14 = vsel %vm14890_vm11, %v9250_v19, %v7842_v35  ;;  %v7824_v51 = vmul.f32 %v14882_v3, %v14854_v43  ;;  %v14906_v15 = vpop.xlane.xlu0 %7631  ;;  %v7782_v19 = vadd.f32 %v14847_v60, %v7781_v45  ;;  %v7950_v27 = vand.u32 4294901760, %v14913_v39 }
0x1029   : >> { %v7749_v22 = vmul.f32 %v14899_v25, %v14856_v55  ;;  %9257 = vrcp.f32 %v14906_v15  ;;  %v7851_v58 = vsel %vm7848_vm12, %v7850_v50, %v7846_v14  ;;  %vm7829_vm1 = vweird.f32 %v14882_v3 }
0x102a   : >> { %v7825_v10 = vsub.f32 1.0, %v7824_v51  ;;  %v7852_v54 = vmul.f32 %v14779_v21, %v7851_v58  ;;  %v7832_v35 = vand.u32 2147483647, %v14854_v43  ;;  %7886 = vmatpush.xpose.msrb.mxu0 %v14869_v26  ;;  %8190 = vmatpush.xpose.msra.mxu2 %v7950_v27  ;;  %v7951_v36 = vsub.f32 %v14913_v39, %v7950_v27  ;;  %vm14951_vm3 = vmor %vm7828_vm2, %vm7829_vm1 }
0x102b   : >> { %v7750_v17 = vsub.f32 1.0, %v7749_v22  ;;  %v7786_v21 = vsel %vm14925_vm14, %v14847_v60, %v7782_v19  ;;  %8271 = vmatpush.xpose.msra.mxu3 %v14869_v26  ;;  %v7790_v14 = vor.u32 1.1754944e-38, %v7789_v30  ;;  %v7957_v51 = vsub.f32 %v14897_v12, %v7956_v5 }
0x102c   : >> { %v7826_v42 = vmul.f32 %v14882_v3, %v7825_v10  ;;  %v14943_v2 = vand.u32 4294901760, %v7852_v54  ;;  %v7952_v48 = vand.u32 4294901760, %v7951_v36  ;;  %v7757_v19 = vand.u32 2147483647, %v14856_v55 }
0x102d   : >> { %v7751_v22 = vmul.f32 %v14899_v25, %v7750_v17  ;;  %vm7833_vm5 = vcmp.eq.f32.partialorder %v7832_v35, 8.507059e+37  ;;  %v7835_v17 = vor.u32 1.1754944e-38, %v7834_v18  ;;  %v7802_v33 = vand.u32 2147483647, %v14906_v15 }
0x102e   : >> { %v7827_v45 = vadd.f32 %v14882_v3, %v7826_v42  ;;  %v14963_v30 = vsub.f32 %v7852_v54, %v14943_v2  ;;  %7888 = vmatpush.xpose.msrb.mxu0 %v14943_v2  ;;  %7953 = vmatpush.xpose.msrb.mxu1 %v7952_v48  ;;  %v7791_v42 = vsel %vm14929_vm15, %v7790_v14, %v7786_v21  ;;  %v7759_v54 = vand.u32 2147483648, %v14856_v55 }
0x102f   : >> { %v14947_v50 = vpop.eup %9257  ;;  %8194 = vmatpush.xpose.msra.mxu2 %v7956_v5  ;;  %8273 = vmatpush.xpose.msra.mxu3 %v14943_v2  ;;  %v7804_v36 = vand.u32 2147483648, %v14906_v15  ;;  %vm14979_vm6 = vcmp.eq.f32.partialorder %v7757_v19, 8.507059e+37  ;;  %v7792_v21 = vmul.f32 %v14781_v16, %v7791_v42  ;;  %v7752_v5 = vadd.f32 %v14899_v25, %v7751_v22 }
0x1030   : >> { %v14958_v10 = vpop.xlane.xlu0 %7627  ;;  %v14960_v43 = vpop.xlane.xlu1 %7621  ;;  %v7831_v27 = vsel %vm14951_vm3, %v14882_v3, %v7827_v45  ;;  %v7794_v58 = vmul.f32 %v14947_v50, %v14906_v15  ;;  %v7958_v45 = vand.u32 4294901760, %v7957_v51  ;;  %v7962_v24 = vand.u32 4294901760, %v14963_v30 }
0x1031   : >> { %9259 = vrcp.f32 %v14958_v10  ;;  %v7836_v35 = vsel %vm7833_vm5, %v7835_v17, %v7831_v27  ;;  %vm7754_vm7 = vweird.f32 %v14899_v25  ;;  %v7760_v60 = vor.u32 1.1754944e-38, %v7759_v54 }
0x1032   : >> { %9261 = vrcp.f32 %v14960_v43  ;;  %v7795_v3 = vsub.f32 1.0, %v7794_v58  ;;  %7959 = vmatpush.xpose.msrb.mxu1 %v7958_v45  ;;  %v7837_v14 = vmul.f32 %v14788_v4, %v7836_v35  ;;  %vm7798_vm8 = vweird.f32 %v14906_v15  ;;  %vm15007_vm11 = vmor %vm7753_vm4, %vm7754_vm7 }
0x1033   : >> { %vm7799_vm9 = vweird.f32 %v14947_v50  ;;  %8198 = vmatpush.xpose.msra.mxu2 %v7962_v24  ;;  %v7963_v51 = vsub.f32 %v14963_v30, %v7962_v24  ;;  %vm14995_vm10 = vcmp.eq.f32.partialorder %v7802_v33, 8.507059e+37  ;;  %v7805_v27 = vor.u32 1.1754944e-38, %v7804_v36 }
0x1034   : >> { %v7796_v18 = vmul.f32 %v14947_v50, %v7795_v3  ;;  %v14999_v58 = vand.u32 4294901760, %v7837_v14  ;;  %v7772_v54 = vand.u32 2147483647, %v14958_v10  ;;  %v15018_v45 = vand.u32 4294901760, %v7792_v21  ;;  %vm15027_vm12 = vmor %vm7798_vm8, %vm7799_vm9 }
0x1035   : >> { %v7964_v3 = vand.u32 4294901760, %v7963_v51  ;;  %v7756_v55 = vsel %vm15007_vm11, %v14899_v25, %v7752_v5  ;;  %v7774_v35 = vand.u32 2147483648, %v14958_v10  ;;  %vm7768_vm0 = vweird.f32 %v14958_v10 }
0x1036   : >> { %v7797_v16 = vadd.f32 %v14947_v50, %v7796_v18  ;;  %7890 = vmatpush.xpose.msrb.mxu0 %v14999_v58  ;;  %8275 = vmatpush.xpose.msra.mxu3 %v14999_v58  ;;  %v7727_v5 = vand.u32 2147483647, %v14960_v43  ;;  %vm7723_vm13 = vweird.f32 %v14960_v43  ;;  %v7729_v42 = vand.u32 2147483648, %v14960_v43 }
0x1037   : >> { %v14992_v19 = vpop.eup %9259  ;;  %7965 = vmatpush.xpose.msrb.mxu1 %v7964_v3  ;;  %vm15047_vm15 = vcmp.eq.f32.partialorder %v7772_v54, 8.507059e+37  ;;  %v15056_v3 = vsub.f32 %v7837_v14, %v14999_v58  ;;  %v16760_v24 = vand.u32 4294901760, %v14840_v62 }
0x1038   : >> { %v15001_v4 = vpop.eup %9261  ;;  %v7764_v17 = vmul.f32 %v14992_v19, %v14958_v10  ;;  %v15014_v33 = vpop.xlane.xlu0 %7623  ;;  %v7801_v25 = vsel %vm15027_vm12, %v14947_v50, %v7797_v16  ;;  %vm7769_vm14 = vweird.f32 %v14992_v19  ;;  %v7761_v50 = vsel %vm14979_vm6, %v7760_v60, %v7756_v55 }
0x1039   : >> { %v15016_v36 = vpop.xlane.xlu1 %7617  ;;  %v7719_v18 = vmul.f32 %v15001_v4, %v14960_v43  ;;  %9263 = vrcp.f32 %v15014_v33  ;;  %v7775_v16 = vor.u32 1.1754944e-38, %v7774_v35  ;;  %vm15062_vm1 = vcmp.eq.f32.partialorder %v7727_v5, 8.507059e+37  ;;  %vm15074_vm2 = vmor %vm7768_vm0, %vm7769_vm14 }
0x103a   : >> { %v7765_v15 = vsub.f32 1.0, %v7764_v17  ;;  %9265 = vrcp.f32 %v15016_v36  ;;  %7892 = vmatpush.xpose.msrb.mxu0 %v14834_v57  ;;  %8277 = vmatpush.xpose.msra.mxu3 %v14834_v57  ;;  %v15068_v60 = vsub.f32 %v7792_v21, %v15018_v45  ;;  %vm7724_vm3 = vweird.f32 %v15001_v4 }
0x103b   : >> { %v7720_v51 = vsub.f32 1.0, %v7719_v18  ;;  %v7806_v18 = vsel %vm14995_vm10, %v7805_v27, %v7801_v25  ;;  %v7968_v22 = vand.u32 4294901760, %v15056_v3  ;;  %v7762_v27 = vmul.f32 %v14786_v49, %v7761_v50  ;;  %vm15107_vm5 = vmor %vm7723_vm13, %vm7724_vm3 }
0x103c   : >> { %v7766_v13 = vmul.f32 %v14992_v19, %v7765_v15  ;;  %v7807_v48 = vmul.f32 %v14794_v32, %v7806_v18  ;;  %vm7738_vm4 = vweird.f32 %v15014_v33  ;;  %vm7693_vm6 = vweird.f32 %v15016_v36 }
0x103d   : >> { %v7721_v17 = vmul.f32 %v15001_v4, %v7720_v51  ;;  %v7742_v51 = vand.u32 2147483647, %v15014_v33  ;;  %8202 = vmatpush.xpose.msra.mxu2 %v7968_v22  ;;  %v7969_v49 = vsub.f32 %v15056_v3, %v7968_v22 }
0x103e   : >> { %v7767_v54 = vadd.f32 %v14992_v19, %v7766_v13  ;;  %v7730_v13 = vor.u32 1.1754944e-38, %v7729_v42  ;;  %v15087_v35 = vand.u32 4294901760, %v7807_v48  ;;  %v7744_v42 = vand.u32 2147483648, %v15014_v33 }
0x103f   : >> { %v15070_v55 = vpop.eup %9263  ;;  %v7722_v21 = vadd.f32 %v15001_v4, %v7721_v17  ;;  %v7986_v17 = vand.u32 4294901760, %v15068_v60  ;;  %v7970_v14 = vand.u32 4294901760, %v7969_v49  ;;  %vm15124_vm8 = vcmp.eq.f32.partialorder %v7742_v51, 8.507059e+37 }
0x1040   : >> { %v7771_v32 = vsel %vm15074_vm2, %v14992_v19, %v7767_v54  ;;  %v7734_v10 = vmul.f32 %v15070_v55, %v15014_v33  ;;  %v15089_v25 = vpop.xlane.xlu0 %7619  ;;  %v15091_v5 = vpop.eup %9265  ;;  %7894 = vmatpush.xpose.msrb.mxu0 %v15087_v35  ;;  %8279 = vmatpush.xpose.msra.mxu3 %v15087_v35  ;;  %v7697_v54 = vand.u32 2147483647, %v15016_v36  ;;  %v15114_v22 = vsub.f32 %v7807_v48, %v15087_v35 }
0x1041   : >> { %9267 = vrcp.f32 %v15089_v25  ;;  %v7689_v50 = vmul.f32 %v15091_v5, %v15016_v36  ;;  %v7726_v31 = vsel %vm15107_vm5, %v15001_v4, %v7722_v21  ;;  %vm7739_vm7 = vweird.f32 %v15070_v55  ;;  %7971 = vmatpush.xpose.msrb.mxu1 %v7970_v14  ;;  %8206 = vmatpush.xpose.msra.mxu2 %v16760_v24 }
0x1042   : >> { %v7735_v19 = vsub.f32 1.0, %v7734_v10  ;;  %v7776_v10 = vsel %vm15047_vm15, %v7775_v16, %v7771_v32  ;;  %v7745_v48 = vor.u32 1.1754944e-38, %v7744_v42  ;;  %v7980_v16 = vand.u32 4294901760, %v15114_v22  ;;  %vm15150_vm9 = vmor %vm7738_vm4, %vm7739_vm7 }
0x1043   : >> { %v7690_v61 = vsub.f32 1.0, %v7689_v50  ;;  %v7777_v6 = vmul.f32 %v14799_v38, %v7776_v10  ;;  %v15137_v21 = vand.u32 4294901760, %v7762_v27  ;;  %v7699_v42 = vand.u32 2147483648, %v15016_v36 }
0x1044   : >> { %v7736_v43 = vmul.f32 %v15070_v55, %v7735_v19  ;;  %7896 = vmatpush.xpose.msrb.mxu0 %v15018_v45  ;;  %8281 = vmatpush.xpose.msra.mxu3 %v15018_v45  ;;  %v7712_v49 = vand.u32 2147483647, %v15089_v25  ;;  %v7981_v19 = vsub.f32 %v15114_v22, %v7980_v16  ;;  %v7731_v50 = vsel %vm15062_vm1, %v7730_v13, %v7726_v31 }
0x1045   : >> { %v7691_v32 = vmul.f32 %v15091_v5, %v7690_v61  ;;  %v15135_v38 = vand.u32 4294901760, %v7777_v6  ;;  %vm7694_vm10 = vweird.f32 %v15091_v5  ;;  %vm15155_vm11 = vcmp.eq.f32.partialorder %v7697_v54, 8.507059e+37  ;;  %8210 = vmatpush.xpose.msra.mxu2 %v7980_v16 }
0x1046   : >> { %v7737_v4 = vadd.f32 %v15070_v55, %v7736_v43  ;;  %v7714_v15 = vand.u32 2147483648, %v15089_v25  ;;  %v16765_v54 = vand.u32 4294901760, %v14874_v0  ;;  %v7982_v43 = vand.u32 4294901760, %v7981_v19  ;;  %vm15190_vm13 = vmor %vm7693_vm6, %vm7694_vm10 }
0x1047   : >> { %v15139_v51 = vpop.eup %9267  ;;  %v7692_v10 = vadd.f32 %v15091_v5, %v7691_v32  ;;  %v15177_v40 = vsub.f32 %v7762_v27, %v15137_v21  ;;  %vm7708_vm12 = vweird.f32 %v15089_v25  ;;  %vm15181_vm0 = vcmp.eq.f32.partialorder %v7712_v49, 8.507059e+37 }
0x1048   : >> { %v7704_v14 = vmul.f32 %v15139_v51, %v15089_v25  ;;  %v15162_v31 = vpop.xlane.xlu0 %7615  ;;  %v15164_v13 = vpop.xlane.xlu1 %7613  ;;  %v7741_v33 = vsel %vm15150_vm9, %v15070_v55, %v7737_v4  ;;  %7977 = vmatpush.xpose.msrb.mxu1 %v16765_v54  ;;  %7898 = vmatpush.xpose.msrb.mxu0 %v15135_v38  ;;  %v7732_v55 = vmul.f32 %v14801_v52, %v7731_v50  ;;  %v7700_v4 = vor.u32 1.1754944e-38, %v7699_v42 }
0x1049   : >> { %9269 = vrcp.f32 %v15162_v31  ;;  %8283 = vmatpush.xpose.msra.mxu3 %v15135_v38  ;;  %v7987_v16 = vsub.f32 %v15068_v60, %v7986_v17  ;;  %vm7709_vm14 = vweird.f32 %v15139_v51  ;;  %v15197_v52 = vsub.f32 %v7777_v6, %v15135_v38  ;;  %8214 = vmatpush.xpose.msra.mxu2 %v7986_v17 }
0x104a   : >> { %v7705_v24 = vsub.f32 1.0, %v7704_v14  ;;  %9271 = vrcp.f32 %v15164_v13  ;;  %v7746_v42 = vsel %vm15124_vm8, %v7745_v48, %v7741_v33  ;;  %v7696_v49 = vsel %vm15190_vm13, %v15091_v5, %v7692_v10  ;;  %vm15217_vm15 = vmor %vm7708_vm12, %vm7709_vm14 }
0x104b   : >> { %v7715_v19 = vor.u32 1.1754944e-38, %v7714_v15  ;;  %v7682_v36 = vand.u32 2147483647, %v15162_v31  ;;  %v7747_v50 = vmul.f32 %v14806_v1, %v7746_v42  ;;  %v7992_v6 = vand.u32 4294901760, %v15197_v52 }
0x104c   : >> { %v7706_v27 = vmul.f32 %v15139_v51, %v7705_v24  ;;  %7983 = vmatpush.xpose.msrb.mxu1 %v7982_v43  ;;  %7900 = vmatpush.xpose.msrb.mxu0 %v15137_v21  ;;  %v7998_v41 = vand.u32 4294901760, %v15177_v40  ;;  %v15211_v48 = vand.u32 4294901760, %v7732_v55  ;;  %vm7678_vm1 = vweird.f32 %v15162_v31 }
0x104d   : >> { %8285 = vmatpush.xpose.msra.mxu3 %v15137_v21  ;;  %v7684_v1 = vand.u32 2147483648, %v15162_v31  ;;  %v7988_v14 = vand.u32 4294901760, %v7987_v16  ;;  %v15223_v15 = vand.u32 4294901760, %v7747_v50  ;;  %v7993_v25 = vsub.f32 %v15197_v52, %v7992_v6  ;;  %8218 = vmatpush.xpose.msra.mxu2 %v7992_v6 }
0x104e   : >> { %v7707_v61 = vadd.f32 %v15139_v51, %v7706_v27  ;;  %v7701_v24 = vsel %vm15155_vm11, %v7700_v4, %v7696_v49  ;;  %vm15236_vm2 = vcmp.eq.f32.partialorder %v7682_v36, 8.507059e+37  ;;  %vm7663_vm3 = vweird.f32 %v15164_v13 }
0x104f   : >> { %v9270_v5 = vpop.eup %9269  ;;  %v7994_v27 = vand.u32 4294901760, %v7993_v25  ;;  %v7999_v18 = vsub.f32 %v15177_v40, %v7998_v41  ;;  %v15248_v4 = vsub.f32 %v7732_v55, %v15211_v48  ;;  %v15251_v49 = vsub.f32 %v7747_v50, %v15223_v15 }
0x1050   : >> { %v15225_v33 = vpop.eup %9271  ;;  %v7711_v10 = vsel %vm15217_vm15, %v15139_v51, %v7707_v61  ;;  %v7674_v54 = vmul.f32 %v9270_v5, %v15162_v31  ;;  %v15232_v43 = vpop.xlane.xlu0 %7611  ;;  %7989 = vmatpush.xpose.msrb.mxu1 %v7988_v14  ;;  %7902 = vmatpush.xpose.msrb.mxu0 %v15223_v15  ;;  %v7702_v61 = vmul.f32 %v14808_v7, %v7701_v24  ;;  %vm7679_vm4 = vweird.f32 %v9270_v5 }
0x1051   : >> { %v7659_v16 = vmul.f32 %v15225_v33, %v15164_v13  ;;  %9273 = vrcp.f32 %v15232_v43  ;;  %8287 = vmatpush.xpose.msra.mxu3 %v15223_v15  ;;  %v7716_v36 = vsel %vm15181_vm0, %v7715_v19, %v7711_v10  ;;  %v7667_v17 = vand.u32 2147483647, %v15164_v13  ;;  %8222 = vmatpush.xpose.msra.mxu2 %v7998_v41  ;;  %vm15269_vm6 = vmor %vm7678_vm1, %vm7679_vm4 }
0x1052   : >> { %v7675_v51 = vsub.f32 1.0, %v7674_v54  ;;  %v7717_v14 = vmul.f32 %v14814_v28, %v7716_v36  ;;  %vm7664_vm5 = vweird.f32 %v15225_v33  ;;  %v7669_v55 = vand.u32 2147483648, %v15164_v13 }
0x1053   : >> { %v7660_v42 = vsub.f32 1.0, %v7659_v16  ;;  %v8004_v50 = vand.u32 4294901760, %v15251_v49  ;;  %v7685_v19 = vor.u32 1.1754944e-38, %v7684_v1  ;;  %v8000_v7 = vand.u32 4294901760, %v7999_v18  ;;  %vm15284_vm7 = vmor %vm7663_vm3, %vm7664_vm5 }
0x1054   : >> { %v7676_v6 = vmul.f32 %v9270_v5, %v7675_v51  ;;  %7995 = vmatpush.xpose.msrb.mxu1 %v7994_v27  ;;  %7904 = vmatpush.xpose.msrb.mxu0 %v15211_v48  ;;  %v15264_v10 = vand.u32 4294901760, %v7717_v14  ;;  %v8010_v1 = vand.u32 4294901760, %v15248_v4  ;;  %v15276_v16 = vand.u32 4294901760, %v7702_v61 }
0x1055   : >> { %v7661_v54 = vmul.f32 %v15225_v33, %v7660_v42  ;;  %8289 = vmatpush.xpose.msra.mxu3 %v15211_v48  ;;  %v8005_v24 = vsub.f32 %v15251_v49, %v8004_v50  ;;  %vm15288_vm8 = vcmp.eq.f32.partialorder %v7667_v17, 8.507059e+37  ;;  %v7670_v36 = vor.u32 1.1754944e-38, %v7669_v55  ;;  %8226 = vmatpush.xpose.msra.mxu2 %v8004_v50 }
0x1056   : >> { %v7677_v0 = vadd.f32 %v9270_v5, %v7676_v6  ;;  %v15294_v42 = vsub.f32 %v7717_v14, %v15264_v10  ;;  %v8011_v55 = vsub.f32 %v15248_v4, %v8010_v1  ;;  %v15309_v50 = vsub.f32 %v7702_v61, %v15276_v16 }
0x1057   : >> { %v9274_v28 = vpop.eup %9273  ;;  %v7662_v41 = vadd.f32 %v15225_v33, %v7661_v54  ;;  %v8006_v13 = vand.u32 4294901760, %v8005_v24  ;;  %v7652_v54 = vand.u32 2147483647, %v15232_v43  ;;  %v16781_v24 = vld [vmem:[#allocation120_spill] sm:$0xff]  ;;  %vm7648_vm10 = vweird.f32 %v15232_v43 }
0x1058   : >> { %v7681_v51 = vsel %vm15269_vm6, %v9270_v5, %v7677_v0  ;;  %v7644_v18 = vmul.f32 %v9274_v28, %v15232_v43  ;;  %8001 = vmatpush.xpose.msrb.mxu1 %v8000_v7  ;;  %7906 = vmatpush.xpose.msrb.mxu0 %v15264_v10  ;;  %v8016_v14 = vand.u32 4294901760, %v15294_v42  ;;  %vm7649_vm9 = vweird.f32 %v9274_v28 }
0x1059   : >> { %v7666_v5 = vsel %vm15284_vm7, %v15225_v33, %v7662_v41  ;;  %v7686_v6 = vsel %vm15236_vm2, %v7685_v19, %v7681_v51  ;;  %8291 = vmatpush.xpose.msra.mxu3 %v15264_v10  ;;  %v7654_v33 = vand.u32 2147483648, %v15232_v43  ;;  %8230 = vmatpush.xpose.msra.mxu2 %v8010_v1  ;;  %v16780_v41 = vld [vmem:[#allocation58_spill] sm:$0xff]  ;;  %vm7650_vm11 = vmor %vm7648_vm10, %vm7649_vm9  ;;  %v8022_v1 = vand.u32 4294901760, %v15309_v50 }
0x105a   : >> { %v7645_v17 = vsub.f32 1.0, %v7644_v18  ;;  %v7687_v0 = vmul.f32 %v14818_v37, %v7686_v6  ;;  %v7671_v32 = vsel %vm15288_vm8, %v7670_v36, %v7666_v5  ;;  %v8017_v37 = vsub.f32 %v15294_v42, %v8016_v14  ;;  %v16782_v43 = vld [vmem:[#allocation134_spill] sm:$0xff] }
0x105b   : >> { %v7672_v25 = vmul.f32 %v14820_v34, %v7671_v32  ;;  %v1395_v51 = vadd.f32 %v16781_v24, %v16780_v41  ;;  %v7655_v27 = vor.u32 1.1754944e-38, %v7654_v33  ;;  %v8012_v34 = vand.u32 4294901760, %v8011_v55  ;;  %v16783_v33 = vld [vmem:[#allocation119_spill] sm:$0xff]  ;;  %v16785_v24 = vld [vmem:[#allocation61_spill] sm:$0xff] }
0x105c   : >> { %v7646_v19 = vmul.f32 %v9274_v28, %v7645_v17  ;;  %v15313_v7 = vand.u32 4294901760, %v7687_v0  ;;  %8007 = vmatpush.xpose.msrb.mxu1 %v8006_v13  ;;  %7908 = vmatpush.xpose.msrb.mxu0 %v15276_v16  ;;  %v15330_v5 = vsub.f32 %v14867_v29, %v14885_v56  ;;  %v2135_v36 = vadd.f32 %v16782_v43, %v14888_v59  ;;  %v16787_v43 = vld [vmem:[#allocation136_spill] sm:$0xff] }
0x105d   : >> { %8293 = vmatpush.xpose.msra.mxu3 %v15276_v16  ;;  %v15326_v18 = vand.u32 4294901760, %v7672_v25  ;;  %vm7653_vm12 = vcmp.eq.f32.partialorder %v7652_v54, 8.507059e+37  ;;  %8234 = vmatpush.xpose.msra.mxu2 %v8016_v14  ;;  %v8018_v6 = vand.u32 4294901760, %v8017_v37  ;;  %v1703_v55 = vadd.f32 %v16783_v33, %v1395_v51  ;;  %v16784_v14 = vld [vmem:[#allocation135_spill] sm:$0xff]  ;;  %v16786_v51 = vld [vmem:[#allocation122_spill] sm:$0xff]  ;;  %v16788_v33 = vld [vmem:[#allocation121_spill] sm:$0xff] }
0x105e   : >> { %v7647_v31 = vadd.f32 %v9274_v28, %v7646_v19  ;;  %v15323_v61 = vsub.f32 %v7687_v0, %v15313_v7  ;;  %v8023_v32 = vsub.f32 %v15309_v50, %v8022_v1  ;;  %v7923_v54 = vand.u32 4294901760, %v2135_v36 }
0x105f   : >> { %v15341_v59 = vsub.f32 %v7672_v25, %v15326_v18  ;;  %v1926_v19 = vadd.f32 %v16784_v14, %v1703_v55  ;;  %v16789_v14 = vld [vmem:[#allocation137_spill] sm:$0xff] }
0x1060   : >> { %v7651_v13 = vsel %vm7650_vm11, %v9274_v28, %v7647_v31  ;;  %8013 = vmatpush.xpose.msrb.mxu1 %v8012_v34  ;;  %v8028_v17 = vand.u32 4294901760, %v15323_v61  ;;  %7910 = vmatpush.xpose.msrb.mxu0 %v15313_v7  ;;  %v7917_v28 = vand.u32 4294901760, %v15330_v5  ;;  %v1400_v31 = vadd.f32 %v16786_v51, %v16785_v24 }
0x1061   : >> { %v7656_v0 = vsel %vm7653_vm12, %v7655_v27, %v7651_v13  ;;  %8295 = vmatpush.xpose.msra.mxu3 %v15313_v7  ;;  %8238 = vmatpush.xpose.msra.mxu2 %v8022_v1  ;;  %v8024_v25 = vand.u32 4294901760, %v8023_v32  ;;  %v8034_v27 = vand.u32 4294901760, %v15341_v59  ;;  %v15359_v1 = vsub.f32 %v2135_v36, %v7923_v54 }
0x1062   : >> { %v7657_v29 = vmul.f32 %v14824_v47, %v7656_v0  ;;  %v8029_v41 = vsub.f32 %v15323_v61, %v8028_v17  ;;  %v7918_v34 = vsub.f32 %v15330_v5, %v7917_v28  ;;  %v2139_v13 = vadd.f32 %v16787_v43, %v1926_v19 }
0x1063   : >> { %v1709_v55 = vadd.f32 %v16788_v33, %v1400_v31  ;;  %v7925_v19 = vand.u32 4294901760, %v15359_v1 }
0x1064   : >> { %v15345_v37 = vand.u32 4294901760, %v7657_v29  ;;  %8019 = vmatpush.xpose.msrb.mxu1 %v8018_v6  ;;  %7912 = vmatpush.xpose.msrb.mxu0 %v15326_v18  ;;  %v8030_v6 = vand.u32 4294901760, %v8029_v41  ;;  %v7919_v32 = vand.u32 4294901760, %v7918_v34  ;;  %v7931_v36 = vand.u32 4294901760, %v2139_v13 }
0x1065   : >> { %8297 = vmatpush.xpose.msra.mxu3 %v15326_v18  ;;  %8242 = vmatpush.xpose.msra.mxu2 %v8028_v17  ;;  %v1930_v24 = vadd.f32 %v16789_v14, %v1709_v55 }
0x1066   : >> { %v15353_v47 = vsub.f32 %v7657_v29, %v15345_v37  ;;  %v8035_v29 = vsub.f32 %v15341_v59, %v8034_v27  ;;  %v15373_v51 = vsub.f32 %v2139_v13, %v7931_v36 }
0x1068   : >> { %8025 = vmatpush.xpose.msrb.mxu1 %v8024_v25  ;;  %v8040_v0 = vand.u32 4294901760, %v15353_v47  ;;  %7914 = vmatpush.xpose.msrb.mxu0 %v15345_v37  ;;  %v8036_v41 = vand.u32 4294901760, %v8035_v29  ;;  %v7926_v25 = vsub.f32 %v15359_v1, %v7925_v19 }
0x1069   : >> { %8299 = vmatpush.xpose.msra.mxu3 %v15345_v37  ;;  %8246 = vmatpush.xpose.msra.mxu2 %v8034_v27 }
0x106a   : >> { %v8041_v17 = vsub.f32 %v15353_v47, %v8040_v0  ;;  %v7927_v43 = vand.u32 4294901760, %v7926_v25 }
0x106b   : >> { %7920 = vmatmul.f32.vlgmr.msrb.gmra.mxu0 %v7919_v32  ;;  %v16791_v32 = vld [vmem:[#allocation162_spill] sm:$0xff] }
0x106c   : >> { %8063 = vmatpush.xpose.msra.mxu0 %v14913_v39  ;;  %8031 = vmatpush.xpose.msrb.mxu1 %v8030_v6  ;;  %v16790_v39 = vld [vmem:[#allocation138_spill] sm:$0xff]  ;;  %v8042_v34 = vand.u32 4294901760, %v8041_v17  ;;  %v7933_v6 = vand.u32 4294901760, %v15373_v51 }
0x106d   : >> { %8301 = vmatmul.f32.vlgmr.msra.gmra.mxu3 %v14885_v56  ;;  %v2143_v31 = vadd.f32 %v16790_v39, %v1930_v24  ;;  %8250 = vmatpush.xpose.msra.mxu2 %v8040_v0  ;;  %v6734_v24 = vadd.f32 %v14565_v11, %v14580_v44  ;;  %v16799_v44 = vld [vmem:[#allocation154_spill] sm:$0xff] }
0x106e   : >> { %v7934_v13 = vsub.f32 %v15373_v51, %v7933_v6 }
0x106f   : >> { %v7939_v27 = vand.u32 4294901760, %v2143_v31 }
0x1070   : >> { %8066 = vmatpush.xpose.msra.mxu0 %v14897_v12  ;;  %8037 = vmatpush.xpose.msrb.mxu1 %v8036_v41  ;;  %v16793_v41 = vld [vmem:[#allocation161_spill] sm:$0xff] }
0x1071   : >> { %8252 = vmatmul.f32.vlgmr.msra.gmra.mxu2 %v14885_v56  ;;  %v7940_v12 = vsub.f32 %v2143_v31, %v7939_v27  ;;  %v16795_v31 = vld [vmem:[#allocation164_spill] sm:$0xff] }
0x1073   : >> { %7928 = vmatmul.f32.gmra.mxu0 %v7927_v43  ;;  %v7941_v0 = vand.u32 4294901760, %v7940_v12 }
0x1074   : >> { %8069 = vmatpush.xpose.msra.mxu0 %v14963_v30  ;;  %8043 = vmatpush.xpose.msrb.mxu1 %v8042_v34  ;;  %v7935_v30 = vand.u32 4294901760, %v7934_v13  ;;  %v16796_v13 = vld [vmem:[#allocation170_spill] sm:$0xff] }
0x1075   : >> { %8305 = vmatmul.f32.gmra.mxu3 %v7923_v54 }
0x1077   : >> { %8045 = vmatmul.f32.vlgmr.msrb.gmra.mxu1 %v14885_v56 }
0x1078   : >> { %8131 = vmatpush.xpose.msra.mxu1 %v14894_v20  ;;  %8072 = vmatpush.xpose.msra.mxu0 %v15056_v3  ;;  %v7942_v20 = vsub.f32 %v7940_v12, %v7941_v0 }
0x1079   : >> { %8256 = vmatmul.f32.gmra.mxu2 %v7923_v54 }
0x107a   : >> { %v7943_v56 = vand.u32 4294901760, %v7942_v20  ;;  %v16798_v20 = vld [vmem:[#allocation157_spill] sm:$0xff] }
0x107b   : >> { %7936 = vmatmul.f32.gmra.mxu0 %v7935_v30  ;;  %v16797_v30 = vld [vmem:[#allocation145_spill] sm:$0xff] }
0x107c   : >> { %8133 = vmatpush.xpose.msra.mxu1 %v14869_v26  ;;  %8075 = vmatpush.xpose.msra.mxu0 %v14840_v62 }
0x107d   : >> { %8309 = vmatmul.f32.gmra.mxu3 %v7931_v36 }
0x107f   : >> { %8049 = vmatmul.f32.gmra.mxu1 %v7923_v54 }
0x1080   : >> { %8135 = vmatpush.xpose.msra.mxu1 %v14943_v2  ;;  %8078 = vmatpush.xpose.msra.mxu0 %v15114_v22 }
0x1081   : >> { %8260 = vmatmul.f32.gmra.mxu2 %v7931_v36 }
0x1083   : >> { %7944 = vmatmul.f32.gmra.mxu0 %v7943_v56 }
0x1084   : >> { %8137 = vmatpush.xpose.msra.mxu1 %v14999_v58  ;;  %8081 = vmatpush.xpose.msra.mxu0 %v15068_v60 }
0x1085   : >> { %8313 = vmatmul.f32.gmra.mxu3 %v7939_v27 }
0x1087   : >> { %8053 = vmatmul.f32.gmra.mxu1 %v7931_v36  ;;  %v16792_v36 = vld [vmem:[#allocation144_spill] sm:$0xff] }
0x1088   : >> { %8139 = vmatpush.xpose.msra.mxu1 %v14834_v57  ;;  %8084 = vmatpush.xpose.msra.mxu0 %v15197_v52  ;;  %v4995_v14 = vadd.f32 %v16792_v36, %v16791_v32  ;;  %v16813_v32 = vld [vmem:[#allocation158_spill] sm:$0xff] }
0x1089   : >> { %8264 = vmatmul.f32.gmra.mxu2 %v7939_v27 }
0x108a   : >> { %v5064_v25 = vadd.f32 %v16795_v31, %v4995_v14  ;;  %v16814_v14 = vld [vmem:[#allocation44_spill] sm:$0xff] }
0x108c   : >> { %8141 = vmatpush.xpose.msra.mxu1 %v15087_v35  ;;  %8087 = vmatpush.xpose.msra.mxu0 %v15177_v40  ;;  %v5121_v56 = vadd.f32 %v16799_v44, %v5064_v25  ;;  %v16816_v25 = vld [vmem:[#allocation39_spill] sm:$0xff] }
0x108f   : >> { %8057 = vmatmul.f32.gmra.mxu1 %v7939_v27  ;;  %v6730_v27 = vadd.f32 %v14558_v46, %v14572_v63  ;;  %v16800_v63 = vld [vmem:[#allocation160_spill] sm:$0xff] }
0x1090   : >> { %8143 = vmatpush.xpose.msra.mxu1 %v15018_v45  ;;  %8090 = vmatpush.xpose.msra.mxu0 %v15251_v49 }
0x1094   : >> { %8145 = vmatpush.xpose.msra.mxu1 %v15135_v38  ;;  %8093 = vmatpush.xpose.msra.mxu0 %v15248_v4 }
0x1098   : >> { %8147 = vmatpush.xpose.msra.mxu1 %v15137_v21  ;;  %8096 = vmatpush.xpose.msra.mxu0 %v15294_v42 }
0x109c   : >> { %8149 = vmatpush.xpose.msra.mxu1 %v15223_v15  ;;  %8099 = vmatpush.xpose.msra.mxu0 %v15309_v50 }
0x10a0   : >> { %8151 = vmatpush.xpose.msra.mxu1 %v15211_v48  ;;  %8102 = vmatpush.xpose.msra.mxu0 %v15323_v61 }
0x10a4   : >> { %8153 = vmatpush.xpose.msra.mxu1 %v15264_v10  ;;  %8105 = vmatpush.xpose.msra.mxu0 %v15341_v59 }
0x10a8   : >> { %8155 = vmatpush.xpose.msra.mxu1 %v15276_v16  ;;  %8108 = vmatpush.xpose.msra.mxu0 %v15353_v47 }
0x10ab   : >> { %8111 = vmatmul.f32.vlgmr.msra.gmra.mxu0 %v15330_v5 }
0x10ac   : >> { %8157 = vmatpush.xpose.msra.mxu1 %v15313_v7 }
0x10b0   : >> { %8159 = vmatpush.xpose.msra.mxu1 %v15326_v18 }
0x10b3   : >> { %8116 = vmatmul.f32.gmra.mxu0 %v15359_v1 }
0x10b4   : >> { %8161 = vmatpush.xpose.msra.mxu1 %v15345_v37 }
0x10b7   : >> { %8165 = vmatmul.f32.vlgmr.msra.gmra.mxu1 %v7917_v28 }
0x10bb   : >> { %8121 = vmatmul.f32.gmra.mxu0 %v15373_v51  ;;  %v16794_v51 = vld [vmem:[#allocation169_spill] sm:$0xff] }
0x10bc   : >> { %v4991_v39 = vadd.f32 %v16794_v51, %v16793_v41 }
0x10be   : >> { %v5059_v11 = vadd.f32 %v16798_v20, %v4991_v39  ;;  %v16815_v39 = vld [vmem:[#allocation155_spill] sm:$0xff] }
0x10bf   : >> { %8171 = vmatmul.f32.gmra.mxu1 %v7925_v19 }
0x10c3   : >> { %8126 = vmatmul.f32.gmra.mxu0 %v7940_v12 }
0x10c7   : >> { %8177 = vmatmul.f32.gmra.mxu1 %v7933_v6 }
0x10cf   : >> { %8183 = vmatmul.f32.gmra.mxu1 %v7941_v0  ;;  %v4987_v0 = vadd.f32 %v16797_v30, %v16796_v13 }
0x10e8   : >> { %v7921_v40 = vpop.f32.mrf.mxu0 }
0x10f0   : >> { %v7929_v57 = vpop.f32.mrf.mxu0  ;;  %v8302_v22 = vpop.f32.mrf.mxu3 }
0x10f4   : >> { %v8046_v62 = vpop.f32.mrf.mxu1  ;;  %v8253_v35 = vpop.f32.mrf.mxu2 }
0x10f5   : >> { %v8047_v10 = vadd.f32 %v8046_v62, %v7921_v40  ;;  %v6783_v62 = vadd.f32 %v14569_v53, %v6734_v24  ;;  %v16806_v53 = vld [vmem:[#allocation168_spill] sm:$0xff] }
0x10f8   : >> { %v7937_v26 = vpop.f32.mrf.mxu0  ;;  %v8306_v48 = vpop.f32.mrf.mxu3 }
0x10fc   : >> { %v8050_v2 = vpop.f32.mrf.mxu1  ;;  %v8257_v52 = vpop.f32.mrf.mxu2 }
0x10fd   : >> { %v8051_v49 = vadd.f32 %v8050_v2, %v7929_v57  ;;  %v6726_v57 = vadd.f32 %v14552_v9, %v14567_v8  ;;  %v16801_v2 = vld [vmem:[#allocation166_spill] sm:$0xff] }
0x1100   : >> { %v7945_v58 = vpop.f32.mrf.mxu0  ;;  %v8310_v54 = vpop.f32.mrf.mxu3 }
0x1104   : >> { %v8054_v45 = vpop.f32.mrf.mxu1  ;;  %v8261_v18 = vpop.f32.mrf.mxu2 }
0x1105   : >> { %v8055_v16 = vadd.f32 %v8054_v45, %v7937_v26  ;;  %v16802_v45 = vld [vmem:[#allocation156_spill] sm:$0xff] }
0x110c   : >> { %v8058_v60 = vpop.f32.mrf.mxu1  ;;  %v8265_v40 = vpop.f32.mrf.mxu2 }
0x110d   : >> { %v8059_v33 = vadd.f32 %v8058_v60, %v7945_v58  ;;  %v4983_v58 = vadd.f32 %v16801_v2, %v16800_v63  ;;  %v16803_v60 = vld [vmem:[#allocation143_spill] sm:$0xff] }
0x110e   : >> { %v16820_v2 = vld [vmem:[#allocation159_spill] sm:$0xff] }
0x1128   : >> { %v8112_v3 = vpop.f32.mrf.mxu0 }
0x1129   : >> { %v8113_v50 = vadd.f32 %v8112_v3, %v8047_v10  ;;  %v5054_v3 = vadd.f32 %v16802_v45, %v4987_v0  ;;  %v16817_v0 = vld [vmem:[#allocation163_spill] sm:$0xff] }
0x1130   : >> { %v8117_v38 = vpop.f32.mrf.mxu0 }
0x1131   : >> { %v8118_v42 = vadd.f32 %v8117_v38, %v8051_v49  ;;  %v16807_v49 = vld [vmem:[#allocation165_spill] sm:$0xff] }
0x1132   : >> { %v5109_v10 = vadd.f32 %v16807_v49, %v5054_v3 }
0x1134   : >> { %v8166_v21 = vpop.f32.mrf.mxu1  ;;  %v5194_v36 = vadd.f32 %v16813_v32, %v5109_v10 }
0x1135   : >> { %v8167_v59 = vadd.f32 %v8166_v21, %v8113_v50  ;;  %v8314_v21 = vpop.f32.mrf.mxu3  ;;  %v16809_v50 = vld [vmem:[#allocation107_spill] sm:$0xff] }
0x1136   : >> { %v5243_v20 = vadd.f32 %v16817_v0, %v5194_v36 }
0x1137   : >> { %v8254_v55 = vadd.f32 %v8253_v35, %v8167_v59  ;;  %v5115_v35 = vadd.f32 %v16803_v60, %v5059_v11 }
0x1138   : >> { %v8122_v4 = vpop.f32.mrf.mxu0 }
0x1139   : >> { %v8123_v7 = vadd.f32 %v8122_v4, %v8055_v16  ;;  %v8303_v43 = vadd.f32 %v8302_v22, %v8254_v55  ;;  %v16804_v22 = vld [vmem:[#allocation80_spill] sm:$0xff]  ;;  %v5049_v4 = vadd.f32 %v16806_v53, %v4983_v58  ;;  %v16808_v16 = vld [vmem:[#allocation42_spill] sm:$0xff]  ;;  %v15537_v53 = vand.u32 4294901760, %v5243_v20 }
0x113a   : >> { %v6722_v38 = vadd.f32 %v16804_v22, %v14560_v23 }
0x113c   : >> { %v8172_v15 = vpop.f32.mrf.mxu1 }
0x113d   : >> { %v8173_v61 = vadd.f32 %v8172_v15, %v8118_v42  ;;  %v15447_v15 = vand.u32 4294901760, %v8303_v43  ;;  %v5202_v42 = vadd.f32 %v16808_v16, %v5121_v56 }
0x113f   : >> { %v8258_v37 = vadd.f32 %v8257_v52, %v8173_v61  ;;  %v16805_v52 = vld [vmem:[#allocation66_spill] sm:$0xff]  ;;  %v5251_v24 = vadd.f32 %v16814_v14, %v5202_v42  ;;  %v8321_v42 = vld [vmem:[%s15814_s2] sm:$0xff]  ;;  %v16827_v14 = vld [vmem:[#allocation139_spill] sm:$0xff] }
0x1140   : >> { %v8127_v1 = vpop.f32.mrf.mxu0 }
0x1141   : >> { %v8307_v19 = vadd.f32 %v8306_v48, %v8258_v37  ;;  %v8128_v17 = vadd.f32 %v8127_v1, %v8059_v33  ;;  %v6779_v48 = vadd.f32 %v16805_v52, %v6730_v27  ;;  %v16812_v37 = vld [vmem:[#allocation68_spill] sm:$0xff]  ;;  %v15472_v33 = vsub.f32 %v8303_v43, %v15447_v15 }
0x1142   : >> { %v15507_v11 = vand.u32 4294901760, %v5251_v24 }
0x1143   : >> { %v15438_v26 = vand.u32 4294901760, %v8307_v19  ;;  %v15474_v55 = vand.u32 4294901760, %v6779_v48  ;;  %v8450_v30 = vand.u32 4294901760, %v15472_v33 }
0x1144   : >> { %v8178_v5 = vpop.f32.mrf.mxu1  ;;  %v15544_v10 = vsub.f32 %v5251_v24, %v15507_v11  ;;  %v16828_v24 = vld [vmem:[#allocation146_spill] sm:$0xff] }
0x1145   : >> { %v8179_v28 = vadd.f32 %v8178_v5, %v8123_v7  ;;  %v6775_v7 = vadd.f32 %v16809_v50, %v6726_v57  ;;  %v15459_v23 = vsub.f32 %v8307_v19, %v15438_v26  ;;  %v16810_v5 = vld [vmem:[#allocation167_spill] sm:$0xff]  ;;  %v15502_v13 = vsub.f32 %v6779_v48, %v15474_v55  ;;  %v16823_v48 = vld [vmem:[#allocation153_spill] sm:$0xff]  ;;  %v16824_v50 = vld [vmem:[#allocation140_spill] sm:$0xff] }
0x1146   : >> { %v5103_v59 = vadd.f32 %v16810_v5, %v5049_v4  ;;  %v8451_v60 = vsub.f32 %v15472_v33, %v8450_v30 }
0x1147   : >> { %v8262_v47 = vadd.f32 %v8261_v18, %v8179_v28  ;;  %v15461_v18 = vand.u32 4294901760, %v6783_v62  ;;  %v16811_v28 = vld [vmem:[#allocation37_spill] sm:$0xff]  ;;  %v15485_v41 = vand.u32 4294901760, %v6775_v7  ;;  %v8444_v51 = vand.u32 4294901760, %v15459_v23 }
0x1148   : >> { %v5190_v31 = vadd.f32 %v16815_v39, %v5103_v59  ;;  %v8462_v22 = vand.u32 4294901760, %v15502_v13  ;;  %v16826_v59 = vld [vmem:[#allocation151_spill] sm:$0xff]  ;;  %v3658_v39 = vadd.f32 %v16828_v24, %v16827_v14 }
0x1149   : >> { %v8311_v29 = vadd.f32 %v8310_v54, %v8262_v47  ;;  %v5198_v54 = vadd.f32 %v16811_v28, %v5115_v35  ;;  %v6771_v47 = vadd.f32 %v16812_v37, %v6722_v38  ;;  %v8445_v56 = vsub.f32 %v15459_v23, %v8444_v51  ;;  %v16821_v38 = vld [vmem:[#allocation141_spill] sm:$0xff] }
0x114a   : >> { %v5239_v58 = vadd.f32 %v16820_v2, %v5190_v31  ;;  %v8452_v37 = vand.u32 4294901760, %v8451_v60  ;;  %v16829_v31 = vld [vmem:[#allocation149_spill] sm:$0xff] }
0x114b   : >> { %v15429_v6 = vand.u32 4294901760, %v8311_v29  ;;  %v15491_v27 = vand.u32 4294901760, %v6771_v47  ;;  %v8446_v4 = vand.u32 4294901760, %v8445_v56  ;;  %v8480_v56 = vand.u32 4294901760, %v15544_v10 }
0x114c   : >> { %v8184_v34 = vpop.f32.mrf.mxu1 }
0x114d   : >> { %v8185_v12 = vadd.f32 %v8184_v34, %v8128_v17  ;;  %v15450_v8 = vsub.f32 %v8311_v29, %v15429_v6  ;;  %v15483_v17 = vsub.f32 %v6783_v62, %v15461_v18  ;;  %v5247_v34 = vadd.f32 %v16816_v25, %v5198_v54  ;;  %v16818_v62 = vld [vmem:[#allocation142_spill] sm:$0xff] }
0x114e   : >> { %v15529_v35 = vsub.f32 %v6771_v47, %v15491_v27  ;;  %v15555_v54 = vand.u32 4294901760, %v5239_v58  ;;  %v8463_v47 = vsub.f32 %v15502_v13, %v8462_v22 }
0x114f   : >> { %v8266_v46 = vadd.f32 %v8265_v40, %v8185_v12  ;;  %v8438_v29 = vand.u32 4294901760, %v15450_v8  ;;  %v15515_v40 = vsub.f32 %v6775_v7, %v15485_v41  ;;  %v8456_v57 = vand.u32 4294901760, %v15483_v17  ;;  %v16825_v7 = vld [vmem:[#allocation148_spill] sm:$0xff] }
0x1150   : >> { %v15522_v45 = vand.u32 4294901760, %v5247_v34  ;;  %v3662_v5 = vadd.f32 %v16825_v7, %v16824_v50  ;;  %v8474_v36 = vand.u32 4294901760, %v15529_v35  ;;  %v8464_v2 = vand.u32 4294901760, %v8463_v47 }
0x1151   : >> { %v8315_v9 = vadd.f32 %v8314_v21, %v8266_v46  ;;  %v8439_v12 = vsub.f32 %v15450_v8, %v8438_v29  ;;  %v16819_v46 = vld [vmem:[#allocation152_spill] sm:$0xff]  ;;  %v16822_v21 = vld [vmem:[#allocation150_spill] sm:$0xff]  ;;  %v8457_v49 = vsub.f32 %v15483_v17, %v8456_v57  ;;  %v8468_v16 = vand.u32 4294901760, %v15515_v40 }
0x1152   : >> { %v3670_v63 = vadd.f32 %v16819_v46, %v16818_v62  ;;  %v3666_v52 = vadd.f32 %v16822_v21, %v16821_v38  ;;  %v15562_v32 = vsub.f32 %v5247_v34, %v15522_v45  ;;  %v3711_v25 = vadd.f32 %v16829_v31, %v3662_v5  ;;  %v16830_v62 = vld [vmem:[#allocation147_spill] sm:$0xff] }
0x1153   : >> { %v15456_v61 = vand.u32 4294901760, %v8315_v9  ;;  %v8440_v3 = vand.u32 4294901760, %v8439_v12  ;;  %v15572_v12 = vand.u32 4294901760, %v8321_v42  ;;  %v8458_v34 = vand.u32 4294901760, %v8457_v49  ;;  %v8322_v49 = vld [vmem:[%s15814_s2 + $0x8] sm:$0xff] }
0x1154   : >> { %v3715_v28 = vadd.f32 %v16826_v59, %v3666_v52  ;;  %v8469_v0 = vsub.f32 %v15515_v40, %v8468_v16  ;;  %v3707_v46 = vadd.f32 %v16830_v62, %v3658_v39  ;;  %v8486_v60 = vand.u32 4294901760, %v15562_v32 }
0x1155   : >> { %v15467_v1 = vsub.f32 %v8315_v9, %v15456_v61  ;;  %8366 = vmatpush.msrb.mxu0 %v15456_v61  ;;  %8613 = vmatpush.msrb.mxu3 %v15456_v61  ;;  %v3719_v9 = vadd.f32 %v16823_v48, %v3670_v63  ;;  %v15595_v38 = vand.u32 4294901760, %v3711_v25  ;;  %v15600_v21 = vsub.f32 %v8321_v42, %v15572_v12 }
0x1156   : >> { %v15583_v63 = vand.u32 4294901760, %v3715_v28  ;;  %v8470_v48 = vand.u32 4294901760, %v8469_v0  ;;  %v15613_v50 = vand.u32 4294901760, %v3707_v46  ;;  %v8487_v7 = vsub.f32 %v15562_v32, %v8486_v60 }
0x1157   : >> { %8368 = vmatpush.msrb.mxu0 %v15429_v6  ;;  %8545 = vmatpush.msrb.mxu2 %v15467_v1  ;;  %v8432_v19 = vand.u32 4294901760, %v15467_v1  ;;  %v8399_v59 = vand.u32 4294901760, %v15600_v21 }
0x1158   : >> { %8615 = vmatpush.msrb.mxu3 %v15429_v6  ;;  %v15641_v39 = vsub.f32 %v3707_v46, %v15613_v50  ;;  %v8488_v31 = vand.u32 4294901760, %v8487_v7 }
0x1159   : >> { %8370 = vmatpush.msrb.mxu0 %v15438_v26  ;;  %8548 = vmatpush.msrb.mxu2 %v15450_v8  ;;  %v8433_v43 = vsub.f32 %v15467_v1, %v8432_v19  ;;  %v8400_v0 = vsub.f32 %v15600_v21, %v8399_v59  ;;  %v8324_v1 = vld [vmem:[%s15814_s2 + $0x18] sm:$0xff] }
0x115a   : >> { %8617 = vmatpush.msrb.mxu3 %v15438_v26 }
0x115b   : >> { %8372 = vmatpush.msrb.mxu0 %v15447_v15  ;;  %8551 = vmatpush.msrb.mxu2 %v15459_v23  ;;  %v8434_v44 = vand.u32 4294901760, %v8433_v43  ;;  %v15568_v43 = vand.u32 4294901760, %v3719_v9  ;;  %v8401_v7 = vand.u32 4294901760, %v8400_v0  ;;  %v8342_v23 = vld [vmem:[%s15815_s3 + $0x8] sm:$0xff] }
0x115c   : >> { %8619 = vmatpush.msrb.mxu3 %v15447_v15 }
0x115d   : >> { %8374 = vmatpush.msrb.mxu0 %v15461_v18  ;;  %8435 = vmatpush.msrb.mxu1 %v8434_v44  ;;  %v15579_v44 = vsub.f32 %v5243_v20, %v15537_v53  ;;  %v15592_v20 = vsub.f32 %v5239_v58, %v15555_v54  ;;  %v15603_v52 = vsub.f32 %v3719_v9, %v15568_v43 }
0x115e   : >> { %8554 = vmatpush.msrb.mxu2 %v15472_v33  ;;  %8621 = vmatpush.msrb.mxu3 %v15461_v18  ;;  %v8481_v58 = vsub.f32 %v15544_v10, %v8480_v56  ;;  %v15618_v9 = vsub.f32 %v3715_v28, %v15583_v63  ;;  %v15631_v28 = vsub.f32 %v3711_v25, %v15595_v38 }
0x115f   : >> { %8376 = vmatpush.msrb.mxu0 %v15474_v55  ;;  %8441 = vmatpush.msrb.mxu1 %v8440_v3  ;;  %v8475_v3 = vsub.f32 %v15529_v35, %v8474_v36  ;;  %v8498_v5 = vand.u32 4294901760, %v15592_v20  ;;  %v8504_v24 = vand.u32 4294901760, %v15603_v52 }
0x1160   : >> { %8557 = vmatpush.msrb.mxu2 %v15483_v17  ;;  %8623 = vmatpush.msrb.mxu3 %v15474_v55  ;;  %v8482_v47 = vand.u32 4294901760, %v8481_v58  ;;  %v8343_v17 = vld [vmem:[%s15815_s3 + $0x10] sm:$0xff] }
0x1161   : >> { %8378 = vmatpush.msrb.mxu0 %v15485_v41  ;;  %8447 = vmatpush.msrb.mxu1 %v8446_v4  ;;  %v8492_v4 = vand.u32 4294901760, %v15579_v44  ;;  %v8476_v42 = vand.u32 4294901760, %v8475_v3  ;;  %v8499_v25 = vsub.f32 %v15592_v20, %v8498_v5  ;;  %v16006_v3 = vand.u32 4294901760, %v15631_v28 }
0x1162   : >> { %8560 = vmatpush.msrb.mxu2 %v15502_v13  ;;  %8625 = vmatpush.msrb.mxu3 %v15485_v41 }
0x1163   : >> { %8380 = vmatpush.msrb.mxu0 %v15491_v27  ;;  %8453 = vmatpush.msrb.mxu1 %v8452_v37  ;;  %v15628_v37 = vand.u32 4294901760, %v8322_v49  ;;  %v8493_v14 = vsub.f32 %v15579_v44, %v8492_v4  ;;  %v8500_v58 = vand.u32 4294901760, %v8499_v25  ;;  %v8517_v25 = vsub.f32 %v15631_v28, %v16006_v3 }
0x1164   : >> { %8563 = vmatpush.msrb.mxu2 %v15515_v40  ;;  %8627 = vmatpush.msrb.mxu3 %v15491_v27 }
0x1165   : >> { %8382 = vmatpush.msrb.mxu0 %v15507_v11  ;;  %8459 = vmatpush.msrb.mxu1 %v8458_v34  ;;  %v8510_v34 = vand.u32 4294901760, %v15618_v9  ;;  %v15652_v62 = vsub.f32 %v8322_v49, %v15628_v37  ;;  %v8494_v46 = vand.u32 4294901760, %v8493_v14  ;;  %v8518_v3 = vand.u32 4294901760, %v8517_v25 }
0x1166   : >> { %8566 = vmatpush.msrb.mxu2 %v15529_v35  ;;  %8629 = vmatpush.msrb.mxu3 %v15507_v11 }
0x1167   : >> { %8384 = vmatpush.msrb.mxu0 %v15522_v45  ;;  %8465 = vmatpush.msrb.mxu1 %v8464_v2  ;;  %v8505_v2 = vsub.f32 %v15603_v52, %v8504_v24  ;;  %v8511_v49 = vsub.f32 %v15618_v9, %v8510_v34 }
0x1168   : >> { %8569 = vmatpush.msrb.mxu2 %v15544_v10  ;;  %8631 = vmatpush.msrb.mxu3 %v15522_v45 }
0x1169   : >> { %8386 = vmatpush.msrb.mxu0 %v15537_v53  ;;  %8471 = vmatpush.msrb.mxu1 %v8470_v48  ;;  %v8323_v48 = vld [vmem:[%s15814_s2 + $0x10] sm:$0xff]  ;;  %v8512_v0 = vand.u32 4294901760, %v8511_v49  ;;  %v15699_v49 = vand.u32 4294901760, %v8324_v1 }
0x116a   : >> { %8572 = vmatpush.msrb.mxu2 %v15562_v32  ;;  %8633 = vmatpush.msrb.mxu3 %v15537_v53  ;;  %v15672_v14 = vand.u32 4294901760, %v8323_v48 }
0x116b   : >> { %8388 = vmatpush.msrb.mxu0 %v15555_v54  ;;  %8477 = vmatpush.msrb.mxu1 %v8476_v42  ;;  %v8522_v42 = vand.u32 4294901760, %v15641_v39  ;;  %v8422_v33 = vsub.f32 %v8324_v1, %v15699_v49 }
0x116c   : >> { %8575 = vmatpush.msrb.mxu2 %v15579_v44  ;;  %8635 = vmatpush.msrb.mxu3 %v15555_v54 }
0x116d   : >> { %8390 = vmatpush.msrb.mxu0 %v15568_v43  ;;  %8483 = vmatpush.msrb.mxu1 %v8482_v47  ;;  %v8407_v47 = vand.u32 4294901760, %v15652_v62 }
0x116e   : >> { %8578 = vmatpush.msrb.mxu2 %v15592_v20  ;;  %8637 = vmatpush.msrb.mxu3 %v15568_v43 }
0x116f   : >> { %8392 = vmatpush.msrb.mxu0 %v15583_v63  ;;  %8489 = vmatpush.msrb.mxu1 %v8488_v31  ;;  %v8506_v31 = vand.u32 4294901760, %v8505_v2  ;;  %v8408_v2 = vsub.f32 %v15652_v62, %v8407_v47 }
0x1170   : >> { %8581 = vmatpush.msrb.mxu2 %v15603_v52  ;;  %8639 = vmatpush.msrb.mxu3 %v15583_v63 }
0x1171   : >> { %8394 = vmatpush.msrb.mxu0 %v15595_v38  ;;  %8495 = vmatpush.msrb.mxu1 %v8494_v46  ;;  %v8523_v46 = vsub.f32 %v15641_v39, %v8522_v42  ;;  %v8409_v8 = vand.u32 4294901760, %v8408_v2 }
0x1172   : >> { %8584 = vmatpush.msrb.mxu2 %v15618_v9  ;;  %8641 = vmatpush.msrb.mxu3 %v15595_v38 }
0x1173   : >> { %8396 = vmatpush.msrb.mxu0 %v15613_v50  ;;  %8501 = vmatpush.msrb.mxu1 %v8500_v58  ;;  %v8414_v58 = vsub.f32 %v8323_v48, %v15672_v14  ;;  %v8341_v48 = vld [vmem:[%s15815_s3] sm:$0xff] }
0x1174   : >> { %8587 = vmatpush.msrb.mxu2 %v15631_v28  ;;  %8643 = vmatpush.msrb.mxu3 %v15613_v50 }
0x1175   : >> { %8672 = vmatpush.msra.mxu0 %v8432_v19  ;;  %8507 = vmatpush.msrb.mxu1 %v8506_v31  ;;  %v8524_v19 = vand.u32 4294901760, %v8523_v46 }
0x1176   : >> { %8590 = vmatpush.msrb.mxu2 %v15641_v39  ;;  %8402 = vmatmul.f32.vlgmr.msrb.gmra.mxu0 %v8401_v7  ;;  %v9420_v7 = vmov 0  }
0x1177   : >> { %8676 = vmatpush.msra.mxu0 %v8438_v29  ;;  %8513 = vmatpush.msrb.mxu1 %v8512_v0  ;;  %v8415_v29 = vand.u32 4294901760, %v8414_v58 }
0x1178   : >> { %8593 = vmatmul.f32.vlgmr.msrb.gmra.mxu2 %v15600_v21  ;;  %8647 = vmatmul.f32.vlgmr.msrb.gmra.mxu3 %v8399_v59 }
0x1179   : >> { %8680 = vmatpush.msra.mxu0 %v8444_v51  ;;  %8519 = vmatpush.msrb.mxu1 %v8518_v3  ;;  %v8416_v51 = vsub.f32 %v8414_v58, %v8415_v29 }
0x117a   : >> { %9017 = vset.pattern.permute.xlu1 %v9420_v7  ;;  %9018 = vset.pattern.permute.xlu0 %v9420_v7 }
0x117b   : >> { %8684 = vmatpush.msra.mxu0 %v8450_v30  ;;  %8525 = vmatpush.msrb.mxu1 %v8524_v19 }
0x117c   : >> { %8347 = vperm.xlu1 %9017, %v8341_v48   ;;  %8527 = vmatmul.f32.vlgmr.msrb.gmra.mxu1 %v15572_v12 }
0x117d   : >> { %8751 = vmatpush.msra.mxu1 %v15456_v61  ;;  %8688 = vmatpush.msra.mxu0 %v8456_v57  ;;  %v8417_v61 = vand.u32 4294901760, %v8416_v51 }
0x117e   : >> { %8410 = vmatmul.f32.gmra.mxu0 %v8409_v8  ;;  %8352 = vperm.xlu0 %9018, %v8342_v23  }
0x117f   : >> { %8753 = vmatpush.msra.mxu1 %v15429_v6  ;;  %8692 = vmatpush.msra.mxu0 %v8462_v22  ;;  %v8423_v6 = vand.u32 4294901760, %v8422_v33 }
0x1180   : >> { %8598 = vmatmul.f32.gmra.mxu2 %v15652_v62  ;;  %8653 = vmatmul.f32.gmra.mxu3 %v8407_v47 }
0x1181   : >> { %8755 = vmatpush.msra.mxu1 %v15438_v26  ;;  %8696 = vmatpush.msra.mxu0 %v8468_v16  ;;  %v8424_v26 = vsub.f32 %v8422_v33, %v8423_v6 }
0x1183   : >> { %8757 = vmatpush.msra.mxu1 %v15447_v15  ;;  %8700 = vmatpush.msra.mxu0 %v8474_v36  ;;  %v8425_v15 = vand.u32 4294901760, %v8424_v26 }
0x1184   : >> { %8531 = vmatmul.f32.gmra.mxu1 %v15628_v37  ;;  %8357 = vperm.xlu1 %9017, %v8343_v17  }
0x1185   : >> { %8759 = vmatpush.msra.mxu1 %v15461_v18  ;;  %8704 = vmatpush.msra.mxu0 %v8480_v56  ;;  %v8344_v18 = vld [vmem:[%s15815_s3 + $0x18] sm:$0xff] }
0x1186   : >> { %8418 = vmatmul.f32.gmra.mxu0 %v8417_v61 }
0x1187   : >> { %8761 = vmatpush.msra.mxu1 %v15474_v55  ;;  %8708 = vmatpush.msra.mxu0 %v8486_v60  ;;  %v16831_v55 = vand.u32 4294901760, %v15631_v28 }
0x1188   : >> { %8603 = vmatmul.f32.gmra.mxu2 %v8414_v58  ;;  %8659 = vmatmul.f32.gmra.mxu3 %v8415_v29 }
0x1189   : >> { %8763 = vmatpush.msra.mxu1 %v15485_v41  ;;  %8712 = vmatpush.msra.mxu0 %v8492_v4 }
0x118b   : >> { %8765 = vmatpush.msra.mxu1 %v15491_v27  ;;  %8716 = vmatpush.msra.mxu0 %v8498_v5 }
0x118c   : >> { %8535 = vmatmul.f32.gmra.mxu1 %v15672_v14  ;;  %8362 = vperm.xlu1 %9017, %v8344_v18  }
0x118d   : >> { %8767 = vmatpush.msra.mxu1 %v15507_v11  ;;  %8720 = vmatpush.msra.mxu0 %v8504_v24 }
0x118e   : >> { %8426 = vmatmul.f32.gmra.mxu0 %v8425_v15 }
0x118f   : >> { %8769 = vmatpush.msra.mxu1 %v15522_v45  ;;  %8724 = vmatpush.msra.mxu0 %v8510_v34 }
0x1190   : >> { %8608 = vmatmul.f32.gmra.mxu2 %v8422_v33  ;;  %8665 = vmatmul.f32.gmra.mxu3 %v8423_v6 }
0x1191   : >> { %8771 = vmatpush.msra.mxu1 %v15537_v53  ;;  %8728 = vmatpush.msra.mxu0 %v16831_v55 }
0x1193   : >> { %8773 = vmatpush.msra.mxu1 %v15555_v54  ;;  %8732 = vmatpush.msra.mxu0 %v8522_v42 }
0x1194   : >> { %8539 = vmatmul.f32.gmra.mxu1 %v15699_v49 }
0x1195   : >> { %8775 = vmatpush.msra.mxu1 %v15568_v43 }
0x1196   : >> { %8734 = vmatmul.f32.vlgmr.msra.gmra.mxu0 %v15572_v12 }
0x1197   : >> { %8777 = vmatpush.msra.mxu1 %v15583_v63 }
0x1199   : >> { %8779 = vmatpush.msra.mxu1 %v15595_v38 }
0x119b   : >> { %8781 = vmatpush.msra.mxu1 %v15613_v50 }
0x119c   : >> { %8783 = vmatmul.f32.vlgmr.msra.gmra.mxu1 %v15572_v12 }
0x119e   : >> { %8738 = vmatmul.f32.gmra.mxu0 %v15628_v37 }
0x11a4   : >> { %8787 = vmatmul.f32.gmra.mxu1 %v15628_v37 }
0x11a6   : >> { %8742 = vmatmul.f32.gmra.mxu0 %v15672_v14 }
0x11ac   : >> { %8791 = vmatmul.f32.gmra.mxu1 %v15672_v14 }
0x11ae   : >> { %8746 = vmatmul.f32.gmra.mxu0 %v15699_v49 }
0x11b4   : >> { %8795 = vmatmul.f32.gmra.mxu1 %v15699_v49 }
0x11ee   : >> { %v8348_v40 = vpop.permute.xlu1 %8347 }
0x11f0   : >> { %v8353_v16 = vpop.permute.xlu0 %8352 }
0x11f3   : >> { %v8403_v41 = vpop.f32.mrf.mxu0 }
0x11f4   : >> { %v8404_v35 = vadd.f32 %v8403_v41, %v8348_v40 }
0x11f6   : >> { %v8358_v44 = vpop.permute.xlu1 %8357 }
0x11f9   : >> { %v8528_v27 = vpop.f32.mrf.mxu1 }
0x11fa   : >> { %v8529_v10 = vadd.f32 %v8528_v27, %v8404_v35 }
0x11fb   : >> { %v8411_v13 = vpop.f32.mrf.mxu0  ;;  %v8594_v45 = vpop.f32.mrf.mxu2 }
0x11fc   : >> { %v8648_v53 = vpop.f32.mrf.mxu3  ;;  %v8595_v32 = vadd.f32 %v8594_v45, %v8529_v10  ;;  %v8412_v36 = vadd.f32 %v8411_v13, %v8353_v16 }
0x11fe   : >> { %v8649_v56 = vadd.f32 %v8648_v53, %v8595_v32  ;;  %v8363_v37 = vpop.permute.xlu1 %8362 }
0x1201   : >> { %v8532_v30 = vpop.f32.mrf.mxu1 }
0x1202   : >> { %v8533_v63 = vadd.f32 %v8532_v30, %v8412_v36 }
0x1203   : >> { %v8419_v11 = vpop.f32.mrf.mxu0  ;;  %v8599_v12 = vpop.f32.mrf.mxu2 }
0x1204   : >> { %v8654_v20 = vpop.f32.mrf.mxu3  ;;  %v8600_v52 = vadd.f32 %v8599_v12, %v8533_v63  ;;  %v8420_v4 = vadd.f32 %v8419_v11, %v8358_v44 }
0x1206   : >> { %v8655_v5 = vadd.f32 %v8654_v20, %v8600_v52 }
0x1209   : >> { %v8536_v57 = vpop.f32.mrf.mxu1 }
0x120a   : >> { %v8537_v59 = vadd.f32 %v8536_v57, %v8420_v4 }
0x120b   : >> { %v8427_v22 = vpop.f32.mrf.mxu0  ;;  %v8604_v9 = vpop.f32.mrf.mxu2 }
0x120c   : >> { %v8660_v39 = vpop.f32.mrf.mxu3  ;;  %v8605_v62 = vadd.f32 %v8604_v9, %v8537_v59  ;;  %v8428_v3 = vadd.f32 %v8427_v22, %v8363_v37 }
0x120e   : >> { %v8661_v47 = vadd.f32 %v8660_v39, %v8605_v62 }
0x1211   : >> { %v8540_v54 = vpop.f32.mrf.mxu1 }
0x1212   : >> { %v8541_v14 = vadd.f32 %v8540_v54, %v8428_v3 }
0x1213   : >> { %v8735_v43 = vpop.f32.mrf.mxu0  ;;  %v8609_v31 = vpop.f32.mrf.mxu2 }
0x1214   : >> { %v8736_v60 = vadd.f32 %v8735_v43, %v8649_v56  ;;  %v8610_v2 = vadd.f32 %v8609_v31, %v8541_v14  ;;  %v8666_v58 = vpop.f32.mrf.mxu3 }
0x1216   : >> { %v8667_v19 = vadd.f32 %v8666_v58, %v8610_v2 }
0x1219   : >> { %v8784_v38 = vpop.f32.mrf.mxu1 }
0x121a   : >> { %v8785_v21 = vadd.f32 %v8784_v38, %v8736_v60 }
0x121b   : >> { %v8739_v50 = vpop.f32.mrf.mxu0 }
0x121c   : >> { %8800 = vst [vmem:[%s15769_s11] sm:$0xff] %v8785_v21  ;;  %v8740_v28 = vadd.f32 %v8739_v50, %v8655_v5 }
0x1221   : >> { %v8788_v24 = vpop.f32.mrf.mxu1 }
0x1222   : >> { %v8789_v34 = vadd.f32 %v8788_v24, %v8740_v28 }
0x1223   : >> { %v8743_v42 = vpop.f32.mrf.mxu0 }
0x1224   : >> { %8801 = vst [vmem:[%s15769_s11 + $0x8] sm:$0xff] %v8789_v34  ;;  %v8744_v25 = vadd.f32 %v8743_v42, %v8661_v47 }
0x1229   : >> { %v8792_v0 = vpop.f32.mrf.mxu1 }
0x122a   : >> { %v8793_v46 = vadd.f32 %v8792_v0, %v8744_v25 }
0x122b   : >> { %v8747_v1 = vpop.f32.mrf.mxu0 }
0x122c   : >> { %8802 = vst [vmem:[%s15769_s11 + $0x10] sm:$0xff] %v8793_v46  ;;  %v8748_v48 = vadd.f32 %v8747_v1, %v8667_v19 }
0x1230   : > { %242 = sbr.rel (!%p240_p1) target bundleno = 48 (0x30), region = 94 }
0x1231   : >> { %v8796_v8 = vpop.f32.mrf.mxu1 }
0x1232   : >> { %v8797_v29 = vadd.f32 %v8796_v8, %v8748_v48 }
0x1234   : >> { %8803 = vst [vmem:[%s15769_s11 + $0x18] sm:$0xff] %v8797_v29 }
0x1235   : > { %9362 = shalt.err (!%p9359_p12)
}
0x1236   : > { %s9421_s20 = smov 128   ;;  %s9422_s26 = smov 8  }
0x1237   : > { %8950 = dma.vmem_to_hbm [thread:$0]  (%p9515_p7), %s8819_s14, 1024, %s8821_s24, %s8805_s30, %s9421_s20, %s9421_s20, %s9422_s26  }
0x1238 PF: > { %s8835_s7 = sand.u32 1, %s9397_s15   ;;  %p16832_p13 = scmp.ge.s32.totalorder %s9409_s18, 2 }
0x1239   : > { %s8836_s11 = scalar_lea.sflag [#allocation6], %s8835_s7 }
0x123a   : > { %p8961_p0 = pnand %p16832_p13, %p9483_p6 }
0x123c   : > { %p8962_p3 = pneg %p8961_p0 }
0x123e   : > { %9392 = dma.done.wait (%p8962_p3), %s8836_s11, 1024  }
0x123f   : > { %9394 = vsyncadd (%p8962_p3), %s8836_s11, 4294966272  ;;  %p18_p5 = scmp.ge.s32.totalorder %s9501_s29, 4   ;;  %s16833_s15 = smov %s9401_s16 }
0x1240   : > { %s16834_s16 = smov %s9405_s17  ;;  %s16835_s17 = smov %s9511_s8 }
0x1241   : > { %s16836_s18 = smov %s9501_s29  ;;  %20 = sbr.rel (!%p18_p5) target bundleno = 6 (0x6), region = 105 }
0x1246   :  { %8842 = vsyncpa [#allocation5], 1 }
0x1247   :  { %8844 = vsyncpa [#allocation5 + $0x1], 1 }
0x1248   :  { %8845 = vsyncpa [#allocation8], 1 }
0x1249   :  { %8846 = vsyncpa [#allocation6], 1 }
0x124a   :  { %8848 = vsyncpa [#allocation6 + $0x1], 1 }

</bundles_post_ra>
